<compile_context>
chip_gen: v7x
topology: tpu7x:2x2x1
jax: 0.10.0
libtpu: 0.0.40
codegen_flags: <defaults>
</compile_context>

<pallas_src>
import functools

import jax
import jax.numpy as jnp
from jax.experimental import pallas as pl
from jax.experimental.pallas import tpu as pltpu


# ----------------------------------------------------------------------------
# Pallas kernel: fused 25-tap conv (all branches), fused BN/ReLU epilogues.
# ----------------------------------------------------------------------------
def inception_b_kernel(x_ref,            # (1, TH+4, W+4, Cin) halo'd input tile
                       w_ref,            # (5, 5, Cin, 192) fused per-tap weights
                       sbr_ref, bbr_ref,  # (1, 192) folded branch BN scale/bias
                       so_ref, bo_ref,    # (1, 192) folded final  BN scale/bias
                       o_ref):           # (1, TH, W, 192) output tile
    THp, Wp, Cin = x_ref.shape[1], x_ref.shape[2], x_ref.shape[3]
    TH, W = THp - 4, Wp - 4
    M = TH * W

    xp = x_ref[0]                                  # (TH+4, W+4, Cin)

    # Fused conv: 25 shifted matmuls, each (M, Cin) x (Cin, 192), accumulated
    # directly in torch concat order.  Taps a branch does not touch carry
    # zero weights, so this exactly reproduces 1x1 / 5x5(pad 2) / 3x3(pad 1).
    acc = jnp.zeros((M, 192), jnp.float32)
    for kh in range(5):
        for kw in range(5):
            xs = xp[kh:kh + TH, kw:kw + W, :].reshape(M, Cin)
            acc = acc + jnp.dot(xs, w_ref[kh, kw],
                                preferred_element_type=jnp.float32)

    # Branch BN + ReLU (one fused pass over the 192-wide accumulator),
    # then final BN + ReLU (second fused pass).
    y = jnp.maximum(acc * sbr_ref[...] + bbr_ref[...], 0.0)
    out = jnp.maximum(y * so_ref[...] + bo_ref[...], 0.0)
    o_ref[...] = out.reshape(1, TH, W, 192).astype(o_ref.dtype)


# ----------------------------------------------------------------------------
# Wrapper helpers.
# ----------------------------------------------------------------------------
def fold_bn(gamma, beta, mean, var, eps):
    scale = gamma / jnp.sqrt(var + eps)
    bias = beta - mean * scale
    return scale, bias


def _pick_tile_h(H, W, Cin, w_bytes, budget_bytes=10 * 1024 * 1024):
    """Largest divisor of H whose per-grid-step VMEM footprint fits the budget
    (double-buffered in/out tiles + f32 accumulator + fused weights).  Sized
    so the same kernel stays within v7x's 32 MiB scoped VMEM."""
    best = 1
    for th in range(1, H + 1):
        if H % th:
            continue
        in_b = (th + 4) * (W + 4) * Cin * 4
        out_b = th * W * 192 * 4
        acc_b = th * W * 192 * 4
        total = 2 * (in_b + out_b) + acc_b + 2 * w_bytes
        if total <= budget_bytes:
            best = th
    return best


@functools.partial(jax.jit, static_argnames=("matmul_dtype",))
def inception_b_forward(x_nchw, params, matmul_dtype=jnp.float32):
    # NCHW -> NHWC (channels on the lane dim), pad by 2 (max receptive halo).
    x = jnp.transpose(x_nchw, (0, 2, 3, 1)).astype(jnp.float32)
    N, H, W, Cin = x.shape
    xp = jnp.pad(x, ((0, 0), (2, 2), (2, 2), (0, 0)))          # (N, H+4, W+4, Cin)
    Wp = W + 4

    # ---- fuse the three branches into per-tap (Cin, 192) weights ----------
    # torch layouts: w1 (64,Cin,1,1), w5 (64,Cin,5,5), w3 (64,Cin,3,3)
    wf = jnp.zeros((5, 5, Cin, 192), jnp.float32)
    wf = wf.at[:, :, :, 64:128].set(jnp.transpose(params["w5"], (2, 3, 1, 0)))
    wf = wf.at[1:4, 1:4, :, 128:192].set(jnp.transpose(params["w3"], (2, 3, 1, 0)))
    wf = wf.at[2, 2, :, 0:64].set(jnp.transpose(params["w1"][:, :, 0, 0], (1, 0)))

    # ---- fold BatchNorms (eval mode) into 192-wide scale/bias -------------
    s1, b1 = fold_bn(*params["bn1"], 0.001)
    s5, b5 = fold_bn(*params["bn5"], 0.001)
    s3, b3 = fold_bn(*params["bn3"], 0.001)
    so, bo = fold_bn(*params["bno"], 1e-5)
    s_br = jnp.concatenate([s1, s5, s3]).reshape(1, 192)
    b_br = jnp.concatenate([b1, b5, b3]).reshape(1, 192)
    so = so.reshape(1, 192)
    bo = bo.reshape(1, 192)

    # matmul precision (pass jnp.bfloat16 on v5e; accumulation stays f32).
    xp = xp.astype(matmul_dtype)
    wf = wf.astype(matmul_dtype)

    # ---- choose H-tiling and build halo'd tiles ----------------------------
    w_bytes = 5 * 5 * Cin * 192 * jnp.dtype(matmul_dtype).itemsize
    TH = _pick_tile_h(H, W, Cin, w_bytes)
    nT = H // TH
    if nT == 1:
        xt = xp                                              # (N, TH+4, Wp, Cin)
    else:
        # Each H-tile carries its +/-2 halo rows from the padded activation.
        row_idx = jnp.arange(nT)[:, None] * TH + jnp.arange(TH + 4)[None, :]
        xt = xp[:, row_idx].reshape(N * nT, TH + 4, Wp, Cin)

    grid = (N, nT)
    out_nhwc = pl.pallas_call(
        inception_b_kernel,
        out_shape=jax.ShapeDtypeStruct((N, H, W, 192), jnp.float32),
        grid_spec=pltpu.PrefetchScalarGridSpec(
            num_scalar_prefetch=0,
            grid=grid,
            in_specs=[
                pl.BlockSpec((1, TH + 4, Wp, Cin),
                             lambda n, t: (n * nT + t, 0, 0, 0)),
                pl.BlockSpec((5, 5, Cin, 192), lambda n, t: (0, 0, 0, 0)),
                pl.BlockSpec((1, 192), lambda n, t: (0, 0)),
                pl.BlockSpec((1, 192), lambda n, t: (0, 0)),
                pl.BlockSpec((1, 192), lambda n, t: (0, 0)),
                pl.BlockSpec((1, 192), lambda n, t: (0, 0)),
            ],
            out_specs=pl.BlockSpec((1, TH, W, 192),
                                   lambda n, t: (n, t, 0, 0)),
        ),
        compiler_params=pltpu.CompilerParams(
            dimension_semantics=("parallel", "parallel"),
            vmem_limit_bytes=32 * 1024 * 1024,
        ),
    )(xt, wf, s_br, b_br, so, bo)

    return jnp.transpose(out_nhwc, (0, 3, 1, 2))             # back to NCHW


# ----------------------------------------------------------------------------
# Pure-JAX reference (for correctness check).
# ----------------------------------------------------------------------------
def reference_forward(x, params):
    def conv(x, w, pad):
        return jax.lax.conv_general_dilated(
            x, w, (1, 1), [(pad, pad), (pad, pad)],
            dimension_numbers=("NCHW", "OIHW", "NCHW"))

    def bn(x, p, eps):
        g, b, m, v = p
        return ((x - m[None, :, None, None])
                / jnp.sqrt(v[None, :, None, None] + eps)
                * g[None, :, None, None] + b[None, :, None, None])

    y1 = jax.nn.relu(bn(conv(x, params["w1"], 0), params["bn1"], 0.001))
    y5 = jax.nn.relu(bn(conv(x, params["w5"], 2), params["bn5"], 0.001))
    y3 = jax.nn.relu(bn(conv(x, params["w3"], 1), params["bn3"], 0.001))
    cat = jnp.concatenate([y1, y5, y3], axis=1)
    return jax.nn.relu(bn(cat, params["bno"], 1e-5))


# ----------------------------------------------------------------------------
# Deterministic parameter init + driver.
# ----------------------------------------------------------------------------
def make_params(key, in_channels):
    ks = jax.random.split(key, 16)

    def bn_params(k, c):
        k1, k2, k3, k4 = jax.random.split(k, 4)
        gamma = jax.random.uniform(k1, (c,), jnp.float32, 0.5, 1.5)
        beta = 0.1 * jax.random.normal(k2, (c,), jnp.float32)
        mean = 0.1 * jax.random.normal(k3, (c,), jnp.float32)
        var = jax.random.uniform(k4, (c,), jnp.float32, 0.5, 1.5)
        return (gamma, beta, mean, var)

    return {
        "w1": 0.1 * jax.random.normal(ks[0], (64, in_channels, 1, 1), jnp.float32),
        "w5": 0.1 * jax.random.normal(ks[1], (64, in_channels, 5, 5), jnp.float32),
        "w3": 0.1 * jax.random.normal(ks[2], (64, in_channels, 3, 3), jnp.float32),
        "bn1": bn_params(ks[3], 64),
        "bn5": bn_params(ks[4], 64),
        "bn3": bn_params(ks[5], 64),
        "bno": bn_params(ks[6], 192),
    }


if __name__ == "__main__":
    key = jax.random.PRNGKey(0)
    k_x, k_p = jax.random.split(key)

    N, C, H, W = 2, 4, 16, 16
    x = jax.random.normal(k_x, (N, C, H, W), jnp.float32)
    params = make_params(k_p, C)

    out = inception_b_forward(x, params)
    out = jax.block_until_ready(out)

    ref = reference_forward(x, params)
    assert out.shape == (N, 192, H, W), out.shape
    assert jnp.allclose(out, ref, atol=1e-4, rtol=1e-4), \
        float(jnp.max(jnp.abs(out - ref)))

    print("KERNEL_OK")
</pallas_src>

<mosaic_0001>
module attributes {stable_mosaic.version = 11 : i64} {
  func.func @inception_b_kernel(%arg0: i32, %arg1: i32, %arg2: memref<1x20x20x4xf32, #tpu.memory_space<vmem>>, %arg3: memref<5x5x4x192xf32, #tpu.memory_space<vmem>>, %arg4: memref<1x192xf32, #tpu.memory_space<vmem>>, %arg5: memref<1x192xf32, #tpu.memory_space<vmem>>, %arg6: memref<1x192xf32, #tpu.memory_space<vmem>>, %arg7: memref<1x192xf32, #tpu.memory_space<vmem>>, %arg8: memref<1x16x16x192xf32, #tpu.memory_space<vmem>>) attributes {dimension_semantics = [#tpu.dimension_semantics<parallel>, #tpu.dimension_semantics<parallel>], iteration_bounds = array<i64: 2, 1>, scalar_prefetch = 0 : i64, scratch_operands = 0 : i64, tpu.core_type = #tpu.core_type<tc>, window_params = [{transform_indices = @transform_0, window_bounds = array<i64: 1, 20, 20, 4>}, {pipeline_mode = #tpu.pipeline_mode<synchronous>, transform_indices = @transform_1, window_bounds = array<i64: 5, 5, 4, 192>}, {pipeline_mode = #tpu.pipeline_mode<synchronous>, transform_indices = @transform_2, window_bounds = array<i64: 1, 192>}, {pipeline_mode = #tpu.pipeline_mode<synchronous>, transform_indices = @transform_3, window_bounds = array<i64: 1, 192>}, {pipeline_mode = #tpu.pipeline_mode<synchronous>, transform_indices = @transform_4, window_bounds = array<i64: 1, 192>}, {pipeline_mode = #tpu.pipeline_mode<synchronous>, transform_indices = @transform_5, window_bounds = array<i64: 1, 192>}, {transform_indices = @transform_6, window_bounds = array<i64: 1, 16, 16, 192>}]} {
    %c0 = arith.constant 0 : index
    %c0_0 = arith.constant 0 : index
    %c0_1 = arith.constant 0 : index
    %c0_2 = arith.constant 0 : index
    %0 = vector.load %arg2[%c0, %c0_0, %c0_1, %c0_2] : memref<1x20x20x4xf32, #tpu.memory_space<vmem>>, vector<1x20x20x4xf32>
    %1 = vector.shape_cast %0 : vector<1x20x20x4xf32> to vector<20x20x4xf32>
    %cst = arith.constant 0.000000e+00 : f32
    %2 = vector.broadcast %cst : f32 to vector<256x192xf32>
    %3 = vector.extract_strided_slice %1 {offsets = [0, 0, 0], sizes = [16, 16, 4], strides = [1, 1, 1]} : vector<20x20x4xf32> to vector<16x16x4xf32>
    %4 = vector.shape_cast %3 : vector<16x16x4xf32> to vector<256x4xf32>
    %c0_3 = arith.constant 0 : index
    %c0_4 = arith.constant 0 : index
    %c0_5 = arith.constant 0 : index
    %c0_6 = arith.constant 0 : index
    %5 = vector.load %arg3[%c0_3, %c0_4, %c0_5, %c0_6] : memref<5x5x4x192xf32, #tpu.memory_space<vmem>>, vector<1x1x4x192xf32>
    %6 = vector.shape_cast %5 : vector<1x1x4x192xf32> to vector<4x192xf32>
    %cst_7 = arith.constant dense<0.000000e+00> : vector<256x192xf32>
    %7 = tpu.matmul %4, %6, %cst_7 {dimension_numbers = #tpu.dot_dimension_numbers<[1], [0], [0], [1], [0, 0, 1, 1], [], []>} : vector<256x4xf32>, vector<4x192xf32>, vector<256x192xf32> -> vector<256x192xf32>
    %8 = arith.addf %2, %7 : vector<256x192xf32>
    %9 = vector.extract_strided_slice %1 {offsets = [0, 1, 0], sizes = [16, 16, 4], strides = [1, 1, 1]} : vector<20x20x4xf32> to vector<16x16x4xf32>
    %10 = vector.shape_cast %9 : vector<16x16x4xf32> to vector<256x4xf32>
    %c0_8 = arith.constant 0 : index
    %c1 = arith.constant 1 : index
    %c0_9 = arith.constant 0 : index
    %c0_10 = arith.constant 0 : index
    %11 = vector.load %arg3[%c0_8, %c1, %c0_9, %c0_10] : memref<5x5x4x192xf32, #tpu.memory_space<vmem>>, vector<1x1x4x192xf32>
    %12 = vector.shape_cast %11 : vector<1x1x4x192xf32> to vector<4x192xf32>
    %cst_11 = arith.constant dense<0.000000e+00> : vector<256x192xf32>
    %13 = tpu.matmul %10, %12, %cst_11 {dimension_numbers = #tpu.dot_dimension_numbers<[1], [0], [0], [1], [0, 0, 1, 1], [], []>} : vector<256x4xf32>, vector<4x192xf32>, vector<256x192xf32> -> vector<256x192xf32>
    %14 = arith.addf %8, %13 : vector<256x192xf32>
    %15 = vector.extract_strided_slice %1 {offsets = [0, 2, 0], sizes = [16, 16, 4], strides = [1, 1, 1]} : vector<20x20x4xf32> to vector<16x16x4xf32>
    %16 = vector.shape_cast %15 : vector<16x16x4xf32> to vector<256x4xf32>
    %c0_12 = arith.constant 0 : index
    %c2 = arith.constant 2 : index
    %c0_13 = arith.constant 0 : index
    %c0_14 = arith.constant 0 : index
    %17 = vector.load %arg3[%c0_12, %c2, %c0_13, %c0_14] : memref<5x5x4x192xf32, #tpu.memory_space<vmem>>, vector<1x1x4x192xf32>
    %18 = vector.shape_cast %17 : vector<1x1x4x192xf32> to vector<4x192xf32>
    %cst_15 = arith.constant dense<0.000000e+00> : vector<256x192xf32>
    %19 = tpu.matmul %16, %18, %cst_15 {dimension_numbers = #tpu.dot_dimension_numbers<[1], [0], [0], [1], [0, 0, 1, 1], [], []>} : vector<256x4xf32>, vector<4x192xf32>, vector<256x192xf32> -> vector<256x192xf32>
    %20 = arith.addf %14, %19 : vector<256x192xf32>
    %21 = vector.extract_strided_slice %1 {offsets = [0, 3, 0], sizes = [16, 16, 4], strides = [1, 1, 1]} : vector<20x20x4xf32> to vector<16x16x4xf32>
    %22 = vector.shape_cast %21 : vector<16x16x4xf32> to vector<256x4xf32>
    %c0_16 = arith.constant 0 : index
    %c3 = arith.constant 3 : index
    %c0_17 = arith.constant 0 : index
    %c0_18 = arith.constant 0 : index
    %23 = vector.load %arg3[%c0_16, %c3, %c0_17, %c0_18] : memref<5x5x4x192xf32, #tpu.memory_space<vmem>>, vector<1x1x4x192xf32>
    %24 = vector.shape_cast %23 : vector<1x1x4x192xf32> to vector<4x192xf32>
    %cst_19 = arith.constant dense<0.000000e+00> : vector<256x192xf32>
    %25 = tpu.matmul %22, %24, %cst_19 {dimension_numbers = #tpu.dot_dimension_numbers<[1], [0], [0], [1], [0, 0, 1, 1], [], []>} : vector<256x4xf32>, vector<4x192xf32>, vector<256x192xf32> -> vector<256x192xf32>
    %26 = arith.addf %20, %25 : vector<256x192xf32>
    %27 = vector.extract_strided_slice %1 {offsets = [0, 4, 0], sizes = [16, 16, 4], strides = [1, 1, 1]} : vector<20x20x4xf32> to vector<16x16x4xf32>
    %28 = vector.shape_cast %27 : vector<16x16x4xf32> to vector<256x4xf32>
    %c0_20 = arith.constant 0 : index
    %c4 = arith.constant 4 : index
    %c0_21 = arith.constant 0 : index
    %c0_22 = arith.constant 0 : index
    %29 = vector.load %arg3[%c0_20, %c4, %c0_21, %c0_22] : memref<5x5x4x192xf32, #tpu.memory_space<vmem>>, vector<1x1x4x192xf32>
    %30 = vector.shape_cast %29 : vector<1x1x4x192xf32> to vector<4x192xf32>
    %cst_23 = arith.constant dense<0.000000e+00> : vector<256x192xf32>
    %31 = tpu.matmul %28, %30, %cst_23 {dimension_numbers = #tpu.dot_dimension_numbers<[1], [0], [0], [1], [0, 0, 1, 1], [], []>} : vector<256x4xf32>, vector<4x192xf32>, vector<256x192xf32> -> vector<256x192xf32>
    %32 = arith.addf %26, %31 : vector<256x192xf32>
    %33 = vector.extract_strided_slice %1 {offsets = [1, 0, 0], sizes = [16, 16, 4], strides = [1, 1, 1]} : vector<20x20x4xf32> to vector<16x16x4xf32>
    %34 = vector.shape_cast %33 : vector<16x16x4xf32> to vector<256x4xf32>
    %c1_24 = arith.constant 1 : index
    %c0_25 = arith.constant 0 : index
    %c0_26 = arith.constant 0 : index
    %c0_27 = arith.constant 0 : index
    %35 = vector.load %arg3[%c1_24, %c0_25, %c0_26, %c0_27] : memref<5x5x4x192xf32, #tpu.memory_space<vmem>>, vector<1x1x4x192xf32>
    %36 = vector.shape_cast %35 : vector<1x1x4x192xf32> to vector<4x192xf32>
    %cst_28 = arith.constant dense<0.000000e+00> : vector<256x192xf32>
    %37 = tpu.matmul %34, %36, %cst_28 {dimension_numbers = #tpu.dot_dimension_numbers<[1], [0], [0], [1], [0, 0, 1, 1], [], []>} : vector<256x4xf32>, vector<4x192xf32>, vector<256x192xf32> -> vector<256x192xf32>
    %38 = arith.addf %32, %37 : vector<256x192xf32>
    %39 = vector.extract_strided_slice %1 {offsets = [1, 1, 0], sizes = [16, 16, 4], strides = [1, 1, 1]} : vector<20x20x4xf32> to vector<16x16x4xf32>
    %40 = vector.shape_cast %39 : vector<16x16x4xf32> to vector<256x4xf32>
    %c1_29 = arith.constant 1 : index
    %c1_30 = arith.constant 1 : index
    %c0_31 = arith.constant 0 : index
    %c0_32 = arith.constant 0 : index
    %41 = vector.load %arg3[%c1_29, %c1_30, %c0_31, %c0_32] : memref<5x5x4x192xf32, #tpu.memory_space<vmem>>, vector<1x1x4x192xf32>
    %42 = vector.shape_cast %41 : vector<1x1x4x192xf32> to vector<4x192xf32>
    %cst_33 = arith.constant dense<0.000000e+00> : vector<256x192xf32>
    %43 = tpu.matmul %40, %42, %cst_33 {dimension_numbers = #tpu.dot_dimension_numbers<[1], [0], [0], [1], [0, 0, 1, 1], [], []>} : vector<256x4xf32>, vector<4x192xf32>, vector<256x192xf32> -> vector<256x192xf32>
    %44 = arith.addf %38, %43 : vector<256x192xf32>
    %45 = vector.extract_strided_slice %1 {offsets = [1, 2, 0], sizes = [16, 16, 4], strides = [1, 1, 1]} : vector<20x20x4xf32> to vector<16x16x4xf32>
    %46 = vector.shape_cast %45 : vector<16x16x4xf32> to vector<256x4xf32>
    %c1_34 = arith.constant 1 : index
    %c2_35 = arith.constant 2 : index
    %c0_36 = arith.constant 0 : index
    %c0_37 = arith.constant 0 : index
    %47 = vector.load %arg3[%c1_34, %c2_35, %c0_36, %c0_37] : memref<5x5x4x192xf32, #tpu.memory_space<vmem>>, vector<1x1x4x192xf32>
    %48 = vector.shape_cast %47 : vector<1x1x4x192xf32> to vector<4x192xf32>
    %cst_38 = arith.constant dense<0.000000e+00> : vector<256x192xf32>
    %49 = tpu.matmul %46, %48, %cst_38 {dimension_numbers = #tpu.dot_dimension_numbers<[1], [0], [0], [1], [0, 0, 1, 1], [], []>} : vector<256x4xf32>, vector<4x192xf32>, vector<256x192xf32> -> vector<256x192xf32>
    %50 = arith.addf %44, %49 : vector<256x192xf32>
    %51 = vector.extract_strided_slice %1 {offsets = [1, 3, 0], sizes = [16, 16, 4], strides = [1, 1, 1]} : vector<20x20x4xf32> to vector<16x16x4xf32>
    %52 = vector.shape_cast %51 : vector<16x16x4xf32> to vector<256x4xf32>
    %c1_39 = arith.constant 1 : index
    %c3_40 = arith.constant 3 : index
    %c0_41 = arith.constant 0 : index
    %c0_42 = arith.constant 0 : index
    %53 = vector.load %arg3[%c1_39, %c3_40, %c0_41, %c0_42] : memref<5x5x4x192xf32, #tpu.memory_space<vmem>>, vector<1x1x4x192xf32>
    %54 = vector.shape_cast %53 : vector<1x1x4x192xf32> to vector<4x192xf32>
    %cst_43 = arith.constant dense<0.000000e+00> : vector<256x192xf32>
    %55 = tpu.matmul %52, %54, %cst_43 {dimension_numbers = #tpu.dot_dimension_numbers<[1], [0], [0], [1], [0, 0, 1, 1], [], []>} : vector<256x4xf32>, vector<4x192xf32>, vector<256x192xf32> -> vector<256x192xf32>
    %56 = arith.addf %50, %55 : vector<256x192xf32>
    %57 = vector.extract_strided_slice %1 {offsets = [1, 4, 0], sizes = [16, 16, 4], strides = [1, 1, 1]} : vector<20x20x4xf32> to vector<16x16x4xf32>
    %58 = vector.shape_cast %57 : vector<16x16x4xf32> to vector<256x4xf32>
    %c1_44 = arith.constant 1 : index
    %c4_45 = arith.constant 4 : index
    %c0_46 = arith.constant 0 : index
    %c0_47 = arith.constant 0 : index
    %59 = vector.load %arg3[%c1_44, %c4_45, %c0_46, %c0_47] : memref<5x5x4x192xf32, #tpu.memory_space<vmem>>, vector<1x1x4x192xf32>
    %60 = vector.shape_cast %59 : vector<1x1x4x192xf32> to vector<4x192xf32>
    %cst_48 = arith.constant dense<0.000000e+00> : vector<256x192xf32>
    %61 = tpu.matmul %58, %60, %cst_48 {dimension_numbers = #tpu.dot_dimension_numbers<[1], [0], [0], [1], [0, 0, 1, 1], [], []>} : vector<256x4xf32>, vector<4x192xf32>, vector<256x192xf32> -> vector<256x192xf32>
    %62 = arith.addf %56, %61 : vector<256x192xf32>
    %63 = vector.extract_strided_slice %1 {offsets = [2, 0, 0], sizes = [16, 16, 4], strides = [1, 1, 1]} : vector<20x20x4xf32> to vector<16x16x4xf32>
    %64 = vector.shape_cast %63 : vector<16x16x4xf32> to vector<256x4xf32>
    %c2_49 = arith.constant 2 : index
    %c0_50 = arith.constant 0 : index
    %c0_51 = arith.constant 0 : index
    %c0_52 = arith.constant 0 : index
    %65 = vector.load %arg3[%c2_49, %c0_50, %c0_51, %c0_52] : memref<5x5x4x192xf32, #tpu.memory_space<vmem>>, vector<1x1x4x192xf32>
    %66 = vector.shape_cast %65 : vector<1x1x4x192xf32> to vector<4x192xf32>
    %cst_53 = arith.constant dense<0.000000e+00> : vector<256x192xf32>
    %67 = tpu.matmul %64, %66, %cst_53 {dimension_numbers = #tpu.dot_dimension_numbers<[1], [0], [0], [1], [0, 0, 1, 1], [], []>} : vector<256x4xf32>, vector<4x192xf32>, vector<256x192xf32> -> vector<256x192xf32>
    %68 = arith.addf %62, %67 : vector<256x192xf32>
    %69 = vector.extract_strided_slice %1 {offsets = [2, 1, 0], sizes = [16, 16, 4], strides = [1, 1, 1]} : vector<20x20x4xf32> to vector<16x16x4xf32>
    %70 = vector.shape_cast %69 : vector<16x16x4xf32> to vector<256x4xf32>
    %c2_54 = arith.constant 2 : index
    %c1_55 = arith.constant 1 : index
    %c0_56 = arith.constant 0 : index
    %c0_57 = arith.constant 0 : index
    %71 = vector.load %arg3[%c2_54, %c1_55, %c0_56, %c0_57] : memref<5x5x4x192xf32, #tpu.memory_space<vmem>>, vector<1x1x4x192xf32>
    %72 = vector.shape_cast %71 : vector<1x1x4x192xf32> to vector<4x192xf32>
    %cst_58 = arith.constant dense<0.000000e+00> : vector<256x192xf32>
    %73 = tpu.matmul %70, %72, %cst_58 {dimension_numbers = #tpu.dot_dimension_numbers<[1], [0], [0], [1], [0, 0, 1, 1], [], []>} : vector<256x4xf32>, vector<4x192xf32>, vector<256x192xf32> -> vector<256x192xf32>
    %74 = arith.addf %68, %73 : vector<256x192xf32>
    %75 = vector.extract_strided_slice %1 {offsets = [2, 2, 0], sizes = [16, 16, 4], strides = [1, 1, 1]} : vector<20x20x4xf32> to vector<16x16x4xf32>
    %76 = vector.shape_cast %75 : vector<16x16x4xf32> to vector<256x4xf32>
    %c2_59 = arith.constant 2 : index
    %c2_60 = arith.constant 2 : index
    %c0_61 = arith.constant 0 : index
    %c0_62 = arith.constant 0 : index
    %77 = vector.load %arg3[%c2_59, %c2_60, %c0_61, %c0_62] : memref<5x5x4x192xf32, #tpu.memory_space<vmem>>, vector<1x1x4x192xf32>
    %78 = vector.shape_cast %77 : vector<1x1x4x192xf32> to vector<4x192xf32>
    %cst_63 = arith.constant dense<0.000000e+00> : vector<256x192xf32>
    %79 = tpu.matmul %76, %78, %cst_63 {dimension_numbers = #tpu.dot_dimension_numbers<[1], [0], [0], [1], [0, 0, 1, 1], [], []>} : vector<256x4xf32>, vector<4x192xf32>, vector<256x192xf32> -> vector<256x192xf32>
    %80 = arith.addf %74, %79 : vector<256x192xf32>
    %81 = vector.extract_strided_slice %1 {offsets = [2, 3, 0], sizes = [16, 16, 4], strides = [1, 1, 1]} : vector<20x20x4xf32> to vector<16x16x4xf32>
    %82 = vector.shape_cast %81 : vector<16x16x4xf32> to vector<256x4xf32>
    %c2_64 = arith.constant 2 : index
    %c3_65 = arith.constant 3 : index
    %c0_66 = arith.constant 0 : index
    %c0_67 = arith.constant 0 : index
    %83 = vector.load %arg3[%c2_64, %c3_65, %c0_66, %c0_67] : memref<5x5x4x192xf32, #tpu.memory_space<vmem>>, vector<1x1x4x192xf32>
    %84 = vector.shape_cast %83 : vector<1x1x4x192xf32> to vector<4x192xf32>
    %cst_68 = arith.constant dense<0.000000e+00> : vector<256x192xf32>
    %85 = tpu.matmul %82, %84, %cst_68 {dimension_numbers = #tpu.dot_dimension_numbers<[1], [0], [0], [1], [0, 0, 1, 1], [], []>} : vector<256x4xf32>, vector<4x192xf32>, vector<256x192xf32> -> vector<256x192xf32>
    %86 = arith.addf %80, %85 : vector<256x192xf32>
    %87 = vector.extract_strided_slice %1 {offsets = [2, 4, 0], sizes = [16, 16, 4], strides = [1, 1, 1]} : vector<20x20x4xf32> to vector<16x16x4xf32>
    %88 = vector.shape_cast %87 : vector<16x16x4xf32> to vector<256x4xf32>
    %c2_69 = arith.constant 2 : index
    %c4_70 = arith.constant 4 : index
    %c0_71 = arith.constant 0 : index
    %c0_72 = arith.constant 0 : index
    %89 = vector.load %arg3[%c2_69, %c4_70, %c0_71, %c0_72] : memref<5x5x4x192xf32, #tpu.memory_space<vmem>>, vector<1x1x4x192xf32>
    %90 = vector.shape_cast %89 : vector<1x1x4x192xf32> to vector<4x192xf32>
    %cst_73 = arith.constant dense<0.000000e+00> : vector<256x192xf32>
    %91 = tpu.matmul %88, %90, %cst_73 {dimension_numbers = #tpu.dot_dimension_numbers<[1], [0], [0], [1], [0, 0, 1, 1], [], []>} : vector<256x4xf32>, vector<4x192xf32>, vector<256x192xf32> -> vector<256x192xf32>
    %92 = arith.addf %86, %91 : vector<256x192xf32>
    %93 = vector.extract_strided_slice %1 {offsets = [3, 0, 0], sizes = [16, 16, 4], strides = [1, 1, 1]} : vector<20x20x4xf32> to vector<16x16x4xf32>
    %94 = vector.shape_cast %93 : vector<16x16x4xf32> to vector<256x4xf32>
    %c3_74 = arith.constant 3 : index
    %c0_75 = arith.constant 0 : index
    %c0_76 = arith.constant 0 : index
    %c0_77 = arith.constant 0 : index
    %95 = vector.load %arg3[%c3_74, %c0_75, %c0_76, %c0_77] : memref<5x5x4x192xf32, #tpu.memory_space<vmem>>, vector<1x1x4x192xf32>
    %96 = vector.shape_cast %95 : vector<1x1x4x192xf32> to vector<4x192xf32>
    %cst_78 = arith.constant dense<0.000000e+00> : vector<256x192xf32>
    %97 = tpu.matmul %94, %96, %cst_78 {dimension_numbers = #tpu.dot_dimension_numbers<[1], [0], [0], [1], [0, 0, 1, 1], [], []>} : vector<256x4xf32>, vector<4x192xf32>, vector<256x192xf32> -> vector<256x192xf32>
    %98 = arith.addf %92, %97 : vector<256x192xf32>
    %99 = vector.extract_strided_slice %1 {offsets = [3, 1, 0], sizes = [16, 16, 4], strides = [1, 1, 1]} : vector<20x20x4xf32> to vector<16x16x4xf32>
    %100 = vector.shape_cast %99 : vector<16x16x4xf32> to vector<256x4xf32>
    %c3_79 = arith.constant 3 : index
    %c1_80 = arith.constant 1 : index
    %c0_81 = arith.constant 0 : index
    %c0_82 = arith.constant 0 : index
    %101 = vector.load %arg3[%c3_79, %c1_80, %c0_81, %c0_82] : memref<5x5x4x192xf32, #tpu.memory_space<vmem>>, vector<1x1x4x192xf32>
    %102 = vector.shape_cast %101 : vector<1x1x4x192xf32> to vector<4x192xf32>
    %cst_83 = arith.constant dense<0.000000e+00> : vector<256x192xf32>
    %103 = tpu.matmul %100, %102, %cst_83 {dimension_numbers = #tpu.dot_dimension_numbers<[1], [0], [0], [1], [0, 0, 1, 1], [], []>} : vector<256x4xf32>, vector<4x192xf32>, vector<256x192xf32> -> vector<256x192xf32>
    %104 = arith.addf %98, %103 : vector<256x192xf32>
    %105 = vector.extract_strided_slice %1 {offsets = [3, 2, 0], sizes = [16, 16, 4], strides = [1, 1, 1]} : vector<20x20x4xf32> to vector<16x16x4xf32>
    %106 = vector.shape_cast %105 : vector<16x16x4xf32> to vector<256x4xf32>
    %c3_84 = arith.constant 3 : index
    %c2_85 = arith.constant 2 : index
    %c0_86 = arith.constant 0 : index
    %c0_87 = arith.constant 0 : index
    %107 = vector.load %arg3[%c3_84, %c2_85, %c0_86, %c0_87] : memref<5x5x4x192xf32, #tpu.memory_space<vmem>>, vector<1x1x4x192xf32>
    %108 = vector.shape_cast %107 : vector<1x1x4x192xf32> to vector<4x192xf32>
    %cst_88 = arith.constant dense<0.000000e+00> : vector<256x192xf32>
    %109 = tpu.matmul %106, %108, %cst_88 {dimension_numbers = #tpu.dot_dimension_numbers<[1], [0], [0], [1], [0, 0, 1, 1], [], []>} : vector<256x4xf32>, vector<4x192xf32>, vector<256x192xf32> -> vector<256x192xf32>
    %110 = arith.addf %104, %109 : vector<256x192xf32>
    %111 = vector.extract_strided_slice %1 {offsets = [3, 3, 0], sizes = [16, 16, 4], strides = [1, 1, 1]} : vector<20x20x4xf32> to vector<16x16x4xf32>
    %112 = vector.shape_cast %111 : vector<16x16x4xf32> to vector<256x4xf32>
    %c3_89 = arith.constant 3 : index
    %c3_90 = arith.constant 3 : index
    %c0_91 = arith.constant 0 : index
    %c0_92 = arith.constant 0 : index
    %113 = vector.load %arg3[%c3_89, %c3_90, %c0_91, %c0_92] : memref<5x5x4x192xf32, #tpu.memory_space<vmem>>, vector<1x1x4x192xf32>
    %114 = vector.shape_cast %113 : vector<1x1x4x192xf32> to vector<4x192xf32>
    %cst_93 = arith.constant dense<0.000000e+00> : vector<256x192xf32>
    %115 = tpu.matmul %112, %114, %cst_93 {dimension_numbers = #tpu.dot_dimension_numbers<[1], [0], [0], [1], [0, 0, 1, 1], [], []>} : vector<256x4xf32>, vector<4x192xf32>, vector<256x192xf32> -> vector<256x192xf32>
    %116 = arith.addf %110, %115 : vector<256x192xf32>
    %117 = vector.extract_strided_slice %1 {offsets = [3, 4, 0], sizes = [16, 16, 4], strides = [1, 1, 1]} : vector<20x20x4xf32> to vector<16x16x4xf32>
    %118 = vector.shape_cast %117 : vector<16x16x4xf32> to vector<256x4xf32>
    %c3_94 = arith.constant 3 : index
    %c4_95 = arith.constant 4 : index
    %c0_96 = arith.constant 0 : index
    %c0_97 = arith.constant 0 : index
    %119 = vector.load %arg3[%c3_94, %c4_95, %c0_96, %c0_97] : memref<5x5x4x192xf32, #tpu.memory_space<vmem>>, vector<1x1x4x192xf32>
    %120 = vector.shape_cast %119 : vector<1x1x4x192xf32> to vector<4x192xf32>
    %cst_98 = arith.constant dense<0.000000e+00> : vector<256x192xf32>
    %121 = tpu.matmul %118, %120, %cst_98 {dimension_numbers = #tpu.dot_dimension_numbers<[1], [0], [0], [1], [0, 0, 1, 1], [], []>} : vector<256x4xf32>, vector<4x192xf32>, vector<256x192xf32> -> vector<256x192xf32>
    %122 = arith.addf %116, %121 : vector<256x192xf32>
    %123 = vector.extract_strided_slice %1 {offsets = [4, 0, 0], sizes = [16, 16, 4], strides = [1, 1, 1]} : vector<20x20x4xf32> to vector<16x16x4xf32>
    %124 = vector.shape_cast %123 : vector<16x16x4xf32> to vector<256x4xf32>
    %c4_99 = arith.constant 4 : index
    %c0_100 = arith.constant 0 : index
    %c0_101 = arith.constant 0 : index
    %c0_102 = arith.constant 0 : index
    %125 = vector.load %arg3[%c4_99, %c0_100, %c0_101, %c0_102] : memref<5x5x4x192xf32, #tpu.memory_space<vmem>>, vector<1x1x4x192xf32>
    %126 = vector.shape_cast %125 : vector<1x1x4x192xf32> to vector<4x192xf32>
    %cst_103 = arith.constant dense<0.000000e+00> : vector<256x192xf32>
    %127 = tpu.matmul %124, %126, %cst_103 {dimension_numbers = #tpu.dot_dimension_numbers<[1], [0], [0], [1], [0, 0, 1, 1], [], []>} : vector<256x4xf32>, vector<4x192xf32>, vector<256x192xf32> -> vector<256x192xf32>
    %128 = arith.addf %122, %127 : vector<256x192xf32>
    %129 = vector.extract_strided_slice %1 {offsets = [4, 1, 0], sizes = [16, 16, 4], strides = [1, 1, 1]} : vector<20x20x4xf32> to vector<16x16x4xf32>
    %130 = vector.shape_cast %129 : vector<16x16x4xf32> to vector<256x4xf32>
    %c4_104 = arith.constant 4 : index
    %c1_105 = arith.constant 1 : index
    %c0_106 = arith.constant 0 : index
    %c0_107 = arith.constant 0 : index
    %131 = vector.load %arg3[%c4_104, %c1_105, %c0_106, %c0_107] : memref<5x5x4x192xf32, #tpu.memory_space<vmem>>, vector<1x1x4x192xf32>
    %132 = vector.shape_cast %131 : vector<1x1x4x192xf32> to vector<4x192xf32>
    %cst_108 = arith.constant dense<0.000000e+00> : vector<256x192xf32>
    %133 = tpu.matmul %130, %132, %cst_108 {dimension_numbers = #tpu.dot_dimension_numbers<[1], [0], [0], [1], [0, 0, 1, 1], [], []>} : vector<256x4xf32>, vector<4x192xf32>, vector<256x192xf32> -> vector<256x192xf32>
    %134 = arith.addf %128, %133 : vector<256x192xf32>
    %135 = vector.extract_strided_slice %1 {offsets = [4, 2, 0], sizes = [16, 16, 4], strides = [1, 1, 1]} : vector<20x20x4xf32> to vector<16x16x4xf32>
    %136 = vector.shape_cast %135 : vector<16x16x4xf32> to vector<256x4xf32>
    %c4_109 = arith.constant 4 : index
    %c2_110 = arith.constant 2 : index
    %c0_111 = arith.constant 0 : index
    %c0_112 = arith.constant 0 : index
    %137 = vector.load %arg3[%c4_109, %c2_110, %c0_111, %c0_112] : memref<5x5x4x192xf32, #tpu.memory_space<vmem>>, vector<1x1x4x192xf32>
    %138 = vector.shape_cast %137 : vector<1x1x4x192xf32> to vector<4x192xf32>
    %cst_113 = arith.constant dense<0.000000e+00> : vector<256x192xf32>
    %139 = tpu.matmul %136, %138, %cst_113 {dimension_numbers = #tpu.dot_dimension_numbers<[1], [0], [0], [1], [0, 0, 1, 1], [], []>} : vector<256x4xf32>, vector<4x192xf32>, vector<256x192xf32> -> vector<256x192xf32>
    %140 = arith.addf %134, %139 : vector<256x192xf32>
    %141 = vector.extract_strided_slice %1 {offsets = [4, 3, 0], sizes = [16, 16, 4], strides = [1, 1, 1]} : vector<20x20x4xf32> to vector<16x16x4xf32>
    %142 = vector.shape_cast %141 : vector<16x16x4xf32> to vector<256x4xf32>
    %c4_114 = arith.constant 4 : index
    %c3_115 = arith.constant 3 : index
    %c0_116 = arith.constant 0 : index
    %c0_117 = arith.constant 0 : index
    %143 = vector.load %arg3[%c4_114, %c3_115, %c0_116, %c0_117] : memref<5x5x4x192xf32, #tpu.memory_space<vmem>>, vector<1x1x4x192xf32>
    %144 = vector.shape_cast %143 : vector<1x1x4x192xf32> to vector<4x192xf32>
    %cst_118 = arith.constant dense<0.000000e+00> : vector<256x192xf32>
    %145 = tpu.matmul %142, %144, %cst_118 {dimension_numbers = #tpu.dot_dimension_numbers<[1], [0], [0], [1], [0, 0, 1, 1], [], []>} : vector<256x4xf32>, vector<4x192xf32>, vector<256x192xf32> -> vector<256x192xf32>
    %146 = arith.addf %140, %145 : vector<256x192xf32>
    %147 = vector.extract_strided_slice %1 {offsets = [4, 4, 0], sizes = [16, 16, 4], strides = [1, 1, 1]} : vector<20x20x4xf32> to vector<16x16x4xf32>
    %148 = vector.shape_cast %147 : vector<16x16x4xf32> to vector<256x4xf32>
    %c4_119 = arith.constant 4 : index
    %c4_120 = arith.constant 4 : index
    %c0_121 = arith.constant 0 : index
    %c0_122 = arith.constant 0 : index
    %149 = vector.load %arg3[%c4_119, %c4_120, %c0_121, %c0_122] : memref<5x5x4x192xf32, #tpu.memory_space<vmem>>, vector<1x1x4x192xf32>
    %150 = vector.shape_cast %149 : vector<1x1x4x192xf32> to vector<4x192xf32>
    %cst_123 = arith.constant dense<0.000000e+00> : vector<256x192xf32>
    %151 = tpu.matmul %148, %150, %cst_123 {dimension_numbers = #tpu.dot_dimension_numbers<[1], [0], [0], [1], [0, 0, 1, 1], [], []>} : vector<256x4xf32>, vector<4x192xf32>, vector<256x192xf32> -> vector<256x192xf32>
    %152 = arith.addf %146, %151 : vector<256x192xf32>
    %c0_124 = arith.constant 0 : index
    %c0_125 = arith.constant 0 : index
    %153 = vector.load %arg4[%c0_124, %c0_125] : memref<1x192xf32, #tpu.memory_space<vmem>>, vector<1x192xf32>
    %154 = vector.broadcast %153 : vector<1x192xf32> to vector<256x192xf32>
    %155 = arith.mulf %152, %154 : vector<256x192xf32>
    %c0_126 = arith.constant 0 : index
    %c0_127 = arith.constant 0 : index
    %156 = vector.load %arg5[%c0_126, %c0_127] : memref<1x192xf32, #tpu.memory_space<vmem>>, vector<1x192xf32>
    %157 = vector.broadcast %156 : vector<1x192xf32> to vector<256x192xf32>
    %158 = arith.addf %155, %157 : vector<256x192xf32>
    %cst_128 = arith.constant 0.000000e+00 : f32
    %159 = vector.broadcast %cst_128 : f32 to vector<256x192xf32>
    %160 = arith.maximumf %158, %159 : vector<256x192xf32>
    %c0_129 = arith.constant 0 : index
    %c0_130 = arith.constant 0 : index
    %161 = vector.load %arg6[%c0_129, %c0_130] : memref<1x192xf32, #tpu.memory_space<vmem>>, vector<1x192xf32>
    %162 = vector.broadcast %161 : vector<1x192xf32> to vector<256x192xf32>
    %163 = arith.mulf %160, %162 : vector<256x192xf32>
    %c0_131 = arith.constant 0 : index
    %c0_132 = arith.constant 0 : index
    %164 = vector.load %arg7[%c0_131, %c0_132] : memref<1x192xf32, #tpu.memory_space<vmem>>, vector<1x192xf32>
    %165 = vector.broadcast %164 : vector<1x192xf32> to vector<256x192xf32>
    %166 = arith.addf %163, %165 : vector<256x192xf32>
    %cst_133 = arith.constant 0.000000e+00 : f32
    %167 = vector.broadcast %cst_133 : f32 to vector<256x192xf32>
    %168 = arith.maximumf %166, %167 : vector<256x192xf32>
    %169 = vector.shape_cast %168 : vector<256x192xf32> to vector<1x16x16x192xf32>
    %c0_134 = arith.constant 0 : index
    %c0_135 = arith.constant 0 : index
    %c0_136 = arith.constant 0 : index
    %c0_137 = arith.constant 0 : index
    %170 = vector.load %arg8[%c0_134, %c0_135, %c0_136, %c0_137] : memref<1x16x16x192xf32, #tpu.memory_space<vmem>>, vector<1x16x16x192xf32>
    tpu.vector_store %arg8[%c0_134, %c0_135, %c0_136, %c0_137], %169 {strides = array<i32>} : memref<1x16x16x192xf32, #tpu.memory_space<vmem>>, vector<1x16x16x192xf32>,
    return
  }
  func.func @transform_0(%arg0: i32, %arg1: i32) -> (i32, i32, i32, i32) {
    %c1_i32 = arith.constant 1 : i32
    %0 = arith.muli %arg0, %c1_i32 : i32
    %1 = arith.addi %0, %arg1 : i32
    %c0_i32 = arith.constant 0 : i32
    %c0_i32_0 = arith.constant 0 : i32
    %c0_i32_1 = arith.constant 0 : i32
    %c0_i32_2 = arith.constant 0 : i32
    return %1, %c0_i32, %c0_i32_0, %c0_i32_1 : i32, i32, i32, i32
  }
  func.func @transform_1(%arg0: i32, %arg1: i32) -> (i32, i32, i32, i32) {
    %c0_i32 = arith.constant 0 : i32
    %c0_i32_0 = arith.constant 0 : i32
    %c0_i32_1 = arith.constant 0 : i32
    %c0_i32_2 = arith.constant 0 : i32
    %c0_i32_3 = arith.constant 0 : i32
    return %c0_i32, %c0_i32_0, %c0_i32_1, %c0_i32_2 : i32, i32, i32, i32
  }
  func.func @transform_2(%arg0: i32, %arg1: i32) -> (i32, i32) {
    %c0_i32 = arith.constant 0 : i32
    %c0_i32_0 = arith.constant 0 : i32
    %c0_i32_1 = arith.constant 0 : i32
    return %c0_i32, %c0_i32_0 : i32, i32
  }
  func.func @transform_3(%arg0: i32, %arg1: i32) -> (i32, i32) {
    %c0_i32 = arith.constant 0 : i32
    %c0_i32_0 = arith.constant 0 : i32
    %c0_i32_1 = arith.constant 0 : i32
    return %c0_i32, %c0_i32_0 : i32, i32
  }
  func.func @transform_4(%arg0: i32, %arg1: i32) -> (i32, i32) {
    %c0_i32 = arith.constant 0 : i32
    %c0_i32_0 = arith.constant 0 : i32
    %c0_i32_1 = arith.constant 0 : i32
    return %c0_i32, %c0_i32_0 : i32, i32
  }
  func.func @transform_5(%arg0: i32, %arg1: i32) -> (i32, i32) {
    %c0_i32 = arith.constant 0 : i32
    %c0_i32_0 = arith.constant 0 : i32
    %c0_i32_1 = arith.constant 0 : i32
    return %c0_i32, %c0_i32_0 : i32, i32
  }
  func.func @transform_6(%arg0: i32, %arg1: i32) -> (i32, i32, i32, i32) {
    %c0_i32 = arith.constant 0 : i32
    %c0_i32_0 = arith.constant 0 : i32
    %c0_i32_1 = arith.constant 0 : i32
    return %arg0, %arg1, %c0_i32, %c0_i32_0 : i32, i32, i32, i32
  }
}

</mosaic_0001>

<bundles_post_ra>
// kernel: inception_b_forward.1
= control target key start
LH: loop header
LB: loop body
LE: loop exit
PB: predicated region body
PF: predicated region fallthrough
CT: control target
= control target key end

     0   :  { %11 = vsyncpa [#allocation3], 0  ;;  %s16864_s0 = inlined_call_operand.vmem [shape: f32[2,20,20,4], index: 0, kind: input, shape index: {}]   ;;  %s16865_s1 = inlined_call_operand.vmem [shape: f32[5,5,4,192], index: 1, kind: input, shape index: {}]   ;;  %s16866_s2 = inlined_call_operand.vmem [shape: f32[1,192], index: 2, kind: input, shape index: {}]   ;;  %s16867_s3 = inlined_call_operand.vmem [shape: f32[1,192], index: 3, kind: input, shape index: {}]   ;;  %s16868_s4 = inlined_call_operand.vmem [shape: f32[1,192], index: 4, kind: input, shape index: {}]   ;;  %s16869_s5 = inlined_call_operand.vmem [shape: f32[1,192], index: 5, kind: input, shape index: {}]   ;;  %s16870_s6 = inlined_call_operand.hbm [shape: f32[2,16,16,192], index: 6, kind: output, shape index: {}]  }
   0x1   :  { %13 = vsyncpa [#allocation3 + $0x1], 0  ;;  %s12587_s21 = smov 0   ;;  %s12589_s22 = smov 0  }
   0x2   :  { %s12591_s23 = smov 0   ;;  %s12593_s24 = smov 0  }
   0x3   :  { %s12595_s25 = smov 0   ;;  %s12597_s26 = smov 0  }
   0x4 LB: > { %s9880_s27 = sadd.s32 4294967295, %s12546_s26   ;;  %s9881_s28 = sadd.s32 4294967294, %s12546_s26   ;;  %s12546_s26 = sphi %s12597_s26, %s19_s26   ;;  %s12542_s25 = sphi %s12595_s25, %s17728_s25   ;;  %s12538_s24 = sphi %s12593_s24, %s17727_s24   ;;  %s12534_s23 = sphi %s12591_s23, %s17726_s23   ;;  %s12530_s22 = sphi %s12589_s22, %s17725_s22   ;;  %s12526_s21 = sphi %s12587_s21, %s17724_s21  }
   0x5   : > { %s31_s29 = sadd.s32 1, %s12542_s25  ;;  %s173_s30 = sadd.s32 1, %s12534_s23 }
   0x6   : > { %p33_p0 = scmp.ge.s32.totalorder %s31_s29, 2  ;;  %p183_p1 = scmp.ne.s32.totalorder %s12534_s23, %s12530_s22 }
   0x7   : > { %p184_p2 = scmp.eq.s32.totalorder %s9880_s27, 1  ;;  %p189_p3 = scmp.ne.s32.totalorder %s12530_s22, %s12526_s21 }
   0x8   : > { %s17730_s29 = smov (%p33_p0, %s31_s29), 0  ;;  %p190_p5 = scmp.eq.s32.totalorder %s9881_s28, 1 }
   0x9   : > { %p12627_p4 = por %p184_p2, %p183_p1  ;;  %s168_s8 = ssub.s32 %s12542_s25, %s17730_s29 }
   0xa   : > { %p9884_p6 = scmp.ge.s32.totalorder %s12546_s26, 1  ;;  %p171_p7 = scmp.eq.s32.totalorder %s168_s8, 0 }
   0xb   : > { %p12634_p8 = por %p190_p5, %p189_p3  ;;  %p233_p9 = scmp.lt.s32.totalorder %s12546_s26, 3 }
   0xc   : > { %s12640_s10 = scalar_select %p171_p7, %s12534_s23, %s173_s30  }
   0xd   : > { %p234_p10 = pnand %p9884_p6, %p233_p9 }
   0xf   : > { %237 = sbr.rel (%p234_p10) target bundleno = 1872 (0x750), region = 44 }
  0x16   : > { %v9887_v0 = vld [vmem:[%s16865_s1 + $0x8] sm:$0xff]  ;;  %vm531_vm0 = vcmask 1043456   ;;  %v10306_v1 = vld [vmem:[%s16865_s1 + $0x60] sm:$0xff]  ;;  %p265_p11 = scmp.lt.s32.totalorder %s12538_s24, 1  ;;  %v17010_v5 = vmov 0.0   ;;  %v12675_v9 = vld [vmem:[%s16865_s1 + $0x70] sm:$0xff] }
  0x17   : > { %v332_v2 = vld [vmem:[%s16865_s1] sm:$0xff]  ;;  %v465_v3 = vcombine.high %v9887_v0, %v9887_v0  ;;  %v12652_v4 = vcombine.high %v10306_v1, %v10306_v1  ;;  %600 = vmatprep.mubr.f32.mxu1 %v17010_v5  ;;  %4984 = vmatprep.mubr.f32.mxu0 %v17010_v5  ;;  %v10341_v7 = vld [vmem:[%s16865_s1 + $0x68] sm:$0xff]  ;;  %vm381_vm1 = vcmask 1046528   ;;  %vm466_vm2 = vcmask 31744   ;;  %s261_s28 = sand.u32 1, %s12530_s22   ;;  %s10766_s12 = sshll.u32 %s12538_s24, 13 }
  0x18   : > { %v794_v6 = vcombine.high %v332_v2, %v332_v2  ;;  %v5249_v8 = vcombine.high %v10341_v7, %v10341_v7  ;;  %s266_s19 = scalar_select %p265_p11, %s12538_s24, 1  ;;  %vm1120_vm3 = vcmask 1045504   ;;  %v5587_v27 = vcombine.high %v12675_v9, %v12675_v9 }
  0x19   : > { %17205 = vst [vmem:[#allocation5_spill] sm:$0xff] %v12652_v4  ;;  %9888 = vmatprep.subr.msk.mxu1 %vm531_vm0, %v465_v3  ;;  %10307 = vmatprep.subr.msk.mxu0 %vm531_vm0, %v12652_v4  ;;  %vm1594_vm4 = vcmask 1044480   ;;  %s9885_s8 = sshll.u32 %s261_s28, 9  ;;  %vm9726_vm5 = vcmask 523264   ;;  %s16809_s15 = scalar_lea.hbm %s16870_s6, %s10766_s12 }
  0x1a   : > { %9889 = vmatpush1.msk.msra.mxu1 %vm531_vm0, %v9887_v0  ;;  %10308 = vmatpush1.msk.msra.mxu0 %vm531_vm0, %v10306_v1  ;;  %s12305_s20 = smul.u32 480, %s266_s19  ;;  %s16447_s11 = scalar_lea.vmem [#allocation2], %s9885_s8 }
  0x1b   : > { %9922 = vmatprep.subr.msk.mxu1 %vm531_vm0, %v794_v6  ;;  %10342 = vmatprep.subr.msk.mxu0 %vm531_vm0, %v5249_v8  ;;  %s9807_s13 = sshll.u32 %s16447_s11, 4  ;;  %s16818_s24 = scalar_lea.sflag [#allocation3], %s261_s28  ;;  %s16811_s13 = int_to_ptr.vmem [resolvable:$true] %s9807_s13 }
  0x1c   : > { %s12670_s30 = scalar_lea.vmem %s16864_s0, %s12305_s20  ;;  %s12468_s16 = scalar_lea.vmem %s16811_s13, 8192 }
  0x1d   : > { %v12678_v10 = vld [vmem:[%s12670_s30] sm:$0xff]  ;;  %v12681_v11 = vld [vmem:[%s12670_s30 + $0x8] sm:$0xff]  ;;  %v12684_v12 = vld [vmem:[%s12670_s30 + $0x30] sm:$0xff]  ;;  %p12469_p12 = scmp.ne.s32.totalorder %s16811_s13, %s12468_s16  ;;  %s12549_s17 = smov [#allocation2]  }
  0x1e   : > { %v382_v13 = vrot.slane %v12678_v10, 1  ;;  %v383_v14 = vrot.slane %v12681_v11, 1  ;;  %v12689_v15 = vld [vmem:[%s12670_s30 + $0x38] sm:$0xff]  ;;  %v1131_v16 = vrot.slane %v12684_v12, 2  ;;  %v274_v17 = vld [vmem:[%s12670_s30 + $0x10] sm:$0xf] }
  0x1f   : > { %v1132_v18 = vrot.slane %v12689_v15, 2  ;;  %v385_v19 = vrot.slane %v274_v17, 1  ;;  %v12695_v20 = vld [vmem:[%s12670_s30 + $0x40] sm:$0xf]  ;;  %v12698_v21 = vld [vmem:[%s12670_s30 + $0x18] sm:$0xff]  ;;  %v12706_v25 = vld [vmem:[%s12670_s30 + $0x48] sm:$0xff]  ;;  %p12470_p13 = pnand %p12469_p12, %p12627_p4 }
  0x20   : > { %v12701_v22 = vld [vmem:[%s12670_s30 + $0x20] sm:$0xff]  ;;  %v384_v23 = vsel %vm381_vm1, %v382_v13, %v383_v14  ;;  %v1134_v24 = vrot.slane %v12695_v20, 2  ;;  %v12709_v26 = vld [vmem:[%s12670_s30 + $0x50] sm:$0xff]  ;;  %v387_v30 = vrot.slane %v12698_v21, 1  ;;  %v1136_v33 = vrot.slane %v12706_v25, 2  ;;  %v12752_v42 = vld [vmem:[%s12670_s30 + $0x68] sm:$0xff] }
  0x21   : > { %9890 = vmatmul.mubr.msk.f32.vlgmr.msra.gmra.mrb[0].mxu1 %vm466_vm2, %v384_v23  ;;  %v12715_v28 = vsel %vm1120_vm3, %v1131_v16, %v1132_v18  ;;  %v386_v29 = vsel %vm381_vm1, %v383_v14, %v385_v19  ;;  %v388_v31 = vrot.slane %v12701_v22, 1  ;;  %v1137_v34 = vrot.slane %v12709_v26, 2  ;;  %v277_v35 = vld [vmem:[%s12670_s30 + $0x28] sm:$0xf]  ;;  %v12733_v36 = vld [vmem:[%s12670_s30 + $0x58] sm:$0xf]  ;;  %p12471_p0 = pneg %p12470_p13 }
  0x22   : > { %17206 = vst [vmem:[#allocation6_spill] sm:$0xff] %v12715_v28  ;;  %9923 = vmatpush1.msk.msra.mxu1 %vm531_vm0, %v332_v2  ;;  %10309 = vmatmul.mubr.msk.f32.vlgmr.msra.gmra.mrb[0].mxu0 %vm466_vm2, %v12715_v28  ;;  %v12726_v32 = vsel %vm1120_vm3, %v1132_v18, %v1134_v24  ;;  %v390_v38 = vrot.slane %v277_v35, 1  ;;  %v1139_v40 = vrot.slane %v12733_v36, 2  ;;  %v12749_v41 = vld [vmem:[%s12670_s30 + $0x60] sm:$0xff]  ;;  %v392_v44 = vrot.slane %v12684_v12, 1  ;;  %v12788_v54 = vld [vmem:[%s12670_s30 + $0x78] sm:$0xff] }
  0x23   : > { %10343 = vmatpush1.msk.msra.mxu0 %vm531_vm0, %v10341_v7  ;;  %606 = vmatprep.mubr.f32.mxu1 %v17010_v5  ;;  %17207 = vst [vmem:[#allocation7_spill] sm:$0xff] %v12726_v32  ;;  %v12741_v37 = vsel %vm381_vm1, %v387_v30, %v388_v31  ;;  %v12745_v39 = vsel %vm1120_vm3, %v1136_v33, %v1137_v34  ;;  %v393_v45 = vrot.slane %v12689_v15, 1  ;;  %v1141_v47 = vrot.slane %v12749_v41, 2  ;;  %v12771_v49 = vld [vmem:[%s12670_s30 + $0x70] sm:$0xf]  ;;  %v12791_v55 = vld [vmem:[%s12670_s30 + $0x80] sm:$0xff] }
  0x24   : > { %4990 = vmatprep.mubr.f32.mxu0 %v17010_v5  ;;  %10377 = vmatprep.subr.msk.mxu0 %vm531_vm0, %v5587_v27  ;;  %17208 = vst [vmem:[#allocation8_spill] sm:$0xff] %v12741_v37  ;;  %v12760_v43 = vsel %vm381_vm1, %v388_v31, %v390_v38  ;;  %v12766_v46 = vsel %vm1120_vm3, %v1137_v34, %v1139_v40  ;;  %v1142_v48 = vrot.slane %v12752_v42, 2  ;;  %v395_v51 = vrot.slane %v12695_v20, 1  ;;  %v12810_v62 = vld [vmem:[%s12670_s30 + $0x88] sm:$0xf]  ;;  %v12827_v3 = vld [vmem:[%s12670_s30 + $0x90] sm:$0xff] }
  0x25   : > { %9891 = vmatmul.mubr.msk.f32.gmra.mrb[2].mxu1 %vm466_vm2, %v386_v29  ;;  %17209 = vst [vmem:[#allocation9_spill] sm:$0xff] %v12760_v43  ;;  %v12779_v50 = vsel %vm381_vm1, %v392_v44, %v393_v45  ;;  %v1144_v53 = vrot.slane %v12771_v49, 2  ;;  %v397_v57 = vrot.slane %v12706_v25, 1  ;;  %v398_v58 = vrot.slane %v12709_v26, 1  ;;  %v12830_v6 = vld [vmem:[%s12670_s30 + $0x98] sm:$0xff]  ;;  %v12866_v29 = vld [vmem:[%s12670_s30 + $0xa8] sm:$0xff] }
  0x26   : > { %10310 = vmatmul.mubr.msk.f32.gmra.mrb[2].mxu0 %vm466_vm2, %v12726_v32  ;;  %612 = vmatprep.mubr.f32.mxu1 %v17010_v5  ;;  %17210 = vst [vmem:[#allocation10_spill] sm:$0xff] %v12779_v50  ;;  %v12784_v52 = vsel %vm1120_vm3, %v1141_v47, %v1142_v48  ;;  %v12799_v56 = vsel %vm381_vm1, %v393_v45, %v395_v51  ;;  %v1146_v60 = vrot.slane %v12788_v54, 2  ;;  %v1147_v61 = vrot.slane %v12791_v55, 2  ;;  %v12849_v18 = vld [vmem:[%s12670_s30 + $0xa0] sm:$0xf]  ;;  %v12869_v30 = vld [vmem:[%s12670_s30 + $0xb0] sm:$0xff] }
  0x27   : > { %4996 = vmatprep.mubr.f32.mxu0 %v17010_v5  ;;  %17211 = vst [vmem:[#allocation11_spill] sm:$0xff] %v12784_v52  ;;  %17212 = vst [vmem:[#allocation12_spill] sm:$0xff] %v12799_v56  ;;  %v12805_v59 = vsel %vm1120_vm3, %v1142_v48, %v1144_v53  ;;  %v12818_v63 = vsel %vm381_vm1, %v397_v57, %v398_v58  ;;  %v400_v0 = vrot.slane %v12733_v36, 1  ;;  %v1149_v2 = vrot.slane %v12810_v62, 2  ;;  %v12890_v44 = vld [vmem:[%s16865_s1 + $0x10] sm:$0xff]  ;;  %s12472_s18 = sshll.u32 %s12549_s17, 4  ;;  %s12473_s18 = int_to_ptr.vmem [resolvable:$false] %s12472_s18 }
  0x28   : > { %17213 = vst [vmem:[#allocation13_spill] sm:$0xff] %v12805_v59  ;;  %17214 = vst [vmem:[#allocation14_spill] sm:$0xff] %v12818_v63  ;;  %v12823_v1 = vsel %vm1120_vm3, %v1146_v60, %v1147_v61  ;;  %v402_v8 = vrot.slane %v12749_v41, 1  ;;  %v403_v13 = vrot.slane %v12752_v42, 1  ;;  %v1151_v16 = vrot.slane %v12827_v3, 2  ;;  %v12915_v60 = vld [vmem:[%s12670_s30 + $0xc8] sm:$0xff]  ;;  %p12475_p1 = scmp.lt.s32.totalorder %s16811_s13, %s12473_s18 }
  0x29   : > { %9892 = vmatmul.mubr.msk.f32.gmra.mrb[4].mxu1 %vm466_vm2, %v12741_v37  ;;  %17215 = vst [vmem:[#allocation15_spill] sm:$0xff] %v12823_v1  ;;  %v12838_v7 = vsel %vm381_vm1, %v398_v58, %v400_v0  ;;  %v12844_v14 = vsel %vm1120_vm3, %v1147_v61, %v1149_v2  ;;  %v1152_v17 = vrot.slane %v12830_v6, 2  ;;  %v405_v23 = vrot.slane %v12771_v49, 1  ;;  %v12893_v45 = vld [vmem:[%s12670_s30 + $0xb8] sm:$0xf]  ;;  %v12912_v58 = vld [vmem:[%s12670_s30 + $0xc0] sm:$0xff] }
  0x2a   : > { %10311 = vmatmul.mubr.msk.f32.gmra.mrb[4].mxu0 %vm466_vm2, %v12745_v39  ;;  %618 = vmatprep.mubr.f32.mxu1 %v17010_v5  ;;  %17216 = vst [vmem:[#allocation16_spill] sm:$0xff] %v12838_v7  ;;  %17217 = vst [vmem:[#allocation17_spill] sm:$0xff] %v12844_v14  ;;  %v12857_v19 = vsel %vm381_vm1, %v402_v8, %v403_v13  ;;  %v1154_v27 = vrot.slane %v12849_v18, 2  ;;  %v407_v33 = vrot.slane %v12788_v54, 1  ;;  %v408_v34 = vrot.slane %v12791_v55, 1  ;;  %s12474_s19 = scalar_lea.vmem %s12473_s18, 16384 }
  0x2b   : > { %5002 = vmatprep.mubr.f32.mxu0 %v17010_v5  ;;  %17218 = vst [vmem:[#allocation18_spill] sm:$0xff] %v12857_v19  ;;  %v12862_v24 = vsel %vm1120_vm3, %v1151_v16, %v1152_v17  ;;  %v12877_v31 = vsel %vm381_vm1, %v403_v13, %v405_v23  ;;  %v1156_v38 = vrot.slane %v12866_v29, 2  ;;  %v1157_v40 = vrot.slane %v12869_v30, 2  ;;  %p12476_p2 = scmp.lt.s32.totalorder %s12474_s19, %s12468_s16 }
  0x2c   : > { %17219 = vst [vmem:[#allocation19_spill] sm:$0xff] %v12862_v24  ;;  %17220 = vst [vmem:[#allocation20_spill] sm:$0xff] %v12877_v31  ;;  %v12883_v35 = vsel %vm1120_vm3, %v1152_v17, %v1154_v27  ;;  %v12901_v47 = vsel %vm381_vm1, %v407_v33, %v408_v34  ;;  %v410_v48 = vrot.slane %v12810_v62, 1  ;;  %v1204_v51 = vcombine.high %v12890_v44, %v12890_v44  ;;  %v12935_v17 = vld [vmem:[%s12670_s30 + $0xd0] sm:$0xf] }
  0x2d   : > { %9893 = vmatmul.mubr.msk.f32.gmra.mrb[6].mxu1 %vm466_vm2, %v12760_v43  ;;  %17221 = vst [vmem:[#allocation21_spill] sm:$0xff] %v12883_v35  ;;  %17222 = vst [vmem:[#allocation22_spill] sm:$0xff] %v12901_v47  ;;  %v12908_v53 = vsel %vm1120_vm3, %v1156_v38, %v1157_v40  ;;  %v1159_v57 = vrot.slane %v12893_v45, 2  ;;  %v412_v0 = vrot.slane %v12827_v3, 1  ;;  %v413_v2 = vrot.slane %v12830_v6, 1  ;;  %v12952_v38 = vld [vmem:[%s12670_s30 + $0xd8] sm:$0xff]  ;;  %p12477_p3 = por %p12476_p2, %p12475_p1 }
  0x2e   : > { %10312 = vmatmul.mubr.msk.f32.gmra.mrb[6].mxu0 %vm466_vm2, %v12766_v46  ;;  %624 = vmatprep.mubr.f32.mxu1 %v17010_v5  ;;  %17223 = vst [vmem:[#allocation23_spill] sm:$0xff] %v12908_v53  ;;  %v12924_v61 = vsel %vm381_vm1, %v408_v34, %v410_v48  ;;  %v1161_v13 = vrot.slane %v12912_v58, 2  ;;  %v1162_v16 = vrot.slane %v12915_v60, 2  ;;  %v415_v27 = vrot.slane %v12849_v18, 1 }
  0x2f   : > { %5008 = vmatprep.mubr.f32.mxu0 %v17010_v5  ;;  %9957 = vmatprep.subr.msk.mxu1 %vm531_vm0, %v1204_v51  ;;  %17224 = vst [vmem:[#allocation24_spill] sm:$0xff] %v12924_v61  ;;  %v12930_v8 = vsel %vm1120_vm3, %v1157_v40, %v1159_v57  ;;  %v12943_v23 = vsel %vm381_vm1, %v412_v0, %v413_v2  ;;  %v1164_v34 = vrot.slane %v12935_v17, 2  ;;  %v12955_v40 = vld [vmem:[%s12670_s30 + $0xe0] sm:$0xff]  ;;  %v417_v51 = vrot.slane %v12866_v29, 1  ;;  %p12478_p5 = pnand %p12477_p3, %p12471_p0 }
  0x30   : > { %17225 = vst [vmem:[#allocation25_spill] sm:$0xff] %v12930_v8  ;;  %17226 = vst [vmem:[#allocation26_spill] sm:$0xff] %v12943_v23  ;;  %v12948_v33 = vsel %vm1120_vm3, %v1161_v13, %v1162_v16  ;;  %v12963_v48 = vsel %vm381_vm1, %v413_v2, %v415_v27  ;;  %v418_v57 = vrot.slane %v12869_v30, 1  ;;  %v1166_v13 = vrot.slane %v12952_v38, 2 }
  0x31   : > { %9894 = vmatmul.mubr.msk.f32.gmra.mrb[8].mxu1 %vm466_vm2, %v12779_v50  ;;  %17227 = vst [vmem:[#allocation27_spill] sm:$0xff] %v12948_v33  ;;  %17228 = vst [vmem:[#allocation28_spill] sm:$0xff] %v12963_v48  ;;  %v12969_v0 = vsel %vm1120_vm3, %v1162_v16, %v1164_v34  ;;  %v1167_v4 = vrot.slane %v12955_v40, 2  ;;  %v420_v16 = vrot.slane %v12893_v45, 1  ;;  %v422_v50 = vrot.slane %v12912_v58, 1 }
  0x32   : > { %10313 = vmatmul.mubr.msk.f32.gmra.mrb[8].mxu0 %vm466_vm2, %v12784_v52  ;;  %630 = vmatprep.mubr.f32.mxu1 %v17010_v5  ;;  %17229 = vst [vmem:[#allocation29_spill] sm:$0xff] %v12969_v0  ;;  %v12982_v2 = vsel %vm381_vm1, %v417_v51, %v418_v57  ;;  %v423_v43 = vrot.slane %v12915_v60, 1  ;;  %v1605_v37 = vrot.slane %v12684_v12, 3  ;;  %v13278_v52 = vld [vmem:[%s12670_s30 + $0x178] sm:$0xf] }
  0x33   : > { %5014 = vmatprep.mubr.f32.mxu0 %v17010_v5  ;;  %17230 = vst [vmem:[#allocation30_spill] sm:$0xff] %v12982_v2  ;;  %v12987_v27 = vsel %vm1120_vm3, %v1166_v13, %v1167_v4  ;;  %v12996_v51 = vsel %vm381_vm1, %v418_v57, %v420_v16  ;;  %v425_v16 = vrot.slane %v12935_v17, 1 }
  0x34   : > { %17231 = vst [vmem:[#allocation31_spill] sm:$0xff] %v12987_v27  ;;  %17232 = vst [vmem:[#allocation32_spill] sm:$0xff] %v12996_v51  ;;  %v13012_v57 = vsel %vm381_vm1, %v422_v50, %v423_v43  ;;  %v427_v50 = vrot.slane %v12952_v38, 1 }
  0x35   : > { %9895 = vmatmul.mubr.msk.f32.gmra.mrb[10].mxu1 %vm466_vm2, %v12799_v56  ;;  %v12974_v56 = vld [vmem:[%s12670_s30 + $0xe8] sm:$0xf]  ;;  %17234 = vst [vmem:[#allocation34_spill] sm:$0xff] %v13012_v57 }
  0x36   : > { %10314 = vmatmul.mubr.msk.f32.gmra.mrb[10].mxu0 %vm466_vm2, %v12805_v59  ;;  %636 = vmatprep.mubr.f32.mxu1 %v17010_v5  ;;  %v1169_v34 = vrot.slane %v12974_v56, 2  ;;  %v1640_v59 = vrot.slane %v12952_v38, 3 }
  0x37   : > { %5020 = vmatprep.mubr.f32.mxu0 %v17010_v5 }
  0x38   : > { %v13002_v13 = vsel %vm1120_vm3, %v1167_v4, %v1169_v34  ;;  %v1608_v34 = vrot.slane %v12695_v20, 3 }
  0x39   : > { %9896 = vmatmul.mubr.msk.f32.gmra.mrb[12].mxu1 %vm466_vm2, %v12818_v63  ;;  %17233 = vst [vmem:[#allocation33_spill] sm:$0xff] %v13002_v13  ;;  %v13100_v63 = vld [vmem:[%s12670_s30 + $0x108] sm:$0xff] }
  0x3a   : > { %10315 = vmatmul.mubr.msk.f32.gmra.mrb[12].mxu0 %vm466_vm2, %v12823_v1  ;;  %642 = vmatprep.mubr.f32.mxu1 %v17010_v5 }
  0x3b   : > { %5026 = vmatprep.mubr.f32.mxu0 %v17010_v5 }
  0x3d   : > { %9897 = vmatmul.mubr.msk.f32.gmra.mrb[14].mxu1 %vm466_vm2, %v12838_v7  ;;  %v13083_v7 = vld [vmem:[%s12670_s30 + $0x100] sm:$0xf] }
  0x3e   : > { %10316 = vmatmul.mubr.msk.f32.gmra.mrb[14].mxu0 %vm466_vm2, %v12844_v14  ;;  %648 = vmatprep.mubr.f32.mxu1 %v17010_v5  ;;  %v13256_v14 = vld [vmem:[%s12670_s30 + $0x168] sm:$0xff] }
  0x3f   : > { %5032 = vmatprep.mubr.f32.mxu0 %v17010_v5 }
  0x41   : > { %9898 = vmatmul.mubr.msk.f32.gmra.mrb[16].mxu1 %vm466_vm2, %v12857_v19  ;;  %v1616_v19 = vrot.slane %v12752_v42, 3 }
  0x42   : > { %10317 = vmatmul.mubr.msk.f32.gmra.mrb[16].mxu0 %vm466_vm2, %v12862_v24  ;;  %654 = vmatprep.mubr.f32.mxu1 %v17010_v5  ;;  %v13239_v24 = vld [vmem:[%s12670_s30 + $0x160] sm:$0xf] }
  0x43   : > { %5038 = vmatprep.mubr.f32.mxu0 %v17010_v5 }
  0x45   : > { %9899 = vmatmul.mubr.msk.f32.gmra.mrb[18].mxu1 %vm466_vm2, %v12877_v31 }
  0x46   : > { %10318 = vmatmul.mubr.msk.f32.gmra.mrb[18].mxu0 %vm466_vm2, %v12883_v35  ;;  %660 = vmatprep.mubr.f32.mxu1 %v17010_v5 }
  0x47   : > { %5044 = vmatprep.mubr.f32.mxu0 %v17010_v5 }
  0x49   : > { %9900 = vmatmul.mubr.msk.f32.gmra.mrb[20].mxu1 %vm466_vm2, %v12901_v47  ;;  %v1611_v47 = vrot.slane %v12709_v26, 3 }
  0x4a   : > { %10319 = vmatmul.mubr.msk.f32.gmra.mrb[20].mxu0 %vm466_vm2, %v12908_v53  ;;  %666 = vmatprep.mubr.f32.mxu1 %v17010_v5  ;;  %v13217_v53 = vld [vmem:[%s12670_s30 + $0x150] sm:$0xff] }
  0x4b   : > { %5050 = vmatprep.mubr.f32.mxu0 %v17010_v5 }
  0x4d   : > { %9901 = vmatmul.mubr.msk.f32.gmra.mrb[22].mxu1 %vm466_vm2, %v12924_v61  ;;  %v1610_v61 = vrot.slane %v12706_v25, 3 }
  0x4e   : > { %10320 = vmatmul.mubr.msk.f32.gmra.mrb[22].mxu0 %vm466_vm2, %v12930_v8  ;;  %672 = vmatprep.mubr.f32.mxu1 %v17010_v5  ;;  %v13200_v8 = vld [vmem:[%s12670_s30 + $0x148] sm:$0xf] }
  0x4f   : > { %5056 = vmatprep.mubr.f32.mxu0 %v17010_v5 }
  0x51   : > { %9902 = vmatmul.mubr.msk.f32.gmra.mrb[24].mxu1 %vm466_vm2, %v12943_v23  ;;  %v428_v23 = vrot.slane %v12955_v40, 1 }
  0x52   : > { %10321 = vmatmul.mubr.msk.f32.gmra.mrb[24].mxu0 %vm466_vm2, %v12948_v33  ;;  %678 = vmatprep.mubr.f32.mxu1 %v17010_v5 }
  0x53   : > { %5062 = vmatprep.mubr.f32.mxu0 %v17010_v5 }
  0x55   : > { %9903 = vmatmul.mubr.msk.f32.gmra.mrb[26].mxu1 %vm466_vm2, %v12963_v48 }
  0x56   : > { %10322 = vmatmul.mubr.msk.f32.gmra.mrb[26].mxu0 %vm466_vm2, %v12969_v0  ;;  %684 = vmatprep.mubr.f32.mxu1 %v17010_v5  ;;  %v13178_v0 = vld [vmem:[%s12670_s30 + $0x138] sm:$0xff] }
  0x57   : > { %5068 = vmatprep.mubr.f32.mxu0 %v17010_v5 }
  0x59   : > { %9904 = vmatmul.mubr.msk.f32.gmra.mrb[28].mxu1 %vm466_vm2, %v12982_v2  ;;  %v1606_v2 = vrot.slane %v12689_v15, 3 }
  0x5a   : > { %10323 = vmatmul.mubr.msk.f32.gmra.mrb[28].mxu0 %vm466_vm2, %v12987_v27  ;;  %690 = vmatprep.mubr.f32.mxu1 %v17010_v5  ;;  %v13161_v27 = vld [vmem:[%s12670_s30 + $0x130] sm:$0xf] }
  0x5b   : > { %5074 = vmatprep.mubr.f32.mxu0 %v17010_v5  ;;  %v13017_v4 = vsel %vm1594_vm4, %v1605_v37, %v1606_v2  ;;  %v13033_v37 = vsel %vm381_vm1, %v423_v43, %v425_v16  ;;  %v430_v43 = vrot.slane %v12974_v56, 1  ;;  %v13061_v16 = vld [vmem:[%s12670_s30 + $0xf0] sm:$0xff] }
  0x5c   : > { %17235 = vst [vmem:[#allocation35_spill] sm:$0xff] %v13017_v4  ;;  %17236 = vst [vmem:[#allocation36_spill] sm:$0xff] %v13033_v37 }
  0x5d   : > { %9905 = vmatmul.mubr.msk.f32.gmra.mrb[30].mxu1 %vm466_vm2, %v12996_v51  ;;  %v13023_v51 = vld [vmem:[%s16865_s1 + $0x78] sm:$0xff] }
  0x5e   : > { %10324 = vmatmul.mubr.msk.f32.gmra.mrb[30].mxu0 %vm466_vm2, %v13002_v13  ;;  %696 = vmatprep.mubr.f32.mxu1 %v17010_v5  ;;  %v5920_v48 = vcombine.high %v13023_v51, %v13023_v51 }
  0x5f   : > { %5322 = vmatprep.mubr.f32.mxu0 %v17010_v5 }
  0x61   : > { %9906 = vmatmul.mubr.msk.f32.gmra.mrb[32].mxu1 %vm466_vm2, %v13012_v57  ;;  %v13041_v57 = vsel %vm1594_vm4, %v1606_v2, %v1608_v34  ;;  %v13057_v2 = vsel %vm1594_vm4, %v1610_v61, %v1611_v47  ;;  %v13064_v34 = vld [vmem:[%s12670_s30 + $0xf8] sm:$0xff]  ;;  %v432_v61 = vrot.slane %v13061_v16, 1 }
  0x62   : > { %10344 = vmatmul.mubr.msk.f32.vlgmr.msra.gmra.mrb[0].mxu0 %vm466_vm2, %v13017_v4  ;;  %702 = vmatprep.mubr.f32.mxu1 %v17010_v5  ;;  %17237 = vst [vmem:[#allocation37_spill] sm:$0xff] %v13041_v57  ;;  %17239 = vst [vmem:[#allocation39_spill] sm:$0xff] %v13057_v2  ;;  %v13139_v4 = vld [vmem:[%s12670_s30 + $0x120] sm:$0xff] }
  0x63   : > { %10378 = vmatpush1.msk.msra.mxu0 %vm531_vm0, %v12675_v9  ;;  %5328 = vmatprep.mubr.f32.mxu0 %v17010_v5  ;;  %v13052_v9 = vsel %vm381_vm1, %v427_v50, %v428_v23  ;;  %v13072_v50 = vsel %vm381_vm1, %v428_v23, %v430_v43 }
  0x64   : > { %10412 = vmatprep.subr.msk.mxu0 %vm531_vm0, %v5920_v48  ;;  %17238 = vst [vmem:[#allocation38_spill] sm:$0xff] %v13052_v9  ;;  %v1613_v48 = vrot.slane %v12733_v36, 3  ;;  %17240 = vst [vmem:[#allocation40_spill] sm:$0xff] %v13072_v50 }
  0x65   : > { %9907 = vmatmul.mubr.msk.f32.gmra.mrb[34].mxu1 %vm466_vm2, %v13033_v37  ;;  %v433_v37 = vrot.slane %v13064_v34, 1 }
  0x66   : > { %10345 = vmatmul.mubr.msk.f32.gmra.mrb[2].mxu0 %vm466_vm2, %v13041_v57  ;;  %708 = vmatprep.mubr.f32.mxu1 %v17010_v5  ;;  %v13078_v31 = vsel %vm1594_vm4, %v1611_v47, %v1613_v48  ;;  %v435_v47 = vrot.slane %v13083_v7, 1  ;;  %v1618_v48 = vrot.slane %v12771_v49, 3  ;;  %v13122_v57 = vld [vmem:[%s12670_s30 + $0x118] sm:$0xf] }
  0x67   : > { %5334 = vmatprep.mubr.f32.mxu0 %v17010_v5  ;;  %17241 = vst [vmem:[#allocation41_spill] sm:$0xff] %v13078_v31  ;;  %v13091_v23 = vsel %vm381_vm1, %v432_v61, %v433_v37 }
  0x68   : > { %17242 = vst [vmem:[#allocation42_spill] sm:$0xff] %v13091_v23  ;;  %v13111_v61 = vsel %vm381_vm1, %v433_v37, %v435_v47 }
  0x69   : > { %9908 = vmatmul.mubr.msk.f32.gmra.mrb[36].mxu1 %vm466_vm2, %v13052_v9  ;;  %v1615_v9 = vrot.slane %v12749_v41, 3  ;;  %17244 = vst [vmem:[#allocation44_spill] sm:$0xff] %v13111_v61 }
  0x6a   : > { %10346 = vmatmul.mubr.msk.f32.gmra.mrb[4].mxu0 %vm466_vm2, %v13057_v2  ;;  %714 = vmatprep.mubr.f32.mxu1 %v17010_v5  ;;  %v13117_v2 = vsel %vm1594_vm4, %v1616_v19, %v1618_v48  ;;  %v1623_v48 = vrot.slane %v12810_v62, 3 }
  0x6b   : > { %5340 = vmatprep.mubr.f32.mxu0 %v17010_v5  ;;  %v13096_v43 = vsel %vm1594_vm4, %v1615_v9, %v1616_v19  ;;  %v437_v9 = vrot.slane %v13100_v63, 1  ;;  %17245 = vst [vmem:[#allocation45_spill] sm:$0xff] %v13117_v2  ;;  %v440_v19 = vrot.slane %v13122_v57, 1 }
  0x6c   : > { %17243 = vst [vmem:[#allocation43_spill] sm:$0xff] %v13096_v43 }
  0x6d   : > { %9909 = vmatmul.mubr.msk.f32.gmra.mrb[38].mxu1 %vm466_vm2, %v13072_v50  ;;  %v13103_v50 = vld [vmem:[%s12670_s30 + $0x110] sm:$0xff] }
  0x6e   : > { %10347 = vmatmul.mubr.msk.f32.gmra.mrb[6].mxu0 %vm466_vm2, %v13078_v31  ;;  %720 = vmatprep.mubr.f32.mxu1 %v17010_v5  ;;  %v438_v31 = vrot.slane %v13103_v50, 1 }
  0x6f   : > { %5346 = vmatprep.mubr.f32.mxu0 %v17010_v5 }
  0x70   : > { %v13130_v37 = vsel %vm381_vm1, %v437_v9, %v438_v31  ;;  %v13150_v9 = vsel %vm381_vm1, %v438_v31, %v440_v19 }
  0x71   : > { %9910 = vmatmul.mubr.msk.f32.gmra.mrb[40].mxu1 %vm466_vm2, %v13091_v23  ;;  %v1620_v23 = vrot.slane %v12788_v54, 3  ;;  %17246 = vst [vmem:[#allocation46_spill] sm:$0xff] %v13130_v37  ;;  %17248 = vst [vmem:[#allocation48_spill] sm:$0xff] %v13150_v9 }
  0x72   : > { %10348 = vmatmul.mubr.msk.f32.gmra.mrb[8].mxu0 %vm466_vm2, %v13096_v43  ;;  %726 = vmatprep.mubr.f32.mxu1 %v17010_v5  ;;  %v1621_v43 = vrot.slane %v12791_v55, 3 }
  0x73   : > { %5352 = vmatprep.mubr.f32.mxu0 %v17010_v5 }
  0x74   : > { %v13135_v47 = vsel %vm1594_vm4, %v1620_v23, %v1621_v43  ;;  %v442_v23 = vrot.slane %v13139_v4, 1  ;;  %v13156_v13 = vsel %vm1594_vm4, %v1621_v43, %v1623_v48  ;;  %v445_v43 = vrot.slane %v13161_v27, 1 }
  0x75   : > { %9911 = vmatmul.mubr.msk.f32.gmra.mrb[42].mxu1 %vm466_vm2, %v13111_v61  ;;  %17247 = vst [vmem:[#allocation47_spill] sm:$0xff] %v13135_v47  ;;  %v13142_v61 = vld [vmem:[%s12670_s30 + $0x128] sm:$0xff]  ;;  %17249 = vst [vmem:[#allocation49_spill] sm:$0xff] %v13156_v13  ;;  %v1628_v48 = vrot.slane %v12849_v18, 3 }
  0x76   : > { %10349 = vmatmul.mubr.msk.f32.gmra.mrb[10].mxu0 %vm466_vm2, %v13117_v2  ;;  %732 = vmatprep.mubr.f32.mxu1 %v17010_v5  ;;  %v443_v2 = vrot.slane %v13142_v61, 1 }
  0x77   : > { %5358 = vmatprep.mubr.f32.mxu0 %v17010_v5 }
  0x78   : > { %v13169_v31 = vsel %vm381_vm1, %v442_v23, %v443_v2  ;;  %v13189_v23 = vsel %vm381_vm1, %v443_v2, %v445_v43 }
  0x79   : > { %9912 = vmatmul.mubr.msk.f32.gmra.mrb[44].mxu1 %vm466_vm2, %v13130_v37  ;;  %v1625_v37 = vrot.slane %v12827_v3, 3  ;;  %17250 = vst [vmem:[#allocation50_spill] sm:$0xff] %v13169_v31  ;;  %17252 = vst [vmem:[#allocation52_spill] sm:$0xff] %v13189_v23 }
  0x7a   : > { %10350 = vmatmul.mubr.msk.f32.gmra.mrb[12].mxu0 %vm466_vm2, %v13135_v47  ;;  %738 = vmatprep.mubr.f32.mxu1 %v17010_v5  ;;  %v1626_v47 = vrot.slane %v12830_v6, 3 }
  0x7b   : > { %5364 = vmatprep.mubr.f32.mxu0 %v17010_v5 }
  0x7c   : > { %v13174_v19 = vsel %vm1594_vm4, %v1625_v37, %v1626_v47  ;;  %v447_v37 = vrot.slane %v13178_v0, 1  ;;  %v13195_v33 = vsel %vm1594_vm4, %v1626_v47, %v1628_v48  ;;  %v450_v47 = vrot.slane %v13200_v8, 1 }
  0x7d   : > { %9913 = vmatmul.mubr.msk.f32.gmra.mrb[46].mxu1 %vm466_vm2, %v13150_v9  ;;  %17251 = vst [vmem:[#allocation51_spill] sm:$0xff] %v13174_v19  ;;  %v13181_v9 = vld [vmem:[%s12670_s30 + $0x140] sm:$0xff]  ;;  %17253 = vst [vmem:[#allocation53_spill] sm:$0xff] %v13195_v33  ;;  %v1633_v48 = vrot.slane %v12893_v45, 3 }
  0x7e   : > { %10351 = vmatmul.mubr.msk.f32.gmra.mrb[14].mxu0 %vm466_vm2, %v13156_v13  ;;  %744 = vmatprep.mubr.f32.mxu1 %v17010_v5  ;;  %v448_v13 = vrot.slane %v13181_v9, 1 }
  0x7f   : > { %5370 = vmatprep.mubr.f32.mxu0 %v17010_v5 }
  0x80   : > { %v13208_v2 = vsel %vm381_vm1, %v447_v37, %v448_v13  ;;  %v13228_v37 = vsel %vm381_vm1, %v448_v13, %v450_v47 }
  0x81   : > { %9914 = vmatmul.mubr.msk.f32.gmra.mrb[48].mxu1 %vm466_vm2, %v13169_v31  ;;  %v1630_v31 = vrot.slane %v12866_v29, 3  ;;  %17254 = vst [vmem:[#allocation54_spill] sm:$0xff] %v13208_v2  ;;  %17256 = vst [vmem:[#allocation56_spill] sm:$0xff] %v13228_v37 }
  0x82   : > { %10352 = vmatmul.mubr.msk.f32.gmra.mrb[16].mxu0 %vm466_vm2, %v13174_v19  ;;  %750 = vmatprep.mubr.f32.mxu1 %v17010_v5  ;;  %v1631_v19 = vrot.slane %v12869_v30, 3 }
  0x83   : > { %5376 = vmatprep.mubr.f32.mxu0 %v17010_v5 }
  0x84   : > { %v13213_v43 = vsel %vm1594_vm4, %v1630_v31, %v1631_v19  ;;  %v452_v31 = vrot.slane %v13217_v53, 1  ;;  %v13234_v35 = vsel %vm1594_vm4, %v1631_v19, %v1633_v48  ;;  %v455_v19 = vrot.slane %v13239_v24, 1 }
  0x85   : > { %9915 = vmatmul.mubr.msk.f32.gmra.mrb[50].mxu1 %vm466_vm2, %v13189_v23  ;;  %17255 = vst [vmem:[#allocation55_spill] sm:$0xff] %v13213_v43  ;;  %v13220_v23 = vld [vmem:[%s12670_s30 + $0x158] sm:$0xff]  ;;  %17257 = vst [vmem:[#allocation57_spill] sm:$0xff] %v13234_v35  ;;  %v1638_v48 = vrot.slane %v12935_v17, 3 }
  0x86   : > { %10353 = vmatmul.mubr.msk.f32.gmra.mrb[18].mxu0 %vm466_vm2, %v13195_v33  ;;  %756 = vmatprep.mubr.f32.mxu1 %v17010_v5  ;;  %v453_v33 = vrot.slane %v13220_v23, 1 }
  0x87   : > { %5382 = vmatprep.mubr.f32.mxu0 %v17010_v5 }
  0x88   : > { %v13247_v13 = vsel %vm381_vm1, %v452_v31, %v453_v33  ;;  %v13267_v31 = vsel %vm381_vm1, %v453_v33, %v455_v19 }
  0x89   : > { %9916 = vmatmul.mubr.msk.f32.gmra.mrb[52].mxu1 %vm466_vm2, %v13208_v2  ;;  %v1635_v2 = vrot.slane %v12912_v58, 3  ;;  %17258 = vst [vmem:[#allocation58_spill] sm:$0xff] %v13247_v13  ;;  %17260 = vst [vmem:[#allocation60_spill] sm:$0xff] %v13267_v31 }
  0x8a   : > { %10354 = vmatmul.mubr.msk.f32.gmra.mrb[20].mxu0 %vm466_vm2, %v13213_v43  ;;  %762 = vmatprep.mubr.f32.mxu1 %v17010_v5  ;;  %v1636_v43 = vrot.slane %v12915_v60, 3 }
  0x8b   : > { %5388 = vmatprep.mubr.f32.mxu0 %v17010_v5 }
  0x8c   : > { %v13252_v47 = vsel %vm1594_vm4, %v1635_v2, %v1636_v43  ;;  %v457_v2 = vrot.slane %v13256_v14, 1  ;;  %v13273_v1 = vsel %vm1594_vm4, %v1636_v43, %v1638_v48  ;;  %v460_v43 = vrot.slane %v13278_v52, 1 }
  0x8d   : > { %9917 = vmatmul.mubr.msk.f32.gmra.mrb[54].mxu1 %vm466_vm2, %v13228_v37  ;;  %17259 = vst [vmem:[#allocation59_spill] sm:$0xff] %v13252_v47  ;;  %v13259_v37 = vld [vmem:[%s12670_s30 + $0x170] sm:$0xff]  ;;  %17261 = vst [vmem:[#allocation61_spill] sm:$0xff] %v13273_v1  ;;  %v1643_v48 = vrot.slane %v12974_v56, 3 }
  0x8e   : > { %10355 = vmatmul.mubr.msk.f32.gmra.mrb[22].mxu0 %vm466_vm2, %v13234_v35  ;;  %768 = vmatprep.mubr.f32.mxu1 %v17010_v5  ;;  %v458_v35 = vrot.slane %v13259_v37, 1 }
  0x8f   : > { %5394 = vmatprep.mubr.f32.mxu0 %v17010_v5 }
  0x90   : > { %v13286_v33 = vsel %vm381_vm1, %v457_v2, %v458_v35  ;;  %v13300_v2 = vsel %vm381_vm1, %v458_v35, %v460_v43  ;;  %v13316_v35 = vld [vmem:[%s16865_s1 + $0x18] sm:$0xff]  ;;  %v1648_v43 = vrot.slane %v13083_v7, 3 }
  0x91   : > { %9918 = vmatmul.mubr.msk.f32.gmra.mrb[56].mxu1 %vm466_vm2, %v13247_v13  ;;  %v1641_v13 = vrot.slane %v12955_v40, 3  ;;  %17262 = vst [vmem:[#allocation62_spill] sm:$0xff] %v13286_v33  ;;  %17264 = vst [vmem:[#allocation64_spill] sm:$0xff] %v13300_v2 }
  0x92   : > { %10356 = vmatmul.mubr.msk.f32.gmra.mrb[24].mxu0 %vm466_vm2, %v13252_v47  ;;  %774 = vmatprep.mubr.f32.mxu1 %v17010_v5 }
  0x93   : > { %5400 = vmatprep.mubr.f32.mxu0 %v17010_v5  ;;  %v13291_v19 = vsel %vm1594_vm4, %v1640_v59, %v1641_v13  ;;  %v1645_v59 = vrot.slane %v13061_v16, 3 }
  0x94   : > { %17263 = vst [vmem:[#allocation63_spill] sm:$0xff] %v13291_v19 }
  0x95   : > { %9919 = vmatmul.mubr.msk.f32.gmra.mrb[58].mxu1 %vm466_vm2, %v13267_v31  ;;  %v13304_v31 = vsel %vm1594_vm4, %v1641_v13, %v1643_v48  ;;  %v1678_v48 = vcombine.high %v13316_v35, %v13316_v35 }
  0x96   : > { %10357 = vmatmul.mubr.msk.f32.gmra.mrb[26].mxu0 %vm466_vm2, %v13273_v1  ;;  %780 = vmatprep.mubr.f32.mxu1 %v17010_v5  ;;  %17265 = vst [vmem:[#allocation65_spill] sm:$0xff] %v13304_v31  ;;  %v1646_v1 = vrot.slane %v13064_v34, 3 }
  0x97   : > { %5406 = vmatprep.mubr.f32.mxu0 %v17010_v5 }
  0x98   : > { %v13320_v13 = vsel %vm1594_vm4, %v1645_v59, %v1646_v1  ;;  %v13334_v59 = vsel %vm1594_vm4, %v1646_v1, %v1648_v43  ;;  %v1653_v1 = vrot.slane %v13122_v57, 3  ;;  %v1660_v43 = vrot.slane %v13178_v0, 3 }
  0x99   : > { %9920 = vmatmul.mubr.msk.f32.gmra.mrb[60].mxu1 %vm466_vm2, %v13286_v33  ;;  %17266 = vst [vmem:[#allocation66_spill] sm:$0xff] %v13320_v13  ;;  %17267 = vst [vmem:[#allocation67_spill] sm:$0xff] %v13334_v59  ;;  %v1651_v33 = vrot.slane %v13103_v50, 3 }
  0x9a   : > { %10358 = vmatmul.mubr.msk.f32.gmra.mrb[28].mxu0 %vm466_vm2, %v13291_v19  ;;  %786 = vmatprep.mubr.f32.mxu1 %v17010_v5 }
  0x9b   : > { %5412 = vmatprep.mubr.f32.mxu0 %v17010_v5 }
  0x9d   : > { %9921 = vmatmul.mubr.msk.f32.gmra.mrb[62].mxu1 %vm466_vm2, %v13300_v2  ;;  %v1650_v2 = vrot.slane %v13100_v63, 3 }
  0x9e   : > { %10359 = vmatmul.mubr.msk.f32.gmra.mrb[30].mxu0 %vm466_vm2, %v13304_v31  ;;  %927 = vmatprep.mubr.f32.mxu1 %v17010_v5 }
  0x9f   : > { %5418 = vmatprep.mubr.f32.mxu0 %v17010_v5 }
  0xa1   : > { %9924 = vmatmul.mubr.msk.f32.vlgmr.msra.gmra.mrb[0].mxu1 %vm466_vm2, %v12678_v10  ;;  %v13346_v10 = vsel %vm1594_vm4, %v1650_v2, %v1651_v33  ;;  %v1656_v2 = vrot.slane %v13142_v61, 3 }
  0xa2   : > { %9958 = vmatpush1.msk.msra.mxu1 %vm531_vm0, %v12890_v44  ;;  %10360 = vmatmul.mubr.msk.f32.gmra.mrb[32].mxu0 %vm466_vm2, %v13320_v13  ;;  %17268 = vst [vmem:[#allocation68_spill] sm:$0xff] %v13346_v10  ;;  %v1655_v44 = vrot.slane %v13139_v4, 3  ;;  %v13481_v13 = vld [vmem:[%s12670_s30 + $0x1a8] sm:$0xf] }
  0xa3   : > { %933 = vmatprep.mubr.f32.mxu1 %v17010_v5  ;;  %5424 = vmatprep.mubr.f32.mxu0 %v17010_v5 }
  0xa4   : > { %9992 = vmatprep.subr.msk.mxu1 %vm531_vm0, %v1678_v48  ;;  %v1661_v48 = vrot.slane %v13181_v9, 3 }
  0xa5   : > { %9925 = vmatmul.mubr.msk.f32.gmra.mrb[2].mxu1 %vm466_vm2, %v12681_v11  ;;  %v13356_v11 = vsel %vm1594_vm4, %v1651_v33, %v1653_v1  ;;  %v1658_v33 = vrot.slane %v13161_v27, 3 }
  0xa6   : > { %10361 = vmatmul.mubr.msk.f32.gmra.mrb[34].mxu0 %vm466_vm2, %v13334_v59  ;;  %939 = vmatprep.mubr.f32.mxu1 %v17010_v5  ;;  %17269 = vst [vmem:[#allocation69_spill] sm:$0xff] %v13356_v11  ;;  %v13388_v1 = vsel %vm1594_vm4, %v1660_v43, %v1661_v48  ;;  %v1666_v43 = vrot.slane %v13220_v23, 3 }
  0xa7   : > { %5430 = vmatprep.mubr.f32.mxu0 %v17010_v5  ;;  %17272 = vst [vmem:[#allocation72_spill] sm:$0xff] %v13388_v1 }
  0xa9   : > { %9926 = vmatmul.mubr.msk.f32.gmra.mrb[4].mxu1 %vm466_vm2, %v12698_v21  ;;  %v13367_v21 = vsel %vm1594_vm4, %v1655_v44, %v1656_v2  ;;  %v1663_v44 = vrot.slane %v13200_v8, 3 }
  0xaa   : > { %10362 = vmatmul.mubr.msk.f32.gmra.mrb[36].mxu0 %vm466_vm2, %v13346_v10  ;;  %945 = vmatprep.mubr.f32.mxu1 %v17010_v5  ;;  %17270 = vst [vmem:[#allocation70_spill] sm:$0xff] %v13367_v21  ;;  %v13467_v10 = vld [vmem:[%s12670_s30 + $0x1a0] sm:$0xff] }
  0xab   : > { %5436 = vmatprep.mubr.f32.mxu0 %v17010_v5  ;;  %v5242_v59 = vrot.slane %v13467_v10, 3 }
  0xad   : > { %9927 = vmatmul.mubr.msk.f32.gmra.mrb[6].mxu1 %vm466_vm2, %v12701_v22  ;;  %v13377_v22 = vsel %vm1594_vm4, %v1656_v2, %v1658_v33  ;;  %v13398_v2 = vsel %vm1594_vm4, %v1661_v48, %v1663_v44  ;;  %v1665_v33 = vrot.slane %v13217_v53, 3  ;;  %v1668_v48 = vrot.slane %v13239_v24, 3 }
  0xae   : > { %10363 = vmatmul.mubr.msk.f32.gmra.mrb[38].mxu0 %vm466_vm2, %v13356_v11  ;;  %951 = vmatprep.mubr.f32.mxu1 %v17010_v5  ;;  %17271 = vst [vmem:[#allocation71_spill] sm:$0xff] %v13377_v22  ;;  %17273 = vst [vmem:[#allocation73_spill] sm:$0xff] %v13398_v2  ;;  %v13451_v11 = vld [vmem:[%s12670_s30 + $0x190] sm:$0xf] }
  0xaf   : > { %5442 = vmatprep.mubr.f32.mxu0 %v17010_v5  ;;  %v13419_v44 = vsel %vm1594_vm4, %v1666_v43, %v1668_v48  ;;  %v13434_v48 = vld [vmem:[%s12670_s30 + $0x180] sm:$0xff] }
  0xb0   : > { %17275 = vst [vmem:[#allocation75_spill] sm:$0xff] %v13419_v44 }
  0xb1   : > { %9928 = vmatmul.mubr.msk.f32.gmra.mrb[8].mxu1 %vm466_vm2, %v12684_v12 }
  0xb2   : > { %10364 = vmatmul.mubr.msk.f32.gmra.mrb[40].mxu0 %vm466_vm2, %v13367_v21  ;;  %957 = vmatprep.mubr.f32.mxu1 %v17010_v5 }
  0xb3   : > { %5448 = vmatprep.mubr.f32.mxu0 %v17010_v5 }
  0xb5   : > { %9929 = vmatmul.mubr.msk.f32.gmra.mrb[10].mxu1 %vm466_vm2, %v12689_v15 }
  0xb6   : > { %10365 = vmatmul.mubr.msk.f32.gmra.mrb[42].mxu0 %vm466_vm2, %v13377_v22  ;;  %963 = vmatprep.mubr.f32.mxu1 %v17010_v5  ;;  %v13437_v22 = vld [vmem:[%s12670_s30 + $0x188] sm:$0xff] }
  0xb7   : > { %5454 = vmatprep.mubr.f32.mxu0 %v17010_v5  ;;  %v3554_v21 = vrot.slane %v13437_v22, 3 }
  0xb9   : > { %9930 = vmatmul.mubr.msk.f32.gmra.mrb[12].mxu1 %vm466_vm2, %v12706_v25 }
  0xba   : > { %10366 = vmatmul.mubr.msk.f32.gmra.mrb[44].mxu0 %vm466_vm2, %v13388_v1  ;;  %969 = vmatprep.mubr.f32.mxu1 %v17010_v5  ;;  %v13409_v1 = vsel %vm1594_vm4, %v1665_v33, %v1666_v43  ;;  %v1671_v33 = vrot.slane %v13259_v37, 3  ;;  %v1673_v43 = vrot.slane %v13278_v52, 3 }
  0xbb   : > { %5460 = vmatprep.mubr.f32.mxu0 %v17010_v5  ;;  %17274 = vst [vmem:[#allocation74_spill] sm:$0xff] %v13409_v1 }
  0xbd   : > { %9931 = vmatmul.mubr.msk.f32.gmra.mrb[14].mxu1 %vm466_vm2, %v12709_v26 }
  0xbe   : > { %10367 = vmatmul.mubr.msk.f32.gmra.mrb[46].mxu0 %vm466_vm2, %v13398_v2  ;;  %975 = vmatprep.mubr.f32.mxu1 %v17010_v5  ;;  %v1670_v2 = vrot.slane %v13256_v14, 3 }
  0xbf   : > { %5466 = vmatprep.mubr.f32.mxu0 %v17010_v5 }
  0xc1   : > { %9932 = vmatmul.mubr.msk.f32.gmra.mrb[16].mxu1 %vm466_vm2, %v12749_v41 }
  0xc2   : > { %10368 = vmatmul.mubr.msk.f32.gmra.mrb[48].mxu0 %vm466_vm2, %v13409_v1  ;;  %981 = vmatprep.mubr.f32.mxu1 %v17010_v5  ;;  %v13430_v1 = vsel %vm1594_vm4, %v1670_v2, %v1671_v33  ;;  %v13446_v2 = vsel %vm1594_vm4, %v1671_v33, %v1673_v43  ;;  %v3556_v43 = vrot.slane %v13451_v11, 3 }
  0xc3   : > { %5472 = vmatprep.mubr.f32.mxu0 %v17010_v5  ;;  %17276 = vst [vmem:[#allocation76_spill] sm:$0xff] %v13430_v1  ;;  %17277 = vst [vmem:[#allocation77_spill] sm:$0xff] %v13446_v2 }
  0xc5   : > { %9933 = vmatmul.mubr.msk.f32.gmra.mrb[18].mxu1 %vm466_vm2, %v12752_v42 }
  0xc6   : > { %10369 = vmatmul.mubr.msk.f32.gmra.mrb[50].mxu0 %vm466_vm2, %v13419_v44  ;;  %987 = vmatprep.mubr.f32.mxu1 %v17010_v5  ;;  %v3553_v44 = vrot.slane %v13434_v48, 3 }
  0xc7   : > { %5478 = vmatprep.mubr.f32.mxu0 %v17010_v5 }
  0xc8   : > { %v13460_v33 = vsel %vm1594_vm4, %v3553_v44, %v3554_v21 }
  0xc9   : > { %9934 = vmatmul.mubr.msk.f32.gmra.mrb[20].mxu1 %vm466_vm2, %v12788_v54  ;;  %17278 = vst [vmem:[#allocation78_spill] sm:$0xff] %v13460_v33 }
  0xca   : > { %10370 = vmatmul.mubr.msk.f32.gmra.mrb[52].mxu0 %vm466_vm2, %v13430_v1  ;;  %993 = vmatprep.mubr.f32.mxu1 %v17010_v5  ;;  %v13464_v1 = vld [vmem:[%s12670_s30 + $0x198] sm:$0xff] }
  0xcb   : > { %5484 = vmatprep.mubr.f32.mxu0 %v17010_v5  ;;  %v5241_v44 = vrot.slane %v13464_v1, 3 }
  0xcd   : > { %9935 = vmatmul.mubr.msk.f32.gmra.mrb[22].mxu1 %vm466_vm2, %v12791_v55 }
  0xce   : > { %10371 = vmatmul.mubr.msk.f32.gmra.mrb[54].mxu0 %vm466_vm2, %v13446_v2  ;;  %999 = vmatprep.mubr.f32.mxu1 %v17010_v5  ;;  %v13476_v2 = vsel %vm1594_vm4, %v3554_v21, %v3556_v43  ;;  %v5244_v21 = vrot.slane %v13481_v13, 3 }
  0xcf   : > { %5490 = vmatprep.mubr.f32.mxu0 %v17010_v5  ;;  %17279 = vst [vmem:[#allocation79_spill] sm:$0xff] %v13476_v2 }
  0xd0   : > { %v13500_v43 = vsel %vm1594_vm4, %v5242_v59, %v5244_v21  ;;  %v2084_v21 = vrot.slane %v12709_v26, 4  ;;  %v2088_v26 = vrot.slane %v12749_v41, 4 }
  0xd1   : > { %9936 = vmatmul.mubr.msk.f32.gmra.mrb[24].mxu1 %vm466_vm2, %v12827_v3  ;;  %17281 = vst [vmem:[#allocation81_spill] sm:$0xff] %v13500_v43 }
  0xd2   : > { %10372 = vmatmul.mubr.msk.f32.gmra.mrb[56].mxu0 %vm466_vm2, %v13460_v33  ;;  %1005 = vmatprep.mubr.f32.mxu1 %v17010_v5  ;;  %v13490_v33 = vsel %vm1594_vm4, %v5241_v44, %v5242_v59  ;;  %v2079_v44 = vrot.slane %v12689_v15, 4  ;;  %v2081_v59 = vrot.slane %v12695_v20, 4 }
  0xd3   : > { %5496 = vmatprep.mubr.f32.mxu0 %v17010_v5  ;;  %17280 = vst [vmem:[#allocation80_spill] sm:$0xff] %v13490_v33 }
  0xd4   : > { %v13530_v20 = vsel %vm531_vm0, %v2079_v44, %v2081_v59  ;;  %v2089_v59 = vrot.slane %v12752_v42, 4  ;;  %v2093_v42 = vrot.slane %v12788_v54, 4 }
  0xd5   : > { %9937 = vmatmul.mubr.msk.f32.gmra.mrb[26].mxu1 %vm466_vm2, %v12830_v6  ;;  %17283 = vst [vmem:[#allocation83_spill] sm:$0xff] %v13530_v20 }
  0xd6   : > { %10373 = vmatmul.mubr.msk.f32.gmra.mrb[58].mxu0 %vm466_vm2, %v13476_v2  ;;  %1011 = vmatprep.mubr.f32.mxu1 %v17010_v5  ;;  %v2078_v2 = vrot.slane %v12684_v12, 4  ;;  %v13517_v12 = vld [vmem:[%s16865_s1 + $0x80] sm:$0xff] }
  0xd7   : > { %5502 = vmatprep.mubr.f32.mxu0 %v17010_v5  ;;  %v6261_v15 = vcombine.high %v13517_v12, %v13517_v12 }
  0xd9   : > { %9938 = vmatmul.mubr.msk.f32.gmra.mrb[28].mxu1 %vm466_vm2, %v12866_v29 }
  0xda   : > { %10374 = vmatmul.mubr.msk.f32.gmra.mrb[60].mxu0 %vm466_vm2, %v13490_v33  ;;  %1017 = vmatprep.mubr.f32.mxu1 %v17010_v5  ;;  %v13511_v33 = vsel %vm531_vm0, %v2078_v2, %v2079_v44  ;;  %v2083_v2 = vrot.slane %v12706_v25, 4  ;;  %v2086_v44 = vrot.slane %v12733_v36, 4  ;;  %v13563_v36 = vsel %vm531_vm0, %v2088_v26, %v2089_v59 }
  0xdb   : > { %5508 = vmatprep.mubr.f32.mxu0 %v17010_v5  ;;  %17282 = vst [vmem:[#allocation82_spill] sm:$0xff] %v13511_v33  ;;  %v2101_v26 = vrot.slane %v12849_v18, 4 }
  0xdc   : > { %v13552_v25 = vsel %vm531_vm0, %v2084_v21, %v2086_v44  ;;  %v2099_v44 = vrot.slane %v12830_v6, 4  ;;  %v2103_v6 = vrot.slane %v12866_v29, 4 }
  0xdd   : > { %9939 = vmatmul.mubr.msk.f32.gmra.mrb[30].mxu1 %vm466_vm2, %v12869_v30 }
  0xde   : > { %10375 = vmatmul.mubr.msk.f32.gmra.mrb[62].mxu0 %vm466_vm2, %v13500_v43  ;;  %1023 = vmatprep.mubr.f32.mxu1 %v17010_v5  ;;  %v13723_v43 = vld [vmem:[%s12670_s30 + $0x20] sm:$0xff] }
  0xdf   : > { %5660 = vmatprep.mubr.f32.mxu0 %v17010_v5 }
  0xe1   : > { %9940 = vmatmul.mubr.msk.f32.gmra.mrb[32].mxu1 %vm466_vm2, %v12912_v58 }
  0xe2   : > { %10379 = vmatmul.mubr.msk.f32.vlgmr.msra.gmra.mrb[0].mxu0 %vm466_vm2, %v13511_v33  ;;  %1029 = vmatprep.mubr.f32.mxu1 %v17010_v5 }
  0xe3   : > { %10413 = vmatpush1.msk.msra.mxu0 %vm531_vm0, %v13023_v51  ;;  %5666 = vmatprep.mubr.f32.mxu0 %v17010_v5  ;;  %v13542_v51 = vsel %vm531_vm0, %v2083_v2, %v2084_v21  ;;  %v2094_v2 = vrot.slane %v12791_v55, 4  ;;  %v2096_v21 = vrot.slane %v12810_v62, 4  ;;  %v2098_v55 = vrot.slane %v12827_v3, 4 }
  0xe4   : > { %10447 = vmatprep.subr.msk.mxu0 %vm531_vm0, %v6261_v15  ;;  %v2091_v15 = vrot.slane %v12771_v49, 4  ;;  %v13615_v3 = vsel %vm531_vm0, %v2099_v44, %v2101_v26 }
  0xe5   : > { %9941 = vmatmul.mubr.msk.f32.gmra.mrb[34].mxu1 %vm466_vm2, %v12915_v60  ;;  %v13584_v49 = vsel %vm531_vm0, %v2093_v42, %v2094_v2  ;;  %v13594_v54 = vsel %vm531_vm0, %v2094_v2, %v2096_v21  ;;  %v13605_v62 = vsel %vm531_vm0, %v2098_v55, %v2099_v44  ;;  %17287 = vst [vmem:[#allocation87_spill] sm:$0xff] %v13615_v3  ;;  %v2109_v42 = vrot.slane %v12915_v60, 4  ;;  %v13681_v44 = vld [vmem:[%s12670_s30 + $0x8] sm:$0xff] }
  0xe6   : > { %10380 = vmatmul.mubr.msk.f32.gmra.mrb[2].mxu0 %vm466_vm2, %v13530_v20  ;;  %1035 = vmatprep.mubr.f32.mxu1 %v17010_v5  ;;  %v13573_v41 = vsel %vm531_vm0, %v2089_v59, %v2091_v15  ;;  %17284 = vst [vmem:[#allocation84_spill] sm:$0xff] %v13584_v49  ;;  %17285 = vst [vmem:[#allocation85_spill] sm:$0xff] %v13594_v54  ;;  %v2104_v59 = vrot.slane %v12869_v30, 4  ;;  %v2106_v15 = vrot.slane %v12893_v45, 4  ;;  %v2108_v30 = vrot.slane %v12912_v58, 4 }
  0xe7   : > { %5672 = vmatprep.mubr.f32.mxu0 %v17010_v5  ;;  %17286 = vst [vmem:[#allocation86_spill] sm:$0xff] %v13605_v62  ;;  %v2111_v2 = vrot.slane %v12935_v17, 4  ;;  %v2113_v60 = vrot.slane %v12952_v38, 4  ;;  %v2114_v21 = vrot.slane %v12955_v40, 4  ;;  %v2116_v55 = vrot.slane %v12974_v56, 4 }
  0xe8   : > { %v13626_v18 = vsel %vm531_vm0, %v2103_v6, %v2104_v59  ;;  %v13636_v29 = vsel %vm531_vm0, %v2104_v59, %v2106_v15  ;;  %v13647_v45 = vsel %vm531_vm0, %v2108_v30, %v2109_v42  ;;  %v1122_v26 = vrot.slane %v13681_v44, 2  ;;  %v13697_v30 = vld [vmem:[%s12670_s30 + $0x10] sm:$0xf] }
  0xe9   : > { %9942 = vmatmul.mubr.msk.f32.gmra.mrb[36].mxu1 %vm466_vm2, %v12952_v38  ;;  %17288 = vst [vmem:[#allocation88_spill] sm:$0xff] %v13626_v18  ;;  %17289 = vst [vmem:[#allocation89_spill] sm:$0xff] %v13636_v29  ;;  %v13657_v58 = vsel %vm531_vm0, %v2109_v42, %v2111_v2  ;;  %v13668_v17 = vsel %vm531_vm0, %v2113_v60, %v2114_v21  ;;  %v13677_v38 = vld [vmem:[%s12670_s30] sm:$0xff]  ;;  %v13686_v56 = vsel %vm531_vm0, %v2114_v21, %v2116_v55 }
  0xea   : > { %10381 = vmatmul.mubr.msk.f32.gmra.mrb[4].mxu0 %vm466_vm2, %v13542_v51  ;;  %1041 = vmatprep.mubr.f32.mxu1 %v17010_v5  ;;  %17290 = vst [vmem:[#allocation90_spill] sm:$0xff] %v13647_v45  ;;  %17291 = vst [vmem:[#allocation91_spill] sm:$0xff] %v13657_v58  ;;  %v2118_v6 = vrot.slane %v13061_v16, 4  ;;  %v2119_v59 = vrot.slane %v13064_v34, 4  ;;  %v1124_v42 = vrot.slane %v13697_v30, 2  ;;  %v13703_v2 = vld [vmem:[%s16865_s1 + $0x20] sm:$0xff] }
  0xeb   : > { %5678 = vmatprep.mubr.f32.mxu0 %v17010_v5  ;;  %17292 = vst [vmem:[#allocation92_spill] sm:$0xff] %v13668_v17  ;;  %17293 = vst [vmem:[#allocation93_spill] sm:$0xff] %v13686_v56  ;;  %v2121_v21 = vrot.slane %v13083_v7, 4  ;;  %v2151_v55 = vcombine.high %v13703_v2, %v13703_v2 }
  0xec   : > { %v13707_v60 = vsel %vm531_vm0, %v2118_v6, %v2119_v59 }
  0xed   : > { %9943 = vmatmul.mubr.msk.f32.gmra.mrb[38].mxu1 %vm466_vm2, %v12955_v40  ;;  %v1121_v40 = vrot.slane %v13677_v38, 2  ;;  %17294 = vst [vmem:[#allocation94_spill] sm:$0xff] %v13707_v60 }
  0xee   : > { %10382 = vmatmul.mubr.msk.f32.gmra.mrb[6].mxu0 %vm466_vm2, %v13552_v25  ;;  %1047 = vmatprep.mubr.f32.mxu1 %v17010_v5 }
  0xef   : > { %5684 = vmatprep.mubr.f32.mxu0 %v17010_v5  ;;  %v1123_v15 = vsel %vm1120_vm3, %v1121_v40, %v1122_v26  ;;  %v1125_v40 = vsel %vm1120_vm3, %v1122_v26, %v1124_v42  ;;  %v13742_v42 = vld [vmem:[%s12670_s30 + $0x28] sm:$0xf] }
  0xf1   : > { %9944 = vmatmul.mubr.msk.f32.gmra.mrb[40].mxu1 %vm466_vm2, %v13061_v16 }
  0xf2   : > { %10383 = vmatmul.mubr.msk.f32.gmra.mrb[8].mxu0 %vm466_vm2, %v13563_v36  ;;  %1053 = vmatprep.mubr.f32.mxu1 %v17010_v5 }
  0xf3   : > { %5690 = vmatprep.mubr.f32.mxu0 %v17010_v5 }
  0xf5   : > { %9945 = vmatmul.mubr.msk.f32.gmra.mrb[42].mxu1 %vm466_vm2, %v13064_v34 }
  0xf6   : > { %10384 = vmatmul.mubr.msk.f32.gmra.mrb[10].mxu0 %vm466_vm2, %v13573_v41  ;;  %1059 = vmatprep.mubr.f32.mxu1 %v17010_v5 }
  0xf7   : > { %5696 = vmatprep.mubr.f32.mxu0 %v17010_v5 }
  0xf9   : > { %9946 = vmatmul.mubr.msk.f32.gmra.mrb[44].mxu1 %vm466_vm2, %v13100_v63 }
  0xfa   : > { %10385 = vmatmul.mubr.msk.f32.gmra.mrb[12].mxu0 %vm466_vm2, %v13584_v49  ;;  %1065 = vmatprep.mubr.f32.mxu1 %v17010_v5 }
  0xfb   : > { %5702 = vmatprep.mubr.f32.mxu0 %v17010_v5 }
  0xfd   : > { %9947 = vmatmul.mubr.msk.f32.gmra.mrb[46].mxu1 %vm466_vm2, %v13103_v50 }
  0xfe   : > { %10386 = vmatmul.mubr.msk.f32.gmra.mrb[14].mxu0 %vm466_vm2, %v13594_v54  ;;  %1071 = vmatprep.mubr.f32.mxu1 %v17010_v5 }
  0xff   : > { %5708 = vmatprep.mubr.f32.mxu0 %v17010_v5 }
 0x101   : > { %9948 = vmatmul.mubr.msk.f32.gmra.mrb[48].mxu1 %vm466_vm2, %v13139_v4 }
 0x102   : > { %10387 = vmatmul.mubr.msk.f32.gmra.mrb[16].mxu0 %vm466_vm2, %v13605_v62  ;;  %1077 = vmatprep.mubr.f32.mxu1 %v17010_v5 }
 0x103   : > { %5714 = vmatprep.mubr.f32.mxu0 %v17010_v5 }
 0x105   : > { %9949 = vmatmul.mubr.msk.f32.gmra.mrb[50].mxu1 %vm466_vm2, %v13142_v61 }
 0x106   : > { %10388 = vmatmul.mubr.msk.f32.gmra.mrb[18].mxu0 %vm466_vm2, %v13615_v3  ;;  %1083 = vmatprep.mubr.f32.mxu1 %v17010_v5 }
 0x107   : > { %5720 = vmatprep.mubr.f32.mxu0 %v17010_v5 }
 0x109   : > { %9950 = vmatmul.mubr.msk.f32.gmra.mrb[52].mxu1 %vm466_vm2, %v13178_v0 }
 0x10a   : > { %10389 = vmatmul.mubr.msk.f32.gmra.mrb[20].mxu0 %vm466_vm2, %v13626_v18  ;;  %1089 = vmatprep.mubr.f32.mxu1 %v17010_v5 }
 0x10b   : > { %5726 = vmatprep.mubr.f32.mxu0 %v17010_v5 }
 0x10d   : > { %9951 = vmatmul.mubr.msk.f32.gmra.mrb[54].mxu1 %vm466_vm2, %v13181_v9 }
 0x10e   : > { %10390 = vmatmul.mubr.msk.f32.gmra.mrb[22].mxu0 %vm466_vm2, %v13636_v29  ;;  %1095 = vmatprep.mubr.f32.mxu1 %v17010_v5 }
 0x10f   : > { %5732 = vmatprep.mubr.f32.mxu0 %v17010_v5 }
 0x111   : > { %9952 = vmatmul.mubr.msk.f32.gmra.mrb[56].mxu1 %vm466_vm2, %v13217_v53 }
 0x112   : > { %10391 = vmatmul.mubr.msk.f32.gmra.mrb[24].mxu0 %vm466_vm2, %v13647_v45  ;;  %1101 = vmatprep.mubr.f32.mxu1 %v17010_v5 }
 0x113   : > { %5738 = vmatprep.mubr.f32.mxu0 %v17010_v5 }
 0x115   : > { %9953 = vmatmul.mubr.msk.f32.gmra.mrb[58].mxu1 %vm466_vm2, %v13220_v23 }
 0x116   : > { %10392 = vmatmul.mubr.msk.f32.gmra.mrb[26].mxu0 %vm466_vm2, %v13657_v58  ;;  %1107 = vmatprep.mubr.f32.mxu1 %v17010_v5 }
 0x117   : > { %5744 = vmatprep.mubr.f32.mxu0 %v17010_v5 }
 0x119   : > { %9954 = vmatmul.mubr.msk.f32.gmra.mrb[60].mxu1 %vm466_vm2, %v13256_v14 }
 0x11a   : > { %10393 = vmatmul.mubr.msk.f32.gmra.mrb[28].mxu0 %vm466_vm2, %v13668_v17  ;;  %1113 = vmatprep.mubr.f32.mxu1 %v17010_v5  ;;  %v17295_v17 = vmov 0.0  }
 0x11b   : > { %5750 = vmatprep.mubr.f32.mxu0 %v17010_v5 }
 0x11d   : > { %9955 = vmatmul.mubr.msk.f32.gmra.mrb[62].mxu1 %vm466_vm2, %v13259_v37 }
 0x11e   : > { %10394 = vmatmul.mubr.msk.f32.gmra.mrb[30].mxu0 %vm466_vm2, %v13686_v56  ;;  %1337 = vmatprep.mubr.f32.mxu1 %v17010_v5  ;;  %v1127_v56 = vrot.slane %v13723_v43, 2 }
 0x11f   : > { %5756 = vmatprep.mubr.f32.mxu0 %v17010_v5  ;;  %v13719_v5 = vld [vmem:[%s12670_s30 + $0x18] sm:$0xff] }
 0x120   : > { %v1126_v6 = vrot.slane %v13719_v5, 2 }
 0x121   : > { %9959 = vmatmul.mubr.msk.f32.vlgmr.msra.gmra.mrb[0].mxu1 %vm466_vm2, %v1123_v15  ;;  %v2123_v15 = vrot.slane %v13100_v63, 4 }
 0x122   : > { %9993 = vmatpush1.msk.msra.mxu1 %vm531_vm0, %v13316_v35  ;;  %10395 = vmatmul.mubr.msk.f32.gmra.mrb[32].mxu0 %vm466_vm2, %v13707_v60  ;;  %v13729_v35 = vsel %vm531_vm0, %v2119_v59, %v2121_v21  ;;  %v2124_v60 = vrot.slane %v13103_v50, 4  ;;  %v13739_v26 = vsel %vm1120_vm3, %v1126_v6, %v1127_v56  ;;  %v1129_v59 = vrot.slane %v13742_v42, 2 }
 0x123   : > { %1343 = vmatprep.mubr.f32.mxu1 %v17295_v17  ;;  %5762 = vmatprep.mubr.f32.mxu0 %v17295_v17  ;;  %17296 = vst [vmem:[#allocation95_spill] sm:$0xff] %v13729_v35  ;;  %17297 = vst [vmem:[#allocation96_spill] sm:$0xff] %v13739_v26 }
 0x124   : > { %10027 = vmatprep.subr.msk.mxu1 %vm531_vm0, %v2151_v55  ;;  %v13747_v21 = vsel %vm531_vm0, %v2123_v15, %v2124_v60  ;;  %v2126_v55 = vrot.slane %v13122_v57, 4  ;;  %v2128_v15 = vrot.slane %v13139_v4, 4 }
 0x125   : > { %9960 = vmatmul.mubr.msk.f32.gmra.mrb[2].mxu1 %vm466_vm2, %v1125_v40  ;;  %17298 = vst [vmem:[#allocation97_spill] sm:$0xff] %v13747_v21  ;;  %v13756_v40 = vsel %vm1120_vm3, %v1127_v56, %v1129_v59 }
 0x126   : > { %10396 = vmatmul.mubr.msk.f32.gmra.mrb[34].mxu0 %vm466_vm2, %v13729_v35  ;;  %1349 = vmatprep.mubr.f32.mxu1 %v17295_v17  ;;  %17299 = vst [vmem:[#allocation98_spill] sm:$0xff] %v13756_v40  ;;  %v13760_v6 = vsel %vm531_vm0, %v2124_v60, %v2126_v55  ;;  %v2129_v35 = vrot.slane %v13142_v61, 4  ;;  %v2131_v60 = vrot.slane %v13161_v27, 4  ;;  %v2133_v55 = vrot.slane %v13178_v0, 4 }
 0x127   : > { %5768 = vmatprep.mubr.f32.mxu0 %v17295_v17  ;;  %17300 = vst [vmem:[#allocation99_spill] sm:$0xff] %v13760_v6 }
 0x128   : > { %v13771_v56 = vsel %vm531_vm0, %v2128_v15, %v2129_v35  ;;  %v13781_v59 = vsel %vm531_vm0, %v2129_v35, %v2131_v60  ;;  %v2134_v15 = vrot.slane %v13181_v9, 4  ;;  %v2136_v35 = vrot.slane %v13200_v8, 4 }
 0x129   : > { %9961 = vmatmul.mubr.msk.f32.gmra.mrb[4].mxu1 %vm466_vm2, %v13739_v26  ;;  %17301 = vst [vmem:[#allocation100_spill] sm:$0xff] %v13771_v56  ;;  %17302 = vst [vmem:[#allocation101_spill] sm:$0xff] %v13781_v59 }
 0x12a   : > { %10397 = vmatmul.mubr.msk.f32.gmra.mrb[36].mxu0 %vm466_vm2, %v13747_v21  ;;  %1355 = vmatprep.mubr.f32.mxu1 %v17295_v17  ;;  %v13802_v60 = vsel %vm531_vm0, %v2134_v15, %v2136_v35  ;;  %v17306_v35 = vld [vmem:[#allocation11_spill] sm:$0xff]  ;;  %v17316_v21 = vld [vmem:[#allocation21_spill] sm:$0xff] }
 0x12b   : > { %5774 = vmatprep.mubr.f32.mxu0 %v17295_v17  ;;  %17304 = vst [vmem:[#allocation103_spill] sm:$0xff] %v13802_v60 }
 0x12d   : > { %9962 = vmatmul.mubr.msk.f32.gmra.mrb[6].mxu1 %vm466_vm2, %v13756_v40 }
 0x12e   : > { %10398 = vmatmul.mubr.msk.f32.gmra.mrb[38].mxu0 %vm466_vm2, %v13760_v6  ;;  %1361 = vmatprep.mubr.f32.mxu1 %v17295_v17  ;;  %v5579_v6 = vrot.slane %v13464_v1, 4 }
 0x12f   : > { %5780 = vmatprep.mubr.f32.mxu0 %v17295_v17 }
 0x131   : > { %9963 = vmatmul.mubr.msk.f32.gmra.mrb[8].mxu1 %vm466_vm2, %v12715_v28  ;;  %v13792_v28 = vsel %vm531_vm0, %v2133_v55, %v2134_v15  ;;  %v2139_v55 = vrot.slane %v13220_v23, 4  ;;  %v2141_v15 = vrot.slane %v13239_v24, 4 }
 0x132   : > { %10399 = vmatmul.mubr.msk.f32.gmra.mrb[40].mxu0 %vm466_vm2, %v13771_v56  ;;  %1367 = vmatprep.mubr.f32.mxu1 %v17295_v17  ;;  %17303 = vst [vmem:[#allocation102_spill] sm:$0xff] %v13792_v28  ;;  %v17312_v56 = vld [vmem:[#allocation17_spill] sm:$0xff] }
 0x133   : > { %5786 = vmatprep.mubr.f32.mxu0 %v17295_v17  ;;  %v13823_v26 = vsel %vm531_vm0, %v2139_v55, %v2141_v15  ;;  %v17310_v15 = vld [vmem:[#allocation15_spill] sm:$0xff] }
 0x134   : > { %17307 = vst [vmem:[#allocation11_spill] sm:$0xff] %v13823_v26 }
 0x135   : > { %9964 = vmatmul.mubr.msk.f32.gmra.mrb[10].mxu1 %vm466_vm2, %v12726_v32  ;;  %v2138_v32 = vrot.slane %v13217_v53, 4 }
 0x136   : > { %10400 = vmatmul.mubr.msk.f32.gmra.mrb[42].mxu0 %vm466_vm2, %v13781_v59  ;;  %1373 = vmatprep.mubr.f32.mxu1 %v17295_v17  ;;  %v3891_v59 = vrot.slane %v13434_v48, 4 }
 0x137   : > { %5792 = vmatprep.mubr.f32.mxu0 %v17295_v17  ;;  %v13813_v40 = vsel %vm531_vm0, %v2138_v32, %v2139_v55  ;;  %v2144_v32 = vrot.slane %v13259_v37, 4  ;;  %v2146_v55 = vrot.slane %v13278_v52, 4 }
 0x138   : > { %17305 = vst [vmem:[#allocation104_spill] sm:$0xff] %v13813_v40 }
 0x139   : > { %9965 = vmatmul.mubr.msk.f32.gmra.mrb[12].mxu1 %vm466_vm2, %v12745_v39 }
 0x13a   : > { %10401 = vmatmul.mubr.msk.f32.gmra.mrb[44].mxu0 %vm466_vm2, %v13792_v28  ;;  %1379 = vmatprep.mubr.f32.mxu1 %v17295_v17  ;;  %v17308_v28 = vld [vmem:[#allocation13_spill] sm:$0xff] }
 0x13b   : > { %5798 = vmatprep.mubr.f32.mxu0 %v17295_v17 }
 0x13d   : > { %9966 = vmatmul.mubr.msk.f32.gmra.mrb[14].mxu1 %vm466_vm2, %v12766_v46 }
 0x13e   : > { %10402 = vmatmul.mubr.msk.f32.gmra.mrb[46].mxu0 %vm466_vm2, %v13802_v60  ;;  %1385 = vmatprep.mubr.f32.mxu1 %v17295_v17  ;;  %v2143_v60 = vrot.slane %v13256_v14, 4 }
 0x13f   : > { %5804 = vmatprep.mubr.f32.mxu0 %v17295_v17 }
 0x141   : > { %9967 = vmatmul.mubr.msk.f32.gmra.mrb[16].mxu1 %vm466_vm2, %v17306_v35 }
 0x142   : > { %10403 = vmatmul.mubr.msk.f32.gmra.mrb[48].mxu0 %vm466_vm2, %v13813_v40  ;;  %1391 = vmatprep.mubr.f32.mxu1 %v17295_v17  ;;  %v13834_v40 = vsel %vm531_vm0, %v2143_v60, %v2144_v32  ;;  %v3892_v60 = vrot.slane %v13437_v22, 4 }
 0x143   : > { %5810 = vmatprep.mubr.f32.mxu0 %v17295_v17  ;;  %17309 = vst [vmem:[#allocation105_spill] sm:$0xff] %v13834_v40 }
 0x145   : > { %9968 = vmatmul.mubr.msk.f32.gmra.mrb[18].mxu1 %vm466_vm2, %v17308_v28 }
 0x146   : > { %10404 = vmatmul.mubr.msk.f32.gmra.mrb[50].mxu0 %vm466_vm2, %v13823_v26  ;;  %1397 = vmatprep.mubr.f32.mxu1 %v17295_v17  ;;  %v13844_v26 = vsel %vm531_vm0, %v2144_v32, %v2146_v55  ;;  %v3894_v32 = vrot.slane %v13451_v11, 4  ;;  %v17314_v55 = vld [vmem:[#allocation19_spill] sm:$0xff] }
 0x147   : > { %5816 = vmatprep.mubr.f32.mxu0 %v17295_v17  ;;  %17311 = vst [vmem:[#allocation106_spill] sm:$0xff] %v13844_v26 }
 0x149   : > { %9969 = vmatmul.mubr.msk.f32.gmra.mrb[20].mxu1 %vm466_vm2, %v17310_v15 }
 0x14a   : > { %10405 = vmatmul.mubr.msk.f32.gmra.mrb[52].mxu0 %vm466_vm2, %v13834_v40  ;;  %1403 = vmatprep.mubr.f32.mxu1 %v17295_v17  ;;  %v13855_v40 = vsel %vm531_vm0, %v3891_v59, %v3892_v60  ;;  %v5580_v59 = vrot.slane %v13467_v10, 4 }
 0x14b   : > { %5822 = vmatprep.mubr.f32.mxu0 %v17295_v17  ;;  %17313 = vst [vmem:[#allocation107_spill] sm:$0xff] %v13855_v40 }
 0x14c   : > { %v13876_v11 = vsel %vm531_vm0, %v5579_v6, %v5580_v59 }
 0x14d   : > { %9970 = vmatmul.mubr.msk.f32.gmra.mrb[22].mxu1 %vm466_vm2, %v17312_v56  ;;  %17317 = vst [vmem:[#allocation109_spill] sm:$0xff] %v13876_v11 }
 0x14e   : > { %10406 = vmatmul.mubr.msk.f32.gmra.mrb[54].mxu0 %vm466_vm2, %v13844_v26  ;;  %1409 = vmatprep.mubr.f32.mxu1 %v17295_v17  ;;  %v13865_v26 = vsel %vm531_vm0, %v3892_v60, %v3894_v32  ;;  %v5582_v60 = vrot.slane %v13481_v13, 4  ;;  %v17318_v32 = vld [vmem:[#allocation23_spill] sm:$0xff]  ;;  %v13897_v13 = vld [vmem:[%s16865_s1 + $0x88] sm:$0xff] }
 0x14f   : > { %5828 = vmatprep.mubr.f32.mxu0 %v17295_v17  ;;  %17315 = vst [vmem:[#allocation108_spill] sm:$0xff] %v13865_v26  ;;  %v6599_v6 = vcombine.high %v13897_v13, %v13897_v13 }
 0x151   : > { %9971 = vmatmul.mubr.msk.f32.gmra.mrb[24].mxu1 %vm466_vm2, %v17314_v55 }
 0x152   : > { %10407 = vmatmul.mubr.msk.f32.gmra.mrb[56].mxu0 %vm466_vm2, %v13855_v40  ;;  %1415 = vmatprep.mubr.f32.mxu1 %v17295_v17  ;;  %v17320_v40 = vld [vmem:[#allocation25_spill] sm:$0xff] }
 0x153   : > { %5834 = vmatprep.mubr.f32.mxu0 %v17295_v17 }
 0x155   : > { %9972 = vmatmul.mubr.msk.f32.gmra.mrb[26].mxu1 %vm466_vm2, %v17316_v21 }
 0x156   : > { %10408 = vmatmul.mubr.msk.f32.gmra.mrb[58].mxu0 %vm466_vm2, %v13865_v26  ;;  %1421 = vmatprep.mubr.f32.mxu1 %v17295_v17  ;;  %v13886_v26 = vsel %vm531_vm0, %v5580_v59, %v5582_v60  ;;  %v17321_v59 = vld [vmem:[#allocation27_spill] sm:$0xff]  ;;  %v13904_v60 = vld [vmem:[%s12670_s30 + $0x48] sm:$0xff] }
 0x157   : > { %5840 = vmatprep.mubr.f32.mxu0 %v17295_v17  ;;  %17319 = vst [vmem:[#allocation110_spill] sm:$0xff] %v13886_v26  ;;  %17322 = vst [vmem:[#allocation111_spill] sm:$0xff] %v13904_v60 }
 0x159   : > { %9973 = vmatmul.mubr.msk.f32.gmra.mrb[28].mxu1 %vm466_vm2, %v17318_v32 }
 0x15a   : > { %10409 = vmatmul.mubr.msk.f32.gmra.mrb[60].mxu0 %vm466_vm2, %v13876_v11  ;;  %1427 = vmatprep.mubr.f32.mxu1 %v17295_v17  ;;  %v13916_v11 = vld [vmem:[%s12670_s30 + $0x50] sm:$0xff] }
 0x15b   : > { %5846 = vmatprep.mubr.f32.mxu0 %v17295_v17  ;;  %17324 = vst [vmem:[#allocation112_spill] sm:$0xff] %v13916_v11 }
 0x15d   : > { %9974 = vmatmul.mubr.msk.f32.gmra.mrb[30].mxu1 %vm466_vm2, %v17320_v40 }
 0x15e   : > { %10410 = vmatmul.mubr.msk.f32.gmra.mrb[62].mxu0 %vm466_vm2, %v13886_v26  ;;  %1433 = vmatprep.mubr.f32.mxu1 %v17295_v17  ;;  %v17323_v26 = vld [vmem:[#allocation29_spill] sm:$0xff] }
 0x15f   : > { %5995 = vmatprep.mubr.f32.mxu0 %v17295_v17 }
 0x161   : > { %9975 = vmatmul.mubr.msk.f32.gmra.mrb[32].mxu1 %vm466_vm2, %v17321_v59  ;;  %v13936_v59 = vld [vmem:[%s12670_s30 + $0x68] sm:$0xff] }
 0x162   : > { %10414 = vmatmul.mubr.msk.f32.vlgmr.msra.gmra.mrb[0].mxu0 %vm466_vm2, %v13904_v60  ;;  %1439 = vmatprep.mubr.f32.mxu1 %v17295_v17  ;;  %v17325_v60 = vld [vmem:[#allocation31_spill] sm:$0xff]  ;;  %17328 = vst [vmem:[#allocation114_spill] sm:$0xff] %v13936_v59 }
 0x163   : > { %10448 = vmatpush1.msk.msra.mxu0 %vm531_vm0, %v13517_v12  ;;  %6001 = vmatprep.mubr.f32.mxu0 %v17295_v17  ;;  %v13925_v12 = vld [vmem:[%s12670_s30 + $0x60] sm:$0xff] }
 0x164   : > { %10482 = vmatprep.subr.msk.mxu0 %vm531_vm0, %v6599_v6  ;;  %17326 = vst [vmem:[#allocation113_spill] sm:$0xff] %v13925_v12  ;;  %v1171_v6 = vrot.slane %v13061_v16, 2  ;;  %v1174_v16 = vrot.slane %v13083_v7, 2  ;;  %v1177_v7 = vrot.slane %v13103_v50, 2  ;;  %v13976_v50 = vld [vmem:[%s12670_s30 + $0x90] sm:$0xff] }
 0x165   : > { %9976 = vmatmul.mubr.msk.f32.gmra.mrb[34].mxu1 %vm466_vm2, %v17323_v26  ;;  %v1172_v26 = vrot.slane %v13064_v34, 2  ;;  %v13949_v34 = vld [vmem:[%s12670_s30 + $0x78] sm:$0xff] }
 0x166   : > { %10415 = vmatmul.mubr.msk.f32.gmra.mrb[2].mxu0 %vm466_vm2, %v13916_v11  ;;  %1445 = vmatprep.mubr.f32.mxu1 %v17295_v17  ;;  %v17327_v11 = vld [vmem:[#allocation33_spill] sm:$0xff] }
 0x167   : > { %6007 = vmatprep.mubr.f32.mxu0 %v17295_v17 }
 0x169   : > { %9977 = vmatmul.mubr.msk.f32.gmra.mrb[36].mxu1 %vm466_vm2, %v17325_v60 }
 0x16a   : > { %10416 = vmatmul.mubr.msk.f32.gmra.mrb[4].mxu0 %vm466_vm2, %v13925_v12  ;;  %1451 = vmatprep.mubr.f32.mxu1 %v17295_v17  ;;  %v13942_v12 = vsel %vm1120_vm3, %v1171_v6, %v1172_v26  ;;  %v1176_v6 = vrot.slane %v13100_v63, 2  ;;  %v1179_v63 = vrot.slane %v13122_v57, 2  ;;  %v1182_v57 = vrot.slane %v13142_v61, 2  ;;  %v14003_v61 = vld [vmem:[%s12670_s30 + $0xa8] sm:$0xff] }
 0x16b   : > { %6013 = vmatprep.mubr.f32.mxu0 %v17295_v17  ;;  %17329 = vst [vmem:[#allocation115_spill] sm:$0xff] %v13942_v12  ;;  %17333 = vst [vmem:[#allocation119_spill] sm:$0xff] %v14003_v61 }
 0x16d   : > { %9978 = vmatmul.mubr.msk.f32.gmra.mrb[38].mxu1 %vm466_vm2, %v17327_v11 }
 0x16e   : > { %10417 = vmatmul.mubr.msk.f32.gmra.mrb[6].mxu0 %vm466_vm2, %v13936_v59  ;;  %1457 = vmatprep.mubr.f32.mxu1 %v17295_v17  ;;  %v13955_v59 = vsel %vm1120_vm3, %v1172_v26, %v1174_v16  ;;  %v13969_v26 = vsel %vm1120_vm3, %v1176_v6, %v1177_v7  ;;  %v13982_v16 = vsel %vm1120_vm3, %v1177_v7, %v1179_v63  ;;  %v1181_v6 = vrot.slane %v13139_v4, 2 }
 0x16f   : > { %6019 = vmatprep.mubr.f32.mxu0 %v17295_v17  ;;  %17330 = vst [vmem:[#allocation116_spill] sm:$0xff] %v13955_v59  ;;  %v1184_v4 = vrot.slane %v13161_v27, 2  ;;  %v1187_v27 = vrot.slane %v13181_v9, 2  ;;  %v14030_v9 = vld [vmem:[%s12670_s30 + $0xc0] sm:$0xff] }
 0x170   : > { %v13996_v7 = vsel %vm1120_vm3, %v1181_v6, %v1182_v57  ;;  %v1186_v6 = vrot.slane %v13178_v0, 2  ;;  %v1189_v0 = vrot.slane %v13200_v8, 2  ;;  %17335 = vst [vmem:[#allocation121_spill] sm:$0xff] %v14030_v9  ;;  %v1192_v8 = vrot.slane %v13220_v23, 2  ;;  %v14057_v23 = vld [vmem:[%s12670_s30 + $0xd8] sm:$0xff] }
 0x171   : > { %9979 = vmatmul.mubr.msk.f32.gmra.mrb[40].mxu1 %vm466_vm2, %v13942_v12  ;;  %v13963_v12 = vld [vmem:[%s12670_s30 + $0x80] sm:$0xff]  ;;  %v14009_v63 = vsel %vm1120_vm3, %v1182_v57, %v1184_v4  ;;  %17339 = vst [vmem:[#allocation125_spill] sm:$0xff] %v14057_v23 }
 0x172   : > { %10418 = vmatmul.mubr.msk.f32.gmra.mrb[8].mxu0 %vm466_vm2, %v13949_v34  ;;  %1463 = vmatprep.mubr.f32.mxu1 %v17295_v17  ;;  %17331 = vst [vmem:[#allocation117_spill] sm:$0xff] %v13963_v12  ;;  %v14023_v57 = vsel %vm1120_vm3, %v1186_v6, %v1187_v27  ;;  %v14036_v4 = vsel %vm1120_vm3, %v1187_v27, %v1189_v0  ;;  %v1191_v6 = vrot.slane %v13217_v53, 2  ;;  %v1194_v53 = vrot.slane %v13239_v24, 2 }
 0x173   : > { %6025 = vmatprep.mubr.f32.mxu0 %v17295_v17  ;;  %17336 = vst [vmem:[#allocation122_spill] sm:$0xff] %v14036_v4  ;;  %v1197_v24 = vrot.slane %v13259_v37, 2  ;;  %v14084_v37 = vld [vmem:[%s12670_s30 + $0xf0] sm:$0xff] }
 0x174   : > { %v14050_v27 = vsel %vm1120_vm3, %v1191_v6, %v1192_v8  ;;  %v14063_v0 = vsel %vm1120_vm3, %v1192_v8, %v1194_v53  ;;  %v1196_v6 = vrot.slane %v13256_v14, 2  ;;  %v1199_v14 = vrot.slane %v13278_v52, 2  ;;  %17343 = vst [vmem:[#allocation129_spill] sm:$0xff] %v14084_v37 }
 0x175   : > { %9980 = vmatmul.mubr.msk.f32.gmra.mrb[42].mxu1 %vm466_vm2, %v13955_v59  ;;  %17338 = vst [vmem:[#allocation124_spill] sm:$0xff] %v14050_v27  ;;  %17340 = vst [vmem:[#allocation126_spill] sm:$0xff] %v14063_v0  ;;  %v1596_v52 = vrot.slane %v13681_v44, 3 }
 0x176   : > { %10419 = vmatmul.mubr.msk.f32.gmra.mrb[10].mxu0 %vm466_vm2, %v13963_v12  ;;  %1469 = vmatprep.mubr.f32.mxu1 %v17295_v17  ;;  %v13990_v12 = vld [vmem:[%s12670_s30 + $0x98] sm:$0xff]  ;;  %v14077_v8 = vsel %vm1120_vm3, %v1196_v6, %v1197_v24  ;;  %v14090_v53 = vsel %vm1120_vm3, %v1197_v24, %v1199_v14  ;;  %v1595_v6 = vrot.slane %v13677_v38, 3  ;;  %v1598_v24 = vrot.slane %v13697_v30, 3  ;;  %v14108_v14 = vld [vmem:[%s16865_s1 + $0x28] sm:$0xff] }
 0x177   : > { %6031 = vmatprep.mubr.f32.mxu0 %v17295_v17  ;;  %17332 = vst [vmem:[#allocation118_spill] sm:$0xff] %v13990_v12  ;;  %17342 = vst [vmem:[#allocation128_spill] sm:$0xff] %v14077_v8 }
 0x178   : > { %17344 = vst [vmem:[#allocation130_spill] sm:$0xff] %v14090_v53 }
 0x179   : > { %9981 = vmatmul.mubr.msk.f32.gmra.mrb[44].mxu1 %vm466_vm2, %v13969_v26 }
 0x17a   : > { %10420 = vmatmul.mubr.msk.f32.gmra.mrb[12].mxu0 %vm466_vm2, %v13976_v50  ;;  %1475 = vmatprep.mubr.f32.mxu1 %v17295_v17 }
 0x17b   : > { %6037 = vmatprep.mubr.f32.mxu0 %v17295_v17 }
 0x17d   : > { %9982 = vmatmul.mubr.msk.f32.gmra.mrb[46].mxu1 %vm466_vm2, %v13982_v16 }
 0x17e   : > { %10421 = vmatmul.mubr.msk.f32.gmra.mrb[14].mxu0 %vm466_vm2, %v13990_v12  ;;  %1481 = vmatprep.mubr.f32.mxu1 %v17295_v17  ;;  %v14017_v12 = vld [vmem:[%s12670_s30 + $0xb0] sm:$0xff] }
 0x17f   : > { %6043 = vmatprep.mubr.f32.mxu0 %v17295_v17  ;;  %17334 = vst [vmem:[#allocation120_spill] sm:$0xff] %v14017_v12 }
 0x181   : > { %9983 = vmatmul.mubr.msk.f32.gmra.mrb[48].mxu1 %vm466_vm2, %v13996_v7 }
 0x182   : > { %10422 = vmatmul.mubr.msk.f32.gmra.mrb[16].mxu0 %vm466_vm2, %v14003_v61  ;;  %1487 = vmatprep.mubr.f32.mxu1 %v17295_v17  ;;  %v1601_v61 = vrot.slane %v13723_v43, 3 }
 0x183   : > { %6049 = vmatprep.mubr.f32.mxu0 %v17295_v17 }
 0x185   : > { %9984 = vmatmul.mubr.msk.f32.gmra.mrb[50].mxu1 %vm466_vm2, %v14009_v63 }
 0x186   : > { %10423 = vmatmul.mubr.msk.f32.gmra.mrb[18].mxu0 %vm466_vm2, %v14017_v12  ;;  %1493 = vmatprep.mubr.f32.mxu1 %v17295_v17  ;;  %v14044_v12 = vld [vmem:[%s12670_s30 + $0xc8] sm:$0xff] }
 0x187   : > { %6055 = vmatprep.mubr.f32.mxu0 %v17295_v17  ;;  %17337 = vst [vmem:[#allocation123_spill] sm:$0xff] %v14044_v12 }
 0x189   : > { %9985 = vmatmul.mubr.msk.f32.gmra.mrb[52].mxu1 %vm466_vm2, %v14023_v57 }
 0x18a   : > { %10424 = vmatmul.mubr.msk.f32.gmra.mrb[20].mxu0 %vm466_vm2, %v14030_v9  ;;  %1499 = vmatprep.mubr.f32.mxu1 %v17295_v17  ;;  %v1600_v9 = vrot.slane %v13719_v5, 3 }
 0x18b   : > { %6061 = vmatprep.mubr.f32.mxu0 %v17295_v17 }
 0x18d   : > { %9986 = vmatmul.mubr.msk.f32.gmra.mrb[54].mxu1 %vm466_vm2, %v14036_v4 }
 0x18e   : > { %10425 = vmatmul.mubr.msk.f32.gmra.mrb[22].mxu0 %vm466_vm2, %v14044_v12  ;;  %1505 = vmatprep.mubr.f32.mxu1 %v17295_v17  ;;  %v14071_v12 = vld [vmem:[%s12670_s30 + $0xe0] sm:$0xff] }
 0x18f   : > { %6067 = vmatprep.mubr.f32.mxu0 %v17295_v17  ;;  %17341 = vst [vmem:[#allocation127_spill] sm:$0xff] %v14071_v12 }
 0x191   : > { %9987 = vmatmul.mubr.msk.f32.gmra.mrb[56].mxu1 %vm466_vm2, %v14050_v27 }
 0x192   : > { %10426 = vmatmul.mubr.msk.f32.gmra.mrb[24].mxu0 %vm466_vm2, %v14057_v23  ;;  %1511 = vmatprep.mubr.f32.mxu1 %v17295_v17  ;;  %v2544_v23 = vcombine.high %v14108_v14, %v14108_v14 }
 0x193   : > { %6073 = vmatprep.mubr.f32.mxu0 %v17295_v17 }
 0x195   : > { %9988 = vmatmul.mubr.msk.f32.gmra.mrb[58].mxu1 %vm466_vm2, %v14063_v0 }
 0x196   : > { %10427 = vmatmul.mubr.msk.f32.gmra.mrb[26].mxu0 %vm466_vm2, %v14071_v12  ;;  %1517 = vmatprep.mubr.f32.mxu1 %v17295_v17  ;;  %v14098_v12 = vld [vmem:[%s12670_s30 + $0xf8] sm:$0xff] }
 0x197   : > { %6079 = vmatprep.mubr.f32.mxu0 %v17295_v17  ;;  %17345 = vst [vmem:[#allocation131_spill] sm:$0xff] %v14098_v12 }
 0x199   : > { %9989 = vmatmul.mubr.msk.f32.gmra.mrb[60].mxu1 %vm466_vm2, %v14077_v8 }
 0x19a   : > { %10428 = vmatmul.mubr.msk.f32.gmra.mrb[28].mxu0 %vm466_vm2, %v14084_v37  ;;  %1523 = vmatprep.mubr.f32.mxu1 %v17295_v17  ;;  %v1597_v37 = vsel %vm1594_vm4, %v1595_v6, %v1596_v52  ;;  %v1599_v6 = vsel %vm1594_vm4, %v1596_v52, %v1598_v24  ;;  %v1603_v52 = vrot.slane %v13742_v42, 3 }
 0x19b   : > { %6085 = vmatprep.mubr.f32.mxu0 %v17295_v17 }
 0x19c   : > { %v14148_v24 = vsel %vm1594_vm4, %v1601_v61, %v1603_v52  ;;  %v17353_v52 = vld [vmem:[#allocation37_spill] sm:$0xff] }
 0x19d   : > { %9990 = vmatmul.mubr.msk.f32.gmra.mrb[62].mxu1 %vm466_vm2, %v14090_v53  ;;  %17349 = vst [vmem:[#allocation135_spill] sm:$0xff] %v14148_v24 }
 0x19e   : > { %10429 = vmatmul.mubr.msk.f32.gmra.mrb[30].mxu0 %vm466_vm2, %v14098_v12  ;;  %1811 = vmatprep.mubr.f32.mxu1 %v17295_v17  ;;  %v14117_v12 = vld [vmem:[%s12670_s30 + $0x108] sm:$0xff] }
 0x19f   : > { %6091 = vmatprep.mubr.f32.mxu0 %v17295_v17 }
 0x1a1   : > { %9994 = vmatmul.mubr.msk.f32.vlgmr.msra.gmra.mrb[0].mxu1 %vm466_vm2, %v1597_v37  ;;  %v14135_v37 = vsel %vm1594_vm4, %v1600_v9, %v1601_v61  ;;  %v14154_v9 = vld [vmem:[%s12670_s30 + $0x128] sm:$0xff]  ;;  %v14163_v61 = vld [vmem:[%s12670_s30 + $0x138] sm:$0xff] }
 0x1a2   : > { %10028 = vmatpush1.msk.msra.mxu1 %vm531_vm0, %v13703_v2  ;;  %10430 = vmatmul.mubr.msk.f32.gmra.mrb[32].mxu0 %vm466_vm2, %v14117_v12  ;;  %v14129_v2 = vld [vmem:[%s12670_s30 + $0x110] sm:$0xff]  ;;  %17347 = vst [vmem:[#allocation133_spill] sm:$0xff] %v14135_v37  ;;  %17350 = vst [vmem:[#allocation136_spill] sm:$0xff] %v14154_v9 }
 0x1a3   : > { %1817 = vmatprep.mubr.f32.mxu1 %v17295_v17  ;;  %6097 = vmatprep.mubr.f32.mxu0 %v17295_v17  ;;  %17346 = vst [vmem:[#allocation132_spill] sm:$0xff] %v14129_v2  ;;  %17352 = vst [vmem:[#allocation137_spill] sm:$0xff] %v14163_v61 }
 0x1a4   : > { %10062 = vmatprep.subr.msk.mxu1 %vm531_vm0, %v2544_v23  ;;  %v14142_v23 = vld [vmem:[%s12670_s30 + $0x120] sm:$0xff] }
 0x1a5   : > { %9995 = vmatmul.mubr.msk.f32.gmra.mrb[2].mxu1 %vm466_vm2, %v1599_v6  ;;  %17348 = vst [vmem:[#allocation134_spill] sm:$0xff] %v14142_v23  ;;  %v17351_v6 = vld [vmem:[#allocation35_spill] sm:$0xff] }
 0x1a6   : > { %10431 = vmatmul.mubr.msk.f32.gmra.mrb[34].mxu0 %vm466_vm2, %v14129_v2  ;;  %1823 = vmatprep.mubr.f32.mxu1 %v17295_v17  ;;  %v17371_v2 = vld [vmem:[#allocation16_spill] sm:$0xff] }
 0x1a7   : > { %6103 = vmatprep.mubr.f32.mxu0 %v17295_v17 }
 0x1a9   : > { %9996 = vmatmul.mubr.msk.f32.gmra.mrb[4].mxu1 %vm466_vm2, %v14135_v37  ;;  %v14181_v37 = vld [vmem:[%s12670_s30 + $0x150] sm:$0xff] }
 0x1aa   : > { %10432 = vmatmul.mubr.msk.f32.gmra.mrb[36].mxu0 %vm466_vm2, %v14142_v23  ;;  %1829 = vmatprep.mubr.f32.mxu1 %v17295_v17  ;;  %v17363_v23 = vld [vmem:[#allocation47_spill] sm:$0xff] }
 0x1ab   : > { %6109 = vmatprep.mubr.f32.mxu0 %v17295_v17 }
 0x1ad   : > { %9997 = vmatmul.mubr.msk.f32.gmra.mrb[6].mxu1 %vm466_vm2, %v14148_v24  ;;  %v14172_v24 = vld [vmem:[%s12670_s30 + $0x140] sm:$0xff] }
 0x1ae   : > { %10433 = vmatmul.mubr.msk.f32.gmra.mrb[38].mxu0 %vm466_vm2, %v14154_v9  ;;  %1835 = vmatprep.mubr.f32.mxu1 %v17295_v17  ;;  %17354 = vst [vmem:[#allocation138_spill] sm:$0xff] %v14172_v24  ;;  %v17361_v9 = vld [vmem:[#allocation45_spill] sm:$0xff] }
 0x1af   : > { %6115 = vmatprep.mubr.f32.mxu0 %v17295_v17 }
 0x1b1   : > { %9998 = vmatmul.mubr.msk.f32.gmra.mrb[8].mxu1 %vm466_vm2, %v17351_v6  ;;  %v17355_v6 = vld [vmem:[#allocation39_spill] sm:$0xff] }
 0x1b2   : > { %10434 = vmatmul.mubr.msk.f32.gmra.mrb[40].mxu0 %vm466_vm2, %v14163_v61  ;;  %1841 = vmatprep.mubr.f32.mxu1 %v17295_v17  ;;  %17356 = vst [vmem:[#allocation39_spill] sm:$0xff] %v14181_v37  ;;  %v17359_v61 = vld [vmem:[#allocation43_spill] sm:$0xff] }
 0x1b3   : > { %6121 = vmatprep.mubr.f32.mxu0 %v17295_v17 }
 0x1b5   : > { %9999 = vmatmul.mubr.msk.f32.gmra.mrb[10].mxu1 %vm466_vm2, %v17353_v52  ;;  %v17357_v52 = vld [vmem:[#allocation41_spill] sm:$0xff] }
 0x1b6   : > { %10435 = vmatmul.mubr.msk.f32.gmra.mrb[42].mxu0 %vm466_vm2, %v14172_v24  ;;  %1847 = vmatprep.mubr.f32.mxu1 %v17295_v17  ;;  %v14190_v24 = vld [vmem:[%s12670_s30 + $0x158] sm:$0xff] }
 0x1b7   : > { %6127 = vmatprep.mubr.f32.mxu0 %v17295_v17  ;;  %17358 = vst [vmem:[#allocation41_spill] sm:$0xff] %v14190_v24 }
 0x1b9   : > { %10000 = vmatmul.mubr.msk.f32.gmra.mrb[12].mxu1 %vm466_vm2, %v17355_v6 }
 0x1ba   : > { %10436 = vmatmul.mubr.msk.f32.gmra.mrb[44].mxu0 %vm466_vm2, %v14181_v37  ;;  %1853 = vmatprep.mubr.f32.mxu1 %v17295_v17  ;;  %v14199_v37 = vld [vmem:[%s12670_s30 + $0x168] sm:$0xff] }
 0x1bb   : > { %6133 = vmatprep.mubr.f32.mxu0 %v17295_v17  ;;  %17360 = vst [vmem:[#allocation43_spill] sm:$0xff] %v14199_v37 }
 0x1bd   : > { %10001 = vmatmul.mubr.msk.f32.gmra.mrb[14].mxu1 %vm466_vm2, %v17357_v52 }
 0x1be   : > { %10437 = vmatmul.mubr.msk.f32.gmra.mrb[46].mxu0 %vm466_vm2, %v14190_v24  ;;  %1859 = vmatprep.mubr.f32.mxu1 %v17295_v17  ;;  %v14208_v24 = vld [vmem:[%s12670_s30 + $0x170] sm:$0xff] }
 0x1bf   : > { %6139 = vmatprep.mubr.f32.mxu0 %v17295_v17  ;;  %17362 = vst [vmem:[#allocation45_spill] sm:$0xff] %v14208_v24 }
 0x1c1   : > { %10002 = vmatmul.mubr.msk.f32.gmra.mrb[16].mxu1 %vm466_vm2, %v17359_v61 }
 0x1c2   : > { %10438 = vmatmul.mubr.msk.f32.gmra.mrb[48].mxu0 %vm466_vm2, %v14199_v37  ;;  %1865 = vmatprep.mubr.f32.mxu1 %v17295_v17  ;;  %v17364_v37 = vld [vmem:[#allocation49_spill] sm:$0xff] }
 0x1c3   : > { %6145 = vmatprep.mubr.f32.mxu0 %v17295_v17 }
 0x1c5   : > { %10003 = vmatmul.mubr.msk.f32.gmra.mrb[18].mxu1 %vm466_vm2, %v17361_v9 }
 0x1c6   : > { %10439 = vmatmul.mubr.msk.f32.gmra.mrb[50].mxu0 %vm466_vm2, %v14208_v24  ;;  %1871 = vmatprep.mubr.f32.mxu1 %v17295_v17  ;;  %v17365_v24 = vld [vmem:[#allocation51_spill] sm:$0xff] }
 0x1c7   : > { %6151 = vmatprep.mubr.f32.mxu0 %v17295_v17 }
 0x1c9   : > { %10004 = vmatmul.mubr.msk.f32.gmra.mrb[20].mxu1 %vm466_vm2, %v17363_v23 }
 0x1ca   : > { %10440 = vmatmul.mubr.msk.f32.gmra.mrb[52].mxu0 %vm466_vm2, %v13434_v48  ;;  %1877 = vmatprep.mubr.f32.mxu1 %v17295_v17  ;;  %v17366_v48 = vld [vmem:[#allocation53_spill] sm:$0xff] }
 0x1cb   : > { %6157 = vmatprep.mubr.f32.mxu0 %v17295_v17 }
 0x1cd   : > { %10005 = vmatmul.mubr.msk.f32.gmra.mrb[22].mxu1 %vm466_vm2, %v17364_v37  ;;  %v17369_v37 = vld [vmem:[#allocation14_spill] sm:$0xff] }
 0x1ce   : > { %10441 = vmatmul.mubr.msk.f32.gmra.mrb[54].mxu0 %vm466_vm2, %v13437_v22  ;;  %1883 = vmatprep.mubr.f32.mxu1 %v17295_v17  ;;  %v14239_v22 = vld [vmem:[%s12670_s30 + $0x1b0] sm:$0xff] }
 0x1cf   : > { %6163 = vmatprep.mubr.f32.mxu0 %v17295_v17 }
 0x1d1   : > { %10006 = vmatmul.mubr.msk.f32.gmra.mrb[24].mxu1 %vm466_vm2, %v17365_v24  ;;  %v17367_v24 = vld [vmem:[#allocation55_spill] sm:$0xff] }
 0x1d2   : > { %10442 = vmatmul.mubr.msk.f32.gmra.mrb[56].mxu0 %vm466_vm2, %v13464_v1  ;;  %1889 = vmatprep.mubr.f32.mxu1 %v17295_v17  ;;  %v14248_v1 = vld [vmem:[%s12670_s30 + $0x1b8] sm:$0xff] }
 0x1d3   : > { %6169 = vmatprep.mubr.f32.mxu0 %v17295_v17 }
 0x1d5   : > { %10007 = vmatmul.mubr.msk.f32.gmra.mrb[26].mxu1 %vm466_vm2, %v17366_v48  ;;  %v17368_v48 = vld [vmem:[#allocation57_spill] sm:$0xff] }
 0x1d6   : > { %10443 = vmatmul.mubr.msk.f32.gmra.mrb[58].mxu0 %vm466_vm2, %v13467_v10  ;;  %1895 = vmatprep.mubr.f32.mxu1 %v17295_v17  ;;  %v14259_v10 = vld [vmem:[%s16865_s1 + $0x90] sm:$0xff] }
 0x1d7   : > { %6175 = vmatprep.mubr.f32.mxu0 %v17295_v17 }
 0x1d9   : > { %10008 = vmatmul.mubr.msk.f32.gmra.mrb[28].mxu1 %vm466_vm2, %v17367_v24  ;;  %v6937_v24 = vcombine.high %v14259_v10, %v14259_v10 }
 0x1da   : > { %10444 = vmatmul.mubr.msk.f32.gmra.mrb[60].mxu0 %vm466_vm2, %v14239_v22  ;;  %1901 = vmatprep.mubr.f32.mxu1 %v17295_v17 }
 0x1db   : > { %6181 = vmatprep.mubr.f32.mxu0 %v17295_v17 }
 0x1dd   : > { %10009 = vmatmul.mubr.msk.f32.gmra.mrb[30].mxu1 %vm466_vm2, %v17368_v48  ;;  %v17370_v48 = vld [vmem:[#allocation61_spill] sm:$0xff] }
 0x1de   : > { %10445 = vmatmul.mubr.msk.f32.gmra.mrb[62].mxu0 %vm466_vm2, %v14248_v1  ;;  %1907 = vmatprep.mubr.f32.mxu1 %v17295_v17 }
 0x1df   : > { %6334 = vmatprep.mubr.f32.mxu0 %v17295_v17 }
 0x1e1   : > { %10010 = vmatmul.mubr.msk.f32.gmra.mrb[32].mxu1 %vm466_vm2, %v13252_v47 }
 0x1e2   : > { %10449 = vmatmul.mubr.msk.f32.vlgmr.msra.gmra.mrb[0].mxu0 %vm466_vm2, %v17369_v37  ;;  %1913 = vmatprep.mubr.f32.mxu1 %v17295_v17  ;;  %v17372_v37 = vld [vmem:[#allocation18_spill] sm:$0xff] }
 0x1e3   : > { %10483 = vmatpush1.msk.msra.mxu0 %vm531_vm0, %v13897_v13  ;;  %6340 = vmatprep.mubr.f32.mxu0 %v17295_v17  ;;  %v17373_v13 = vld [vmem:[#allocation20_spill] sm:$0xff] }
 0x1e4   : > { %10517 = vmatprep.subr.msk.mxu0 %vm531_vm0, %v6937_v24  ;;  %v17374_v24 = vld [vmem:[#allocation66_spill] sm:$0xff] }
 0x1e5   : > { %10011 = vmatmul.mubr.msk.f32.gmra.mrb[34].mxu1 %vm466_vm2, %v17370_v48 }
 0x1e6   : > { %10450 = vmatmul.mubr.msk.f32.gmra.mrb[2].mxu0 %vm466_vm2, %v17371_v2  ;;  %1919 = vmatprep.mubr.f32.mxu1 %v17295_v17  ;;  %v17375_v2 = vld [vmem:[#allocation22_spill] sm:$0xff] }
 0x1e7   : > { %6346 = vmatprep.mubr.f32.mxu0 %v17295_v17 }
 0x1e9   : > { %10012 = vmatmul.mubr.msk.f32.gmra.mrb[36].mxu1 %vm466_vm2, %v13291_v19  ;;  %v2069_v19 = vrot.slane %v13681_v44, 4 }
 0x1ea   : > { %10451 = vmatmul.mubr.msk.f32.gmra.mrb[4].mxu0 %vm466_vm2, %v17372_v37  ;;  %1925 = vmatprep.mubr.f32.mxu1 %v17295_v17  ;;  %v17376_v37 = vld [vmem:[#allocation67_spill] sm:$0xff] }
 0x1eb   : > { %6352 = vmatprep.mubr.f32.mxu0 %v17295_v17 }
 0x1ed   : > { %10013 = vmatmul.mubr.msk.f32.gmra.mrb[38].mxu1 %vm466_vm2, %v13304_v31  ;;  %v17377_v31 = vld [vmem:[#allocation24_spill] sm:$0xff] }
 0x1ee   : > { %10452 = vmatmul.mubr.msk.f32.gmra.mrb[6].mxu0 %vm466_vm2, %v17373_v13  ;;  %1931 = vmatprep.mubr.f32.mxu1 %v17295_v17  ;;  %v17378_v13 = vld [vmem:[#allocation68_spill] sm:$0xff] }
 0x1ef   : > { %6358 = vmatprep.mubr.f32.mxu0 %v17295_v17 }
 0x1f1   : > { %10014 = vmatmul.mubr.msk.f32.gmra.mrb[40].mxu1 %vm466_vm2, %v17374_v24  ;;  %v17379_v24 = vld [vmem:[#allocation26_spill] sm:$0xff] }
 0x1f2   : > { %10453 = vmatmul.mubr.msk.f32.gmra.mrb[8].mxu0 %vm466_vm2, %v17375_v2  ;;  %1937 = vmatprep.mubr.f32.mxu1 %v17295_v17  ;;  %v17380_v2 = vld [vmem:[#allocation69_spill] sm:$0xff] }
 0x1f3   : > { %6364 = vmatprep.mubr.f32.mxu0 %v17295_v17 }
 0x1f5   : > { %10015 = vmatmul.mubr.msk.f32.gmra.mrb[42].mxu1 %vm466_vm2, %v17376_v37  ;;  %v17381_v37 = vld [vmem:[#allocation28_spill] sm:$0xff] }
 0x1f6   : > { %10454 = vmatmul.mubr.msk.f32.gmra.mrb[10].mxu0 %vm466_vm2, %v17377_v31  ;;  %1943 = vmatprep.mubr.f32.mxu1 %v17295_v17  ;;  %v17382_v31 = vld [vmem:[#allocation70_spill] sm:$0xff] }
 0x1f7   : > { %6370 = vmatprep.mubr.f32.mxu0 %v17295_v17 }
 0x1f9   : > { %10016 = vmatmul.mubr.msk.f32.gmra.mrb[44].mxu1 %vm466_vm2, %v17378_v13  ;;  %v17383_v13 = vld [vmem:[#allocation30_spill] sm:$0xff] }
 0x1fa   : > { %10455 = vmatmul.mubr.msk.f32.gmra.mrb[12].mxu0 %vm466_vm2, %v17379_v24  ;;  %1949 = vmatprep.mubr.f32.mxu1 %v17295_v17  ;;  %v17384_v24 = vld [vmem:[#allocation71_spill] sm:$0xff] }
 0x1fb   : > { %6376 = vmatprep.mubr.f32.mxu0 %v17295_v17 }
 0x1fd   : > { %10017 = vmatmul.mubr.msk.f32.gmra.mrb[46].mxu1 %vm466_vm2, %v17380_v2  ;;  %v17385_v2 = vld [vmem:[#allocation32_spill] sm:$0xff] }
 0x1fe   : > { %10456 = vmatmul.mubr.msk.f32.gmra.mrb[14].mxu0 %vm466_vm2, %v17381_v37  ;;  %1955 = vmatprep.mubr.f32.mxu1 %v17295_v17  ;;  %v17386_v37 = vld [vmem:[#allocation72_spill] sm:$0xff] }
 0x1ff   : > { %6382 = vmatprep.mubr.f32.mxu0 %v17295_v17 }
 0x201   : > { %10018 = vmatmul.mubr.msk.f32.gmra.mrb[48].mxu1 %vm466_vm2, %v17382_v31  ;;  %v17387_v31 = vld [vmem:[#allocation34_spill] sm:$0xff] }
 0x202   : > { %10457 = vmatmul.mubr.msk.f32.gmra.mrb[16].mxu0 %vm466_vm2, %v17383_v13  ;;  %1961 = vmatprep.mubr.f32.mxu1 %v17295_v17  ;;  %v17388_v13 = vld [vmem:[#allocation73_spill] sm:$0xff] }
 0x203   : > { %6388 = vmatprep.mubr.f32.mxu0 %v17295_v17 }
 0x205   : > { %10019 = vmatmul.mubr.msk.f32.gmra.mrb[50].mxu1 %vm466_vm2, %v17384_v24  ;;  %v17389_v24 = vld [vmem:[#allocation36_spill] sm:$0xff] }
 0x206   : > { %10458 = vmatmul.mubr.msk.f32.gmra.mrb[18].mxu0 %vm466_vm2, %v17385_v2  ;;  %1967 = vmatprep.mubr.f32.mxu1 %v17295_v17  ;;  %v17390_v2 = vld [vmem:[#allocation74_spill] sm:$0xff] }
 0x207   : > { %6394 = vmatprep.mubr.f32.mxu0 %v17295_v17 }
 0x209   : > { %10020 = vmatmul.mubr.msk.f32.gmra.mrb[52].mxu1 %vm466_vm2, %v17386_v37  ;;  %v17391_v37 = vld [vmem:[#allocation38_spill] sm:$0xff] }
 0x20a   : > { %10459 = vmatmul.mubr.msk.f32.gmra.mrb[20].mxu0 %vm466_vm2, %v17387_v31  ;;  %1973 = vmatprep.mubr.f32.mxu1 %v17295_v17  ;;  %v17392_v31 = vld [vmem:[#allocation75_spill] sm:$0xff] }
 0x20b   : > { %6400 = vmatprep.mubr.f32.mxu0 %v17295_v17 }
 0x20d   : > { %10021 = vmatmul.mubr.msk.f32.gmra.mrb[54].mxu1 %vm466_vm2, %v17388_v13  ;;  %v17393_v13 = vld [vmem:[#allocation40_spill] sm:$0xff] }
 0x20e   : > { %10460 = vmatmul.mubr.msk.f32.gmra.mrb[22].mxu0 %vm466_vm2, %v17389_v24  ;;  %1979 = vmatprep.mubr.f32.mxu1 %v17295_v17  ;;  %v17394_v24 = vld [vmem:[#allocation76_spill] sm:$0xff] }
 0x20f   : > { %6406 = vmatprep.mubr.f32.mxu0 %v17295_v17 }
 0x211   : > { %10022 = vmatmul.mubr.msk.f32.gmra.mrb[56].mxu1 %vm466_vm2, %v17390_v2  ;;  %v17395_v2 = vld [vmem:[#allocation42_spill] sm:$0xff] }
 0x212   : > { %10461 = vmatmul.mubr.msk.f32.gmra.mrb[24].mxu0 %vm466_vm2, %v17391_v37  ;;  %1985 = vmatprep.mubr.f32.mxu1 %v17295_v17  ;;  %v2068_v37 = vrot.slane %v13677_v38, 4  ;;  %v14368_v38 = vld [vmem:[%s16865_s1 + $0x30] sm:$0xff] }
 0x213   : > { %6412 = vmatprep.mubr.f32.mxu0 %v17295_v17  ;;  %v2885_v44 = vcombine.high %v14368_v38, %v14368_v38 }
 0x215   : > { %10023 = vmatmul.mubr.msk.f32.gmra.mrb[58].mxu1 %vm466_vm2, %v17392_v31  ;;  %v17396_v31 = vld [vmem:[#allocation77_spill] sm:$0xff] }
 0x216   : > { %10462 = vmatmul.mubr.msk.f32.gmra.mrb[26].mxu0 %vm466_vm2, %v17393_v13  ;;  %1991 = vmatprep.mubr.f32.mxu1 %v17295_v17  ;;  %v17397_v13 = vld [vmem:[#allocation44_spill] sm:$0xff] }
 0x217   : > { %6418 = vmatprep.mubr.f32.mxu0 %v17295_v17 }
 0x219   : > { %10024 = vmatmul.mubr.msk.f32.gmra.mrb[60].mxu1 %vm466_vm2, %v17394_v24  ;;  %v2070_v24 = vsel %vm531_vm0, %v2068_v37, %v2069_v19  ;;  %v2073_v37 = vrot.slane %v13719_v5, 4  ;;  %v2076_v5 = vrot.slane %v13742_v42, 4  ;;  %v17404_v42 = vld [vmem:[#allocation54_spill] sm:$0xff] }
 0x21a   : > { %10463 = vmatmul.mubr.msk.f32.gmra.mrb[28].mxu0 %vm466_vm2, %v17395_v2  ;;  %1997 = vmatprep.mubr.f32.mxu1 %v17295_v17  ;;  %v2071_v2 = vrot.slane %v13697_v30, 4 }
 0x21b   : > { %6424 = vmatprep.mubr.f32.mxu0 %v17295_v17 }
 0x21c   : > { %v2072_v30 = vsel %vm531_vm0, %v2069_v19, %v2071_v2  ;;  %v17401_v19 = vld [vmem:[#allocation50_spill] sm:$0xff]  ;;  %v17403_v2 = vld [vmem:[#allocation52_spill] sm:$0xff] }
 0x21d   : > { %10025 = vmatmul.mubr.msk.f32.gmra.mrb[62].mxu1 %vm466_vm2, %v17396_v31  ;;  %v2074_v31 = vrot.slane %v13723_v43, 4 }
 0x21e   : > { %10464 = vmatmul.mubr.msk.f32.gmra.mrb[30].mxu0 %vm466_vm2, %v17397_v13  ;;  %2284 = vmatprep.mubr.f32.mxu1 %v17295_v17  ;;  %v17398_v13 = vld [vmem:[#allocation46_spill] sm:$0xff] }
 0x21f   : > { %6430 = vmatprep.mubr.f32.mxu0 %v17295_v17  ;;  %v14399_v43 = vsel %vm531_vm0, %v2074_v31, %v2076_v5  ;;  %v14439_v5 = vld [vmem:[%s12670_s30 + $0x180] sm:$0xff] }
 0x220   : > { %17402 = vst [vmem:[#allocation139_spill] sm:$0xff] %v14399_v43 }
 0x221   : > { %10029 = vmatmul.mubr.msk.f32.vlgmr.msra.gmra.mrb[0].mxu1 %vm466_vm2, %v2070_v24  ;;  %v17399_v24 = vld [vmem:[#allocation48_spill] sm:$0xff] }
 0x222   : > { %10063 = vmatpush1.msk.msra.mxu1 %vm531_vm0, %v14108_v14  ;;  %10465 = vmatmul.mubr.msk.f32.gmra.mrb[32].mxu0 %vm466_vm2, %v17398_v13  ;;  %v14389_v14 = vsel %vm531_vm0, %v2073_v37, %v2074_v31  ;;  %v17405_v31 = vld [vmem:[#allocation56_spill] sm:$0xff]  ;;  %v17408_v37 = vld [vmem:[#allocation62_spill] sm:$0xff] }
 0x223   : > { %2290 = vmatprep.mubr.f32.mxu1 %v17295_v17  ;;  %6436 = vmatprep.mubr.f32.mxu0 %v17295_v17  ;;  %17400 = vst [vmem:[#allocation47_spill] sm:$0xff] %v14389_v14 }
 0x224   : > { %10097 = vmatprep.subr.msk.mxu1 %vm531_vm0, %v2885_v44  ;;  %v17406_v44 = vld [vmem:[#allocation58_spill] sm:$0xff] }
 0x225   : > { %10030 = vmatmul.mubr.msk.f32.gmra.mrb[2].mxu1 %vm466_vm2, %v2072_v30  ;;  %v17407_v30 = vld [vmem:[#allocation60_spill] sm:$0xff] }
 0x226   : > { %10466 = vmatmul.mubr.msk.f32.gmra.mrb[34].mxu0 %vm466_vm2, %v17399_v24  ;;  %2296 = vmatprep.mubr.f32.mxu1 %v17295_v17 }
 0x227   : > { %6442 = vmatprep.mubr.f32.mxu0 %v17295_v17 }
 0x229   : > { %10031 = vmatmul.mubr.msk.f32.gmra.mrb[4].mxu1 %vm466_vm2, %v14389_v14  ;;  %v17409_v14 = vld [vmem:[#allocation64_spill] sm:$0xff] }
 0x22a   : > { %10467 = vmatmul.mubr.msk.f32.gmra.mrb[36].mxu0 %vm466_vm2, %v17401_v19  ;;  %2302 = vmatprep.mubr.f32.mxu1 %v17295_v17  ;;  %v6254_v19 = vrot.slane %v14248_v1, 1 }
 0x22b   : > { %6448 = vmatprep.mubr.f32.mxu0 %v17295_v17 }
 0x22d   : > { %10032 = vmatmul.mubr.msk.f32.gmra.mrb[6].mxu1 %vm466_vm2, %v14399_v43 }
 0x22e   : > { %10468 = vmatmul.mubr.msk.f32.gmra.mrb[38].mxu0 %vm466_vm2, %v17403_v2  ;;  %2308 = vmatprep.mubr.f32.mxu1 %v17295_v17 }
 0x22f   : > { %6454 = vmatprep.mubr.f32.mxu0 %v17295_v17 }
 0x231   : > { %10033 = vmatmul.mubr.msk.f32.gmra.mrb[8].mxu1 %vm466_vm2, %v13511_v33  ;;  %v14443_v33 = vld [vmem:[%s12670_s30 + $0x188] sm:$0xff] }
 0x232   : > { %10469 = vmatmul.mubr.msk.f32.gmra.mrb[40].mxu0 %vm466_vm2, %v17404_v42  ;;  %2314 = vmatprep.mubr.f32.mxu1 %v17295_v17  ;;  %v2878_v43 = vrot.slane %v14443_v33, 1  ;;  %v14473_v42 = vld [vmem:[%s12670_s30 + $0x1a0] sm:$0xff] }
 0x233   : > { %6460 = vmatprep.mubr.f32.mxu0 %v17295_v17  ;;  %v4566_v2 = vrot.slane %v14473_v42, 1 }
 0x235   : > { %10034 = vmatmul.mubr.msk.f32.gmra.mrb[10].mxu1 %vm466_vm2, %v13530_v20  ;;  %v2877_v20 = vrot.slane %v14439_v5, 1 }
 0x236   : > { %10470 = vmatmul.mubr.msk.f32.gmra.mrb[42].mxu0 %vm466_vm2, %v17405_v31  ;;  %2320 = vmatprep.mubr.f32.mxu1 %v17295_v17 }
 0x237   : > { %6466 = vmatprep.mubr.f32.mxu0 %v17295_v17 }
 0x239   : > { %10035 = vmatmul.mubr.msk.f32.gmra.mrb[12].mxu1 %vm466_vm2, %v13542_v51 }
 0x23a   : > { %10471 = vmatmul.mubr.msk.f32.gmra.mrb[44].mxu0 %vm466_vm2, %v17406_v44  ;;  %2326 = vmatprep.mubr.f32.mxu1 %v17295_v17 }
 0x23b   : > { %6472 = vmatprep.mubr.f32.mxu0 %v17295_v17 }
 0x23d   : > { %10036 = vmatmul.mubr.msk.f32.gmra.mrb[14].mxu1 %vm466_vm2, %v13552_v25 }
 0x23e   : > { %10472 = vmatmul.mubr.msk.f32.gmra.mrb[46].mxu0 %vm466_vm2, %v17407_v30  ;;  %2332 = vmatprep.mubr.f32.mxu1 %v17295_v17  ;;  %v14456_v30 = vld [vmem:[%s12670_s30 + $0x190] sm:$0xf] }
 0x23f   : > { %6478 = vmatprep.mubr.f32.mxu0 %v17295_v17  ;;  %v2880_v44 = vrot.slane %v14456_v30, 1 }
 0x241   : > { %10037 = vmatmul.mubr.msk.f32.gmra.mrb[16].mxu1 %vm466_vm2, %v13563_v36 }
 0x242   : > { %10473 = vmatmul.mubr.msk.f32.gmra.mrb[48].mxu0 %vm466_vm2, %v17408_v37  ;;  %2338 = vmatprep.mubr.f32.mxu1 %v17295_v17  ;;  %v14453_v37 = vsel %vm381_vm1, %v2877_v20, %v2878_v43  ;;  %v14469_v20 = vld [vmem:[%s12670_s30 + $0x198] sm:$0xff] }
 0x243   : > { %6484 = vmatprep.mubr.f32.mxu0 %v17295_v17  ;;  %17410 = vst [vmem:[#allocation140_spill] sm:$0xff] %v14453_v37  ;;  %v4565_v31 = vrot.slane %v14469_v20, 1 }
 0x245   : > { %10038 = vmatmul.mubr.msk.f32.gmra.mrb[18].mxu1 %vm466_vm2, %v13573_v41 }
 0x246   : > { %10474 = vmatmul.mubr.msk.f32.gmra.mrb[50].mxu0 %vm466_vm2, %v17409_v14  ;;  %2344 = vmatprep.mubr.f32.mxu1 %v17295_v17  ;;  %v14466_v14 = vsel %vm381_vm1, %v2878_v43, %v2880_v44  ;;  %v14483_v43 = vsel %vm381_vm1, %v4565_v31, %v4566_v2  ;;  %v14486_v44 = vld [vmem:[%s12670_s30 + $0x1a8] sm:$0xf]  ;;  %v6253_v31 = vrot.slane %v14239_v22, 1 }
 0x247   : > { %6490 = vmatprep.mubr.f32.mxu0 %v17295_v17  ;;  %17411 = vst [vmem:[#allocation141_spill] sm:$0xff] %v14466_v14  ;;  %17412 = vst [vmem:[#allocation142_spill] sm:$0xff] %v14483_v43 }
 0x249   : > { %10039 = vmatmul.mubr.msk.f32.gmra.mrb[20].mxu1 %vm466_vm2, %v13584_v49 }
 0x24a   : > { %10475 = vmatmul.mubr.msk.f32.gmra.mrb[52].mxu0 %vm466_vm2, %v14453_v37  ;;  %2350 = vmatprep.mubr.f32.mxu1 %v17295_v17  ;;  %v4568_v37 = vrot.slane %v14486_v44, 1 }
 0x24b   : > { %6496 = vmatprep.mubr.f32.mxu0 %v17295_v17 }
 0x24d   : > { %10040 = vmatmul.mubr.msk.f32.gmra.mrb[22].mxu1 %vm466_vm2, %v13594_v54  ;;  %v14501_v54 = vld [vmem:[%s12670_s30 + $0x1c0] sm:$0xf] }
 0x24e   : > { %10476 = vmatmul.mubr.msk.f32.gmra.mrb[54].mxu0 %vm466_vm2, %v14466_v14  ;;  %2356 = vmatprep.mubr.f32.mxu1 %v17295_v17  ;;  %v14496_v14 = vsel %vm381_vm1, %v4566_v2, %v4568_v37  ;;  %v6256_v2 = vrot.slane %v14501_v54, 1 }
 0x24f   : > { %6502 = vmatprep.mubr.f32.mxu0 %v17295_v17  ;;  %17413 = vst [vmem:[#allocation143_spill] sm:$0xff] %v14496_v14 }
 0x250   : > { %v14520_v37 = vsel %vm381_vm1, %v6254_v19, %v6256_v2  ;;  %v17419_v2 = vld [vmem:[#allocation95_spill] sm:$0xff] }
 0x251   : > { %10041 = vmatmul.mubr.msk.f32.gmra.mrb[24].mxu1 %vm466_vm2, %v13605_v62  ;;  %17415 = vst [vmem:[#allocation145_spill] sm:$0xff] %v14520_v37 }
 0x252   : > { %10477 = vmatmul.mubr.msk.f32.gmra.mrb[56].mxu0 %vm466_vm2, %v14483_v43  ;;  %2362 = vmatprep.mubr.f32.mxu1 %v17295_v17  ;;  %v14510_v43 = vsel %vm381_vm1, %v6253_v31, %v6254_v19  ;;  %v14531_v31 = vld [vmem:[%s16865_s1 + $0x98] sm:$0xff] }
 0x253   : > { %6508 = vmatprep.mubr.f32.mxu0 %v17295_v17  ;;  %17414 = vst [vmem:[#allocation144_spill] sm:$0xff] %v14510_v43  ;;  %v17416_v19 = vld [vmem:[#allocation92_spill] sm:$0xff] }
 0x255   : > { %10042 = vmatmul.mubr.msk.f32.gmra.mrb[26].mxu1 %vm466_vm2, %v13615_v3 }
 0x256   : > { %10478 = vmatmul.mubr.msk.f32.gmra.mrb[58].mxu0 %vm466_vm2, %v14496_v14  ;;  %2368 = vmatprep.mubr.f32.mxu1 %v17295_v17  ;;  %v17421_v14 = vld [vmem:[#allocation99_spill] sm:$0xff] }
 0x257   : > { %6514 = vmatprep.mubr.f32.mxu0 %v17295_v17 }
 0x259   : > { %10043 = vmatmul.mubr.msk.f32.gmra.mrb[28].mxu1 %vm466_vm2, %v13626_v18 }
 0x25a   : > { %10479 = vmatmul.mubr.msk.f32.gmra.mrb[60].mxu0 %vm466_vm2, %v14510_v43  ;;  %2374 = vmatprep.mubr.f32.mxu1 %v17295_v17  ;;  %v7275_v43 = vcombine.high %v14531_v31, %v14531_v31 }
 0x25b   : > { %6520 = vmatprep.mubr.f32.mxu0 %v17295_v17 }
 0x25d   : > { %10044 = vmatmul.mubr.msk.f32.gmra.mrb[30].mxu1 %vm466_vm2, %v13636_v29 }
 0x25e   : > { %10480 = vmatmul.mubr.msk.f32.gmra.mrb[62].mxu0 %vm466_vm2, %v14520_v37  ;;  %2380 = vmatprep.mubr.f32.mxu1 %v17295_v17  ;;  %v17420_v37 = vld [vmem:[#allocation97_spill] sm:$0xff] }
 0x25f   : > { %6672 = vmatprep.mubr.f32.mxu0 %v17295_v17 }
 0x261   : > { %10045 = vmatmul.mubr.msk.f32.gmra.mrb[32].mxu1 %vm466_vm2, %v13647_v45 }
 0x262   : > { %10484 = vmatmul.mubr.msk.f32.vlgmr.msra.gmra.mrb[0].mxu0 %vm466_vm2, %v12745_v39  ;;  %2386 = vmatprep.mubr.f32.mxu1 %v17295_v17 }
 0x263   : > { %10518 = vmatpush1.msk.msra.mxu0 %vm531_vm0, %v14259_v10  ;;  %6678 = vmatprep.mubr.f32.mxu0 %v17295_v17  ;;  %v17417_v10 = vld [vmem:[#allocation93_spill] sm:$0xff] }
 0x264   : > { %10552 = vmatprep.subr.msk.mxu0 %vm531_vm0, %v7275_v43  ;;  %v17418_v43 = vld [vmem:[#allocation94_spill] sm:$0xff] }
 0x265   : > { %10046 = vmatmul.mubr.msk.f32.gmra.mrb[34].mxu1 %vm466_vm2, %v13657_v58 }
 0x266   : > { %10485 = vmatmul.mubr.msk.f32.gmra.mrb[2].mxu0 %vm466_vm2, %v12766_v46  ;;  %2392 = vmatprep.mubr.f32.mxu1 %v17295_v17 }
 0x267   : > { %6684 = vmatprep.mubr.f32.mxu0 %v17295_v17 }
 0x269   : > { %10047 = vmatmul.mubr.msk.f32.gmra.mrb[36].mxu1 %vm466_vm2, %v17416_v19 }
 0x26a   : > { %10486 = vmatmul.mubr.msk.f32.gmra.mrb[4].mxu0 %vm466_vm2, %v17306_v35  ;;  %2398 = vmatprep.mubr.f32.mxu1 %v17295_v17 }
 0x26b   : > { %6690 = vmatprep.mubr.f32.mxu0 %v17295_v17 }
 0x26d   : > { %10048 = vmatmul.mubr.msk.f32.gmra.mrb[38].mxu1 %vm466_vm2, %v17417_v10 }
 0x26e   : > { %10487 = vmatmul.mubr.msk.f32.gmra.mrb[6].mxu0 %vm466_vm2, %v17308_v28  ;;  %2404 = vmatprep.mubr.f32.mxu1 %v17295_v17  ;;  %v17427_v28 = vld [vmem:[#allocation29_spill] sm:$0xff] }
 0x26f   : > { %6696 = vmatprep.mubr.f32.mxu0 %v17295_v17 }
 0x271   : > { %10049 = vmatmul.mubr.msk.f32.gmra.mrb[40].mxu1 %vm466_vm2, %v17418_v43 }
 0x272   : > { %10488 = vmatmul.mubr.msk.f32.gmra.mrb[8].mxu0 %vm466_vm2, %v17310_v15  ;;  %2410 = vmatprep.mubr.f32.mxu1 %v17295_v17  ;;  %v17425_v15 = vld [vmem:[#allocation27_spill] sm:$0xff] }
 0x273   : > { %6702 = vmatprep.mubr.f32.mxu0 %v17295_v17 }
 0x275   : > { %10050 = vmatmul.mubr.msk.f32.gmra.mrb[42].mxu1 %vm466_vm2, %v17419_v2 }
 0x276   : > { %10489 = vmatmul.mubr.msk.f32.gmra.mrb[10].mxu0 %vm466_vm2, %v17312_v56  ;;  %2416 = vmatprep.mubr.f32.mxu1 %v17295_v17  ;;  %v17422_v56 = vld [vmem:[#allocation100_spill] sm:$0xff] }
 0x277   : > { %6708 = vmatprep.mubr.f32.mxu0 %v17295_v17 }
 0x279   : > { %10051 = vmatmul.mubr.msk.f32.gmra.mrb[44].mxu1 %vm466_vm2, %v17420_v37 }
 0x27a   : > { %10490 = vmatmul.mubr.msk.f32.gmra.mrb[12].mxu0 %vm466_vm2, %v17314_v55  ;;  %2422 = vmatprep.mubr.f32.mxu1 %v17295_v17  ;;  %v17423_v55 = vld [vmem:[#allocation101_spill] sm:$0xff] }
 0x27b   : > { %6714 = vmatprep.mubr.f32.mxu0 %v17295_v17 }
 0x27d   : > { %10052 = vmatmul.mubr.msk.f32.gmra.mrb[46].mxu1 %vm466_vm2, %v17421_v14 }
 0x27e   : > { %10491 = vmatmul.mubr.msk.f32.gmra.mrb[14].mxu0 %vm466_vm2, %v17316_v21  ;;  %2428 = vmatprep.mubr.f32.mxu1 %v17295_v17  ;;  %v17424_v21 = vld [vmem:[#allocation102_spill] sm:$0xff] }
 0x27f   : > { %6720 = vmatprep.mubr.f32.mxu0 %v17295_v17 }
 0x281   : > { %10053 = vmatmul.mubr.msk.f32.gmra.mrb[48].mxu1 %vm466_vm2, %v17422_v56 }
 0x282   : > { %10492 = vmatmul.mubr.msk.f32.gmra.mrb[16].mxu0 %vm466_vm2, %v17318_v32  ;;  %2434 = vmatprep.mubr.f32.mxu1 %v17295_v17  ;;  %v17426_v32 = vld [vmem:[#allocation103_spill] sm:$0xff] }
 0x283   : > { %6726 = vmatprep.mubr.f32.mxu0 %v17295_v17 }
 0x285   : > { %10054 = vmatmul.mubr.msk.f32.gmra.mrb[50].mxu1 %vm466_vm2, %v17423_v55 }
 0x286   : > { %10493 = vmatmul.mubr.msk.f32.gmra.mrb[18].mxu0 %vm466_vm2, %v17320_v40  ;;  %2440 = vmatprep.mubr.f32.mxu1 %v17295_v17  ;;  %v17428_v40 = vld [vmem:[#allocation104_spill] sm:$0xff] }
 0x287   : > { %6732 = vmatprep.mubr.f32.mxu0 %v17295_v17 }
 0x289   : > { %10055 = vmatmul.mubr.msk.f32.gmra.mrb[52].mxu1 %vm466_vm2, %v17424_v21 }
 0x28a   : > { %10494 = vmatmul.mubr.msk.f32.gmra.mrb[20].mxu0 %vm466_vm2, %v17425_v15  ;;  %2446 = vmatprep.mubr.f32.mxu1 %v17295_v17  ;;  %v17429_v15 = vld [vmem:[#allocation11_spill] sm:$0xff] }
 0x28b   : > { %6738 = vmatprep.mubr.f32.mxu0 %v17295_v17 }
 0x28d   : > { %10056 = vmatmul.mubr.msk.f32.gmra.mrb[54].mxu1 %vm466_vm2, %v17426_v32 }
 0x28e   : > { %10495 = vmatmul.mubr.msk.f32.gmra.mrb[22].mxu0 %vm466_vm2, %v17427_v28  ;;  %2452 = vmatprep.mubr.f32.mxu1 %v17295_v17  ;;  %v17430_v28 = vld [vmem:[#allocation105_spill] sm:$0xff] }
 0x28f   : > { %6744 = vmatprep.mubr.f32.mxu0 %v17295_v17 }
 0x291   : > { %10057 = vmatmul.mubr.msk.f32.gmra.mrb[56].mxu1 %vm466_vm2, %v17428_v40  ;;  %v17431_v40 = vld [vmem:[#allocation115_spill] sm:$0xff] }
 0x292   : > { %10496 = vmatmul.mubr.msk.f32.gmra.mrb[24].mxu0 %vm466_vm2, %v17325_v60  ;;  %2458 = vmatprep.mubr.f32.mxu1 %v17295_v17  ;;  %v17432_v60 = vld [vmem:[#allocation106_spill] sm:$0xff] }
 0x293   : > { %6750 = vmatprep.mubr.f32.mxu0 %v17295_v17 }
 0x295   : > { %10058 = vmatmul.mubr.msk.f32.gmra.mrb[58].mxu1 %vm466_vm2, %v17429_v15 }
 0x296   : > { %10497 = vmatmul.mubr.msk.f32.gmra.mrb[26].mxu0 %vm466_vm2, %v17327_v11  ;;  %2464 = vmatprep.mubr.f32.mxu1 %v17295_v17  ;;  %v14636_v11 = vld [vmem:[%s16865_s1 + $0x38] sm:$0xff] }
 0x297   : > { %6756 = vmatprep.mubr.f32.mxu0 %v17295_v17 }
 0x299   : > { %10059 = vmatmul.mubr.msk.f32.gmra.mrb[60].mxu1 %vm466_vm2, %v17430_v28  ;;  %v12427_v28 = vld [vmem:[%s12670_s30 + $0x18] sm:$0xff] }
 0x29a   : > { %10498 = vmatmul.mubr.msk.f32.gmra.mrb[28].mxu0 %vm466_vm2, %v17431_v40  ;;  %2470 = vmatprep.mubr.f32.mxu1 %v17295_v17  ;;  %v3223_v40 = vcombine.high %v14636_v11, %v14636_v11 }
 0x29b   : > { %6762 = vmatprep.mubr.f32.mxu0 %v17295_v17 }
 0x29d   : > { %10060 = vmatmul.mubr.msk.f32.gmra.mrb[62].mxu1 %vm466_vm2, %v17432_v60 }
 0x29e   : > { %10499 = vmatmul.mubr.msk.f32.gmra.mrb[30].mxu0 %vm466_vm2, %v13955_v59  ;;  %2619 = vmatprep.mubr.f32.mxu1 %v17295_v17  ;;  %v12428_v59 = vld [vmem:[%s12670_s30 + $0x20] sm:$0xff] }
 0x29f   : > { %6768 = vmatprep.mubr.f32.mxu0 %v17295_v17 }
 0x2a1   : > { %10064 = vmatmul.mubr.msk.f32.vlgmr.msra.gmra.mrb[0].mxu1 %vm466_vm2, %v12427_v28  ;;  %v12429_v28 = vld [vmem:[%s12670_s30 + $0x30] sm:$0xff] }
 0x2a2   : > { %10098 = vmatpush1.msk.msra.mxu1 %vm531_vm0, %v14368_v38  ;;  %10500 = vmatmul.mubr.msk.f32.gmra.mrb[32].mxu0 %vm466_vm2, %v13969_v26  ;;  %v17434_v38 = vld [vmem:[#allocation112_spill] sm:$0xff] }
 0x2a3   : > { %2625 = vmatprep.mubr.f32.mxu1 %v17295_v17  ;;  %6774 = vmatprep.mubr.f32.mxu0 %v17295_v17 }
 0x2a4   : > { %10132 = vmatprep.subr.msk.mxu1 %vm531_vm0, %v3223_v40  ;;  %v12430_v40 = vld [vmem:[%s12670_s30 + $0x38] sm:$0xff] }
 0x2a5   : > { %10065 = vmatmul.mubr.msk.f32.gmra.mrb[2].mxu1 %vm466_vm2, %v12428_v59  ;;  %v17433_v59 = vld [vmem:[#allocation111_spill] sm:$0xff] }
 0x2a6   : > { %10501 = vmatmul.mubr.msk.f32.gmra.mrb[34].mxu0 %vm466_vm2, %v13982_v16  ;;  %2631 = vmatprep.mubr.f32.mxu1 %v17295_v17 }
 0x2a7   : > { %6780 = vmatprep.mubr.f32.mxu0 %v17295_v17 }
 0x2a9   : > { %10066 = vmatmul.mubr.msk.f32.gmra.mrb[4].mxu1 %vm466_vm2, %v12429_v28  ;;  %v17435_v28 = vld [vmem:[#allocation113_spill] sm:$0xff] }
 0x2aa   : > { %10502 = vmatmul.mubr.msk.f32.gmra.mrb[36].mxu0 %vm466_vm2, %v13996_v7  ;;  %2637 = vmatprep.mubr.f32.mxu1 %v17295_v17 }
 0x2ab   : > { %6786 = vmatprep.mubr.f32.mxu0 %v17295_v17 }
 0x2ad   : > { %10067 = vmatmul.mubr.msk.f32.gmra.mrb[6].mxu1 %vm466_vm2, %v12430_v40  ;;  %v17436_v40 = vld [vmem:[#allocation114_spill] sm:$0xff] }
 0x2ae   : > { %10503 = vmatmul.mubr.msk.f32.gmra.mrb[38].mxu0 %vm466_vm2, %v14009_v63  ;;  %2643 = vmatprep.mubr.f32.mxu1 %v17295_v17 }
 0x2af   : > { %6792 = vmatprep.mubr.f32.mxu0 %v17295_v17 }
 0x2b1   : > { %10068 = vmatmul.mubr.msk.f32.gmra.mrb[8].mxu1 %vm466_vm2, %v17433_v59  ;;  %v3215_v59 = vrot.slane %v14439_v5, 2 }
 0x2b2   : > { %10504 = vmatmul.mubr.msk.f32.gmra.mrb[40].mxu0 %vm466_vm2, %v14023_v57  ;;  %2649 = vmatprep.mubr.f32.mxu1 %v17295_v17 }
 0x2b3   : > { %6798 = vmatprep.mubr.f32.mxu0 %v17295_v17 }
 0x2b5   : > { %10069 = vmatmul.mubr.msk.f32.gmra.mrb[10].mxu1 %vm466_vm2, %v17434_v38  ;;  %v3216_v38 = vrot.slane %v14443_v33, 2 }
 0x2b6   : > { %10505 = vmatmul.mubr.msk.f32.gmra.mrb[42].mxu0 %vm466_vm2, %v14036_v4  ;;  %2655 = vmatprep.mubr.f32.mxu1 %v17295_v17 }
 0x2b7   : > { %6804 = vmatprep.mubr.f32.mxu0 %v17295_v17 }
 0x2b9   : > { %10070 = vmatmul.mubr.msk.f32.gmra.mrb[12].mxu1 %vm466_vm2, %v17435_v28  ;;  %v17437_v28 = vld [vmem:[#allocation117_spill] sm:$0xff] }
 0x2ba   : > { %10506 = vmatmul.mubr.msk.f32.gmra.mrb[44].mxu0 %vm466_vm2, %v14050_v27  ;;  %2661 = vmatprep.mubr.f32.mxu1 %v17295_v17 }
 0x2bb   : > { %6810 = vmatprep.mubr.f32.mxu0 %v17295_v17 }
 0x2bd   : > { %10071 = vmatmul.mubr.msk.f32.gmra.mrb[14].mxu1 %vm466_vm2, %v17436_v40  ;;  %v3218_v40 = vrot.slane %v14456_v30, 2  ;;  %v4906_v30 = vrot.slane %v14486_v44, 2 }
 0x2be   : > { %10507 = vmatmul.mubr.msk.f32.gmra.mrb[46].mxu0 %vm466_vm2, %v14063_v0  ;;  %2667 = vmatprep.mubr.f32.mxu1 %v17295_v17 }
 0x2bf   : > { %6816 = vmatprep.mubr.f32.mxu0 %v17295_v17 }
 0x2c1   : > { %10072 = vmatmul.mubr.msk.f32.gmra.mrb[16].mxu1 %vm466_vm2, %v13949_v34  ;;  %v14707_v34 = vsel %vm1120_vm3, %v3215_v59, %v3216_v38  ;;  %v4904_v59 = vrot.slane %v14473_v42, 2  ;;  %v6591_v42 = vrot.slane %v14239_v22, 2 }
 0x2c2   : > { %10508 = vmatmul.mubr.msk.f32.gmra.mrb[48].mxu0 %vm466_vm2, %v14077_v8  ;;  %2673 = vmatprep.mubr.f32.mxu1 %v17295_v17  ;;  %17438 = vst [vmem:[#allocation97_spill] sm:$0xff] %v14707_v34  ;;  %v17440_v8 = vld [vmem:[#allocation118_spill] sm:$0xff] }
 0x2c3   : > { %6822 = vmatprep.mubr.f32.mxu0 %v17295_v17 }
 0x2c5   : > { %10073 = vmatmul.mubr.msk.f32.gmra.mrb[18].mxu1 %vm466_vm2, %v17437_v28  ;;  %v14717_v28 = vsel %vm1120_vm3, %v3216_v38, %v3218_v40  ;;  %v17442_v38 = vld [vmem:[#allocation119_spill] sm:$0xff]  ;;  %v6594_v40 = vrot.slane %v14501_v54, 2 }
 0x2c6   : > { %10509 = vmatmul.mubr.msk.f32.gmra.mrb[50].mxu0 %vm466_vm2, %v14090_v53  ;;  %2679 = vmatprep.mubr.f32.mxu1 %v17295_v17  ;;  %17439 = vst [vmem:[#allocation111_spill] sm:$0xff] %v14717_v28  ;;  %v4903_v53 = vrot.slane %v14469_v20, 2  ;;  %v17444_v20 = vld [vmem:[#allocation120_spill] sm:$0xff] }
 0x2c7   : > { %6828 = vmatprep.mubr.f32.mxu0 %v17295_v17 }
 0x2c9   : > { %10074 = vmatmul.mubr.msk.f32.gmra.mrb[20].mxu1 %vm466_vm2, %v13976_v50  ;;  %v14728_v50 = vsel %vm1120_vm3, %v4903_v53, %v4904_v59  ;;  %v6592_v53 = vrot.slane %v14248_v1, 2 }
 0x2ca   : > { %10510 = vmatmul.mubr.msk.f32.gmra.mrb[52].mxu0 %vm466_vm2, %v14707_v34  ;;  %2685 = vmatprep.mubr.f32.mxu1 %v17295_v17  ;;  %17441 = vst [vmem:[#allocation112_spill] sm:$0xff] %v14728_v50 }
 0x2cb   : > { %6834 = vmatprep.mubr.f32.mxu0 %v17295_v17  ;;  %v14749_v44 = vsel %vm1120_vm3, %v6591_v42, %v6592_v53  ;;  %v14770_v42 = vld [vmem:[%s16865_s1 + $0xa0] sm:$0xff] }
 0x2cc   : > { %17445 = vst [vmem:[#allocation114_spill] sm:$0xff] %v14749_v44 }
 0x2cd   : > { %10075 = vmatmul.mubr.msk.f32.gmra.mrb[22].mxu1 %vm466_vm2, %v17440_v8  ;;  %v14738_v8 = vsel %vm1120_vm3, %v4904_v59, %v4906_v30  ;;  %v17446_v59 = vld [vmem:[#allocation121_spill] sm:$0xff]  ;;  %v14759_v30 = vsel %vm1120_vm3, %v6592_v53, %v6594_v40  ;;  %v17450_v40 = vld [vmem:[#allocation127_spill] sm:$0xff] }
 0x2ce   : > { %10511 = vmatmul.mubr.msk.f32.gmra.mrb[54].mxu0 %vm466_vm2, %v14717_v28  ;;  %2691 = vmatprep.mubr.f32.mxu1 %v17295_v17  ;;  %17443 = vst [vmem:[#allocation113_spill] sm:$0xff] %v14738_v8  ;;  %17447 = vst [vmem:[#allocation117_spill] sm:$0xff] %v14759_v30  ;;  %v17449_v53 = vld [vmem:[#allocation125_spill] sm:$0xff] }
 0x2cf   : > { %6840 = vmatprep.mubr.f32.mxu0 %v17295_v17 }
 0x2d1   : > { %10076 = vmatmul.mubr.msk.f32.gmra.mrb[24].mxu1 %vm466_vm2, %v17442_v38  ;;  %v17448_v38 = vld [vmem:[#allocation123_spill] sm:$0xff] }
 0x2d2   : > { %10512 = vmatmul.mubr.msk.f32.gmra.mrb[56].mxu0 %vm466_vm2, %v14728_v50  ;;  %2697 = vmatprep.mubr.f32.mxu1 %v17295_v17  ;;  %v17471_v50 = vld [vmem:[#allocation8_spill] sm:$0xff] }
 0x2d3   : > { %6846 = vmatprep.mubr.f32.mxu0 %v17295_v17 }
 0x2d5   : > { %10077 = vmatmul.mubr.msk.f32.gmra.mrb[26].mxu1 %vm466_vm2, %v17444_v20  ;;  %v7608_v20 = vcombine.high %v14770_v42, %v14770_v42 }
 0x2d6   : > { %10513 = vmatmul.mubr.msk.f32.gmra.mrb[58].mxu0 %vm466_vm2, %v14738_v8  ;;  %2703 = vmatprep.mubr.f32.mxu1 %v17295_v17  ;;  %v14875_v8 = vld [vmem:[%s16865_s1 + $0x40] sm:$0xff] }
 0x2d7   : > { %6852 = vmatprep.mubr.f32.mxu0 %v17295_v17 }
 0x2d9   : > { %10078 = vmatmul.mubr.msk.f32.gmra.mrb[28].mxu1 %vm466_vm2, %v17446_v59  ;;  %v17451_v59 = vld [vmem:[#allocation129_spill] sm:$0xff] }
 0x2da   : > { %10514 = vmatmul.mubr.msk.f32.gmra.mrb[60].mxu0 %vm466_vm2, %v14749_v44  ;;  %2709 = vmatprep.mubr.f32.mxu1 %v17295_v17  ;;  %v17467_v44 = vld [vmem:[#allocation45_spill] sm:$0xff] }
 0x2db   : > { %6858 = vmatprep.mubr.f32.mxu0 %v17295_v17 }
 0x2dd   : > { %10079 = vmatmul.mubr.msk.f32.gmra.mrb[30].mxu1 %vm466_vm2, %v17448_v38  ;;  %v17453_v38 = vld [vmem:[#allocation132_spill] sm:$0xff] }
 0x2de   : > { %10515 = vmatmul.mubr.msk.f32.gmra.mrb[62].mxu0 %vm466_vm2, %v14759_v30  ;;  %2715 = vmatprep.mubr.f32.mxu1 %v17295_v17  ;;  %v17463_v30 = vld [vmem:[#allocation39_spill] sm:$0xff] }
 0x2df   : > { %7010 = vmatprep.mubr.f32.mxu0 %v17295_v17 }
 0x2e1   : > { %10080 = vmatmul.mubr.msk.f32.gmra.mrb[32].mxu1 %vm466_vm2, %v17449_v53  ;;  %v17455_v53 = vld [vmem:[#allocation134_spill] sm:$0xff] }
 0x2e2   : > { %10519 = vmatmul.mubr.msk.f32.vlgmr.msra.gmra.mrb[0].mxu0 %vm466_vm2, %v17355_v6  ;;  %2721 = vmatprep.mubr.f32.mxu1 %v17295_v17 }
 0x2e3   : > { %10553 = vmatpush1.msk.msra.mxu0 %vm531_vm0, %v14531_v31  ;;  %7016 = vmatprep.mubr.f32.mxu0 %v17295_v17  ;;  %v17452_v31 = vld [vmem:[#allocation131_spill] sm:$0xff] }
 0x2e4   : > { %10587 = vmatprep.subr.msk.mxu0 %vm531_vm0, %v7608_v20  ;;  %v17454_v20 = vld [vmem:[#allocation49_spill] sm:$0xff] }
 0x2e5   : > { %10081 = vmatmul.mubr.msk.f32.gmra.mrb[34].mxu1 %vm466_vm2, %v17450_v40  ;;  %v17457_v40 = vld [vmem:[#allocation136_spill] sm:$0xff] }
 0x2e6   : > { %10520 = vmatmul.mubr.msk.f32.gmra.mrb[2].mxu0 %vm466_vm2, %v17357_v52  ;;  %2727 = vmatprep.mubr.f32.mxu1 %v17295_v17 }
 0x2e7   : > { %7022 = vmatprep.mubr.f32.mxu0 %v17295_v17 }
 0x2e9   : > { %10082 = vmatmul.mubr.msk.f32.gmra.mrb[36].mxu1 %vm466_vm2, %v17451_v59  ;;  %v17458_v59 = vld [vmem:[#allocation53_spill] sm:$0xff] }
 0x2ea   : > { %10521 = vmatmul.mubr.msk.f32.gmra.mrb[4].mxu0 %vm466_vm2, %v17359_v61  ;;  %2733 = vmatprep.mubr.f32.mxu1 %v17295_v17 }
 0x2eb   : > { %7028 = vmatprep.mubr.f32.mxu0 %v17295_v17 }
 0x2ed   : > { %10083 = vmatmul.mubr.msk.f32.gmra.mrb[38].mxu1 %vm466_vm2, %v17452_v31  ;;  %v17459_v31 = vld [vmem:[#allocation137_spill] sm:$0xff] }
 0x2ee   : > { %10522 = vmatmul.mubr.msk.f32.gmra.mrb[6].mxu0 %vm466_vm2, %v17361_v9  ;;  %2739 = vmatprep.mubr.f32.mxu1 %v17295_v17 }
 0x2ef   : > { %7034 = vmatprep.mubr.f32.mxu0 %v17295_v17 }
 0x2f1   : > { %10084 = vmatmul.mubr.msk.f32.gmra.mrb[40].mxu1 %vm466_vm2, %v14117_v12  ;;  %v17456_v12 = vld [vmem:[#allocation51_spill] sm:$0xff] }
 0x2f2   : > { %10523 = vmatmul.mubr.msk.f32.gmra.mrb[8].mxu0 %vm466_vm2, %v17363_v23  ;;  %2745 = vmatprep.mubr.f32.mxu1 %v17295_v17 }
 0x2f3   : > { %7040 = vmatprep.mubr.f32.mxu0 %v17295_v17 }
 0x2f5   : > { %10085 = vmatmul.mubr.msk.f32.gmra.mrb[42].mxu1 %vm466_vm2, %v17453_v38  ;;  %v17460_v38 = vld [vmem:[#allocation55_spill] sm:$0xff] }
 0x2f6   : > { %10524 = vmatmul.mubr.msk.f32.gmra.mrb[10].mxu0 %vm466_vm2, %v17454_v20  ;;  %2751 = vmatprep.mubr.f32.mxu1 %v17295_v17 }
 0x2f7   : > { %7046 = vmatprep.mubr.f32.mxu0 %v17295_v17 }
 0x2f9   : > { %10086 = vmatmul.mubr.msk.f32.gmra.mrb[44].mxu1 %vm466_vm2, %v17455_v53  ;;  %v17461_v53 = vld [vmem:[#allocation138_spill] sm:$0xff] }
 0x2fa   : > { %10525 = vmatmul.mubr.msk.f32.gmra.mrb[12].mxu0 %vm466_vm2, %v17456_v12  ;;  %2757 = vmatprep.mubr.f32.mxu1 %v17295_v17 }
 0x2fb   : > { %7052 = vmatprep.mubr.f32.mxu0 %v17295_v17 }
 0x2fd   : > { %10087 = vmatmul.mubr.msk.f32.gmra.mrb[46].mxu1 %vm466_vm2, %v17457_v40  ;;  %v17462_v40 = vld [vmem:[#allocation57_spill] sm:$0xff] }
 0x2fe   : > { %10526 = vmatmul.mubr.msk.f32.gmra.mrb[14].mxu0 %vm466_vm2, %v17458_v59  ;;  %2763 = vmatprep.mubr.f32.mxu1 %v17295_v17 }
 0x2ff   : > { %7058 = vmatprep.mubr.f32.mxu0 %v17295_v17 }
 0x301   : > { %10088 = vmatmul.mubr.msk.f32.gmra.mrb[48].mxu1 %vm466_vm2, %v17459_v31  ;;  %v17464_v31 = vld [vmem:[#allocation41_spill] sm:$0xff] }
 0x302   : > { %10527 = vmatmul.mubr.msk.f32.gmra.mrb[16].mxu0 %vm466_vm2, %v17460_v38  ;;  %2769 = vmatprep.mubr.f32.mxu1 %v17295_v17 }
 0x303   : > { %7064 = vmatprep.mubr.f32.mxu0 %v17295_v17 }
 0x305   : > { %10089 = vmatmul.mubr.msk.f32.gmra.mrb[50].mxu1 %vm466_vm2, %v17461_v53  ;;  %v17465_v53 = vld [vmem:[#allocation43_spill] sm:$0xff] }
 0x306   : > { %10528 = vmatmul.mubr.msk.f32.gmra.mrb[18].mxu0 %vm466_vm2, %v17462_v40  ;;  %2775 = vmatprep.mubr.f32.mxu1 %v17295_v17 }
 0x307   : > { %7070 = vmatprep.mubr.f32.mxu0 %v17295_v17 }
 0x309   : > { %10090 = vmatmul.mubr.msk.f32.gmra.mrb[52].mxu1 %vm466_vm2, %v17463_v30  ;;  %v17466_v30 = vld [vmem:[#allocation63_spill] sm:$0xff] }
 0x30a   : > { %10529 = vmatmul.mubr.msk.f32.gmra.mrb[20].mxu0 %vm466_vm2, %v13252_v47  ;;  %2781 = vmatprep.mubr.f32.mxu1 %v17295_v17 }
 0x30b   : > { %7076 = vmatprep.mubr.f32.mxu0 %v17295_v17 }
 0x30d   : > { %10091 = vmatmul.mubr.msk.f32.gmra.mrb[54].mxu1 %vm466_vm2, %v17464_v31  ;;  %v17468_v31 = vld [vmem:[#allocation65_spill] sm:$0xff] }
 0x30e   : > { %10530 = vmatmul.mubr.msk.f32.gmra.mrb[22].mxu0 %vm466_vm2, %v17370_v48  ;;  %2787 = vmatprep.mubr.f32.mxu1 %v17295_v17 }
 0x30f   : > { %7082 = vmatprep.mubr.f32.mxu0 %v17295_v17 }
 0x311   : > { %10092 = vmatmul.mubr.msk.f32.gmra.mrb[56].mxu1 %vm466_vm2, %v17465_v53  ;;  %v17469_v53 = vld [vmem:[#allocation66_spill] sm:$0xff] }
 0x312   : > { %10531 = vmatmul.mubr.msk.f32.gmra.mrb[24].mxu0 %vm466_vm2, %v17466_v30  ;;  %2793 = vmatprep.mubr.f32.mxu1 %v17295_v17 }
 0x313   : > { %7088 = vmatprep.mubr.f32.mxu0 %v17295_v17 }
 0x315   : > { %10093 = vmatmul.mubr.msk.f32.gmra.mrb[58].mxu1 %vm466_vm2, %v17467_v44  ;;  %v17470_v44 = vld [vmem:[#allocation67_spill] sm:$0xff] }
 0x316   : > { %10532 = vmatmul.mubr.msk.f32.gmra.mrb[26].mxu0 %vm466_vm2, %v17468_v31  ;;  %2799 = vmatprep.mubr.f32.mxu1 %v17295_v17  ;;  %v17497_v31 = vld [vmem:[#allocation32_spill] sm:$0xff] }
 0x317   : > { %7094 = vmatprep.mubr.f32.mxu0 %v17295_v17 }
 0x319   : > { %10094 = vmatmul.mubr.msk.f32.gmra.mrb[60].mxu1 %vm466_vm2, %v14439_v5  ;;  %v3561_v5 = vcombine.high %v14875_v8, %v14875_v8 }
 0x31a   : > { %10533 = vmatmul.mubr.msk.f32.gmra.mrb[28].mxu0 %vm466_vm2, %v17469_v53  ;;  %2805 = vmatprep.mubr.f32.mxu1 %v17295_v17  ;;  %v17474_v53 = vld [vmem:[#allocation69_spill] sm:$0xff] }
 0x31b   : > { %7100 = vmatprep.mubr.f32.mxu0 %v17295_v17 }
 0x31d   : > { %10095 = vmatmul.mubr.msk.f32.gmra.mrb[62].mxu1 %vm466_vm2, %v14443_v33  ;;  %v17472_v33 = vld [vmem:[#allocation68_spill] sm:$0xff] }
 0x31e   : > { %10534 = vmatmul.mubr.msk.f32.gmra.mrb[30].mxu0 %vm466_vm2, %v17470_v44  ;;  %2958 = vmatprep.mubr.f32.mxu1 %v17295_v17  ;;  %v17473_v44 = vld [vmem:[#allocation9_spill] sm:$0xff] }
 0x31f   : > { %7106 = vmatprep.mubr.f32.mxu0 %v17295_v17 }
 0x321   : > { %10099 = vmatmul.mubr.msk.f32.vlgmr.msra.gmra.mrb[0].mxu1 %vm466_vm2, %v17471_v50  ;;  %v17476_v50 = vld [vmem:[#allocation70_spill] sm:$0xff] }
 0x322   : > { %10133 = vmatpush1.msk.msra.mxu1 %vm531_vm0, %v14636_v11  ;;  %10535 = vmatmul.mubr.msk.f32.gmra.mrb[32].mxu0 %vm466_vm2, %v17472_v33  ;;  %v17475_v11 = vld [vmem:[#allocation10_spill] sm:$0xff]  ;;  %v17488_v33 = vld [vmem:[#allocation76_spill] sm:$0xff] }
 0x323   : > { %2964 = vmatprep.mubr.f32.mxu1 %v17295_v17  ;;  %7112 = vmatprep.mubr.f32.mxu0 %v17295_v17 }
 0x324   : > { %10167 = vmatprep.subr.msk.mxu1 %vm531_vm0, %v3561_v5  ;;  %v17477_v5 = vld [vmem:[#allocation12_spill] sm:$0xff] }
 0x325   : > { %10100 = vmatmul.mubr.msk.f32.gmra.mrb[2].mxu1 %vm466_vm2, %v17473_v44  ;;  %v17478_v44 = vld [vmem:[#allocation71_spill] sm:$0xff] }
 0x326   : > { %10536 = vmatmul.mubr.msk.f32.gmra.mrb[34].mxu0 %vm466_vm2, %v17474_v53  ;;  %2970 = vmatprep.mubr.f32.mxu1 %v17295_v17  ;;  %v17479_v53 = vld [vmem:[#allocation14_spill] sm:$0xff] }
 0x327   : > { %7118 = vmatprep.mubr.f32.mxu0 %v17295_v17 }
 0x329   : > { %10101 = vmatmul.mubr.msk.f32.gmra.mrb[4].mxu1 %vm466_vm2, %v17475_v11  ;;  %v17480_v11 = vld [vmem:[#allocation72_spill] sm:$0xff] }
 0x32a   : > { %10537 = vmatmul.mubr.msk.f32.gmra.mrb[36].mxu0 %vm466_vm2, %v17476_v50  ;;  %2976 = vmatprep.mubr.f32.mxu1 %v17295_v17  ;;  %v17481_v50 = vld [vmem:[#allocation16_spill] sm:$0xff] }
 0x32b   : > { %7124 = vmatprep.mubr.f32.mxu0 %v17295_v17 }
 0x32d   : > { %10102 = vmatmul.mubr.msk.f32.gmra.mrb[6].mxu1 %vm466_vm2, %v17477_v5  ;;  %v17482_v5 = vld [vmem:[#allocation73_spill] sm:$0xff] }
 0x32e   : > { %10538 = vmatmul.mubr.msk.f32.gmra.mrb[38].mxu0 %vm466_vm2, %v17478_v44  ;;  %2982 = vmatprep.mubr.f32.mxu1 %v17295_v17  ;;  %v17483_v44 = vld [vmem:[#allocation18_spill] sm:$0xff] }
 0x32f   : > { %7130 = vmatprep.mubr.f32.mxu0 %v17295_v17 }
 0x331   : > { %10103 = vmatmul.mubr.msk.f32.gmra.mrb[8].mxu1 %vm466_vm2, %v17479_v53  ;;  %v17484_v53 = vld [vmem:[#allocation74_spill] sm:$0xff] }
 0x332   : > { %10539 = vmatmul.mubr.msk.f32.gmra.mrb[40].mxu0 %vm466_vm2, %v17480_v11  ;;  %2988 = vmatprep.mubr.f32.mxu1 %v17295_v17  ;;  %v17485_v11 = vld [vmem:[#allocation20_spill] sm:$0xff] }
 0x333   : > { %7136 = vmatprep.mubr.f32.mxu0 %v17295_v17 }
 0x335   : > { %10104 = vmatmul.mubr.msk.f32.gmra.mrb[10].mxu1 %vm466_vm2, %v17481_v50  ;;  %v17486_v50 = vld [vmem:[#allocation75_spill] sm:$0xff] }
 0x336   : > { %10540 = vmatmul.mubr.msk.f32.gmra.mrb[42].mxu0 %vm466_vm2, %v17482_v5  ;;  %2994 = vmatprep.mubr.f32.mxu1 %v17295_v17  ;;  %v17487_v5 = vld [vmem:[#allocation22_spill] sm:$0xff] }
 0x337   : > { %7142 = vmatprep.mubr.f32.mxu0 %v17295_v17 }
 0x339   : > { %10105 = vmatmul.mubr.msk.f32.gmra.mrb[12].mxu1 %vm466_vm2, %v17483_v44  ;;  %v17500_v44 = vld [vmem:[#allocation34_spill] sm:$0xff] }
 0x33a   : > { %10541 = vmatmul.mubr.msk.f32.gmra.mrb[44].mxu0 %vm466_vm2, %v17484_v53  ;;  %3000 = vmatprep.mubr.f32.mxu1 %v17295_v17  ;;  %v17489_v53 = vld [vmem:[#allocation24_spill] sm:$0xff] }
 0x33b   : > { %7148 = vmatprep.mubr.f32.mxu0 %v17295_v17 }
 0x33d   : > { %10106 = vmatmul.mubr.msk.f32.gmra.mrb[14].mxu1 %vm466_vm2, %v17485_v11  ;;  %v17490_v11 = vld [vmem:[#allocation77_spill] sm:$0xff] }
 0x33e   : > { %10542 = vmatmul.mubr.msk.f32.gmra.mrb[46].mxu0 %vm466_vm2, %v17486_v50  ;;  %3006 = vmatprep.mubr.f32.mxu1 %v17295_v17  ;;  %v17491_v50 = vld [vmem:[#allocation26_spill] sm:$0xff] }
 0x33f   : > { %7154 = vmatprep.mubr.f32.mxu0 %v17295_v17 }
 0x341   : > { %10107 = vmatmul.mubr.msk.f32.gmra.mrb[16].mxu1 %vm466_vm2, %v17487_v5  ;;  %v17492_v5 = vld [vmem:[#allocation78_spill] sm:$0xff] }
 0x342   : > { %10543 = vmatmul.mubr.msk.f32.gmra.mrb[48].mxu0 %vm466_vm2, %v17488_v33  ;;  %3012 = vmatprep.mubr.f32.mxu1 %v17295_v17  ;;  %v17493_v33 = vld [vmem:[#allocation28_spill] sm:$0xff] }
 0x343   : > { %7160 = vmatprep.mubr.f32.mxu0 %v17295_v17 }
 0x345   : > { %10108 = vmatmul.mubr.msk.f32.gmra.mrb[18].mxu1 %vm466_vm2, %v17489_v53  ;;  %v17494_v53 = vld [vmem:[#allocation79_spill] sm:$0xff] }
 0x346   : > { %10544 = vmatmul.mubr.msk.f32.gmra.mrb[50].mxu0 %vm466_vm2, %v17490_v11  ;;  %3018 = vmatprep.mubr.f32.mxu1 %v17295_v17  ;;  %v17495_v11 = vld [vmem:[#allocation30_spill] sm:$0xff] }
 0x347   : > { %7166 = vmatprep.mubr.f32.mxu0 %v17295_v17 }
 0x349   : > { %10109 = vmatmul.mubr.msk.f32.gmra.mrb[20].mxu1 %vm466_vm2, %v17491_v50  ;;  %v17496_v50 = vld [vmem:[#allocation80_spill] sm:$0xff] }
 0x34a   : > { %10545 = vmatmul.mubr.msk.f32.gmra.mrb[52].mxu0 %vm466_vm2, %v17492_v5  ;;  %3024 = vmatprep.mubr.f32.mxu1 %v17295_v17  ;;  %v6929_v5 = vrot.slane %v14239_v22, 3 }
 0x34b   : > { %7172 = vmatprep.mubr.f32.mxu0 %v17295_v17 }
 0x34d   : > { %10110 = vmatmul.mubr.msk.f32.gmra.mrb[22].mxu1 %vm466_vm2, %v17493_v33  ;;  %v6930_v33 = vrot.slane %v14248_v1, 3  ;;  %v17502_v1 = vld [vmem:[#allocation36_spill] sm:$0xff] }
 0x34e   : > { %10546 = vmatmul.mubr.msk.f32.gmra.mrb[54].mxu0 %vm466_vm2, %v17494_v53  ;;  %3030 = vmatprep.mubr.f32.mxu1 %v17295_v17  ;;  %v17498_v53 = vld [vmem:[#allocation81_spill] sm:$0xff] }
 0x34f   : > { %7178 = vmatprep.mubr.f32.mxu0 %v17295_v17 }
 0x351   : > { %10111 = vmatmul.mubr.msk.f32.gmra.mrb[24].mxu1 %vm466_vm2, %v17495_v11  ;;  %v6932_v11 = vrot.slane %v14501_v54, 3 }
 0x352   : > { %10547 = vmatmul.mubr.msk.f32.gmra.mrb[56].mxu0 %vm466_vm2, %v17496_v50  ;;  %3036 = vmatprep.mubr.f32.mxu1 %v17295_v17  ;;  %v14970_v50 = vsel %vm1594_vm4, %v6929_v5, %v6930_v33  ;;  %v14991_v5 = vld [vmem:[%s16865_s1 + $0xa8] sm:$0xff] }
 0x353   : > { %7184 = vmatprep.mubr.f32.mxu0 %v17295_v17  ;;  %17499 = vst [vmem:[#allocation118_spill] sm:$0xff] %v14970_v50  ;;  %v14980_v22 = vsel %vm1594_vm4, %v6930_v33, %v6932_v11  ;;  %v17503_v33 = vld [vmem:[#allocation38_spill] sm:$0xff]  ;;  %v17504_v11 = vld [vmem:[#allocation40_spill] sm:$0xff] }
 0x354   : > { %17501 = vst [vmem:[#allocation119_spill] sm:$0xff] %v14980_v22 }
 0x355   : > { %10112 = vmatmul.mubr.msk.f32.gmra.mrb[26].mxu1 %vm466_vm2, %v17497_v31 }
 0x356   : > { %10548 = vmatmul.mubr.msk.f32.gmra.mrb[58].mxu0 %vm466_vm2, %v17498_v53  ;;  %3042 = vmatprep.mubr.f32.mxu1 %v17295_v17  ;;  %v17508_v53 = vld [vmem:[#allocation50_spill] sm:$0xff] }
 0x357   : > { %7190 = vmatprep.mubr.f32.mxu0 %v17295_v17 }
 0x359   : > { %10113 = vmatmul.mubr.msk.f32.gmra.mrb[28].mxu1 %vm466_vm2, %v17500_v44 }
 0x35a   : > { %10549 = vmatmul.mubr.msk.f32.gmra.mrb[60].mxu0 %vm466_vm2, %v14970_v50  ;;  %3048 = vmatprep.mubr.f32.mxu1 %v17295_v17  ;;  %v7949_v50 = vcombine.high %v14991_v5, %v14991_v5 }
 0x35b   : > { %7196 = vmatprep.mubr.f32.mxu0 %v17295_v17 }
 0x35d   : > { %10114 = vmatmul.mubr.msk.f32.gmra.mrb[30].mxu1 %vm466_vm2, %v17502_v1 }
 0x35e   : > { %10550 = vmatmul.mubr.msk.f32.gmra.mrb[62].mxu0 %vm466_vm2, %v14980_v22  ;;  %3054 = vmatprep.mubr.f32.mxu1 %v17295_v17  ;;  %v17505_v22 = vld [vmem:[#allocation42_spill] sm:$0xff] }
 0x35f   : > { %7348 = vmatprep.mubr.f32.mxu0 %v17295_v17 }
 0x361   : > { %10115 = vmatmul.mubr.msk.f32.gmra.mrb[32].mxu1 %vm466_vm2, %v17503_v33 }
 0x362   : > { %10554 = vmatmul.mubr.msk.f32.vlgmr.msra.gmra.mrb[0].mxu0 %vm466_vm2, %v13542_v51  ;;  %3060 = vmatprep.mubr.f32.mxu1 %v17295_v17 }
 0x363   : > { %10588 = vmatpush1.msk.msra.mxu0 %vm531_vm0, %v14770_v42  ;;  %7354 = vmatprep.mubr.f32.mxu0 %v17295_v17  ;;  %v17506_v42 = vld [vmem:[#allocation44_spill] sm:$0xff] }
 0x364   : > { %10622 = vmatprep.subr.msk.mxu0 %vm531_vm0, %v7949_v50  ;;  %v17507_v50 = vld [vmem:[#allocation85_spill] sm:$0xff] }
 0x365   : > { %10116 = vmatmul.mubr.msk.f32.gmra.mrb[34].mxu1 %vm466_vm2, %v17504_v11 }
 0x366   : > { %10555 = vmatmul.mubr.msk.f32.gmra.mrb[2].mxu0 %vm466_vm2, %v13552_v25  ;;  %3066 = vmatprep.mubr.f32.mxu1 %v17295_v17 }
 0x367   : > { %7360 = vmatprep.mubr.f32.mxu0 %v17295_v17 }
 0x369   : > { %10117 = vmatmul.mubr.msk.f32.gmra.mrb[36].mxu1 %vm466_vm2, %v17505_v22 }
 0x36a   : > { %10556 = vmatmul.mubr.msk.f32.gmra.mrb[4].mxu0 %vm466_vm2, %v13563_v36  ;;  %3072 = vmatprep.mubr.f32.mxu1 %v17295_v17 }
 0x36b   : > { %7366 = vmatprep.mubr.f32.mxu0 %v17295_v17 }
 0x36d   : > { %10118 = vmatmul.mubr.msk.f32.gmra.mrb[38].mxu1 %vm466_vm2, %v17506_v42 }
 0x36e   : > { %10557 = vmatmul.mubr.msk.f32.gmra.mrb[6].mxu0 %vm466_vm2, %v13573_v41  ;;  %3078 = vmatprep.mubr.f32.mxu1 %v17295_v17 }
 0x36f   : > { %7372 = vmatprep.mubr.f32.mxu0 %v17295_v17 }
 0x371   : > { %10119 = vmatmul.mubr.msk.f32.gmra.mrb[40].mxu1 %vm466_vm2, %v17398_v13 }
 0x372   : > { %10558 = vmatmul.mubr.msk.f32.gmra.mrb[8].mxu0 %vm466_vm2, %v13584_v49  ;;  %3084 = vmatprep.mubr.f32.mxu1 %v17295_v17  ;;  %v17509_v49 = vld [vmem:[#allocation52_spill] sm:$0xff] }
 0x373   : > { %7378 = vmatprep.mubr.f32.mxu0 %v17295_v17 }
 0x375   : > { %10120 = vmatmul.mubr.msk.f32.gmra.mrb[42].mxu1 %vm466_vm2, %v17399_v24 }
 0x376   : > { %10559 = vmatmul.mubr.msk.f32.gmra.mrb[10].mxu0 %vm466_vm2, %v17507_v50  ;;  %3090 = vmatprep.mubr.f32.mxu1 %v17295_v17  ;;  %v17510_v50 = vld [vmem:[#allocation54_spill] sm:$0xff] }
 0x377   : > { %7384 = vmatprep.mubr.f32.mxu0 %v17295_v17 }
 0x379   : > { %10121 = vmatmul.mubr.msk.f32.gmra.mrb[44].mxu1 %vm466_vm2, %v17508_v53 }
 0x37a   : > { %10560 = vmatmul.mubr.msk.f32.gmra.mrb[12].mxu0 %vm466_vm2, %v13605_v62  ;;  %3096 = vmatprep.mubr.f32.mxu1 %v17295_v17  ;;  %v17511_v62 = vld [vmem:[#allocation56_spill] sm:$0xff] }
 0x37b   : > { %7390 = vmatprep.mubr.f32.mxu0 %v17295_v17 }
 0x37d   : > { %10122 = vmatmul.mubr.msk.f32.gmra.mrb[46].mxu1 %vm466_vm2, %v17509_v49 }
 0x37e   : > { %10561 = vmatmul.mubr.msk.f32.gmra.mrb[14].mxu0 %vm466_vm2, %v13615_v3  ;;  %3102 = vmatprep.mubr.f32.mxu1 %v17295_v17  ;;  %v17512_v3 = vld [vmem:[#allocation58_spill] sm:$0xff] }
 0x37f   : > { %7396 = vmatprep.mubr.f32.mxu0 %v17295_v17 }
 0x381   : > { %10123 = vmatmul.mubr.msk.f32.gmra.mrb[48].mxu1 %vm466_vm2, %v17510_v50 }
 0x382   : > { %10562 = vmatmul.mubr.msk.f32.gmra.mrb[16].mxu0 %vm466_vm2, %v13626_v18  ;;  %3108 = vmatprep.mubr.f32.mxu1 %v17295_v17  ;;  %v17513_v18 = vld [vmem:[#allocation60_spill] sm:$0xff] }
 0x383   : > { %7402 = vmatprep.mubr.f32.mxu0 %v17295_v17 }
 0x385   : > { %10124 = vmatmul.mubr.msk.f32.gmra.mrb[50].mxu1 %vm466_vm2, %v17511_v62 }
 0x386   : > { %10563 = vmatmul.mubr.msk.f32.gmra.mrb[18].mxu0 %vm466_vm2, %v13636_v29  ;;  %3114 = vmatprep.mubr.f32.mxu1 %v17295_v17  ;;  %v17514_v29 = vld [vmem:[#allocation62_spill] sm:$0xff] }
 0x387   : > { %7408 = vmatprep.mubr.f32.mxu0 %v17295_v17 }
 0x389   : > { %10125 = vmatmul.mubr.msk.f32.gmra.mrb[52].mxu1 %vm466_vm2, %v17512_v3 }
 0x38a   : > { %10564 = vmatmul.mubr.msk.f32.gmra.mrb[20].mxu0 %vm466_vm2, %v13647_v45  ;;  %3120 = vmatprep.mubr.f32.mxu1 %v17295_v17  ;;  %v17515_v45 = vld [vmem:[#allocation64_spill] sm:$0xff] }
 0x38b   : > { %7414 = vmatprep.mubr.f32.mxu0 %v17295_v17 }
 0x38d   : > { %10126 = vmatmul.mubr.msk.f32.gmra.mrb[54].mxu1 %vm466_vm2, %v17513_v18 }
 0x38e   : > { %10565 = vmatmul.mubr.msk.f32.gmra.mrb[22].mxu0 %vm466_vm2, %v13657_v58  ;;  %3126 = vmatprep.mubr.f32.mxu1 %v17295_v17  ;;  %v17516_v58 = vld [vmem:[#allocation140_spill] sm:$0xff] }
 0x38f   : > { %7420 = vmatprep.mubr.f32.mxu0 %v17295_v17 }
 0x391   : > { %10127 = vmatmul.mubr.msk.f32.gmra.mrb[56].mxu1 %vm466_vm2, %v17514_v29 }
 0x392   : > { %10566 = vmatmul.mubr.msk.f32.gmra.mrb[24].mxu0 %vm466_vm2, %v17416_v19  ;;  %3132 = vmatprep.mubr.f32.mxu1 %v17295_v17  ;;  %v17517_v19 = vld [vmem:[#allocation141_spill] sm:$0xff] }
 0x393   : > { %7426 = vmatprep.mubr.f32.mxu0 %v17295_v17 }
 0x395   : > { %10128 = vmatmul.mubr.msk.f32.gmra.mrb[58].mxu1 %vm466_vm2, %v17515_v45 }
 0x396   : > { %10567 = vmatmul.mubr.msk.f32.gmra.mrb[26].mxu0 %vm466_vm2, %v17417_v10  ;;  %3138 = vmatprep.mubr.f32.mxu1 %v17295_v17  ;;  %v15096_v10 = vld [vmem:[%s16865_s1 + $0x48] sm:$0xff] }
 0x397   : > { %7432 = vmatprep.mubr.f32.mxu0 %v17295_v17 }
 0x399   : > { %10129 = vmatmul.mubr.msk.f32.gmra.mrb[60].mxu1 %vm466_vm2, %v17516_v58  ;;  %v17518_v58 = vld [vmem:[#allocation96_spill] sm:$0xff] }
 0x39a   : > { %10568 = vmatmul.mubr.msk.f32.gmra.mrb[28].mxu0 %vm466_vm2, %v17418_v43  ;;  %3144 = vmatprep.mubr.f32.mxu1 %v17295_v17  ;;  %v3899_v43 = vcombine.high %v15096_v10, %v15096_v10 }
 0x39b   : > { %7438 = vmatprep.mubr.f32.mxu0 %v17295_v17 }
 0x39d   : > { %10130 = vmatmul.mubr.msk.f32.gmra.mrb[62].mxu1 %vm466_vm2, %v17517_v19 }
 0x39e   : > { %10569 = vmatmul.mubr.msk.f32.gmra.mrb[30].mxu0 %vm466_vm2, %v17419_v2  ;;  %3296 = vmatprep.mubr.f32.mxu1 %v17295_v17  ;;  %v17519_v2 = vld [vmem:[#allocation98_spill] sm:$0xff] }
 0x39f   : > { %7444 = vmatprep.mubr.f32.mxu0 %v17295_v17 }
 0x3a1   : > { %10134 = vmatmul.mubr.msk.f32.vlgmr.msra.gmra.mrb[0].mxu1 %vm466_vm2, %v17518_v58  ;;  %v17520_v58 = vld [vmem:[#allocation6_spill] sm:$0xff] }
 0x3a2   : > { %10168 = vmatpush1.msk.msra.mxu1 %vm531_vm0, %v14875_v8  ;;  %10570 = vmatmul.mubr.msk.f32.gmra.mrb[32].mxu0 %vm466_vm2, %v17420_v37  ;;  %v17525_v8 = vld [vmem:[#allocation105_spill] sm:$0xff] }
 0x3a3   : > { %3302 = vmatprep.mubr.f32.mxu1 %v17295_v17  ;;  %7450 = vmatprep.mubr.f32.mxu0 %v17295_v17 }
 0x3a4   : > { %10202 = vmatprep.subr.msk.mxu1 %vm531_vm0, %v3899_v43  ;;  %v17521_v43 = vld [vmem:[#allocation7_spill] sm:$0xff] }
 0x3a5   : > { %10135 = vmatmul.mubr.msk.f32.gmra.mrb[2].mxu1 %vm466_vm2, %v17519_v2  ;;  %v17523_v2 = vld [vmem:[#allocation13_spill] sm:$0xff] }
 0x3a6   : > { %10571 = vmatmul.mubr.msk.f32.gmra.mrb[34].mxu0 %vm466_vm2, %v17421_v14  ;;  %3308 = vmatprep.mubr.f32.mxu1 %v17295_v17  ;;  %v17536_v14 = vld [vmem:[#allocation27_spill] sm:$0xff] }
 0x3a7   : > { %7456 = vmatprep.mubr.f32.mxu0 %v17295_v17 }
 0x3a9   : > { %10136 = vmatmul.mubr.msk.f32.gmra.mrb[4].mxu1 %vm466_vm2, %v17520_v58  ;;  %v17526_v58 = vld [vmem:[#allocation17_spill] sm:$0xff] }
 0x3aa   : > { %10572 = vmatmul.mubr.msk.f32.gmra.mrb[36].mxu0 %vm466_vm2, %v17422_v56  ;;  %3314 = vmatprep.mubr.f32.mxu1 %v17295_v17  ;;  %v17533_v56 = vld [vmem:[#allocation25_spill] sm:$0xff] }
 0x3ab   : > { %7462 = vmatprep.mubr.f32.mxu0 %v17295_v17 }
 0x3ad   : > { %10137 = vmatmul.mubr.msk.f32.gmra.mrb[6].mxu1 %vm466_vm2, %v17521_v43  ;;  %v17527_v43 = vld [vmem:[#allocation19_spill] sm:$0xff] }
 0x3ae   : > { %10573 = vmatmul.mubr.msk.f32.gmra.mrb[38].mxu0 %vm466_vm2, %v17423_v55  ;;  %3320 = vmatprep.mubr.f32.mxu1 %v17295_v17  ;;  %v15187_v55 = vld [vmem:[%s12670_s30 + $0x1b8] sm:$0xff] }
 0x3af   : > { %7468 = vmatprep.mubr.f32.mxu0 %v17295_v17 }
 0x3b1   : > { %10138 = vmatmul.mubr.msk.f32.gmra.mrb[8].mxu1 %vm466_vm2, %v12745_v39  ;;  %v17522_v39 = vld [vmem:[#allocation104_spill] sm:$0xff] }
 0x3b2   : > { %10574 = vmatmul.mubr.msk.f32.gmra.mrb[40].mxu0 %vm466_vm2, %v17424_v21  ;;  %3326 = vmatprep.mubr.f32.mxu1 %v17295_v17 }
 0x3b3   : > { %7474 = vmatprep.mubr.f32.mxu0 %v17295_v17 }
 0x3b5   : > { %10139 = vmatmul.mubr.msk.f32.gmra.mrb[10].mxu1 %vm466_vm2, %v12766_v46  ;;  %v17524_v46 = vld [vmem:[#allocation15_spill] sm:$0xff] }
 0x3b6   : > { %10575 = vmatmul.mubr.msk.f32.gmra.mrb[42].mxu0 %vm466_vm2, %v17426_v32  ;;  %3332 = vmatprep.mubr.f32.mxu1 %v17295_v17  ;;  %v17532_v32 = vld [vmem:[#allocation109_spill] sm:$0xff] }
 0x3b7   : > { %7480 = vmatprep.mubr.f32.mxu0 %v17295_v17 }
 0x3b9   : > { %10140 = vmatmul.mubr.msk.f32.gmra.mrb[12].mxu1 %vm466_vm2, %v17306_v35 }
 0x3ba   : > { %10576 = vmatmul.mubr.msk.f32.gmra.mrb[44].mxu0 %vm466_vm2, %v17522_v39  ;;  %3338 = vmatprep.mubr.f32.mxu1 %v17295_v17  ;;  %v17530_v39 = vld [vmem:[#allocation108_spill] sm:$0xff] }
 0x3bb   : > { %7486 = vmatprep.mubr.f32.mxu0 %v17295_v17 }
 0x3bd   : > { %10141 = vmatmul.mubr.msk.f32.gmra.mrb[14].mxu1 %vm466_vm2, %v17523_v2 }
 0x3be   : > { %10577 = vmatmul.mubr.msk.f32.gmra.mrb[46].mxu0 %vm466_vm2, %v17429_v15  ;;  %3344 = vmatprep.mubr.f32.mxu1 %v17295_v17  ;;  %v17529_v15 = vld [vmem:[#allocation21_spill] sm:$0xff] }
 0x3bf   : > { %7492 = vmatprep.mubr.f32.mxu0 %v17295_v17 }
 0x3c1   : > { %10142 = vmatmul.mubr.msk.f32.gmra.mrb[16].mxu1 %vm466_vm2, %v17524_v46 }
 0x3c2   : > { %10578 = vmatmul.mubr.msk.f32.gmra.mrb[48].mxu0 %vm466_vm2, %v17525_v8  ;;  %3350 = vmatprep.mubr.f32.mxu1 %v17295_v17  ;;  %v17528_v8 = vld [vmem:[#allocation107_spill] sm:$0xff] }
 0x3c3   : > { %7498 = vmatprep.mubr.f32.mxu0 %v17295_v17 }
 0x3c5   : > { %10143 = vmatmul.mubr.msk.f32.gmra.mrb[18].mxu1 %vm466_vm2, %v17526_v58 }
 0x3c6   : > { %10579 = vmatmul.mubr.msk.f32.gmra.mrb[50].mxu0 %vm466_vm2, %v17432_v60  ;;  %3356 = vmatprep.mubr.f32.mxu1 %v17295_v17  ;;  %v17531_v60 = vld [vmem:[#allocation23_spill] sm:$0xff] }
 0x3c7   : > { %7504 = vmatprep.mubr.f32.mxu0 %v17295_v17 }
 0x3c9   : > { %10144 = vmatmul.mubr.msk.f32.gmra.mrb[20].mxu1 %vm466_vm2, %v17527_v43 }
 0x3ca   : > { %10580 = vmatmul.mubr.msk.f32.gmra.mrb[52].mxu0 %vm466_vm2, %v17528_v8  ;;  %3362 = vmatprep.mubr.f32.mxu1 %v17295_v17  ;;  %v15183_v8 = vld [vmem:[%s12670_s30 + $0x1b0] sm:$0xff] }
 0x3cb   : > { %7510 = vmatprep.mubr.f32.mxu0 %v17295_v17  ;;  %v7267_v21 = vrot.slane %v15183_v8, 4 }
 0x3cd   : > { %10145 = vmatmul.mubr.msk.f32.gmra.mrb[22].mxu1 %vm466_vm2, %v17529_v15  ;;  %v17534_v15 = vld [vmem:[#allocation110_spill] sm:$0xff] }
 0x3ce   : > { %10581 = vmatmul.mubr.msk.f32.gmra.mrb[54].mxu0 %vm466_vm2, %v17530_v39  ;;  %3368 = vmatprep.mubr.f32.mxu1 %v17295_v17  ;;  %v7268_v39 = vrot.slane %v15187_v55, 4 }
 0x3cf   : > { %7516 = vmatprep.mubr.f32.mxu0 %v17295_v17 }
 0x3d1   : > { %10146 = vmatmul.mubr.msk.f32.gmra.mrb[24].mxu1 %vm466_vm2, %v17531_v60  ;;  %v7270_v60 = vrot.slane %v14501_v54, 4  ;;  %v15218_v54 = vld [vmem:[%s16865_s1 + $0xb0] sm:$0xff] }
 0x3d2   : > { %10582 = vmatmul.mubr.msk.f32.gmra.mrb[56].mxu0 %vm466_vm2, %v17532_v32  ;;  %3374 = vmatprep.mubr.f32.mxu1 %v17295_v17  ;;  %v15197_v32 = vsel %vm531_vm0, %v7267_v21, %v7268_v39  ;;  %v8287_v21 = vcombine.high %v15218_v54, %v15218_v54 }
 0x3d3   : > { %7522 = vmatprep.mubr.f32.mxu0 %v17295_v17  ;;  %17535 = vst [vmem:[#allocation120_spill] sm:$0xff] %v15197_v32 }
 0x3d5   : > { %10147 = vmatmul.mubr.msk.f32.gmra.mrb[26].mxu1 %vm466_vm2, %v17533_v56  ;;  %v17538_v56 = vld [vmem:[#allocation29_spill] sm:$0xff] }
 0x3d6   : > { %10583 = vmatmul.mubr.msk.f32.gmra.mrb[58].mxu0 %vm466_vm2, %v17534_v15  ;;  %3380 = vmatprep.mubr.f32.mxu1 %v17295_v17  ;;  %v15207_v15 = vsel %vm531_vm0, %v7268_v39, %v7270_v60  ;;  %v17539_v60 = vld [vmem:[#allocation31_spill] sm:$0xff]  ;;  %v15225_v39 = vld [vmem:[%s12670_s30 + $0x60] sm:$0xff] }
 0x3d7   : > { %7528 = vmatprep.mubr.f32.mxu0 %v17295_v17  ;;  %17537 = vst [vmem:[#allocation121_spill] sm:$0xff] %v15207_v15  ;;  %17540 = vst [vmem:[#allocation123_spill] sm:$0xff] %v15225_v39 }
 0x3d9   : > { %10148 = vmatmul.mubr.msk.f32.gmra.mrb[28].mxu1 %vm466_vm2, %v17536_v14 }
 0x3da   : > { %10584 = vmatmul.mubr.msk.f32.gmra.mrb[60].mxu0 %vm466_vm2, %v15197_v32  ;;  %3386 = vmatprep.mubr.f32.mxu1 %v17295_v17  ;;  %v15237_v32 = vld [vmem:[%s12670_s30 + $0x68] sm:$0xff] }
 0x3db   : > { %7534 = vmatprep.mubr.f32.mxu0 %v17295_v17  ;;  %17542 = vst [vmem:[#allocation125_spill] sm:$0xff] %v15237_v32 }
 0x3dd   : > { %10149 = vmatmul.mubr.msk.f32.gmra.mrb[30].mxu1 %vm466_vm2, %v17538_v56 }
 0x3de   : > { %10585 = vmatmul.mubr.msk.f32.gmra.mrb[62].mxu0 %vm466_vm2, %v15207_v15  ;;  %3392 = vmatprep.mubr.f32.mxu1 %v17295_v17  ;;  %v17541_v15 = vld [vmem:[#allocation33_spill] sm:$0xff] }
 0x3df   : > { %7683 = vmatprep.mubr.f32.mxu0 %v17295_v17 }
 0x3e1   : > { %10150 = vmatmul.mubr.msk.f32.gmra.mrb[32].mxu1 %vm466_vm2, %v17539_v60 }
 0x3e2   : > { %10589 = vmatmul.mubr.msk.f32.vlgmr.msra.gmra.mrb[0].mxu0 %vm466_vm2, %v15225_v39  ;;  %3398 = vmatprep.mubr.f32.mxu1 %v17295_v17  ;;  %v17543_v39 = vld [vmem:[#allocation115_spill] sm:$0xff] }
 0x3e3   : > { %10623 = vmatpush1.msk.msra.mxu0 %vm531_vm0, %v14991_v5  ;;  %7689 = vmatprep.mubr.f32.mxu0 %v17295_v17  ;;  %v15246_v5 = vld [vmem:[%s12670_s30 + $0x78] sm:$0xff] }
 0x3e4   : > { %10657 = vmatprep.subr.msk.mxu0 %vm531_vm0, %v8287_v21  ;;  %17544 = vst [vmem:[#allocation127_spill] sm:$0xff] %v15246_v5  ;;  %v17545_v21 = vld [vmem:[#allocation116_spill] sm:$0xff] }
 0x3e5   : > { %10151 = vmatmul.mubr.msk.f32.gmra.mrb[34].mxu1 %vm466_vm2, %v17541_v15 }
 0x3e6   : > { %10590 = vmatmul.mubr.msk.f32.gmra.mrb[2].mxu0 %vm466_vm2, %v15237_v32  ;;  %3404 = vmatprep.mubr.f32.mxu1 %v17295_v17  ;;  %v15255_v32 = vld [vmem:[%s12670_s30 + $0x80] sm:$0xff] }
 0x3e7   : > { %7695 = vmatprep.mubr.f32.mxu0 %v17295_v17  ;;  %17546 = vst [vmem:[#allocation129_spill] sm:$0xff] %v15255_v32 }
 0x3e9   : > { %10152 = vmatmul.mubr.msk.f32.gmra.mrb[36].mxu1 %vm466_vm2, %v17543_v39 }
 0x3ea   : > { %10591 = vmatmul.mubr.msk.f32.gmra.mrb[4].mxu0 %vm466_vm2, %v15246_v5  ;;  %3410 = vmatprep.mubr.f32.mxu1 %v17295_v17  ;;  %v15264_v5 = vld [vmem:[%s12670_s30 + $0x90] sm:$0xff] }
 0x3eb   : > { %7701 = vmatprep.mubr.f32.mxu0 %v17295_v17  ;;  %17547 = vst [vmem:[#allocation131_spill] sm:$0xff] %v15264_v5 }
 0x3ed   : > { %10153 = vmatmul.mubr.msk.f32.gmra.mrb[38].mxu1 %vm466_vm2, %v17545_v21 }
 0x3ee   : > { %10592 = vmatmul.mubr.msk.f32.gmra.mrb[6].mxu0 %vm466_vm2, %v15255_v32  ;;  %3416 = vmatprep.mubr.f32.mxu1 %v17295_v17  ;;  %v15273_v32 = vld [vmem:[%s12670_s30 + $0x98] sm:$0xff] }
 0x3ef   : > { %7707 = vmatprep.mubr.f32.mxu0 %v17295_v17  ;;  %17548 = vst [vmem:[#allocation132_spill] sm:$0xff] %v15273_v32 }
 0x3f1   : > { %10154 = vmatmul.mubr.msk.f32.gmra.mrb[40].mxu1 %vm466_vm2, %v13969_v26 }
 0x3f2   : > { %10593 = vmatmul.mubr.msk.f32.gmra.mrb[8].mxu0 %vm466_vm2, %v15264_v5  ;;  %3422 = vmatprep.mubr.f32.mxu1 %v17295_v17  ;;  %v15282_v5 = vld [vmem:[%s12670_s30 + $0xa8] sm:$0xff] }
 0x3f3   : > { %7713 = vmatprep.mubr.f32.mxu0 %v17295_v17  ;;  %17549 = vst [vmem:[#allocation49_spill] sm:$0xff] %v15282_v5 }
 0x3f5   : > { %10155 = vmatmul.mubr.msk.f32.gmra.mrb[42].mxu1 %vm466_vm2, %v13982_v16 }
 0x3f6   : > { %10594 = vmatmul.mubr.msk.f32.gmra.mrb[10].mxu0 %vm466_vm2, %v15273_v32  ;;  %3428 = vmatprep.mubr.f32.mxu1 %v17295_v17  ;;  %v15291_v32 = vld [vmem:[%s12670_s30 + $0xb0] sm:$0xff] }
 0x3f7   : > { %7719 = vmatprep.mubr.f32.mxu0 %v17295_v17  ;;  %17550 = vst [vmem:[#allocation134_spill] sm:$0xff] %v15291_v32 }
 0x3f9   : > { %10156 = vmatmul.mubr.msk.f32.gmra.mrb[44].mxu1 %vm466_vm2, %v13996_v7 }
 0x3fa   : > { %10595 = vmatmul.mubr.msk.f32.gmra.mrb[12].mxu0 %vm466_vm2, %v15282_v5  ;;  %3434 = vmatprep.mubr.f32.mxu1 %v17295_v17  ;;  %v15300_v5 = vld [vmem:[%s12670_s30 + $0xc0] sm:$0xff] }
 0x3fb   : > { %7725 = vmatprep.mubr.f32.mxu0 %v17295_v17  ;;  %17551 = vst [vmem:[#allocation51_spill] sm:$0xff] %v15300_v5 }
 0x3fd   : > { %10157 = vmatmul.mubr.msk.f32.gmra.mrb[46].mxu1 %vm466_vm2, %v14009_v63 }
 0x3fe   : > { %10596 = vmatmul.mubr.msk.f32.gmra.mrb[14].mxu0 %vm466_vm2, %v15291_v32  ;;  %3440 = vmatprep.mubr.f32.mxu1 %v17295_v17  ;;  %v15309_v32 = vld [vmem:[%s12670_s30 + $0xc8] sm:$0xff] }
 0x3ff   : > { %7731 = vmatprep.mubr.f32.mxu0 %v17295_v17  ;;  %17552 = vst [vmem:[#allocation136_spill] sm:$0xff] %v15309_v32 }
 0x401   : > { %10158 = vmatmul.mubr.msk.f32.gmra.mrb[48].mxu1 %vm466_vm2, %v14023_v57 }
 0x402   : > { %10597 = vmatmul.mubr.msk.f32.gmra.mrb[16].mxu0 %vm466_vm2, %v15300_v5  ;;  %3446 = vmatprep.mubr.f32.mxu1 %v17295_v17  ;;  %v15318_v5 = vld [vmem:[%s12670_s30 + $0xd8] sm:$0xff] }
 0x403   : > { %7737 = vmatprep.mubr.f32.mxu0 %v17295_v17  ;;  %17553 = vst [vmem:[#allocation53_spill] sm:$0xff] %v15318_v5 }
 0x405   : > { %10159 = vmatmul.mubr.msk.f32.gmra.mrb[50].mxu1 %vm466_vm2, %v14036_v4 }
 0x406   : > { %10598 = vmatmul.mubr.msk.f32.gmra.mrb[18].mxu0 %vm466_vm2, %v15309_v32  ;;  %3452 = vmatprep.mubr.f32.mxu1 %v17295_v17  ;;  %v15327_v32 = vld [vmem:[%s12670_s30 + $0xe0] sm:$0xff] }
 0x407   : > { %7743 = vmatprep.mubr.f32.mxu0 %v17295_v17  ;;  %17554 = vst [vmem:[#allocation137_spill] sm:$0xff] %v15327_v32 }
 0x409   : > { %10160 = vmatmul.mubr.msk.f32.gmra.mrb[52].mxu1 %vm466_vm2, %v14050_v27  ;;  %v17555_v27 = vld [vmem:[#allocation128_spill] sm:$0xff] }
 0x40a   : > { %10599 = vmatmul.mubr.msk.f32.gmra.mrb[20].mxu0 %vm466_vm2, %v15318_v5  ;;  %3458 = vmatprep.mubr.f32.mxu1 %v17295_v17  ;;  %v15336_v5 = vld [vmem:[%s12670_s30 + $0xf0] sm:$0xff] }
 0x40b   : > { %7749 = vmatprep.mubr.f32.mxu0 %v17295_v17  ;;  %17556 = vst [vmem:[#allocation55_spill] sm:$0xff] %v15336_v5 }
 0x40d   : > { %10161 = vmatmul.mubr.msk.f32.gmra.mrb[54].mxu1 %vm466_vm2, %v14063_v0  ;;  %v17557_v0 = vld [vmem:[#allocation130_spill] sm:$0xff] }
 0x40e   : > { %10600 = vmatmul.mubr.msk.f32.gmra.mrb[22].mxu0 %vm466_vm2, %v15327_v32  ;;  %3464 = vmatprep.mubr.f32.mxu1 %v17295_v17  ;;  %v15345_v32 = vld [vmem:[%s12670_s30 + $0xf8] sm:$0xff] }
 0x40f   : > { %7755 = vmatprep.mubr.f32.mxu0 %v17295_v17  ;;  %17558 = vst [vmem:[#allocation138_spill] sm:$0xff] %v15345_v32 }
 0x411   : > { %10162 = vmatmul.mubr.msk.f32.gmra.mrb[56].mxu1 %vm466_vm2, %v17555_v27 }
 0x412   : > { %10601 = vmatmul.mubr.msk.f32.gmra.mrb[24].mxu0 %vm466_vm2, %v15336_v5  ;;  %3470 = vmatprep.mubr.f32.mxu1 %v17295_v17  ;;  %v15354_v5 = vld [vmem:[%s12670_s30 + $0x108] sm:$0xff] }
 0x413   : > { %7761 = vmatprep.mubr.f32.mxu0 %v17295_v17  ;;  %17559 = vst [vmem:[#allocation57_spill] sm:$0xff] %v15354_v5 }
 0x415   : > { %10163 = vmatmul.mubr.msk.f32.gmra.mrb[58].mxu1 %vm466_vm2, %v17557_v0  ;;  %v17561_v0 = vld [vmem:[#allocation133_spill] sm:$0xff] }
 0x416   : > { %10602 = vmatmul.mubr.msk.f32.gmra.mrb[26].mxu0 %vm466_vm2, %v15345_v32  ;;  %3476 = vmatprep.mubr.f32.mxu1 %v17295_v17  ;;  %v15363_v32 = vld [vmem:[%s12670_s30 + $0x110] sm:$0xff] }
 0x417   : > { %7767 = vmatprep.mubr.f32.mxu0 %v17295_v17  ;;  %17560 = vst [vmem:[#allocation39_spill] sm:$0xff] %v15363_v32 }
 0x419   : > { %10164 = vmatmul.mubr.msk.f32.gmra.mrb[60].mxu1 %vm466_vm2, %v14707_v34  ;;  %v15371_v34 = vld [vmem:[%s16865_s1 + $0x50] sm:$0xff] }
 0x41a   : > { %10603 = vmatmul.mubr.msk.f32.gmra.mrb[28].mxu0 %vm466_vm2, %v15354_v5  ;;  %3482 = vmatprep.mubr.f32.mxu1 %v17295_v17  ;;  %v4232_v5 = vcombine.high %v15371_v34, %v15371_v34 }
 0x41b   : > { %7773 = vmatprep.mubr.f32.mxu0 %v17295_v17 }
 0x41d   : > { %10165 = vmatmul.mubr.msk.f32.gmra.mrb[62].mxu1 %vm466_vm2, %v14717_v28  ;;  %v17563_v28 = vld [vmem:[#allocation135_spill] sm:$0xff] }
 0x41e   : > { %10604 = vmatmul.mubr.msk.f32.gmra.mrb[30].mxu0 %vm466_vm2, %v15363_v32  ;;  %3634 = vmatprep.mubr.f32.mxu1 %v17295_v17  ;;  %v15381_v32 = vld [vmem:[%s12670_s30 + $0x120] sm:$0xff] }
 0x41f   : > { %7779 = vmatprep.mubr.f32.mxu0 %v17295_v17  ;;  %17562 = vst [vmem:[#allocation41_spill] sm:$0xff] %v15381_v32 }
 0x421   : > { %10169 = vmatmul.mubr.msk.f32.vlgmr.msra.gmra.mrb[0].mxu1 %vm466_vm2, %v17561_v0  ;;  %v15391_v0 = vld [vmem:[%s12670_s30 + $0x128] sm:$0xff] }
 0x422   : > { %10203 = vmatpush1.msk.msra.mxu1 %vm531_vm0, %v15096_v10  ;;  %10605 = vmatmul.mubr.msk.f32.gmra.mrb[32].mxu0 %vm466_vm2, %v15381_v32  ;;  %v17564_v10 = vld [vmem:[#allocation35_spill] sm:$0xff]  ;;  %v15400_v32 = vld [vmem:[%s12670_s30 + $0x138] sm:$0xff] }
 0x423   : > { %3640 = vmatprep.mubr.f32.mxu1 %v17295_v17  ;;  %7785 = vmatprep.mubr.f32.mxu0 %v17295_v17 }
 0x424   : > { %10237 = vmatprep.subr.msk.mxu1 %vm531_vm0, %v4232_v5  ;;  %v15409_v5 = vld [vmem:[%s12670_s30 + $0x140] sm:$0xff] }
 0x425   : > { %10170 = vmatmul.mubr.msk.f32.gmra.mrb[2].mxu1 %vm466_vm2, %v17563_v28  ;;  %v17565_v28 = vld [vmem:[#allocation37_spill] sm:$0xff] }
 0x426   : > { %10606 = vmatmul.mubr.msk.f32.gmra.mrb[34].mxu0 %vm466_vm2, %v15391_v0  ;;  %3646 = vmatprep.mubr.f32.mxu1 %v17295_v17 }
 0x427   : > { %7791 = vmatprep.mubr.f32.mxu0 %v17295_v17 }
 0x429   : > { %10171 = vmatmul.mubr.msk.f32.gmra.mrb[4].mxu1 %vm466_vm2, %v17564_v10  ;;  %v15418_v10 = vld [vmem:[%s12670_s30 + $0x150] sm:$0xff] }
 0x42a   : > { %10607 = vmatmul.mubr.msk.f32.gmra.mrb[36].mxu0 %vm466_vm2, %v15400_v32  ;;  %3652 = vmatprep.mubr.f32.mxu1 %v17295_v17 }
 0x42b   : > { %7797 = vmatprep.mubr.f32.mxu0 %v17295_v17 }
 0x42d   : > { %10172 = vmatmul.mubr.msk.f32.gmra.mrb[6].mxu1 %vm466_vm2, %v17565_v28  ;;  %v15427_v28 = vld [vmem:[%s12670_s30 + $0x158] sm:$0xff] }
 0x42e   : > { %10608 = vmatmul.mubr.msk.f32.gmra.mrb[38].mxu0 %vm466_vm2, %v15409_v5  ;;  %3658 = vmatprep.mubr.f32.mxu1 %v17295_v17  ;;  %17566 = vst [vmem:[#allocation43_spill] sm:$0xff] %v15427_v28 }
 0x42f   : > { %7803 = vmatprep.mubr.f32.mxu0 %v17295_v17 }
 0x431   : > { %10173 = vmatmul.mubr.msk.f32.gmra.mrb[8].mxu1 %vm466_vm2, %v17355_v6  ;;  %v15436_v6 = vld [vmem:[%s12670_s30 + $0x168] sm:$0xff] }
 0x432   : > { %10609 = vmatmul.mubr.msk.f32.gmra.mrb[40].mxu0 %vm466_vm2, %v15418_v10  ;;  %3664 = vmatprep.mubr.f32.mxu1 %v17295_v17  ;;  %17567 = vst [vmem:[#allocation45_spill] sm:$0xff] %v15436_v6 }
 0x433   : > { %7809 = vmatprep.mubr.f32.mxu0 %v17295_v17 }
 0x435   : > { %10174 = vmatmul.mubr.msk.f32.gmra.mrb[10].mxu1 %vm466_vm2, %v17357_v52  ;;  %v15445_v52 = vld [vmem:[%s12670_s30 + $0x170] sm:$0xff] }
 0x436   : > { %10610 = vmatmul.mubr.msk.f32.gmra.mrb[42].mxu0 %vm466_vm2, %v15427_v28  ;;  %3670 = vmatprep.mubr.f32.mxu1 %v17295_v17  ;;  %17568 = vst [vmem:[#allocation8_spill] sm:$0xff] %v15445_v52  ;;  %v17573_v28 = vld [vmem:[#allocation18_spill] sm:$0xff] }
 0x437   : > { %7815 = vmatprep.mubr.f32.mxu0 %v17295_v17 }
 0x439   : > { %10175 = vmatmul.mubr.msk.f32.gmra.mrb[12].mxu1 %vm466_vm2, %v17359_v61 }
 0x43a   : > { %10611 = vmatmul.mubr.msk.f32.gmra.mrb[44].mxu0 %vm466_vm2, %v15436_v6  ;;  %3676 = vmatprep.mubr.f32.mxu1 %v17295_v17  ;;  %v15454_v6 = vld [vmem:[%s12670_s30 + $0x180] sm:$0xff] }
 0x43b   : > { %7821 = vmatprep.mubr.f32.mxu0 %v17295_v17  ;;  %17569 = vst [vmem:[#allocation9_spill] sm:$0xff] %v15454_v6 }
 0x43d   : > { %10176 = vmatmul.mubr.msk.f32.gmra.mrb[14].mxu1 %vm466_vm2, %v17361_v9 }
 0x43e   : > { %10612 = vmatmul.mubr.msk.f32.gmra.mrb[46].mxu0 %vm466_vm2, %v15445_v52  ;;  %3682 = vmatprep.mubr.f32.mxu1 %v17295_v17  ;;  %v15463_v52 = vld [vmem:[%s12670_s30 + $0x188] sm:$0xff] }
 0x43f   : > { %7827 = vmatprep.mubr.f32.mxu0 %v17295_v17  ;;  %17570 = vst [vmem:[#allocation50_spill] sm:$0xff] %v15463_v52 }
 0x441   : > { %10177 = vmatmul.mubr.msk.f32.gmra.mrb[16].mxu1 %vm466_vm2, %v17363_v23 }
 0x442   : > { %10613 = vmatmul.mubr.msk.f32.gmra.mrb[48].mxu0 %vm466_vm2, %v15454_v6  ;;  %3688 = vmatprep.mubr.f32.mxu1 %v17295_v17  ;;  %v15472_v6 = vld [vmem:[%s12670_s30 + $0x198] sm:$0xff] }
 0x443   : > { %7833 = vmatprep.mubr.f32.mxu0 %v17295_v17  ;;  %17571 = vst [vmem:[#allocation52_spill] sm:$0xff] %v15472_v6 }
 0x445   : > { %10178 = vmatmul.mubr.msk.f32.gmra.mrb[18].mxu1 %vm466_vm2, %v17454_v20 }
 0x446   : > { %10614 = vmatmul.mubr.msk.f32.gmra.mrb[50].mxu0 %vm466_vm2, %v15463_v52  ;;  %3694 = vmatprep.mubr.f32.mxu1 %v17295_v17  ;;  %v15481_v52 = vld [vmem:[%s12670_s30 + $0x1a0] sm:$0xff] }
 0x447   : > { %7839 = vmatprep.mubr.f32.mxu0 %v17295_v17  ;;  %17572 = vst [vmem:[#allocation54_spill] sm:$0xff] %v15481_v52 }
 0x449   : > { %10179 = vmatmul.mubr.msk.f32.gmra.mrb[20].mxu1 %vm466_vm2, %v17456_v12 }
 0x44a   : > { %10615 = vmatmul.mubr.msk.f32.gmra.mrb[52].mxu0 %vm466_vm2, %v15472_v6  ;;  %3700 = vmatprep.mubr.f32.mxu1 %v17295_v17 }
 0x44b   : > { %7845 = vmatprep.mubr.f32.mxu0 %v17295_v17 }
 0x44d   : > { %10180 = vmatmul.mubr.msk.f32.gmra.mrb[22].mxu1 %vm466_vm2, %v17458_v59 }
 0x44e   : > { %10616 = vmatmul.mubr.msk.f32.gmra.mrb[54].mxu0 %vm466_vm2, %v15481_v52  ;;  %3706 = vmatprep.mubr.f32.mxu1 %v17295_v17  ;;  %v15500_v52 = vld [vmem:[%s12670_s30 + $0x1c8] sm:$0xff] }
 0x44f   : > { %7851 = vmatprep.mubr.f32.mxu0 %v17295_v17 }
 0x451   : > { %10181 = vmatmul.mubr.msk.f32.gmra.mrb[24].mxu1 %vm466_vm2, %v17460_v38 }
 0x452   : > { %10617 = vmatmul.mubr.msk.f32.gmra.mrb[56].mxu0 %vm466_vm2, %v15183_v8  ;;  %3712 = vmatprep.mubr.f32.mxu1 %v17295_v17  ;;  %v15509_v8 = vld [vmem:[%s12670_s30 + $0x1d0] sm:$0xff] }
 0x453   : > { %7857 = vmatprep.mubr.f32.mxu0 %v17295_v17 }
 0x455   : > { %10182 = vmatmul.mubr.msk.f32.gmra.mrb[26].mxu1 %vm466_vm2, %v17462_v40 }
 0x456   : > { %10618 = vmatmul.mubr.msk.f32.gmra.mrb[58].mxu0 %vm466_vm2, %v15187_v55  ;;  %3718 = vmatprep.mubr.f32.mxu1 %v17295_v17  ;;  %v15520_v55 = vld [vmem:[%s16865_s1 + $0xb8] sm:$0xff] }
 0x457   : > { %7863 = vmatprep.mubr.f32.mxu0 %v17295_v17  ;;  %v8625_v6 = vcombine.high %v15520_v55, %v15520_v55 }
 0x459   : > { %10183 = vmatmul.mubr.msk.f32.gmra.mrb[28].mxu1 %vm466_vm2, %v13252_v47  ;;  %v17575_v47 = vld [vmem:[#allocation20_spill] sm:$0xff] }
 0x45a   : > { %10619 = vmatmul.mubr.msk.f32.gmra.mrb[60].mxu0 %vm466_vm2, %v15500_v52  ;;  %3724 = vmatprep.mubr.f32.mxu1 %v17295_v17 }
 0x45b   : > { %7869 = vmatprep.mubr.f32.mxu0 %v17295_v17 }
 0x45d   : > { %10184 = vmatmul.mubr.msk.f32.gmra.mrb[30].mxu1 %vm466_vm2, %v17370_v48  ;;  %v17574_v48 = vld [vmem:[#allocation65_spill] sm:$0xff] }
 0x45e   : > { %10620 = vmatmul.mubr.msk.f32.gmra.mrb[62].mxu0 %vm466_vm2, %v15509_v8  ;;  %3730 = vmatprep.mubr.f32.mxu1 %v17295_v17 }
 0x45f   : > { %8022 = vmatprep.mubr.f32.mxu0 %v17295_v17 }
 0x461   : > { %10185 = vmatmul.mubr.msk.f32.gmra.mrb[32].mxu1 %vm466_vm2, %v17466_v30  ;;  %v17577_v30 = vld [vmem:[#allocation22_spill] sm:$0xff] }
 0x462   : > { %10624 = vmatmul.mubr.msk.f32.vlgmr.msra.gmra.mrb[0].mxu0 %vm466_vm2, %v17573_v28  ;;  %3736 = vmatprep.mubr.f32.mxu1 %v17295_v17  ;;  %v17576_v28 = vld [vmem:[#allocation66_spill] sm:$0xff] }
 0x463   : > { %10658 = vmatpush1.msk.msra.mxu0 %vm531_vm0, %v15218_v54  ;;  %8028 = vmatprep.mubr.f32.mxu0 %v17295_v17  ;;  %v17578_v54 = vld [vmem:[#allocation67_spill] sm:$0xff] }
 0x464   : > { %10692 = vmatprep.subr.msk.mxu0 %vm531_vm0, %v8625_v6  ;;  %v17579_v6 = vld [vmem:[#allocation24_spill] sm:$0xff] }
 0x465   : > { %10186 = vmatmul.mubr.msk.f32.gmra.mrb[34].mxu1 %vm466_vm2, %v17574_v48 }
 0x466   : > { %10625 = vmatmul.mubr.msk.f32.gmra.mrb[2].mxu0 %vm466_vm2, %v17575_v47  ;;  %3742 = vmatprep.mubr.f32.mxu1 %v17295_v17  ;;  %v17580_v47 = vld [vmem:[#allocation68_spill] sm:$0xff] }
 0x467   : > { %8034 = vmatprep.mubr.f32.mxu0 %v17295_v17 }
 0x469   : > { %10187 = vmatmul.mubr.msk.f32.gmra.mrb[36].mxu1 %vm466_vm2, %v17576_v28  ;;  %v17581_v28 = vld [vmem:[#allocation26_spill] sm:$0xff] }
 0x46a   : > { %10626 = vmatmul.mubr.msk.f32.gmra.mrb[4].mxu0 %vm466_vm2, %v17577_v30  ;;  %3748 = vmatprep.mubr.f32.mxu1 %v17295_v17  ;;  %v17582_v30 = vld [vmem:[#allocation69_spill] sm:$0xff] }
 0x46b   : > { %8040 = vmatprep.mubr.f32.mxu0 %v17295_v17 }
 0x46d   : > { %10188 = vmatmul.mubr.msk.f32.gmra.mrb[38].mxu1 %vm466_vm2, %v17578_v54  ;;  %v17583_v54 = vld [vmem:[#allocation28_spill] sm:$0xff] }
 0x46e   : > { %10627 = vmatmul.mubr.msk.f32.gmra.mrb[6].mxu0 %vm466_vm2, %v17579_v6  ;;  %3754 = vmatprep.mubr.f32.mxu1 %v17295_v17  ;;  %v17584_v6 = vld [vmem:[#allocation70_spill] sm:$0xff] }
 0x46f   : > { %8046 = vmatprep.mubr.f32.mxu0 %v17295_v17 }
 0x471   : > { %10189 = vmatmul.mubr.msk.f32.gmra.mrb[40].mxu1 %vm466_vm2, %v17580_v47  ;;  %v17585_v47 = vld [vmem:[#allocation30_spill] sm:$0xff] }
 0x472   : > { %10628 = vmatmul.mubr.msk.f32.gmra.mrb[8].mxu0 %vm466_vm2, %v17581_v28  ;;  %3760 = vmatprep.mubr.f32.mxu1 %v17295_v17  ;;  %v17586_v28 = vld [vmem:[#allocation71_spill] sm:$0xff] }
 0x473   : > { %8052 = vmatprep.mubr.f32.mxu0 %v17295_v17 }
 0x475   : > { %10190 = vmatmul.mubr.msk.f32.gmra.mrb[42].mxu1 %vm466_vm2, %v17582_v30 }
 0x476   : > { %10629 = vmatmul.mubr.msk.f32.gmra.mrb[10].mxu0 %vm466_vm2, %v17583_v54  ;;  %3766 = vmatprep.mubr.f32.mxu1 %v17295_v17  ;;  %v17587_v54 = vld [vmem:[#allocation72_spill] sm:$0xff] }
 0x477   : > { %8058 = vmatprep.mubr.f32.mxu0 %v17295_v17 }
 0x479   : > { %10191 = vmatmul.mubr.msk.f32.gmra.mrb[44].mxu1 %vm466_vm2, %v17584_v6 }
 0x47a   : > { %10630 = vmatmul.mubr.msk.f32.gmra.mrb[12].mxu0 %vm466_vm2, %v17585_v47  ;;  %3772 = vmatprep.mubr.f32.mxu1 %v17295_v17  ;;  %v17588_v47 = vld [vmem:[#allocation73_spill] sm:$0xff] }
 0x47b   : > { %8064 = vmatprep.mubr.f32.mxu0 %v17295_v17 }
 0x47d   : > { %10192 = vmatmul.mubr.msk.f32.gmra.mrb[46].mxu1 %vm466_vm2, %v17586_v28 }
 0x47e   : > { %10631 = vmatmul.mubr.msk.f32.gmra.mrb[14].mxu0 %vm466_vm2, %v17497_v31  ;;  %3778 = vmatprep.mubr.f32.mxu1 %v17295_v17  ;;  %v17589_v31 = vld [vmem:[#allocation74_spill] sm:$0xff] }
 0x47f   : > { %8070 = vmatprep.mubr.f32.mxu0 %v17295_v17 }
 0x481   : > { %10193 = vmatmul.mubr.msk.f32.gmra.mrb[48].mxu1 %vm466_vm2, %v17587_v54 }
 0x482   : > { %10632 = vmatmul.mubr.msk.f32.gmra.mrb[16].mxu0 %vm466_vm2, %v17500_v44  ;;  %3784 = vmatprep.mubr.f32.mxu1 %v17295_v17  ;;  %v17590_v44 = vld [vmem:[#allocation75_spill] sm:$0xff] }
 0x483   : > { %8076 = vmatprep.mubr.f32.mxu0 %v17295_v17 }
 0x485   : > { %10194 = vmatmul.mubr.msk.f32.gmra.mrb[50].mxu1 %vm466_vm2, %v17588_v47 }
 0x486   : > { %10633 = vmatmul.mubr.msk.f32.gmra.mrb[18].mxu0 %vm466_vm2, %v17502_v1  ;;  %3790 = vmatprep.mubr.f32.mxu1 %v17295_v17  ;;  %v17591_v1 = vld [vmem:[#allocation76_spill] sm:$0xff] }
 0x487   : > { %8082 = vmatprep.mubr.f32.mxu0 %v17295_v17 }
 0x489   : > { %10195 = vmatmul.mubr.msk.f32.gmra.mrb[52].mxu1 %vm466_vm2, %v17589_v31 }
 0x48a   : > { %10634 = vmatmul.mubr.msk.f32.gmra.mrb[20].mxu0 %vm466_vm2, %v17503_v33  ;;  %3796 = vmatprep.mubr.f32.mxu1 %v17295_v17  ;;  %v17592_v33 = vld [vmem:[#allocation77_spill] sm:$0xff] }
 0x48b   : > { %8088 = vmatprep.mubr.f32.mxu0 %v17295_v17 }
 0x48d   : > { %10196 = vmatmul.mubr.msk.f32.gmra.mrb[54].mxu1 %vm466_vm2, %v17590_v44 }
 0x48e   : > { %10635 = vmatmul.mubr.msk.f32.gmra.mrb[22].mxu0 %vm466_vm2, %v17504_v11  ;;  %3802 = vmatprep.mubr.f32.mxu1 %v17295_v17  ;;  %v17593_v11 = vld [vmem:[#allocation78_spill] sm:$0xff] }
 0x48f   : > { %8094 = vmatprep.mubr.f32.mxu0 %v17295_v17 }
 0x491   : > { %10197 = vmatmul.mubr.msk.f32.gmra.mrb[56].mxu1 %vm466_vm2, %v17591_v1 }
 0x492   : > { %10636 = vmatmul.mubr.msk.f32.gmra.mrb[24].mxu0 %vm466_vm2, %v17505_v22  ;;  %3808 = vmatprep.mubr.f32.mxu1 %v17295_v17  ;;  %v17594_v22 = vld [vmem:[#allocation79_spill] sm:$0xff] }
 0x493   : > { %8100 = vmatprep.mubr.f32.mxu0 %v17295_v17 }
 0x495   : > { %10198 = vmatmul.mubr.msk.f32.gmra.mrb[58].mxu1 %vm466_vm2, %v17592_v33 }
 0x496   : > { %10637 = vmatmul.mubr.msk.f32.gmra.mrb[26].mxu0 %vm466_vm2, %v17506_v42  ;;  %3814 = vmatprep.mubr.f32.mxu1 %v17295_v17  ;;  %v15625_v42 = vld [vmem:[%s16865_s1 + $0x58] sm:$0xff] }
 0x497   : > { %8106 = vmatprep.mubr.f32.mxu0 %v17295_v17 }
 0x499   : > { %10199 = vmatmul.mubr.msk.f32.gmra.mrb[60].mxu1 %vm466_vm2, %v17593_v11  ;;  %v17595_v11 = vld [vmem:[#allocation47_spill] sm:$0xff] }
 0x49a   : > { %10638 = vmatmul.mubr.msk.f32.gmra.mrb[28].mxu0 %vm466_vm2, %v17398_v13  ;;  %3820 = vmatprep.mubr.f32.mxu1 %v17295_v17  ;;  %v4573_v13 = vcombine.high %v15625_v42, %v15625_v42 }
 0x49b   : > { %8112 = vmatprep.mubr.f32.mxu0 %v17295_v17 }
 0x49d   : > { %10200 = vmatmul.mubr.msk.f32.gmra.mrb[62].mxu1 %vm466_vm2, %v17594_v22 }
 0x49e   : > { %10639 = vmatmul.mubr.msk.f32.gmra.mrb[30].mxu0 %vm466_vm2, %v17399_v24  ;;  %3972 = vmatprep.mubr.f32.mxu1 %v17295_v17  ;;  %v17596_v24 = vld [vmem:[#allocation139_spill] sm:$0xff] }
 0x49f   : > { %8118 = vmatprep.mubr.f32.mxu0 %v17295_v17 }
 0x4a1   : > { %10204 = vmatmul.mubr.msk.f32.vlgmr.msra.gmra.mrb[0].mxu1 %vm466_vm2, %v17595_v11  ;;  %v17602_v11 = vld [vmem:[#allocation86_spill] sm:$0xff] }
 0x4a2   : > { %10238 = vmatpush1.msk.msra.mxu1 %vm531_vm0, %v15371_v34  ;;  %10640 = vmatmul.mubr.msk.f32.gmra.mrb[32].mxu0 %vm466_vm2, %v17508_v53  ;;  %v17597_v34 = vld [vmem:[#allocation82_spill] sm:$0xff] }
 0x4a3   : > { %3978 = vmatprep.mubr.f32.mxu1 %v17295_v17  ;;  %8124 = vmatprep.mubr.f32.mxu0 %v17295_v17 }
 0x4a4   : > { %10272 = vmatprep.subr.msk.mxu1 %vm531_vm0, %v4573_v13  ;;  %v17598_v13 = vld [vmem:[#allocation83_spill] sm:$0xff] }
 0x4a5   : > { %10205 = vmatmul.mubr.msk.f32.gmra.mrb[2].mxu1 %vm466_vm2, %v17596_v24  ;;  %v17601_v24 = vld [vmem:[#allocation85_spill] sm:$0xff] }
 0x4a6   : > { %10641 = vmatmul.mubr.msk.f32.gmra.mrb[34].mxu0 %vm466_vm2, %v17509_v49  ;;  %3984 = vmatprep.mubr.f32.mxu1 %v17295_v17 }
 0x4a7   : > { %8130 = vmatprep.mubr.f32.mxu0 %v17295_v17 }
 0x4a9   : > { %10206 = vmatmul.mubr.msk.f32.gmra.mrb[4].mxu1 %vm466_vm2, %v17597_v34  ;;  %v17603_v34 = vld [vmem:[#allocation142_spill] sm:$0xff] }
 0x4aa   : > { %10642 = vmatmul.mubr.msk.f32.gmra.mrb[36].mxu0 %vm466_vm2, %v17510_v50  ;;  %3990 = vmatprep.mubr.f32.mxu1 %v17295_v17 }
 0x4ab   : > { %8136 = vmatprep.mubr.f32.mxu0 %v17295_v17 }
 0x4ad   : > { %10207 = vmatmul.mubr.msk.f32.gmra.mrb[6].mxu1 %vm466_vm2, %v17598_v13  ;;  %v17604_v13 = vld [vmem:[#allocation87_spill] sm:$0xff] }
 0x4ae   : > { %10643 = vmatmul.mubr.msk.f32.gmra.mrb[38].mxu0 %vm466_vm2, %v17511_v62  ;;  %3996 = vmatprep.mubr.f32.mxu1 %v17295_v17 }
 0x4af   : > { %8142 = vmatprep.mubr.f32.mxu0 %v17295_v17 }
 0x4b1   : > { %10208 = vmatmul.mubr.msk.f32.gmra.mrb[8].mxu1 %vm466_vm2, %v13542_v51  ;;  %v17599_v51 = vld [vmem:[#allocation84_spill] sm:$0xff] }
 0x4b2   : > { %10644 = vmatmul.mubr.msk.f32.gmra.mrb[40].mxu0 %vm466_vm2, %v17512_v3  ;;  %4002 = vmatprep.mubr.f32.mxu1 %v17295_v17  ;;  %v17609_v3 = vld [vmem:[#allocation145_spill] sm:$0xff] }
 0x4b3   : > { %8148 = vmatprep.mubr.f32.mxu0 %v17295_v17 }
 0x4b5   : > { %10209 = vmatmul.mubr.msk.f32.gmra.mrb[10].mxu1 %vm466_vm2, %v13552_v25  ;;  %v17600_v25 = vld [vmem:[#allocation140_spill] sm:$0xff] }
 0x4b6   : > { %10645 = vmatmul.mubr.msk.f32.gmra.mrb[42].mxu0 %vm466_vm2, %v17513_v18  ;;  %4008 = vmatprep.mubr.f32.mxu1 %v17295_v17  ;;  %v15714_v18 = vld [vmem:[%s12670_s30 + $0x1d8] sm:$0xf] }
 0x4b7   : > { %8154 = vmatprep.mubr.f32.mxu0 %v17295_v17  ;;  %v7944_v62 = vrot.slane %v15714_v18, 1 }
 0x4b9   : > { %10210 = vmatmul.mubr.msk.f32.gmra.mrb[12].mxu1 %vm466_vm2, %v13563_v36 }
 0x4ba   : > { %10646 = vmatmul.mubr.msk.f32.gmra.mrb[44].mxu0 %vm466_vm2, %v17514_v29  ;;  %4014 = vmatprep.mubr.f32.mxu1 %v17295_v17  ;;  %v7942_v29 = vrot.slane %v15509_v8, 1 }
 0x4bb   : > { %8160 = vmatprep.mubr.f32.mxu0 %v17295_v17 }
 0x4bd   : > { %10211 = vmatmul.mubr.msk.f32.gmra.mrb[14].mxu1 %vm466_vm2, %v13573_v41 }
 0x4be   : > { %10647 = vmatmul.mubr.msk.f32.gmra.mrb[46].mxu0 %vm466_vm2, %v17515_v45  ;;  %4020 = vmatprep.mubr.f32.mxu1 %v17295_v17  ;;  %v17607_v45 = vld [vmem:[#allocation144_spill] sm:$0xff] }
 0x4bf   : > { %8166 = vmatprep.mubr.f32.mxu0 %v17295_v17 }
 0x4c1   : > { %10212 = vmatmul.mubr.msk.f32.gmra.mrb[16].mxu1 %vm466_vm2, %v17599_v51 }
 0x4c2   : > { %10648 = vmatmul.mubr.msk.f32.gmra.mrb[48].mxu0 %vm466_vm2, %v17600_v25  ;;  %4026 = vmatprep.mubr.f32.mxu1 %v17295_v17  ;;  %v17605_v25 = vld [vmem:[#allocation143_spill] sm:$0xff] }
 0x4c3   : > { %8172 = vmatprep.mubr.f32.mxu0 %v17295_v17 }
 0x4c5   : > { %10213 = vmatmul.mubr.msk.f32.gmra.mrb[18].mxu1 %vm466_vm2, %v17601_v24 }
 0x4c6   : > { %10649 = vmatmul.mubr.msk.f32.gmra.mrb[50].mxu0 %vm466_vm2, %v17517_v19  ;;  %4032 = vmatprep.mubr.f32.mxu1 %v17295_v17  ;;  %v17606_v19 = vld [vmem:[#allocation88_spill] sm:$0xff] }
 0x4c7   : > { %8178 = vmatprep.mubr.f32.mxu0 %v17295_v17 }
 0x4c9   : > { %10214 = vmatmul.mubr.msk.f32.gmra.mrb[20].mxu1 %vm466_vm2, %v17602_v11 }
 0x4ca   : > { %10650 = vmatmul.mubr.msk.f32.gmra.mrb[52].mxu0 %vm466_vm2, %v17603_v34  ;;  %4038 = vmatprep.mubr.f32.mxu1 %v17295_v17  ;;  %v7941_v34 = vrot.slane %v15500_v52, 1 }
 0x4cb   : > { %8184 = vmatprep.mubr.f32.mxu0 %v17295_v17 }
 0x4cd   : > { %10215 = vmatmul.mubr.msk.f32.gmra.mrb[22].mxu1 %vm466_vm2, %v17604_v13 }
 0x4ce   : > { %10651 = vmatmul.mubr.msk.f32.gmra.mrb[54].mxu0 %vm466_vm2, %v17605_v25  ;;  %4044 = vmatprep.mubr.f32.mxu1 %v17295_v17  ;;  %v17608_v25 = vld [vmem:[#allocation89_spill] sm:$0xff] }
 0x4cf   : > { %8190 = vmatprep.mubr.f32.mxu0 %v17295_v17 }
 0x4d1   : > { %10216 = vmatmul.mubr.msk.f32.gmra.mrb[24].mxu1 %vm466_vm2, %v17606_v19  ;;  %v17610_v19 = vld [vmem:[#allocation90_spill] sm:$0xff] }
 0x4d2   : > { %10652 = vmatmul.mubr.msk.f32.gmra.mrb[56].mxu0 %vm466_vm2, %v17607_v45  ;;  %4050 = vmatprep.mubr.f32.mxu1 %v17295_v17  ;;  %v7943_v45 = vsel %vm381_vm1, %v7941_v34, %v7942_v29  ;;  %v15738_v34 = vld [vmem:[%s16865_s1 + $0xc0] sm:$0xff] }
 0x4d3   : > { %8196 = vmatprep.mubr.f32.mxu0 %v17295_v17 }
 0x4d5   : > { %10217 = vmatmul.mubr.msk.f32.gmra.mrb[26].mxu1 %vm466_vm2, %v17608_v25  ;;  %v7945_v25 = vsel %vm381_vm1, %v7942_v29, %v7944_v62  ;;  %v17613_v62 = vld [vmem:[#allocation93_spill] sm:$0xff]  ;;  %v17614_v29 = vld [vmem:[#allocation94_spill] sm:$0xff] }
 0x4d6   : > { %10653 = vmatmul.mubr.msk.f32.gmra.mrb[58].mxu0 %vm466_vm2, %v17609_v3  ;;  %4056 = vmatprep.mubr.f32.mxu1 %v17295_v17  ;;  %v17611_v3 = vld [vmem:[#allocation91_spill] sm:$0xff] }
 0x4d7   : > { %8202 = vmatprep.mubr.f32.mxu0 %v17295_v17 }
 0x4d9   : > { %10218 = vmatmul.mubr.msk.f32.gmra.mrb[28].mxu1 %vm466_vm2, %v17610_v19  ;;  %v17612_v19 = vld [vmem:[#allocation92_spill] sm:$0xff] }
 0x4da   : > { %10654 = vmatmul.mubr.msk.f32.gmra.mrb[60].mxu0 %vm466_vm2, %v7943_v45  ;;  %4062 = vmatprep.mubr.f32.mxu1 %v17295_v17  ;;  %v8963_v45 = vcombine.high %v15738_v34, %v15738_v34 }
 0x4db   : > { %8208 = vmatprep.mubr.f32.mxu0 %v17295_v17 }
 0x4dd   : > { %10219 = vmatmul.mubr.msk.f32.gmra.mrb[30].mxu1 %vm466_vm2, %v17611_v3 }
 0x4de   : > { %10655 = vmatmul.mubr.msk.f32.gmra.mrb[62].mxu0 %vm466_vm2, %v7945_v25  ;;  %4068 = vmatprep.mubr.f32.mxu1 %v17295_v17  ;;  %v17621_v25 = vld [vmem:[#allocation25_spill] sm:$0xff] }
 0x4df   : > { %8360 = vmatprep.mubr.f32.mxu0 %v17295_v17 }
 0x4e1   : > { %10220 = vmatmul.mubr.msk.f32.gmra.mrb[32].mxu1 %vm466_vm2, %v17612_v19 }
 0x4e2   : > { %10659 = vmatmul.mubr.msk.f32.vlgmr.msra.gmra.mrb[0].mxu0 %vm466_vm2, %v17306_v35  ;;  %4074 = vmatprep.mubr.f32.mxu1 %v17295_v17  ;;  %v17615_v35 = vld [vmem:[#allocation95_spill] sm:$0xff] }
 0x4e3   : > { %10693 = vmatpush1.msk.msra.mxu0 %vm531_vm0, %v15520_v55  ;;  %8366 = vmatprep.mubr.f32.mxu0 %v17295_v17  ;;  %v17619_v55 = vld [vmem:[#allocation23_spill] sm:$0xff] }
 0x4e4   : > { %10727 = vmatprep.subr.msk.mxu0 %vm531_vm0, %v8963_v45  ;;  %v17622_v45 = vld [vmem:[#allocation102_spill] sm:$0xff] }
 0x4e5   : > { %10221 = vmatmul.mubr.msk.f32.gmra.mrb[34].mxu1 %vm466_vm2, %v17613_v62 }
 0x4e6   : > { %10660 = vmatmul.mubr.msk.f32.gmra.mrb[2].mxu0 %vm466_vm2, %v17523_v2  ;;  %4080 = vmatprep.mubr.f32.mxu1 %v17295_v17  ;;  %v17616_v2 = vld [vmem:[#allocation99_spill] sm:$0xff] }
 0x4e7   : > { %8372 = vmatprep.mubr.f32.mxu0 %v17295_v17 }
 0x4e9   : > { %10222 = vmatmul.mubr.msk.f32.gmra.mrb[36].mxu1 %vm466_vm2, %v17614_v29 }
 0x4ea   : > { %10661 = vmatmul.mubr.msk.f32.gmra.mrb[4].mxu0 %vm466_vm2, %v17524_v46  ;;  %4086 = vmatprep.mubr.f32.mxu1 %v17295_v17  ;;  %v17617_v46 = vld [vmem:[#allocation21_spill] sm:$0xff] }
 0x4eb   : > { %8378 = vmatprep.mubr.f32.mxu0 %v17295_v17 }
 0x4ed   : > { %10223 = vmatmul.mubr.msk.f32.gmra.mrb[38].mxu1 %vm466_vm2, %v17615_v35 }
 0x4ee   : > { %10662 = vmatmul.mubr.msk.f32.gmra.mrb[6].mxu0 %vm466_vm2, %v17526_v58  ;;  %4092 = vmatprep.mubr.f32.mxu1 %v17295_v17  ;;  %v17618_v58 = vld [vmem:[#allocation100_spill] sm:$0xff] }
 0x4ef   : > { %8384 = vmatprep.mubr.f32.mxu0 %v17295_v17 }
 0x4f1   : > { %10224 = vmatmul.mubr.msk.f32.gmra.mrb[40].mxu1 %vm466_vm2, %v17420_v37 }
 0x4f2   : > { %10663 = vmatmul.mubr.msk.f32.gmra.mrb[8].mxu0 %vm466_vm2, %v17527_v43  ;;  %4098 = vmatprep.mubr.f32.mxu1 %v17295_v17  ;;  %v17620_v43 = vld [vmem:[#allocation101_spill] sm:$0xff] }
 0x4f3   : > { %8390 = vmatprep.mubr.f32.mxu0 %v17295_v17 }
 0x4f5   : > { %10225 = vmatmul.mubr.msk.f32.gmra.mrb[42].mxu1 %vm466_vm2, %v17616_v2 }
 0x4f6   : > { %10664 = vmatmul.mubr.msk.f32.gmra.mrb[10].mxu0 %vm466_vm2, %v17617_v46  ;;  %4104 = vmatprep.mubr.f32.mxu1 %v17295_v17  ;;  %v17623_v46 = vld [vmem:[#allocation103_spill] sm:$0xff] }
 0x4f7   : > { %8396 = vmatprep.mubr.f32.mxu0 %v17295_v17 }
 0x4f9   : > { %10226 = vmatmul.mubr.msk.f32.gmra.mrb[44].mxu1 %vm466_vm2, %v17618_v58 }
 0x4fa   : > { %10665 = vmatmul.mubr.msk.f32.gmra.mrb[12].mxu0 %vm466_vm2, %v17619_v55  ;;  %4110 = vmatprep.mubr.f32.mxu1 %v17295_v17  ;;  %v17624_v55 = vld [vmem:[#allocation104_spill] sm:$0xff] }
 0x4fb   : > { %8402 = vmatprep.mubr.f32.mxu0 %v17295_v17 }
 0x4fd   : > { %10227 = vmatmul.mubr.msk.f32.gmra.mrb[46].mxu1 %vm466_vm2, %v17620_v43 }
 0x4fe   : > { %10666 = vmatmul.mubr.msk.f32.gmra.mrb[14].mxu0 %vm466_vm2, %v17621_v25  ;;  %4116 = vmatprep.mubr.f32.mxu1 %v17295_v17  ;;  %v17629_v25 = vld [vmem:[#allocation108_spill] sm:$0xff] }
 0x4ff   : > { %8408 = vmatprep.mubr.f32.mxu0 %v17295_v17 }
 0x501   : > { %10228 = vmatmul.mubr.msk.f32.gmra.mrb[48].mxu1 %vm466_vm2, %v17622_v45 }
 0x502   : > { %10667 = vmatmul.mubr.msk.f32.gmra.mrb[16].mxu0 %vm466_vm2, %v17536_v14  ;;  %4122 = vmatprep.mubr.f32.mxu1 %v17295_v17  ;;  %v17625_v14 = vld [vmem:[#allocation11_spill] sm:$0xff] }
 0x503   : > { %8414 = vmatprep.mubr.f32.mxu0 %v17295_v17 }
 0x505   : > { %10229 = vmatmul.mubr.msk.f32.gmra.mrb[50].mxu1 %vm466_vm2, %v17623_v46 }
 0x506   : > { %10668 = vmatmul.mubr.msk.f32.gmra.mrb[18].mxu0 %vm466_vm2, %v17538_v56  ;;  %4128 = vmatprep.mubr.f32.mxu1 %v17295_v17  ;;  %v17626_v56 = vld [vmem:[#allocation105_spill] sm:$0xff] }
 0x507   : > { %8420 = vmatprep.mubr.f32.mxu0 %v17295_v17 }
 0x509   : > { %10230 = vmatmul.mubr.msk.f32.gmra.mrb[52].mxu1 %vm466_vm2, %v17624_v55 }
 0x50a   : > { %10669 = vmatmul.mubr.msk.f32.gmra.mrb[20].mxu0 %vm466_vm2, %v17539_v60  ;;  %4134 = vmatprep.mubr.f32.mxu1 %v17295_v17  ;;  %v17627_v60 = vld [vmem:[#allocation106_spill] sm:$0xff] }
 0x50b   : > { %8426 = vmatprep.mubr.f32.mxu0 %v17295_v17 }
 0x50d   : > { %10231 = vmatmul.mubr.msk.f32.gmra.mrb[54].mxu1 %vm466_vm2, %v17625_v14 }
 0x50e   : > { %10670 = vmatmul.mubr.msk.f32.gmra.mrb[22].mxu0 %vm466_vm2, %v17541_v15  ;;  %4140 = vmatprep.mubr.f32.mxu1 %v17295_v17  ;;  %v17628_v15 = vld [vmem:[#allocation107_spill] sm:$0xff] }
 0x50f   : > { %8432 = vmatprep.mubr.f32.mxu0 %v17295_v17 }
 0x511   : > { %10232 = vmatmul.mubr.msk.f32.gmra.mrb[56].mxu1 %vm466_vm2, %v17626_v56  ;;  %v17650_v56 = vld [vmem:[#allocation53_spill] sm:$0xff] }
 0x512   : > { %10671 = vmatmul.mubr.msk.f32.gmra.mrb[24].mxu0 %vm466_vm2, %v17543_v39  ;;  %4146 = vmatprep.mubr.f32.mxu1 %v17295_v17 }
 0x513   : > { %8438 = vmatprep.mubr.f32.mxu0 %v17295_v17 }
 0x515   : > { %10233 = vmatmul.mubr.msk.f32.gmra.mrb[58].mxu1 %vm466_vm2, %v17627_v60  ;;  %v12461_v60 = vld [vmem:[%s12670_s30 + $0x30] sm:$0xff] }
 0x516   : > { %10672 = vmatmul.mubr.msk.f32.gmra.mrb[26].mxu0 %vm466_vm2, %v17545_v21  ;;  %4152 = vmatprep.mubr.f32.mxu1 %v17295_v17 }
 0x517   : > { %8444 = vmatprep.mubr.f32.mxu0 %v17295_v17 }
 0x519   : > { %10234 = vmatmul.mubr.msk.f32.gmra.mrb[60].mxu1 %vm466_vm2, %v17628_v15  ;;  %v12462_v15 = vld [vmem:[%s12670_s30 + $0x38] sm:$0xff] }
 0x51a   : > { %10673 = vmatmul.mubr.msk.f32.gmra.mrb[28].mxu0 %vm466_vm2, %v13969_v26  ;;  %4158 = vmatprep.mubr.f32.mxu1 %v17295_v17 }
 0x51b   : > { %8450 = vmatprep.mubr.f32.mxu0 %v17295_v17 }
 0x51d   : > { %10235 = vmatmul.mubr.msk.f32.gmra.mrb[62].mxu1 %vm466_vm2, %v17629_v25  ;;  %v17630_v25 = vld [vmem:[#allocation5_spill] sm:$0xff] }
 0x51e   : > { %10674 = vmatmul.mubr.msk.f32.gmra.mrb[30].mxu0 %vm466_vm2, %v13982_v16  ;;  %4307 = vmatprep.mubr.f32.mxu1 %v17295_v17 }
 0x51f   : > { %8456 = vmatprep.mubr.f32.mxu0 %v17295_v17 }
 0x521   : > { %10239 = vmatmul.mubr.msk.f32.vlgmr.msra.gmra.mrb[0].mxu1 %vm466_vm2, %v12461_v60  ;;  %v12464_v60 = vld [vmem:[%s12670_s30 + $0x50] sm:$0xff] }
 0x522   : > { %10273 = vmatpush1.msk.msra.mxu1 %vm531_vm0, %v15625_v42  ;;  %10675 = vmatmul.mubr.msk.f32.gmra.mrb[32].mxu0 %vm466_vm2, %v13996_v7  ;;  %v12463_v42 = vld [vmem:[%s12670_s30 + $0x48] sm:$0xff] }
 0x523   : > { %4313 = vmatprep.mubr.f32.mxu1 %v17295_v17  ;;  %8462 = vmatprep.mubr.f32.mxu0 %v17295_v17 }
 0x524   : > { %10767 = vmatprep.subr.msk.mxu1 %vm531_vm0, %v17630_v25  ;;  %v17632_v25 = vld [vmem:[#allocation124_spill] sm:$0xff] }
 0x525   : > { %10240 = vmatmul.mubr.msk.f32.gmra.mrb[2].mxu1 %vm466_vm2, %v12462_v15  ;;  %v17631_v15 = vld [vmem:[#allocation123_spill] sm:$0xff] }
 0x526   : > { %10676 = vmatmul.mubr.msk.f32.gmra.mrb[34].mxu0 %vm466_vm2, %v14009_v63  ;;  %4319 = vmatprep.mubr.f32.mxu1 %v17295_v17 }
 0x527   : > { %8468 = vmatprep.mubr.f32.mxu0 %v17295_v17 }
 0x529   : > { %10241 = vmatmul.mubr.msk.f32.gmra.mrb[4].mxu1 %vm466_vm2, %v12463_v42  ;;  %v17633_v42 = vld [vmem:[#allocation125_spill] sm:$0xff] }
 0x52a   : > { %10677 = vmatmul.mubr.msk.f32.gmra.mrb[36].mxu0 %vm466_vm2, %v14023_v57  ;;  %4325 = vmatprep.mubr.f32.mxu1 %v17295_v17 }
 0x52b   : > { %8474 = vmatprep.mubr.f32.mxu0 %v17295_v17 }
 0x52d   : > { %10242 = vmatmul.mubr.msk.f32.gmra.mrb[6].mxu1 %vm466_vm2, %v12464_v60  ;;  %v17634_v60 = vld [vmem:[#allocation126_spill] sm:$0xff] }
 0x52e   : > { %10678 = vmatmul.mubr.msk.f32.gmra.mrb[38].mxu0 %vm466_vm2, %v14036_v4  ;;  %4331 = vmatprep.mubr.f32.mxu1 %v17295_v17  ;;  %v17635_v4 = vld [vmem:[#allocation127_spill] sm:$0xff] }
 0x52f   : > { %8480 = vmatprep.mubr.f32.mxu0 %v17295_v17 }
 0x531   : > { %10243 = vmatmul.mubr.msk.f32.gmra.mrb[8].mxu1 %vm466_vm2, %v17631_v15  ;;  %v17636_v15 = vld [vmem:[#allocation129_spill] sm:$0xff] }
 0x532   : > { %10679 = vmatmul.mubr.msk.f32.gmra.mrb[40].mxu0 %vm466_vm2, %v17632_v25  ;;  %4337 = vmatprep.mubr.f32.mxu1 %v17295_v17  ;;  %v17648_v25 = vld [vmem:[#allocation136_spill] sm:$0xff] }
 0x533   : > { %8486 = vmatprep.mubr.f32.mxu0 %v17295_v17 }
 0x535   : > { %10244 = vmatmul.mubr.msk.f32.gmra.mrb[10].mxu1 %vm466_vm2, %v17633_v42  ;;  %v17637_v42 = vld [vmem:[#allocation130_spill] sm:$0xff] }
 0x536   : > { %10680 = vmatmul.mubr.msk.f32.gmra.mrb[42].mxu0 %vm466_vm2, %v17634_v60  ;;  %4343 = vmatprep.mubr.f32.mxu1 %v17295_v17  ;;  %v17638_v60 = vld [vmem:[#allocation131_spill] sm:$0xff] }
 0x537   : > { %8492 = vmatprep.mubr.f32.mxu0 %v17295_v17 }
 0x539   : > { %10245 = vmatmul.mubr.msk.f32.gmra.mrb[12].mxu1 %vm466_vm2, %v17635_v4  ;;  %v17639_v4 = vld [vmem:[#allocation97_spill] sm:$0xff] }
 0x53a   : > { %10681 = vmatmul.mubr.msk.f32.gmra.mrb[44].mxu0 %vm466_vm2, %v17555_v27  ;;  %4349 = vmatprep.mubr.f32.mxu1 %v17295_v17  ;;  %v17640_v27 = vld [vmem:[#allocation132_spill] sm:$0xff] }
 0x53b   : > { %8498 = vmatprep.mubr.f32.mxu0 %v17295_v17 }
 0x53d   : > { %10246 = vmatmul.mubr.msk.f32.gmra.mrb[14].mxu1 %vm466_vm2, %v17636_v15  ;;  %v17641_v15 = vld [vmem:[#allocation111_spill] sm:$0xff] }
 0x53e   : > { %10682 = vmatmul.mubr.msk.f32.gmra.mrb[46].mxu0 %vm466_vm2, %v17637_v42  ;;  %4355 = vmatprep.mubr.f32.mxu1 %v17295_v17  ;;  %v17642_v42 = vld [vmem:[#allocation49_spill] sm:$0xff] }
 0x53f   : > { %8504 = vmatprep.mubr.f32.mxu0 %v17295_v17 }
 0x541   : > { %10247 = vmatmul.mubr.msk.f32.gmra.mrb[16].mxu1 %vm466_vm2, %v17638_v60  ;;  %v17643_v60 = vld [vmem:[#allocation112_spill] sm:$0xff] }
 0x542   : > { %10683 = vmatmul.mubr.msk.f32.gmra.mrb[48].mxu0 %vm466_vm2, %v17639_v4  ;;  %4361 = vmatprep.mubr.f32.mxu1 %v17295_v17  ;;  %v17644_v4 = vld [vmem:[#allocation134_spill] sm:$0xff] }
 0x543   : > { %8510 = vmatprep.mubr.f32.mxu0 %v17295_v17 }
 0x545   : > { %10248 = vmatmul.mubr.msk.f32.gmra.mrb[18].mxu1 %vm466_vm2, %v17640_v27  ;;  %v17645_v27 = vld [vmem:[#allocation113_spill] sm:$0xff] }
 0x546   : > { %10684 = vmatmul.mubr.msk.f32.gmra.mrb[50].mxu0 %vm466_vm2, %v17641_v15  ;;  %4367 = vmatprep.mubr.f32.mxu1 %v17295_v17  ;;  %v17646_v15 = vld [vmem:[#allocation51_spill] sm:$0xff] }
 0x547   : > { %8516 = vmatprep.mubr.f32.mxu0 %v17295_v17 }
 0x549   : > { %10249 = vmatmul.mubr.msk.f32.gmra.mrb[20].mxu1 %vm466_vm2, %v17642_v42  ;;  %v17647_v42 = vld [vmem:[#allocation114_spill] sm:$0xff] }
 0x54a   : > { %10685 = vmatmul.mubr.msk.f32.gmra.mrb[52].mxu0 %vm466_vm2, %v17643_v60  ;;  %4373 = vmatprep.mubr.f32.mxu1 %v17295_v17  ;;  %v8279_v60 = vrot.slane %v15500_v52, 2 }
 0x54b   : > { %8522 = vmatprep.mubr.f32.mxu0 %v17295_v17 }
 0x54d   : > { %10250 = vmatmul.mubr.msk.f32.gmra.mrb[22].mxu1 %vm466_vm2, %v17644_v4  ;;  %v8280_v4 = vrot.slane %v15509_v8, 2 }
 0x54e   : > { %10686 = vmatmul.mubr.msk.f32.gmra.mrb[54].mxu0 %vm466_vm2, %v17645_v27  ;;  %4379 = vmatprep.mubr.f32.mxu1 %v17295_v17  ;;  %v17649_v27 = vld [vmem:[#allocation117_spill] sm:$0xff] }
 0x54f   : > { %8528 = vmatprep.mubr.f32.mxu0 %v17295_v17 }
 0x551   : > { %10251 = vmatmul.mubr.msk.f32.gmra.mrb[24].mxu1 %vm466_vm2, %v17646_v15  ;;  %v8281_v15 = vsel %vm1120_vm3, %v8279_v60, %v8280_v4  ;;  %v17652_v60 = vld [vmem:[#allocation55_spill] sm:$0xff] }
 0x552   : > { %10687 = vmatmul.mubr.msk.f32.gmra.mrb[56].mxu0 %vm466_vm2, %v17647_v42  ;;  %4385 = vmatprep.mubr.f32.mxu1 %v17295_v17  ;;  %v8282_v42 = vrot.slane %v15714_v18, 2 }
 0x553   : > { %8534 = vmatprep.mubr.f32.mxu0 %v17295_v17 }
 0x555   : > { %10252 = vmatmul.mubr.msk.f32.gmra.mrb[26].mxu1 %vm466_vm2, %v17648_v25  ;;  %v8283_v25 = vsel %vm1120_vm3, %v8280_v4, %v8282_v42  ;;  %v17654_v4 = vld [vmem:[#allocation57_spill] sm:$0xff]  ;;  %v17670_v42 = vld [vmem:[#allocation10_spill] sm:$0xff] }
 0x556   : > { %10688 = vmatmul.mubr.msk.f32.gmra.mrb[58].mxu0 %vm466_vm2, %v17649_v27  ;;  %4391 = vmatprep.mubr.f32.mxu1 %v17295_v17  ;;  %v17651_v27 = vld [vmem:[#allocation137_spill] sm:$0xff] }
 0x557   : > { %8540 = vmatprep.mubr.f32.mxu0 %v17295_v17 }
 0x559   : > { %10253 = vmatmul.mubr.msk.f32.gmra.mrb[28].mxu1 %vm466_vm2, %v17650_v56  ;;  %v17653_v56 = vld [vmem:[#allocation138_spill] sm:$0xff] }
 0x55a   : > { %10689 = vmatmul.mubr.msk.f32.gmra.mrb[60].mxu0 %vm466_vm2, %v8281_v15  ;;  %4397 = vmatprep.mubr.f32.mxu1 %v17295_v17  ;;  %v17669_v15 = vld [vmem:[#allocation54_spill] sm:$0xff] }
 0x55b   : > { %8546 = vmatprep.mubr.f32.mxu0 %v17295_v17 }
 0x55d   : > { %10254 = vmatmul.mubr.msk.f32.gmra.mrb[30].mxu1 %vm466_vm2, %v17651_v27  ;;  %v17672_v27 = vld [vmem:[#allocation14_spill] sm:$0xff] }
 0x55e   : > { %10690 = vmatmul.mubr.msk.f32.gmra.mrb[62].mxu0 %vm466_vm2, %v8283_v25  ;;  %4403 = vmatprep.mubr.f32.mxu1 %v17295_v17  ;;  %v12465_v25 = vld [vmem:[%s16865_s1 + $0x60] sm:$0xff] }
 0x55f   : > { %8698 = vmatprep.mubr.f32.mxu0 %v17295_v17 }
 0x561   : > { %10255 = vmatmul.mubr.msk.f32.gmra.mrb[32].mxu1 %vm466_vm2, %v17652_v60  ;;  %v17679_v60 = vld [vmem:[#allocation78_spill] sm:$0xff] }
 0x562   : > { %10694 = vmatmul.mubr.msk.f32.vlgmr.msra.gmra.mrb[0].mxu0 %vm466_vm2, %v17359_v61  ;;  %4409 = vmatprep.mubr.f32.mxu1 %v17295_v17  ;;  %v17655_v61 = vld [vmem:[#allocation39_spill] sm:$0xff] }
 0x563   : > { %10728 = vmatpush1.msk.msra.mxu0 %vm531_vm0, %v15738_v34  ;;  %8704 = vmatprep.mubr.f32.mxu0 %v17295_v17  ;;  %v17668_v34 = vld [vmem:[#allocation68_spill] sm:$0xff] }
 0x565   : > { %10256 = vmatmul.mubr.msk.f32.gmra.mrb[34].mxu1 %vm466_vm2, %v17653_v56  ;;  %v17682_v56 = vld [vmem:[#allocation80_spill] sm:$0xff] }
 0x566   : > { %10695 = vmatmul.mubr.msk.f32.gmra.mrb[2].mxu0 %vm466_vm2, %v17361_v9  ;;  %4415 = vmatprep.mubr.f32.mxu1 %v17295_v17  ;;  %v17656_v9 = vld [vmem:[#allocation41_spill] sm:$0xff] }
 0x567   : > { %8710 = vmatprep.mubr.f32.mxu0 %v17295_v17 }
 0x569   : > { %10257 = vmatmul.mubr.msk.f32.gmra.mrb[36].mxu1 %vm466_vm2, %v17654_v4  ;;  %v17683_v4 = vld [vmem:[#allocation32_spill] sm:$0xff] }
 0x56a   : > { %10696 = vmatmul.mubr.msk.f32.gmra.mrb[4].mxu0 %vm466_vm2, %v17363_v23  ;;  %4421 = vmatprep.mubr.f32.mxu1 %v17295_v17  ;;  %v17658_v23 = vld [vmem:[#allocation43_spill] sm:$0xff] }
 0x56b   : > { %8716 = vmatprep.mubr.f32.mxu0 %v17295_v17 }
 0x56d   : > { %10258 = vmatmul.mubr.msk.f32.gmra.mrb[38].mxu1 %vm466_vm2, %v17655_v61  ;;  %v17684_v61 = vld [vmem:[#allocation81_spill] sm:$0xff] }
 0x56e   : > { %10697 = vmatmul.mubr.msk.f32.gmra.mrb[6].mxu0 %vm466_vm2, %v17454_v20  ;;  %4427 = vmatprep.mubr.f32.mxu1 %v17295_v17  ;;  %v17659_v20 = vld [vmem:[#allocation61_spill] sm:$0xff] }
 0x56f   : > { %8722 = vmatprep.mubr.f32.mxu0 %v17295_v17 }
 0x571   : > { %10259 = vmatmul.mubr.msk.f32.gmra.mrb[40].mxu1 %vm466_vm2, %v17656_v9  ;;  %v17686_v9 = vld [vmem:[#allocation118_spill] sm:$0xff] }
 0x572   : > { %10698 = vmatmul.mubr.msk.f32.gmra.mrb[8].mxu0 %vm466_vm2, %v17456_v12  ;;  %4433 = vmatprep.mubr.f32.mxu1 %v17295_v17  ;;  %v17660_v12 = vld [vmem:[#allocation45_spill] sm:$0xff] }
 0x573   : > { %8728 = vmatprep.mubr.f32.mxu0 %v17295_v17 }
 0x575   : > { %10260 = vmatmul.mubr.msk.f32.gmra.mrb[42].mxu1 %vm466_vm2, %v15391_v0  ;;  %v17664_v0 = vld [vmem:[#allocation66_spill] sm:$0xff] }
 0x576   : > { %10699 = vmatmul.mubr.msk.f32.gmra.mrb[10].mxu0 %vm466_vm2, %v17458_v59  ;;  %4439 = vmatprep.mubr.f32.mxu1 %v17295_v17  ;;  %v17661_v59 = vld [vmem:[#allocation63_spill] sm:$0xff] }
 0x577   : > { %8734 = vmatprep.mubr.f32.mxu0 %v17295_v17 }
 0x579   : > { %10261 = vmatmul.mubr.msk.f32.gmra.mrb[44].mxu1 %vm466_vm2, %v15400_v32  ;;  %v17657_v32 = vld [vmem:[#allocation59_spill] sm:$0xff] }
 0x57a   : > { %10700 = vmatmul.mubr.msk.f32.gmra.mrb[12].mxu0 %vm466_vm2, %v17460_v38  ;;  %4445 = vmatprep.mubr.f32.mxu1 %v17295_v17  ;;  %v17662_v38 = vld [vmem:[#allocation8_spill] sm:$0xff] }
 0x57b   : > { %8740 = vmatprep.mubr.f32.mxu0 %v17295_v17 }
 0x57d   : > { %10262 = vmatmul.mubr.msk.f32.gmra.mrb[46].mxu1 %vm466_vm2, %v15409_v5  ;;  %v17665_v5 = vld [vmem:[#allocation50_spill] sm:$0xff] }
 0x57e   : > { %10701 = vmatmul.mubr.msk.f32.gmra.mrb[14].mxu0 %vm466_vm2, %v17462_v40  ;;  %4451 = vmatprep.mubr.f32.mxu1 %v17295_v17  ;;  %v17663_v40 = vld [vmem:[#allocation9_spill] sm:$0xff] }
 0x57f   : > { %8746 = vmatprep.mubr.f32.mxu0 %v17295_v17 }
 0x581   : > { %10263 = vmatmul.mubr.msk.f32.gmra.mrb[48].mxu1 %vm466_vm2, %v15418_v10  ;;  %v17666_v10 = vld [vmem:[#allocation67_spill] sm:$0xff] }
 0x582   : > { %10702 = vmatmul.mubr.msk.f32.gmra.mrb[16].mxu0 %vm466_vm2, %v17657_v32  ;;  %4457 = vmatprep.mubr.f32.mxu1 %v17295_v17  ;;  %v8617_v32 = vrot.slane %v15500_v52, 3 }
 0x583   : > { %8752 = vmatprep.mubr.f32.mxu0 %v17295_v17 }
 0x585   : > { %10264 = vmatmul.mubr.msk.f32.gmra.mrb[50].mxu1 %vm466_vm2, %v17658_v23  ;;  %v8618_v23 = vrot.slane %v15509_v8, 3  ;;  %v17690_v8 = vld [vmem:[#allocation40_spill] sm:$0xff] }
 0x586   : > { %10703 = vmatmul.mubr.msk.f32.gmra.mrb[18].mxu0 %vm466_vm2, %v17659_v20  ;;  %4463 = vmatprep.mubr.f32.mxu1 %v17295_v17  ;;  %v17687_v20 = vld [vmem:[#allocation36_spill] sm:$0xff] }
 0x587   : > { %8758 = vmatprep.mubr.f32.mxu0 %v17295_v17 }
 0x589   : > { %10265 = vmatmul.mubr.msk.f32.gmra.mrb[52].mxu1 %vm466_vm2, %v17660_v12  ;;  %v17688_v12 = vld [vmem:[#allocation119_spill] sm:$0xff] }
 0x58a   : > { %10704 = vmatmul.mubr.msk.f32.gmra.mrb[20].mxu0 %vm466_vm2, %v17661_v59  ;;  %4469 = vmatprep.mubr.f32.mxu1 %v17295_v17  ;;  %v8619_v59 = vsel %vm1594_vm4, %v8617_v32, %v8618_v23 }
 0x58b   : > { %8764 = vmatprep.mubr.f32.mxu0 %v17295_v17 }
 0x58d   : > { %10266 = vmatmul.mubr.msk.f32.gmra.mrb[54].mxu1 %vm466_vm2, %v17662_v38  ;;  %v8620_v38 = vrot.slane %v15714_v18, 3 }
 0x58e   : > { %10705 = vmatmul.mubr.msk.f32.gmra.mrb[22].mxu0 %vm466_vm2, %v17574_v48  ;;  %4475 = vmatprep.mubr.f32.mxu1 %v17295_v17  ;;  %v17667_v48 = vld [vmem:[#allocation52_spill] sm:$0xff] }
 0x58f   : > { %8770 = vmatprep.mubr.f32.mxu0 %v17295_v17  ;;  %v8621_v52 = vsel %vm1594_vm4, %v8618_v23, %v8620_v38 }
 0x591   : > { %10267 = vmatmul.mubr.msk.f32.gmra.mrb[56].mxu1 %vm466_vm2, %v17663_v40  ;;  %v17689_v40 = vld [vmem:[#allocation38_spill] sm:$0xff] }
 0x592   : > { %10706 = vmatmul.mubr.msk.f32.gmra.mrb[24].mxu0 %vm466_vm2, %v17664_v0  ;;  %4481 = vmatprep.mubr.f32.mxu1 %v17295_v17  ;;  %v17691_v0 = vld [vmem:[#allocation42_spill] sm:$0xff] }
 0x593   : > { %8776 = vmatprep.mubr.f32.mxu0 %v17295_v17 }
 0x595   : > { %10268 = vmatmul.mubr.msk.f32.gmra.mrb[58].mxu1 %vm466_vm2, %v17665_v5  ;;  %v17692_v5 = vld [vmem:[#allocation44_spill] sm:$0xff] }
 0x596   : > { %10707 = vmatmul.mubr.msk.f32.gmra.mrb[26].mxu0 %vm466_vm2, %v17666_v10  ;;  %4487 = vmatprep.mubr.f32.mxu1 %v17295_v17  ;;  %v17693_v10 = vld [vmem:[#allocation46_spill] sm:$0xff] }
 0x597   : > { %8782 = vmatprep.mubr.f32.mxu0 %v17295_v17 }
 0x599   : > { %10269 = vmatmul.mubr.msk.f32.gmra.mrb[60].mxu1 %vm466_vm2, %v17667_v48 }
 0x59a   : > { %10708 = vmatmul.mubr.msk.f32.gmra.mrb[28].mxu0 %vm466_vm2, %v17668_v34  ;;  %4493 = vmatprep.mubr.f32.mxu1 %v17295_v17  ;;  %v17720_v34 = vld [vmem:[#allocation111_spill] sm:$0xff] }
 0x59b   : > { %8788 = vmatprep.mubr.f32.mxu0 %v17295_v17 }
 0x59d   : > { %10270 = vmatmul.mubr.msk.f32.gmra.mrb[62].mxu1 %vm466_vm2, %v17669_v15  ;;  %v17721_v15 = vld [vmem:[#allocation121_spill] sm:$0xff] }
 0x59e   : > { %10709 = vmatmul.mubr.msk.f32.gmra.mrb[30].mxu0 %vm466_vm2, %v17582_v30  ;;  %4646 = vmatprep.mubr.f32.mxu1 %v17295_v17  ;;  %v17671_v30 = vld [vmem:[#allocation12_spill] sm:$0xff] }
 0x59f   : > { %8794 = vmatprep.mubr.f32.mxu0 %v17295_v17 }
 0x5a1   : > { %10274 = vmatmul.mubr.msk.f32.vlgmr.msra.gmra.mrb[0].mxu1 %vm466_vm2, %v17670_v42 }
 0x5a2   : > { %10768 = vmatpush1.msk.msra.mxu1 %vm531_vm0, %v12465_v25  ;;  %10710 = vmatmul.mubr.msk.f32.gmra.mrb[32].mxu0 %vm466_vm2, %v17584_v6  ;;  %v17673_v6 = vld [vmem:[#allocation16_spill] sm:$0xff]  ;;  %v8958_v25 = vrot.slane %v15714_v18, 4 }
 0x5a3   : > { %4652 = vmatprep.mubr.f32.mxu1 %v17295_v17  ;;  %8800 = vmatprep.mubr.f32.mxu0 %v17295_v17 }
 0x5a5   : > { %10275 = vmatmul.mubr.msk.f32.gmra.mrb[2].mxu1 %vm466_vm2, %v17671_v30  ;;  %v17722_v30 = vld [vmem:[#allocation112_spill] sm:$0xff] }
 0x5a6   : > { %10711 = vmatmul.mubr.msk.f32.gmra.mrb[34].mxu0 %vm466_vm2, %v17586_v28  ;;  %4658 = vmatprep.mubr.f32.mxu1 %v17295_v17  ;;  %v17674_v28 = vld [vmem:[#allocation18_spill] sm:$0xff] }
 0x5a7   : > { %8806 = vmatprep.mubr.f32.mxu0 %v17295_v17 }
 0x5a9   : > { %10276 = vmatmul.mubr.msk.f32.gmra.mrb[4].mxu1 %vm466_vm2, %v17672_v27 }
 0x5aa   : > { %10712 = vmatmul.mubr.msk.f32.gmra.mrb[36].mxu0 %vm466_vm2, %v17587_v54  ;;  %4664 = vmatprep.mubr.f32.mxu1 %v17295_v17  ;;  %v17675_v54 = vld [vmem:[#allocation20_spill] sm:$0xff] }
 0x5ab   : > { %8812 = vmatprep.mubr.f32.mxu0 %v17295_v17 }
 0x5ad   : > { %10277 = vmatmul.mubr.msk.f32.gmra.mrb[6].mxu1 %vm466_vm2, %v17673_v6  ;;  %v17723_v6 = vld [vmem:[#allocation113_spill] sm:$0xff] }
 0x5ae   : > { %10713 = vmatmul.mubr.msk.f32.gmra.mrb[38].mxu0 %vm466_vm2, %v17588_v47  ;;  %4670 = vmatprep.mubr.f32.mxu1 %v17295_v17  ;;  %v17676_v47 = vld [vmem:[#allocation22_spill] sm:$0xff] }
 0x5af   : > { %8818 = vmatprep.mubr.f32.mxu0 %v17295_v17 }
 0x5b1   : > { %10278 = vmatmul.mubr.msk.f32.gmra.mrb[8].mxu1 %vm466_vm2, %v17674_v28 }
 0x5b2   : > { %10714 = vmatmul.mubr.msk.f32.gmra.mrb[40].mxu0 %vm466_vm2, %v17589_v31  ;;  %4676 = vmatprep.mubr.f32.mxu1 %v17295_v17  ;;  %v17677_v31 = vld [vmem:[#allocation24_spill] sm:$0xff] }
 0x5b3   : > { %8824 = vmatprep.mubr.f32.mxu0 %v17295_v17 }
 0x5b5   : > { %10279 = vmatmul.mubr.msk.f32.gmra.mrb[10].mxu1 %vm466_vm2, %v17675_v54 }
 0x5b6   : > { %10715 = vmatmul.mubr.msk.f32.gmra.mrb[42].mxu0 %vm466_vm2, %v17590_v44  ;;  %4682 = vmatprep.mubr.f32.mxu1 %v17295_v17  ;;  %v17678_v44 = vld [vmem:[#allocation26_spill] sm:$0xff] }
 0x5b7   : > { %8830 = vmatprep.mubr.f32.mxu0 %v17295_v17 }
 0x5b9   : > { %10280 = vmatmul.mubr.msk.f32.gmra.mrb[12].mxu1 %vm466_vm2, %v17676_v47 }
 0x5ba   : > { %10716 = vmatmul.mubr.msk.f32.gmra.mrb[44].mxu0 %vm466_vm2, %v17591_v1  ;;  %4688 = vmatprep.mubr.f32.mxu1 %v17295_v17  ;;  %v17680_v1 = vld [vmem:[#allocation28_spill] sm:$0xff] }
 0x5bb   : > { %8836 = vmatprep.mubr.f32.mxu0 %v17295_v17 }
 0x5bd   : > { %10281 = vmatmul.mubr.msk.f32.gmra.mrb[14].mxu1 %vm466_vm2, %v17677_v31 }
 0x5be   : > { %10717 = vmatmul.mubr.msk.f32.gmra.mrb[46].mxu0 %vm466_vm2, %v17592_v33  ;;  %4694 = vmatprep.mubr.f32.mxu1 %v17295_v17  ;;  %v17681_v33 = vld [vmem:[#allocation30_spill] sm:$0xff] }
 0x5bf   : > { %8842 = vmatprep.mubr.f32.mxu0 %v17295_v17 }
 0x5c1   : > { %10282 = vmatmul.mubr.msk.f32.gmra.mrb[16].mxu1 %vm466_vm2, %v17678_v44 }
 0x5c2   : > { %10718 = vmatmul.mubr.msk.f32.gmra.mrb[48].mxu0 %vm466_vm2, %v17679_v60  ;;  %4700 = vmatprep.mubr.f32.mxu1 %v17295_v17 }
 0x5c3   : > { %8848 = vmatprep.mubr.f32.mxu0 %v17295_v17 }
 0x5c5   : > { %10283 = vmatmul.mubr.msk.f32.gmra.mrb[18].mxu1 %vm466_vm2, %v17680_v1 }
 0x5c6   : > { %10719 = vmatmul.mubr.msk.f32.gmra.mrb[50].mxu0 %vm466_vm2, %v17594_v22  ;;  %4706 = vmatprep.mubr.f32.mxu1 %v17295_v17  ;;  %v17685_v22 = vld [vmem:[#allocation34_spill] sm:$0xff] }
 0x5c7   : > { %8854 = vmatprep.mubr.f32.mxu0 %v17295_v17 }
 0x5c9   : > { %10284 = vmatmul.mubr.msk.f32.gmra.mrb[20].mxu1 %vm466_vm2, %v17681_v33 }
 0x5ca   : > { %10720 = vmatmul.mubr.msk.f32.gmra.mrb[52].mxu0 %vm466_vm2, %v17682_v56  ;;  %4712 = vmatprep.mubr.f32.mxu1 %v17295_v17 }
 0x5cb   : > { %8860 = vmatprep.mubr.f32.mxu0 %v17295_v17 }
 0x5cd   : > { %10285 = vmatmul.mubr.msk.f32.gmra.mrb[22].mxu1 %vm466_vm2, %v17683_v4 }
 0x5ce   : > { %10721 = vmatmul.mubr.msk.f32.gmra.mrb[54].mxu0 %vm466_vm2, %v17684_v61  ;;  %4718 = vmatprep.mubr.f32.mxu1 %v17295_v17 }
 0x5cf   : > { %8866 = vmatprep.mubr.f32.mxu0 %v17295_v17 }
 0x5d1   : > { %10286 = vmatmul.mubr.msk.f32.gmra.mrb[24].mxu1 %vm466_vm2, %v17685_v22 }
 0x5d2   : > { %10722 = vmatmul.mubr.msk.f32.gmra.mrb[56].mxu0 %vm466_vm2, %v17686_v9  ;;  %4724 = vmatprep.mubr.f32.mxu1 %v17295_v17 }
 0x5d3   : > { %8872 = vmatprep.mubr.f32.mxu0 %v17295_v17 }
 0x5d5   : > { %10287 = vmatmul.mubr.msk.f32.gmra.mrb[26].mxu1 %vm466_vm2, %v17687_v20 }
 0x5d6   : > { %10723 = vmatmul.mubr.msk.f32.gmra.mrb[58].mxu0 %vm466_vm2, %v17688_v12  ;;  %4730 = vmatprep.mubr.f32.mxu1 %v17295_v17 }
 0x5d7   : > { %8878 = vmatprep.mubr.f32.mxu0 %v17295_v17 }
 0x5d9   : > { %10288 = vmatmul.mubr.msk.f32.gmra.mrb[28].mxu1 %vm466_vm2, %v17689_v40 }
 0x5da   : > { %10724 = vmatmul.mubr.msk.f32.gmra.mrb[60].mxu0 %vm466_vm2, %v8619_v59  ;;  %4736 = vmatprep.mubr.f32.mxu1 %v17295_v17 }
 0x5db   : > { %8884 = vmatprep.mubr.f32.mxu0 %v17295_v17 }
 0x5dd   : > { %10289 = vmatmul.mubr.msk.f32.gmra.mrb[30].mxu1 %vm466_vm2, %v17690_v8 }
 0x5de   : > { %10725 = vmatmul.mubr.msk.f32.gmra.mrb[62].mxu0 %vm466_vm2, %v8621_v52  ;;  %4742 = vmatprep.mubr.f32.mxu1 %v17295_v17 }
 0x5df   : > { %9036 = vmatprep.mubr.f32.mxu0 %v17295_v17 }
 0x5e1   : > { %10290 = vmatmul.mubr.msk.f32.gmra.mrb[32].mxu1 %vm466_vm2, %v17691_v0 }
 0x5e2   : > { %10729 = vmatmul.mubr.msk.f32.vlgmr.msra.gmra.mrb[0].mxu0 %vm466_vm2, %v13563_v36  ;;  %4748 = vmatprep.mubr.f32.mxu1 %v17295_v17  ;;  %v17694_v36 = vld [vmem:[#allocation48_spill] sm:$0xff] }
 0x5e3   : > { %9042 = vmatprep.mubr.f32.mxu0 %v17295_v17 }
 0x5e5   : > { %10291 = vmatmul.mubr.msk.f32.gmra.mrb[34].mxu1 %vm466_vm2, %v17692_v5 }
 0x5e6   : > { %10730 = vmatmul.mubr.msk.f32.gmra.mrb[2].mxu0 %vm466_vm2, %v13573_v41  ;;  %4754 = vmatprep.mubr.f32.mxu1 %v17295_v17  ;;  %v17695_v41 = vld [vmem:[#allocation88_spill] sm:$0xff] }
 0x5e7   : > { %9048 = vmatprep.mubr.f32.mxu0 %v17295_v17 }
 0x5e9   : > { %10292 = vmatmul.mubr.msk.f32.gmra.mrb[36].mxu1 %vm466_vm2, %v17693_v10 }
 0x5ea   : > { %10731 = vmatmul.mubr.msk.f32.gmra.mrb[4].mxu0 %vm466_vm2, %v17599_v51  ;;  %4760 = vmatprep.mubr.f32.mxu1 %v17295_v17  ;;  %v17698_v51 = vld [vmem:[#allocation58_spill] sm:$0xff] }
 0x5eb   : > { %9054 = vmatprep.mubr.f32.mxu0 %v17295_v17 }
 0x5ed   : > { %10293 = vmatmul.mubr.msk.f32.gmra.mrb[38].mxu1 %vm466_vm2, %v17694_v36  ;;  %v9295_v36 = vlaneseq }
 0x5ee   : > { %10732 = vmatmul.mubr.msk.f32.gmra.mrb[6].mxu0 %vm466_vm2, %v17601_v24  ;;  %4766 = vmatprep.mubr.f32.mxu1 %v17295_v17  ;;  %v17700_v24 = vld [vmem:[#allocation60_spill] sm:$0xff] }
 0x5ef   : > { %9060 = vmatprep.mubr.f32.mxu0 %v17295_v17 }
 0x5f1   : > { %10294 = vmatmul.mubr.msk.f32.gmra.mrb[40].mxu1 %vm466_vm2, %v17508_v53  ;;  %v17696_v53 = vld [vmem:[#allocation56_spill] sm:$0xff] }
 0x5f2   : > { %10733 = vmatmul.mubr.msk.f32.gmra.mrb[8].mxu0 %vm466_vm2, %v17602_v11  ;;  %4772 = vmatprep.mubr.f32.mxu1 %v17295_v17  ;;  %v17701_v11 = vld [vmem:[#allocation62_spill] sm:$0xff] }
 0x5f3   : > { %9066 = vmatprep.mubr.f32.mxu0 %v17295_v17 }
 0x5f5   : > { %10295 = vmatmul.mubr.msk.f32.gmra.mrb[42].mxu1 %vm466_vm2, %v17509_v49  ;;  %v17697_v49 = vld [vmem:[#allocation89_spill] sm:$0xff] }
 0x5f6   : > { %10734 = vmatmul.mubr.msk.f32.gmra.mrb[10].mxu0 %vm466_vm2, %v17604_v13  ;;  %4778 = vmatprep.mubr.f32.mxu1 %v17295_v17  ;;  %v17702_v13 = vld [vmem:[#allocation64_spill] sm:$0xff] }
 0x5f7   : > { %9072 = vmatprep.mubr.f32.mxu0 %v17295_v17 }
 0x5f9   : > { %10296 = vmatmul.mubr.msk.f32.gmra.mrb[44].mxu1 %vm466_vm2, %v17510_v50  ;;  %v17699_v50 = vld [vmem:[#allocation90_spill] sm:$0xff] }
 0x5fa   : > { %10735 = vmatmul.mubr.msk.f32.gmra.mrb[12].mxu0 %vm466_vm2, %v17695_v41  ;;  %4784 = vmatprep.mubr.f32.mxu1 %v17295_v17 }
 0x5fb   : > { %9078 = vmatprep.mubr.f32.mxu0 %v17295_v17 }
 0x5fd   : > { %10297 = vmatmul.mubr.msk.f32.gmra.mrb[46].mxu1 %vm466_vm2, %v17696_v53 }
 0x5fe   : > { %10736 = vmatmul.mubr.msk.f32.gmra.mrb[14].mxu0 %vm466_vm2, %v17697_v49  ;;  %4790 = vmatprep.mubr.f32.mxu1 %v17295_v17  ;;  %v9296_v49 = vshrl.u32 %v9295_v36, 7 }
 0x5ff   : > { %9084 = vmatprep.mubr.f32.mxu0 %v17295_v17 }
 0x601   : > { %10298 = vmatmul.mubr.msk.f32.gmra.mrb[48].mxu1 %vm466_vm2, %v17698_v51 }
 0x602   : > { %10737 = vmatmul.mubr.msk.f32.gmra.mrb[16].mxu0 %vm466_vm2, %v17699_v50  ;;  %4796 = vmatprep.mubr.f32.mxu1 %v17295_v17 }
 0x603   : > { %9090 = vmatprep.mubr.f32.mxu0 %v17295_v17 }
 0x605   : > { %10299 = vmatmul.mubr.msk.f32.gmra.mrb[50].mxu1 %vm466_vm2, %v17700_v24  ;;  %v9297_v24 = vsub.s32 0, %v9296_v49 }
 0x606   : > { %10738 = vmatmul.mubr.msk.f32.gmra.mrb[18].mxu0 %vm466_vm2, %v17611_v3  ;;  %4802 = vmatprep.mubr.f32.mxu1 %v17295_v17  ;;  %v17703_v3 = vld [vmem:[#allocation140_spill] sm:$0xff] }
 0x607   : > { %9096 = vmatprep.mubr.f32.mxu0 %v17295_v17 }
 0x609   : > { %10300 = vmatmul.mubr.msk.f32.gmra.mrb[52].mxu1 %vm466_vm2, %v17701_v11 }
 0x60a   : > { %10739 = vmatmul.mubr.msk.f32.gmra.mrb[20].mxu0 %vm466_vm2, %v17612_v19  ;;  %4808 = vmatprep.mubr.f32.mxu1 %v17295_v17  ;;  %v17704_v19 = vld [vmem:[#allocation141_spill] sm:$0xff] }
 0x60b   : > { %9102 = vmatprep.mubr.f32.mxu0 %v17295_v17 }
 0x60d   : > { %10301 = vmatmul.mubr.msk.f32.gmra.mrb[54].mxu1 %vm466_vm2, %v17702_v13  ;;  %v9293_v13 = vld [vmem:[%s16866_s2] sm:$0x3] }
 0x60e   : > { %10740 = vmatmul.mubr.msk.f32.gmra.mrb[22].mxu0 %vm466_vm2, %v17613_v62  ;;  %4814 = vmatprep.mubr.f32.mxu1 %v17295_v17  ;;  %v17705_v62 = vld [vmem:[#allocation142_spill] sm:$0xff] }
 0x60f   : > { %9108 = vmatprep.mubr.f32.mxu0 %v17295_v17 }
 0x611   : > { %10302 = vmatmul.mubr.msk.f32.gmra.mrb[56].mxu1 %vm466_vm2, %v17703_v3  ;;  %v9301_v3 = vsub.s32 1, %v9296_v49 }
 0x612   : > { %10741 = vmatmul.mubr.msk.f32.gmra.mrb[24].mxu0 %vm466_vm2, %v17614_v29  ;;  %4820 = vmatprep.mubr.f32.mxu1 %v17295_v17  ;;  %v17706_v29 = vld [vmem:[#allocation143_spill] sm:$0xff] }
 0x613   : > { %9114 = vmatprep.mubr.f32.mxu0 %v17295_v17 }
 0x615   : > { %10303 = vmatmul.mubr.msk.f32.gmra.mrb[58].mxu1 %vm466_vm2, %v17704_v19  ;;  %v9369_v19 = vld [vmem:[%s16867_s3] sm:$0x3] }
 0x616   : > { %10742 = vmatmul.mubr.msk.f32.gmra.mrb[26].mxu0 %vm466_vm2, %v17615_v35  ;;  %4826 = vmatprep.mubr.f32.mxu1 %v17295_v17  ;;  %v17715_v35 = vld [vmem:[#allocation109_spill] sm:$0xff] }
 0x617   : > { %9120 = vmatprep.mubr.f32.mxu0 %v17295_v17 }
 0x619   : > { %10304 = vmatmul.mubr.msk.f32.gmra.mrb[60].mxu1 %vm466_vm2, %v17705_v62  ;;  %v16400_v62 = vrot.slane %v9293_v13, %v9297_v24 }
 0x61a   : > { %10743 = vmatmul.mubr.msk.f32.gmra.mrb[28].mxu0 %vm466_vm2, %v17420_v37  ;;  %4832 = vmatprep.mubr.f32.mxu1 %v17295_v17  ;;  %v17712_v37 = vld [vmem:[#allocation126_spill] sm:$0xff] }
 0x61b   : > { %9126 = vmatprep.mubr.f32.mxu0 %v17295_v17 }
 0x61d   : > { %10305 = vmatmul.mubr.msk.f32.gmra.mrb[62].mxu1 %vm466_vm2, %v17706_v29 }
 0x61e   : > { %10744 = vmatmul.mubr.msk.f32.gmra.mrb[30].mxu0 %vm466_vm2, %v17616_v2  ;;  %5080 = vmatprep.mubr.f32.mxu1 %v17295_v17  ;;  %v17716_v2 = vld [vmem:[#allocation130_spill] sm:$0xff] }
 0x61f   : > { %9132 = vmatprep.mubr.f32.mxu0 %v17295_v17 }
 0x621   : > { %10325 = vmatmul.mubr.msk.f32.vlgmr.msra.gmra.mrb[32].mxu1 %vm466_vm2, %v17543_v39  ;;  %v17713_v39 = vld [vmem:[#allocation108_spill] sm:$0xff] }
 0x622   : > { %10745 = vmatmul.mubr.msk.f32.gmra.mrb[32].mxu0 %vm466_vm2, %v17618_v58  ;;  %5086 = vmatprep.mubr.f32.mxu1 %v17295_v17  ;;  %v17717_v58 = vld [vmem:[#allocation110_spill] sm:$0xff] }
 0x623   : > { %9138 = vmatprep.mubr.f32.mxu0 %v17295_v17 }
 0x625   : > { %10326 = vmatmul.mubr.msk.f32.gmra.mrb[34].mxu1 %vm466_vm2, %v17545_v21  ;;  %v17714_v21 = vld [vmem:[#allocation128_spill] sm:$0xff] }
 0x626   : > { %10746 = vmatmul.mubr.msk.f32.gmra.mrb[34].mxu0 %vm466_vm2, %v17620_v43  ;;  %5092 = vmatprep.mubr.f32.mxu1 %v17295_v17  ;;  %v17718_v43 = vld [vmem:[#allocation97_spill] sm:$0xff] }
 0x627   : > { %9144 = vmatprep.mubr.f32.mxu0 %v17295_v17 }
 0x629   : > { %10327 = vmatmul.mubr.msk.f32.gmra.mrb[36].mxu1 %vm466_vm2, %v13969_v26  ;;  %v17707_v26 = vld [vmem:[#allocation105_spill] sm:$0xff] }
 0x62a   : > { %10747 = vmatmul.mubr.msk.f32.gmra.mrb[36].mxu0 %vm466_vm2, %v17622_v45  ;;  %5098 = vmatprep.mubr.f32.mxu1 %v17295_v17  ;;  %v17719_v45 = vld [vmem:[#allocation120_spill] sm:$0xff] }
 0x62b   : > { %9150 = vmatprep.mubr.f32.mxu0 %v17295_v17 }
 0x62d   : > { %10328 = vmatmul.mubr.msk.f32.gmra.mrb[38].mxu1 %vm466_vm2, %v13982_v16  ;;  %v17708_v16 = vld [vmem:[#allocation122_spill] sm:$0xff] }
 0x62e   : > { %10748 = vmatmul.mubr.msk.f32.gmra.mrb[38].mxu0 %vm466_vm2, %v17623_v46  ;;  %5104 = vmatprep.mubr.f32.mxu1 %v17295_v17  ;;  %v12466_v46 = vld [vmem:[%s12670_s30 + $0x1c8] sm:$0xff] }
 0x62f   : > { %9156 = vmatprep.mubr.f32.mxu0 %v17295_v17 }
 0x631   : > { %10329 = vmatmul.mubr.msk.f32.gmra.mrb[40].mxu1 %vm466_vm2, %v13996_v7  ;;  %v17709_v7 = vld [vmem:[#allocation106_spill] sm:$0xff] }
 0x632   : > { %10749 = vmatmul.mubr.msk.f32.gmra.mrb[40].mxu0 %vm466_vm2, %v17624_v55  ;;  %5110 = vmatprep.mubr.f32.mxu1 %v17295_v17  ;;  %v8955_v55 = vrot.slane %v12466_v46, 4 }
 0x633   : > { %9162 = vmatprep.mubr.f32.mxu0 %v17295_v17 }
 0x635   : > { %10330 = vmatmul.mubr.msk.f32.gmra.mrb[42].mxu1 %vm466_vm2, %v14009_v63  ;;  %v17710_v63 = vld [vmem:[#allocation124_spill] sm:$0xff] }
 0x636   : > { %10750 = vmatmul.mubr.msk.f32.gmra.mrb[42].mxu0 %vm466_vm2, %v17625_v14  ;;  %5116 = vmatprep.mubr.f32.mxu1 %v17295_v17  ;;  %v12467_v14 = vld [vmem:[%s12670_s30 + $0x1d0] sm:$0xff] }
 0x637   : > { %9168 = vmatprep.mubr.f32.mxu0 %v17295_v17  ;;  %v8956_v48 = vrot.slane %v12467_v14, 4 }
 0x639   : > { %10331 = vmatmul.mubr.msk.f32.gmra.mrb[44].mxu1 %vm466_vm2, %v14023_v57  ;;  %v17711_v57 = vld [vmem:[#allocation107_spill] sm:$0xff]  ;;  %v8957_v42 = vsel %vm531_vm0, %v8955_v55, %v8956_v48  ;;  %v8959_v27 = vsel %vm531_vm0, %v8956_v48, %v8958_v25 }
 0x63a   : > { %10751 = vmatmul.mubr.msk.f32.gmra.mrb[44].mxu0 %vm466_vm2, %v17707_v26  ;;  %5122 = vmatprep.mubr.f32.mxu1 %v17295_v17  ;;  %v16402_v26 = vrot.slane %v9293_v13, %v9301_v3 }
 0x63b   : > { %9174 = vmatprep.mubr.f32.mxu0 %v17295_v17 }
 0x63d   : > { %10332 = vmatmul.mubr.msk.f32.gmra.mrb[46].mxu1 %vm466_vm2, %v17708_v16 }
 0x63e   : > { %10752 = vmatmul.mubr.msk.f32.gmra.mrb[46].mxu0 %vm466_vm2, %v17709_v7  ;;  %5128 = vmatprep.mubr.f32.mxu1 %v17295_v17  ;;  %v16404_v7 = vrot.slane %v9369_v19, %v9297_v24 }
 0x63f   : > { %9180 = vmatprep.mubr.f32.mxu0 %v17295_v17 }
 0x641   : > { %10333 = vmatmul.mubr.msk.f32.gmra.mrb[48].mxu1 %vm466_vm2, %v17710_v63 }
 0x642   : > { %10753 = vmatmul.mubr.msk.f32.gmra.mrb[48].mxu0 %vm466_vm2, %v17711_v57  ;;  %5134 = vmatprep.mubr.f32.mxu1 %v17295_v17  ;;  %v9509_v57 = vld [vmem:[%s16868_s4] sm:$0x3] }
 0x643   : > { %9186 = vmatprep.mubr.f32.mxu0 %v17295_v17  ;;  %v16421_v48 = vrot.slane %v9509_v57, %v9301_v3 }
 0x645   : > { %10334 = vmatmul.mubr.msk.f32.gmra.mrb[50].mxu1 %vm466_vm2, %v17712_v37 }
 0x646   : > { %10754 = vmatmul.mubr.msk.f32.gmra.mrb[50].mxu0 %vm466_vm2, %v17713_v39  ;;  %5140 = vmatprep.mubr.f32.mxu1 %v17295_v17  ;;  %v16409_v39 = vrot.slane %v9369_v19, %v9301_v3 }
 0x647   : > { %9192 = vmatprep.mubr.f32.mxu0 %v17295_v17 }
 0x649   : > { %10335 = vmatmul.mubr.msk.f32.gmra.mrb[52].mxu1 %vm466_vm2, %v17714_v21 }
 0x64a   : > { %10755 = vmatmul.mubr.msk.f32.gmra.mrb[52].mxu0 %vm466_vm2, %v17715_v35  ;;  %5146 = vmatprep.mubr.f32.mxu1 %v17295_v17  ;;  %v9585_v35 = vld [vmem:[%s16869_s5] sm:$0x3] }
 0x64b   : > { %9198 = vmatprep.mubr.f32.mxu0 %v17295_v17 }
 0x64d   : > { %10336 = vmatmul.mubr.msk.f32.gmra.mrb[54].mxu1 %vm466_vm2, %v17716_v2 }
 0x64e   : > { %10756 = vmatmul.mubr.msk.f32.gmra.mrb[54].mxu0 %vm466_vm2, %v17717_v58  ;;  %5152 = vmatprep.mubr.f32.mxu1 %v17295_v17 }
 0x64f   : > { %9204 = vmatprep.mubr.f32.mxu0 %v17295_v17 }
 0x651   : > { %10337 = vmatmul.mubr.msk.f32.gmra.mrb[56].mxu1 %vm466_vm2, %v17718_v43 }
 0x652   : > { %10757 = vmatmul.mubr.msk.f32.gmra.mrb[56].mxu0 %vm466_vm2, %v17719_v45  ;;  %5158 = vmatprep.mubr.f32.mxu1 %v17295_v17  ;;  %v16417_v45 = vrot.slane %v9509_v57, %v9297_v24 }
 0x653   : > { %9210 = vmatprep.mubr.f32.mxu0 %v17295_v17 }
 0x655   : > { %10338 = vmatmul.mubr.msk.f32.gmra.mrb[58].mxu1 %vm466_vm2, %v17720_v34 }
 0x656   : > { %10758 = vmatmul.mubr.msk.f32.gmra.mrb[58].mxu0 %vm466_vm2, %v17721_v15  ;;  %5164 = vmatprep.mubr.f32.mxu1 %v17295_v17 }
 0x657   : > { %9216 = vmatprep.mubr.f32.mxu0 %v17295_v17 }
 0x659   : > { %10339 = vmatmul.mubr.msk.f32.gmra.mrb[60].mxu1 %vm466_vm2, %v17722_v30 }
 0x65a   : > { %10759 = vmatmul.mubr.msk.f32.gmra.mrb[60].mxu0 %vm466_vm2, %v8957_v42  ;;  %5170 = vmatprep.mubr.f32.mxu1 %v17295_v17  ;;  %v16423_v42 = vrot.slane %v9585_v35, %v9297_v24 }
 0x65b   : > { %9222 = vmatprep.mubr.f32.mxu0 %v17295_v17 }
 0x65d   : > { %10340 = vmatmul.mubr.msk.f32.gmra.mrb[62].mxu1 %vm466_vm2, %v17723_v6 }
 0x65e   : > { %10760 = vmatmul.mubr.msk.f32.gmra.mrb[62].mxu0 %vm466_vm2, %v8959_v27  ;;  %v16426_v27 = vrot.slane %v9585_v35, %v9301_v3 }
 0x674   : > { %v4648_v28 = vpop.f32.mrb[0].mxu1 }
 0x675   : > { %v4650_v54 = vpop.f32.mrb[1].mxu1 }
 0x678   : > { %v4654_v47 = vpop.f32.mrb[2].mxu1 }
 0x679   : > { %v4656_v18 = vpop.f32.mrb[3].mxu1 }
 0x67c   : > { %v16338_v31 = vpop.f32.mrb[4].mxu1 }
 0x67d   : > { %v16340_v44 = vpop.f32.mrb[5].mxu1 }
 0x680   : > { %v16342_v60 = vpop.f32.mrb[6].mxu1 }
 0x681   : > { %v16344_v1 = vpop.f32.mrb[7].mxu1 }
 0x684   : > { %v16346_v17 = vpop.f32.mrb[8].mxu1 }
 0x685   : > { %v16348_v33 = vpop.f32.mrb[9].mxu1 }
 0x688   : > { %v16350_v56 = vpop.f32.mrb[10].mxu1 }
 0x689   : > { %v16352_v4 = vpop.f32.mrb[11].mxu1 }
 0x68c   : > { %v16354_v61 = vpop.f32.mrb[12].mxu1 }
 0x68d   : > { %v16356_v22 = vpop.f32.mrb[13].mxu1 }
 0x690   : > { %v16358_v9 = vpop.f32.mrb[14].mxu1 }
 0x691   : > { %v16360_v32 = vpop.f32.mrb[15].mxu1 }
 0x694   : > { %v16362_v23 = vpop.f32.mrb[16].mxu1 }
 0x695   : > { %v16364_v20 = vpop.f32.mrb[17].mxu1 }
 0x698   : > { %v16366_v12 = vpop.f32.mrb[18].mxu1 }
 0x699   : > { %v16368_v59 = vpop.f32.mrb[19].mxu1 }
 0x69c   : > { %v16370_v38 = vpop.f32.mrb[20].mxu1 }
 0x69d   : > { %v16372_v40 = vpop.f32.mrb[21].mxu1 }
 0x6a0   : > { %v16374_v52 = vpop.f32.mrb[22].mxu1 }
 0x6a1   : > { %v16376_v8 = vpop.f32.mrb[23].mxu1 }
 0x6a4   : > { %v16378_v0 = vpop.f32.mrb[24].mxu1 }
 0x6a5   : > { %v16380_v5 = vpop.f32.mrb[25].mxu1 }
 0x6a8   : > { %v16382_v10 = vpop.f32.mrb[26].mxu1 }
 0x6a9   : > { %v16384_v41 = vpop.f32.mrb[27].mxu1 }
 0x6ac   : > { %v16386_v53 = vpop.f32.mrb[28].mxu1 }
 0x6ad   : > { %v16388_v51 = vpop.f32.mrb[29].mxu1 }
 0x6b0   : > { %v16390_v50 = vpop.f32.mrb[30].mxu1 }
 0x6b1   : > { %v16392_v11 = vpop.f32.mrb[31].mxu1 }
 0x6b5   : > { %v9038_v29 = vpop.f32.mrb[0].mxu0 }
 0x6b6   : > { %v10769_v16 = vadd.f32 %v9038_v29, %v4648_v28  ;;  %v9040_v63 = vpop.f32.mrb[1].mxu0 }
 0x6b7   : > { %v10770_v37 = vadd.f32 %v9040_v63, %v4650_v54 }
 0x6b8   : > { %v9305_v21 = vmul.f32 %v10769_v16, %v16400_v62 }
 0x6b9   : > { %v9306_v2 = vmul.f32 %v10770_v37, %v16402_v26  ;;  %v9044_v58 = vpop.f32.mrb[2].mxu0 }
 0x6ba   : > { %v9381_v43 = vadd.f32 %v16404_v7, %v9305_v21  ;;  %v10771_v46 = vadd.f32 %v9044_v58, %v4654_v47  ;;  %v9046_v55 = vpop.f32.mrb[3].mxu0 }
 0x6bb   : > { %v9382_v14 = vadd.f32 %v16409_v39, %v9306_v2  ;;  %v10772_v34 = vadd.f32 %v9046_v55, %v4656_v18 }
 0x6bc   : > { %v9445_v15 = vmax.f32 %v9381_v43, 0.0  ;;  %v9307_v25 = vmul.f32 %v10771_v46, %v16400_v62 }
 0x6bd   : > { %v9446_v30 = vmax.f32 %v9382_v14, 0.0  ;;  %v9308_v6 = vmul.f32 %v10772_v34, %v16402_v26  ;;  %v9050_v28 = vpop.f32.mrb[4].mxu0 }
 0x6be   : > { %v9521_v54 = vmul.f32 %v16417_v45, %v9445_v15  ;;  %v9383_v47 = vadd.f32 %v16404_v7, %v9307_v25  ;;  %v10773_v36 = vadd.f32 %v9050_v28, %v16338_v31  ;;  %v9052_v18 = vpop.f32.mrb[5].mxu0 }
 0x6bf   : > { %v9522_v49 = vmul.f32 %v16421_v48, %v9446_v30  ;;  %v9384_v24 = vadd.f32 %v16409_v39, %v9308_v6  ;;  %v10774_v13 = vadd.f32 %v9052_v18, %v16340_v44 }
 0x6c0   : > { %v9597_v3 = vadd.f32 %v16423_v42, %v9521_v54  ;;  %v9447_v19 = vmax.f32 %v9383_v47, 0.0  ;;  %v9309_v29 = vmul.f32 %v10773_v36, %v16400_v62 }
 0x6c1   : > { %v9598_v16 = vadd.f32 %v16426_v27, %v9522_v49  ;;  %v9448_v63 = vmax.f32 %v9384_v24, 0.0  ;;  %v9310_v57 = vmul.f32 %v10774_v13, %v16402_v26  ;;  %v9056_v37 = vpop.f32.mrb[6].mxu0 }
 0x6c2   : > { %v9661_v31 = vmax.f32 %v9597_v3, 0.0  ;;  %v9523_v21 = vmul.f32 %v16417_v45, %v9447_v19  ;;  %v9385_v35 = vadd.f32 %v16404_v7, %v9309_v29  ;;  %v10775_v2 = vadd.f32 %v9056_v37, %v16342_v60  ;;  %v9058_v44 = vpop.f32.mrb[7].mxu0 }
 0x6c3   : > { %v9662_v58 = vmax.f32 %v9598_v16, 0.0  ;;  %v9524_v43 = vmul.f32 %v16421_v48, %v9448_v63  ;;  %v9386_v46 = vadd.f32 %v16409_v39, %v9310_v57  ;;  %v10776_v55 = vadd.f32 %v9058_v44, %v16344_v1 }
 0x6c4   : > { %9725 = vst [vmem:[%s16447_s11] sm:$0xff] %v9661_v31  ;;  %v9599_v14 = vadd.f32 %v16423_v42, %v9523_v21  ;;  %v9449_v34 = vmax.f32 %v9385_v35, 0.0  ;;  %v9311_v15 = vmul.f32 %v10775_v2, %v16400_v62 }
 0x6c5   : > { %9727 = vst.msk [vmem:[%s16447_s11 + $0x8] sm:$0xff] %vm9726_vm5, %v9662_v58  ;;  %v9600_v60 = vadd.f32 %v16426_v27, %v9524_v43  ;;  %v9450_v25 = vmax.f32 %v9386_v46, 0.0  ;;  %v9312_v30 = vmul.f32 %v10776_v55, %v16402_v26  ;;  %v9062_v1 = vpop.f32.mrb[8].mxu0 }
 0x6c6   : > { %v9663_v6 = vmax.f32 %v9599_v14, 0.0  ;;  %v9525_v28 = vmul.f32 %v16417_v45, %v9449_v34  ;;  %v9387_v54 = vadd.f32 %v16404_v7, %v9311_v15  ;;  %v10777_v47 = vadd.f32 %v9062_v1, %v16346_v17  ;;  %v9064_v36 = vpop.f32.mrb[9].mxu0 }
 0x6c7   : > { %v9664_v18 = vmax.f32 %v9600_v60, 0.0  ;;  %v9526_v49 = vmul.f32 %v16421_v48, %v9450_v25  ;;  %v9388_v24 = vadd.f32 %v16409_v39, %v9312_v30  ;;  %v10778_v13 = vadd.f32 %v9064_v36, %v16348_v33 }
 0x6c8   : > { %9728 = vst [vmem:[%s16447_s11 + $0x10] sm:$0xff] %v9663_v6  ;;  %v9601_v3 = vadd.f32 %v16423_v42, %v9525_v28  ;;  %v9451_v19 = vmax.f32 %v9387_v54, 0.0  ;;  %v9313_v29 = vmul.f32 %v10777_v47, %v16400_v62 }
 0x6c9   : > { %9729 = vst.msk [vmem:[%s16447_s11 + $0x18] sm:$0xff] %vm9726_vm5, %v9664_v18  ;;  %v9602_v16 = vadd.f32 %v16426_v27, %v9526_v49  ;;  %v9452_v17 = vmax.f32 %v9388_v24, 0.0  ;;  %v9314_v63 = vmul.f32 %v10778_v13, %v16402_v26  ;;  %v9068_v57 = vpop.f32.mrb[10].mxu0 }
 0x6ca   : > { %v9665_v37 = vmax.f32 %v9601_v3, 0.0  ;;  %v9527_v31 = vmul.f32 %v16417_v45, %v9451_v19  ;;  %v9389_v33 = vadd.f32 %v16404_v7, %v9313_v29  ;;  %v10779_v21 = vadd.f32 %v9068_v57, %v16350_v56  ;;  %v9070_v35 = vpop.f32.mrb[11].mxu0 }
 0x6cb   : > { %v9666_v2 = vmax.f32 %v9602_v16, 0.0  ;;  %v9528_v44 = vmul.f32 %v16421_v48, %v9452_v17  ;;  %v9390_v58 = vadd.f32 %v16409_v39, %v9314_v63  ;;  %v10780_v43 = vadd.f32 %v9070_v35, %v16352_v4 }
 0x6cc   : > { %9730 = vst [vmem:[%s16447_s11 + $0x20] sm:$0xff] %v9665_v37  ;;  %v9603_v46 = vadd.f32 %v16423_v42, %v9527_v31  ;;  %v9453_v55 = vmax.f32 %v9389_v33, 0.0  ;;  %v9315_v14 = vmul.f32 %v10779_v21, %v16400_v62 }
 0x6cd   : > { %9731 = vst.msk [vmem:[%s16447_s11 + $0x28] sm:$0xff] %vm9726_vm5, %v9666_v2  ;;  %v9604_v34 = vadd.f32 %v16426_v27, %v9528_v44  ;;  %v9454_v56 = vmax.f32 %v9390_v58, 0.0  ;;  %v9316_v15 = vmul.f32 %v10780_v43, %v16402_v26  ;;  %v9074_v60 = vpop.f32.mrb[12].mxu0 }
 0x6ce   : > { %v9667_v25 = vmax.f32 %v9603_v46, 0.0  ;;  %v9529_v30 = vmul.f32 %v16417_v45, %v9453_v55  ;;  %v9391_v4 = vadd.f32 %v16404_v7, %v9315_v14  ;;  %v10781_v1 = vadd.f32 %v9074_v60, %v16354_v61  ;;  %v9076_v6 = vpop.f32.mrb[13].mxu0 }
 0x6cf   : > { %v9668_v28 = vmax.f32 %v9604_v34, 0.0  ;;  %v9530_v54 = vmul.f32 %v16421_v48, %v9454_v56  ;;  %v9392_v47 = vadd.f32 %v16409_v39, %v9316_v15  ;;  %v10782_v36 = vadd.f32 %v9076_v6, %v16356_v22 }
 0x6d0   : > { %9732 = vst [vmem:[%s16447_s11 + $0x30] sm:$0xff] %v9667_v25  ;;  %v9605_v18 = vadd.f32 %v16423_v42, %v9529_v30  ;;  %v9455_v49 = vmax.f32 %v9391_v4, 0.0  ;;  %v9317_v24 = vmul.f32 %v10781_v1, %v16400_v62 }
 0x6d1   : > { %9733 = vst.msk [vmem:[%s16447_s11 + $0x38] sm:$0xff] %vm9726_vm5, %v9668_v28  ;;  %v9606_v13 = vadd.f32 %v16426_v27, %v9530_v54  ;;  %v9456_v61 = vmax.f32 %v9392_v47, 0.0  ;;  %v9318_v3 = vmul.f32 %v10782_v36, %v16402_v26  ;;  %v9080_v19 = vpop.f32.mrb[14].mxu0 }
 0x6d2   : > { %v9669_v29 = vmax.f32 %v9605_v18, 0.0  ;;  %v9531_v16 = vmul.f32 %v16417_v45, %v9455_v49  ;;  %v9393_v22 = vadd.f32 %v16404_v7, %v9317_v24  ;;  %v10783_v17 = vadd.f32 %v9080_v19, %v16358_v9  ;;  %v9082_v63 = vpop.f32.mrb[15].mxu0 }
 0x6d3   : > { %v9670_v57 = vmax.f32 %v9606_v13, 0.0  ;;  %v9532_v37 = vmul.f32 %v16421_v48, %v9456_v61  ;;  %v9394_v31 = vadd.f32 %v16409_v39, %v9318_v3  ;;  %v10784_v33 = vadd.f32 %v9082_v63, %v16360_v32 }
 0x6d4   : > { %9734 = vst [vmem:[%s16447_s11 + $0x40] sm:$0xff] %v9669_v29  ;;  %v9607_v21 = vadd.f32 %v16423_v42, %v9531_v16  ;;  %v9457_v35 = vmax.f32 %v9393_v22, 0.0  ;;  %v9319_v2 = vmul.f32 %v10783_v17, %v16400_v62 }
 0x6d5   : > { %9735 = vst.msk [vmem:[%s16447_s11 + $0x48] sm:$0xff] %vm9726_vm5, %v9670_v57  ;;  %v9608_v44 = vadd.f32 %v16426_v27, %v9532_v37  ;;  %v9458_v9 = vmax.f32 %v9394_v31, 0.0  ;;  %v9320_v58 = vmul.f32 %v10784_v33, %v16402_v26  ;;  %v9086_v43 = vpop.f32.mrb[16].mxu0 }
 0x6d6   : > { %v9671_v46 = vmax.f32 %v9607_v21, 0.0  ;;  %v9533_v55 = vmul.f32 %v16417_v45, %v9457_v35  ;;  %v9395_v32 = vadd.f32 %v16404_v7, %v9319_v2  ;;  %v10785_v14 = vadd.f32 %v9086_v43, %v16362_v23  ;;  %v9088_v34 = vpop.f32.mrb[17].mxu0 }
 0x6d7   : > { %v9672_v56 = vmax.f32 %v9608_v44, 0.0  ;;  %v9534_v15 = vmul.f32 %v16421_v48, %v9458_v9  ;;  %v9396_v60 = vadd.f32 %v16409_v39, %v9320_v58  ;;  %v10786_v25 = vadd.f32 %v9088_v34, %v16364_v20 }
 0x6d8   : > { %9736 = vst [vmem:[%s16447_s11 + $0x50] sm:$0xff] %v9671_v46  ;;  %v9609_v30 = vadd.f32 %v16423_v42, %v9533_v55  ;;  %v9459_v4 = vmax.f32 %v9395_v32, 0.0  ;;  %v9321_v1 = vmul.f32 %v10785_v14, %v16400_v62 }
 0x6d9   : > { %9737 = vst.msk [vmem:[%s16447_s11 + $0x58] sm:$0xff] %vm9726_vm5, %v9672_v56  ;;  %v9610_v6 = vadd.f32 %v16426_v27, %v9534_v15  ;;  %v9460_v23 = vmax.f32 %v9396_v60, 0.0  ;;  %v9322_v28 = vmul.f32 %v10786_v25, %v16402_v26  ;;  %v9092_v54 = vpop.f32.mrb[18].mxu0 }
 0x6da   : > { %v9673_v47 = vmax.f32 %v9609_v30, 0.0  ;;  %v9535_v36 = vmul.f32 %v16417_v45, %v9459_v4  ;;  %v9397_v20 = vadd.f32 %v16404_v7, %v9321_v1  ;;  %v10787_v18 = vadd.f32 %v9092_v54, %v16366_v12  ;;  %v9094_v49 = vpop.f32.mrb[19].mxu0 }
 0x6db   : > { %v9674_v24 = vmax.f32 %v9610_v6, 0.0  ;;  %v9536_v13 = vmul.f32 %v16421_v48, %v9460_v23  ;;  %v9398_v61 = vadd.f32 %v16409_v39, %v9322_v28  ;;  %v10788_v3 = vadd.f32 %v9094_v49, %v16368_v59 }
 0x6dc   : > { %9738 = vst [vmem:[%s16447_s11 + $0x60] sm:$0xff] %v9673_v47  ;;  %v9611_v19 = vadd.f32 %v16423_v42, %v9535_v36  ;;  %v9461_v29 = vmax.f32 %v9397_v20, 0.0  ;;  %v9323_v16 = vmul.f32 %v10787_v18, %v16400_v62 }
 0x6dd   : > { %9739 = vst.msk [vmem:[%s16447_s11 + $0x68] sm:$0xff] %vm9726_vm5, %v9674_v24  ;;  %v9612_v22 = vadd.f32 %v16426_v27, %v9536_v13  ;;  %v9462_v12 = vmax.f32 %v9398_v61, 0.0  ;;  %v9324_v17 = vmul.f32 %v10788_v3, %v16402_v26  ;;  %v9098_v63 = vpop.f32.mrb[20].mxu0 }
 0x6de   : > { %v9675_v57 = vmax.f32 %v9611_v19, 0.0  ;;  %v9537_v37 = vmul.f32 %v16417_v45, %v9461_v29  ;;  %v9399_v59 = vadd.f32 %v16404_v7, %v9323_v16  ;;  %v10789_v31 = vadd.f32 %v9098_v63, %v16370_v38  ;;  %v9100_v33 = vpop.f32.mrb[21].mxu0 }
 0x6df   : > { %v9676_v21 = vmax.f32 %v9612_v22, 0.0  ;;  %v9538_v35 = vmul.f32 %v16421_v48, %v9462_v12  ;;  %v9400_v2 = vadd.f32 %v16409_v39, %v9324_v17  ;;  %v10790_v44 = vadd.f32 %v9100_v33, %v16372_v40 }
 0x6e0   : > { %9740 = vst [vmem:[%s16447_s11 + $0x70] sm:$0xff] %v9675_v57  ;;  %v9613_v9 = vadd.f32 %v16423_v42, %v9537_v37  ;;  %v9463_v58 = vmax.f32 %v9399_v59, 0.0  ;;  %v9325_v43 = vmul.f32 %v10789_v31, %v16400_v62 }
 0x6e1   : > { %9741 = vst.msk [vmem:[%s16447_s11 + $0x78] sm:$0xff] %vm9726_vm5, %v9676_v21  ;;  %v9614_v46 = vadd.f32 %v16426_v27, %v9538_v35  ;;  %v9464_v38 = vmax.f32 %v9400_v2, 0.0  ;;  %v9326_v55 = vmul.f32 %v10790_v44, %v16402_v26  ;;  %v9104_v32 = vpop.f32.mrb[22].mxu0 }
 0x6e2   : > { %v9677_v14 = vmax.f32 %v9613_v9, 0.0  ;;  %v9539_v34 = vmul.f32 %v16417_v45, %v9463_v58  ;;  %v9401_v40 = vadd.f32 %v16404_v7, %v9325_v43  ;;  %v10791_v56 = vadd.f32 %v9104_v32, %v16374_v52  ;;  %v9106_v15 = vpop.f32.mrb[23].mxu0 }
 0x6e3   : > { %v9678_v60 = vmax.f32 %v9614_v46, 0.0  ;;  %v9540_v25 = vmul.f32 %v16421_v48, %v9464_v38  ;;  %v9402_v30 = vadd.f32 %v16409_v39, %v9326_v55  ;;  %v10792_v4 = vadd.f32 %v9106_v15, %v16376_v8 }
 0x6e4   : > { %9742 = vst [vmem:[%s16447_s11 + $0x80] sm:$0xff] %v9677_v14  ;;  %v9615_v1 = vadd.f32 %v16423_v42, %v9539_v34  ;;  %v9465_v6 = vmax.f32 %v9401_v40, 0.0  ;;  %v9327_v23 = vmul.f32 %v10791_v56, %v16400_v62 }
 0x6e5   : > { %9743 = vst.msk [vmem:[%s16447_s11 + $0x88] sm:$0xff] %vm9726_vm5, %v9678_v60  ;;  %v9616_v28 = vadd.f32 %v16426_v27, %v9540_v25  ;;  %v9466_v52 = vmax.f32 %v9402_v30, 0.0  ;;  %v9328_v54 = vmul.f32 %v10792_v4, %v16402_v26  ;;  %v9110_v47 = vpop.f32.mrb[24].mxu0 }
 0x6e6   : > { %v9679_v36 = vmax.f32 %v9615_v1, 0.0  ;;  %v9541_v20 = vmul.f32 %v16417_v45, %v9465_v6  ;;  %v9403_v8 = vadd.f32 %v16404_v7, %v9327_v23  ;;  %v10793_v18 = vadd.f32 %v9110_v47, %v16378_v0  ;;  %v9112_v49 = vpop.f32.mrb[25].mxu0 }
 0x6e7   : > { %v9680_v24 = vmax.f32 %v9616_v28, 0.0  ;;  %v9542_v13 = vmul.f32 %v16421_v48, %v9466_v52  ;;  %v9404_v61 = vadd.f32 %v16409_v39, %v9328_v54  ;;  %v10794_v3 = vadd.f32 %v9112_v49, %v16380_v5 }
 0x6e8   : > { %9744 = vst [vmem:[%s16447_s11 + $0x90] sm:$0xff] %v9679_v36  ;;  %v9617_v19 = vadd.f32 %v16423_v42, %v9541_v20  ;;  %v9467_v29 = vmax.f32 %v9403_v8, 0.0  ;;  %v9329_v16 = vmul.f32 %v10793_v18, %v16400_v62 }
 0x6e9   : > { %9745 = vst.msk [vmem:[%s16447_s11 + $0x98] sm:$0xff] %vm9726_vm5, %v9680_v24  ;;  %v9618_v22 = vadd.f32 %v16426_v27, %v9542_v13  ;;  %v9468_v0 = vmax.f32 %v9404_v61, 0.0  ;;  %v9330_v12 = vmul.f32 %v10794_v3, %v16402_v26  ;;  %v9116_v17 = vpop.f32.mrb[26].mxu0 }
 0x6ea   : > { %v9681_v63 = vmax.f32 %v9617_v19, 0.0  ;;  %v9543_v57 = vmul.f32 %v16417_v45, %v9467_v29  ;;  %v9405_v5 = vadd.f32 %v16404_v7, %v9329_v16  ;;  %v10795_v37 = vadd.f32 %v9116_v17, %v16382_v10  ;;  %v9118_v59 = vpop.f32.mrb[27].mxu0 }
 0x6eb   : > { %v9682_v31 = vmax.f32 %v9618_v22, 0.0  ;;  %v9544_v33 = vmul.f32 %v16421_v48, %v9468_v0  ;;  %v9406_v21 = vadd.f32 %v16409_v39, %v9330_v12  ;;  %v10796_v35 = vadd.f32 %v9118_v59, %v16384_v41 }
 0x6ec   : > { %9746 = vst [vmem:[%s16447_s11 + $0xa0] sm:$0xff] %v9681_v63  ;;  %v9619_v2 = vadd.f32 %v16423_v42, %v9543_v57  ;;  %v9469_v44 = vmax.f32 %v9405_v5, 0.0  ;;  %v9331_v9 = vmul.f32 %v10795_v37, %v16400_v62 }
 0x6ed   : > { %9747 = vst.msk [vmem:[%s16447_s11 + $0xa8] sm:$0xff] %vm9726_vm5, %v9682_v31  ;;  %v9620_v58 = vadd.f32 %v16426_v27, %v9544_v33  ;;  %v9470_v10 = vmax.f32 %v9406_v21, 0.0  ;;  %v9332_v43 = vmul.f32 %v10796_v35, %v16402_v26  ;;  %v9122_v46 = vpop.f32.mrb[28].mxu0 }
 0x6ee   : > { %v9683_v38 = vmax.f32 %v9619_v2, 0.0  ;;  %v9545_v55 = vmul.f32 %v16417_v45, %v9469_v44  ;;  %v9407_v41 = vadd.f32 %v16404_v7, %v9331_v9  ;;  %v10797_v32 = vadd.f32 %v9122_v46, %v16386_v53  ;;  %v9124_v14 = vpop.f32.mrb[29].mxu0 }
 0x6ef   : > { %v9684_v34 = vmax.f32 %v9620_v58, 0.0  ;;  %v9546_v40 = vmul.f32 %v16421_v48, %v9470_v10  ;;  %v9408_v56 = vadd.f32 %v16409_v39, %v9332_v43  ;;  %v10798_v15 = vadd.f32 %v9124_v14, %v16388_v51 }
 0x6f0   : > { %9748 = vst [vmem:[%s16447_s11 + $0xb0] sm:$0xff] %v9683_v38  ;;  %v9621_v60 = vadd.f32 %v16423_v42, %v9545_v55  ;;  %v9471_v25 = vmax.f32 %v9407_v41, 0.0  ;;  %v9333_v30 = vmul.f32 %v10797_v32, %v16400_v62 }
 0x6f1   : > { %9749 = vst.msk [vmem:[%s16447_s11 + $0xb8] sm:$0xff] %vm9726_vm5, %v9684_v34  ;;  %v9622_v4 = vadd.f32 %v16426_v27, %v9546_v40  ;;  %v9472_v53 = vmax.f32 %v9408_v56, 0.0  ;;  %v9334_v1 = vmul.f32 %v10798_v15, %v16402_v26  ;;  %v9128_v6 = vpop.f32.mrb[30].mxu0 }
 0x6f2   : > { %v9685_v23 = vmax.f32 %v9621_v60, 0.0  ;;  %v9547_v28 = vmul.f32 %v16417_v45, %v9471_v25  ;;  %v9409_v51 = vadd.f32 %v16404_v7, %v9333_v30  ;;  %v10799_v52 = vadd.f32 %v9128_v6, %v16390_v50  ;;  %v9130_v54 = vpop.f32.mrb[31].mxu0 }
 0x6f3   : > { %v9686_v47 = vmax.f32 %v9622_v4, 0.0  ;;  %v9548_v36 = vmul.f32 %v16421_v48, %v9472_v53  ;;  %v9410_v20 = vadd.f32 %v16409_v39, %v9334_v1  ;;  %v10800_v8 = vadd.f32 %v9130_v54, %v16392_v11 }
 0x6f4   : > { %9750 = vst [vmem:[%s16447_s11 + $0xc0] sm:$0xff] %v9685_v23  ;;  %v9623_v18 = vadd.f32 %v16423_v42, %v9547_v28  ;;  %v9473_v49 = vmax.f32 %v9409_v51, 0.0  ;;  %v9335_v24 = vmul.f32 %v10799_v52, %v16400_v62  ;;  %v5082_v13 = vpop.f32.mrb[32].mxu1 }
 0x6f5   : > { %9751 = vst.msk [vmem:[%s16447_s11 + $0xc8] sm:$0xff] %vm9726_vm5, %v9686_v47  ;;  %v9624_v50 = vadd.f32 %v16426_v27, %v9548_v36  ;;  %v9474_v61 = vmax.f32 %v9410_v20, 0.0  ;;  %v9336_v3 = vmul.f32 %v10800_v8, %v16402_v26  ;;  %v9134_v19 = vpop.f32.mrb[32].mxu0  ;;  %v5084_v29 = vpop.f32.mrb[33].mxu1 }
 0x6f6   : > { %v9687_v16 = vmax.f32 %v9623_v18, 0.0  ;;  %v9549_v11 = vmul.f32 %v16417_v45, %v9473_v49  ;;  %v9411_v22 = vadd.f32 %v16404_v7, %v9335_v24  ;;  %v10801_v0 = vadd.f32 %v9134_v19, %v5082_v13  ;;  %v9136_v12 = vpop.f32.mrb[33].mxu0 }
 0x6f7   : > { %v9688_v17 = vmax.f32 %v9624_v50, 0.0  ;;  %v9550_v63 = vmul.f32 %v16421_v48, %v9474_v61  ;;  %v9412_v57 = vadd.f32 %v16409_v39, %v9336_v3  ;;  %v10802_v5 = vadd.f32 %v9136_v12, %v5084_v29 }
 0x6f8   : > { %9752 = vst [vmem:[%s16447_s11 + $0xd0] sm:$0xff] %v9687_v16  ;;  %v9625_v37 = vadd.f32 %v16423_v42, %v9549_v11  ;;  %v9475_v59 = vmax.f32 %v9411_v22, 0.0  ;;  %v9337_v31 = vmul.f32 %v10801_v0, %v16400_v62  ;;  %v5088_v33 = vpop.f32.mrb[34].mxu1 }
 0x6f9   : > { %9753 = vst.msk [vmem:[%s16447_s11 + $0xd8] sm:$0xff] %vm9726_vm5, %v9688_v17  ;;  %v9626_v21 = vadd.f32 %v16426_v27, %v9550_v63  ;;  %v9476_v35 = vmax.f32 %v9412_v57, 0.0  ;;  %v9338_v2 = vmul.f32 %v10802_v5, %v16402_v26  ;;  %v9140_v44 = vpop.f32.mrb[34].mxu0  ;;  %v5090_v9 = vpop.f32.mrb[35].mxu1 }
 0x6fa   : > { %v9689_v58 = vmax.f32 %v9625_v37, 0.0  ;;  %v9551_v10 = vmul.f32 %v16417_v45, %v9475_v59  ;;  %v9413_v43 = vadd.f32 %v16404_v7, %v9337_v31  ;;  %v10803_v46 = vadd.f32 %v9140_v44, %v5088_v33  ;;  %v9142_v38 = vpop.f32.mrb[35].mxu0 }
 0x6fb   : > { %v9690_v55 = vmax.f32 %v9626_v21, 0.0  ;;  %v9552_v41 = vmul.f32 %v16421_v48, %v9476_v35  ;;  %v9414_v32 = vadd.f32 %v16409_v39, %v9338_v2  ;;  %v10804_v14 = vadd.f32 %v9142_v38, %v5090_v9 }
 0x6fc   : > { %9754 = vst [vmem:[%s16447_s11 + $0xe0] sm:$0xff] %v9689_v58  ;;  %v9627_v34 = vadd.f32 %v16423_v42, %v9551_v10  ;;  %v9477_v40 = vmax.f32 %v9413_v43, 0.0  ;;  %v9339_v56 = vmul.f32 %v10803_v46, %v16400_v62  ;;  %v5094_v15 = vpop.f32.mrb[36].mxu1 }
 0x6fd   : > { %9755 = vst.msk [vmem:[%s16447_s11 + $0xe8] sm:$0xff] %vm9726_vm5, %v9690_v55  ;;  %v9628_v60 = vadd.f32 %v16426_v27, %v9552_v41  ;;  %v9478_v25 = vmax.f32 %v9414_v32, 0.0  ;;  %v9340_v30 = vmul.f32 %v10804_v14, %v16402_v26  ;;  %v9146_v4 = vpop.f32.mrb[36].mxu0  ;;  %v5096_v53 = vpop.f32.mrb[37].mxu1 }
 0x6fe   : > { %v9691_v1 = vmax.f32 %v9627_v34, 0.0  ;;  %v9553_v6 = vmul.f32 %v16417_v45, %v9477_v40  ;;  %v9415_v23 = vadd.f32 %v16404_v7, %v9339_v56  ;;  %v10805_v28 = vadd.f32 %v9146_v4, %v5094_v15  ;;  %v9148_v51 = vpop.f32.mrb[37].mxu0 }
 0x6ff   : > { %v9692_v52 = vmax.f32 %v9628_v60, 0.0  ;;  %v9554_v54 = vmul.f32 %v16421_v48, %v9478_v25  ;;  %v9416_v47 = vadd.f32 %v16409_v39, %v9340_v30  ;;  %v10806_v36 = vadd.f32 %v9148_v51, %v5096_v53 }
 0x700   : > { %9756 = vst [vmem:[%s16447_s11 + $0xf0] sm:$0xff] %v9691_v1  ;;  %v9629_v20 = vadd.f32 %v16423_v42, %v9553_v6  ;;  %v9479_v8 = vmax.f32 %v9415_v23, 0.0  ;;  %v9341_v18 = vmul.f32 %v10805_v28, %v16400_v62  ;;  %v5100_v49 = vpop.f32.mrb[38].mxu1 }
 0x701   : > { %9757 = vst.msk [vmem:[%s16447_s11 + $0xf8] sm:$0xff] %vm9726_vm5, %v9692_v52  ;;  %v9630_v24 = vadd.f32 %v16426_v27, %v9554_v54  ;;  %v9480_v13 = vmax.f32 %v9416_v47, 0.0  ;;  %v9342_v50 = vmul.f32 %v10806_v36, %v16402_v26  ;;  %v9152_v61 = vpop.f32.mrb[38].mxu0  ;;  %v5102_v3 = vpop.f32.mrb[39].mxu1 }
 0x702   : > { %v9693_v19 = vmax.f32 %v9629_v20, 0.0  ;;  %v9555_v29 = vmul.f32 %v16417_v45, %v9479_v8  ;;  %v9417_v16 = vadd.f32 %v16404_v7, %v9341_v18  ;;  %v10807_v11 = vadd.f32 %v9152_v61, %v5100_v49  ;;  %v9154_v22 = vpop.f32.mrb[39].mxu0 }
 0x703   : > { %v9694_v0 = vmax.f32 %v9630_v24, 0.0  ;;  %v9556_v12 = vmul.f32 %v16421_v48, %v9480_v13  ;;  %v9418_v17 = vadd.f32 %v16409_v39, %v9342_v50  ;;  %v10808_v63 = vadd.f32 %v9154_v22, %v5102_v3 }
 0x704   : > { %9758 = vst [vmem:[%s16447_s11 + $0x100] sm:$0xff] %v9693_v19  ;;  %v9631_v57 = vadd.f32 %v16423_v42, %v9555_v29  ;;  %v9481_v5 = vmax.f32 %v9417_v16, 0.0  ;;  %v9343_v37 = vmul.f32 %v10807_v11, %v16400_v62  ;;  %v5106_v59 = vpop.f32.mrb[40].mxu1 }
 0x705   : > { %9759 = vst.msk [vmem:[%s16447_s11 + $0x108] sm:$0xff] %vm9726_vm5, %v9694_v0  ;;  %v9632_v31 = vadd.f32 %v16426_v27, %v9556_v12  ;;  %v9482_v33 = vmax.f32 %v9418_v17, 0.0  ;;  %v9344_v21 = vmul.f32 %v10808_v63, %v16402_v26  ;;  %v9158_v35 = vpop.f32.mrb[40].mxu0  ;;  %v5108_v2 = vpop.f32.mrb[41].mxu1 }
 0x706   : > { %v9695_v44 = vmax.f32 %v9631_v57, 0.0  ;;  %v9557_v9 = vmul.f32 %v16417_v45, %v9481_v5  ;;  %v9419_v58 = vadd.f32 %v16404_v7, %v9343_v37  ;;  %v10809_v10 = vadd.f32 %v9158_v35, %v5106_v59  ;;  %v9160_v43 = vpop.f32.mrb[41].mxu0 }
 0x707   : > { %v9696_v46 = vmax.f32 %v9632_v31, 0.0  ;;  %v9558_v38 = vmul.f32 %v16421_v48, %v9482_v33  ;;  %v9420_v55 = vadd.f32 %v16409_v39, %v9344_v21  ;;  %v10810_v41 = vadd.f32 %v9160_v43, %v5108_v2 }
 0x708   : > { %9760 = vst [vmem:[%s16447_s11 + $0x110] sm:$0xff] %v9695_v44  ;;  %v9633_v32 = vadd.f32 %v16423_v42, %v9557_v9  ;;  %v9483_v14 = vmax.f32 %v9419_v58, 0.0  ;;  %v9345_v34 = vmul.f32 %v10809_v10, %v16400_v62  ;;  %v5112_v40 = vpop.f32.mrb[42].mxu1 }
 0x709   : > { %9761 = vst.msk [vmem:[%s16447_s11 + $0x118] sm:$0xff] %vm9726_vm5, %v9696_v46  ;;  %v9634_v56 = vadd.f32 %v16426_v27, %v9558_v38  ;;  %v9484_v15 = vmax.f32 %v9420_v55, 0.0  ;;  %v9346_v60 = vmul.f32 %v10810_v41, %v16402_v26  ;;  %v9164_v25 = vpop.f32.mrb[42].mxu0  ;;  %v5114_v30 = vpop.f32.mrb[43].mxu1 }
 0x70a   : > { %v9697_v4 = vmax.f32 %v9633_v32, 0.0  ;;  %v9559_v53 = vmul.f32 %v16417_v45, %v9483_v14  ;;  %v9421_v1 = vadd.f32 %v16404_v7, %v9345_v34  ;;  %v10811_v6 = vadd.f32 %v9164_v25, %v5112_v40  ;;  %v9166_v23 = vpop.f32.mrb[43].mxu0 }
 0x70b   : > { %v9698_v28 = vmax.f32 %v9634_v56, 0.0  ;;  %v9560_v51 = vmul.f32 %v16421_v48, %v9484_v15  ;;  %v9422_v52 = vadd.f32 %v16409_v39, %v9346_v60  ;;  %v10812_v54 = vadd.f32 %v9166_v23, %v5114_v30 }
 0x70c   : > { %9762 = vst [vmem:[%s16447_s11 + $0x120] sm:$0xff] %v9697_v4  ;;  %v9635_v47 = vadd.f32 %v16423_v42, %v9559_v53  ;;  %v9485_v36 = vmax.f32 %v9421_v1, 0.0  ;;  %v9347_v20 = vmul.f32 %v10811_v6, %v16400_v62  ;;  %v5118_v8 = vpop.f32.mrb[44].mxu1 }
 0x70d   : > { %9763 = vst.msk [vmem:[%s16447_s11 + $0x128] sm:$0xff] %vm9726_vm5, %v9698_v28  ;;  %v9636_v18 = vadd.f32 %v16426_v27, %v9560_v51  ;;  %v9486_v49 = vmax.f32 %v9422_v52, 0.0  ;;  %v9348_v24 = vmul.f32 %v10812_v54, %v16402_v26  ;;  %v9170_v13 = vpop.f32.mrb[44].mxu0  ;;  %v5120_v50 = vpop.f32.mrb[45].mxu1 }
 0x70e   : > { %v9699_v61 = vmax.f32 %v9635_v47, 0.0  ;;  %v9561_v3 = vmul.f32 %v16417_v45, %v9485_v36  ;;  %v9423_v19 = vadd.f32 %v16404_v7, %v9347_v20  ;;  %v10813_v29 = vadd.f32 %v9170_v13, %v5118_v8  ;;  %v9172_v16 = vpop.f32.mrb[45].mxu0 }
 0x70f   : > { %v9700_v11 = vmax.f32 %v9636_v18, 0.0  ;;  %v9562_v22 = vmul.f32 %v16421_v48, %v9486_v49  ;;  %v9424_v0 = vadd.f32 %v16409_v39, %v9348_v24  ;;  %v10814_v12 = vadd.f32 %v9172_v16, %v5120_v50 }
 0x710   : > { %9764 = vst [vmem:[%s16447_s11 + $0x130] sm:$0xff] %v9699_v61  ;;  %v9637_v17 = vadd.f32 %v16423_v42, %v9561_v3  ;;  %v9487_v63 = vmax.f32 %v9423_v19, 0.0  ;;  %v9349_v57 = vmul.f32 %v10813_v29, %v16400_v62  ;;  %v5124_v5 = vpop.f32.mrb[46].mxu1 }
 0x711   : > { %9765 = vst.msk [vmem:[%s16447_s11 + $0x138] sm:$0xff] %vm9726_vm5, %v9700_v11  ;;  %v9638_v37 = vadd.f32 %v16426_v27, %v9562_v22  ;;  %v9488_v59 = vmax.f32 %v9424_v0, 0.0  ;;  %v9350_v31 = vmul.f32 %v10814_v12, %v16402_v26  ;;  %v9176_v33 = vpop.f32.mrb[46].mxu0  ;;  %v5126_v21 = vpop.f32.mrb[47].mxu1 }
 0x712   : > { %v9701_v35 = vmax.f32 %v9637_v17, 0.0  ;;  %v9563_v2 = vmul.f32 %v16417_v45, %v9487_v63  ;;  %v9425_v44 = vadd.f32 %v16404_v7, %v9349_v57  ;;  %v10815_v9 = vadd.f32 %v9176_v33, %v5124_v5  ;;  %v9178_v58 = vpop.f32.mrb[47].mxu0 }
 0x713   : > { %v9702_v10 = vmax.f32 %v9638_v37, 0.0  ;;  %v9564_v43 = vmul.f32 %v16421_v48, %v9488_v59  ;;  %v9426_v46 = vadd.f32 %v16409_v39, %v9350_v31  ;;  %v10816_v38 = vadd.f32 %v9178_v58, %v5126_v21 }
 0x714   : > { %9766 = vst [vmem:[%s16447_s11 + $0x140] sm:$0xff] %v9701_v35  ;;  %v9639_v55 = vadd.f32 %v16423_v42, %v9563_v2  ;;  %v9489_v41 = vmax.f32 %v9425_v44, 0.0  ;;  %v9351_v32 = vmul.f32 %v10815_v9, %v16400_v62  ;;  %v5130_v14 = vpop.f32.mrb[48].mxu1 }
 0x715   : > { %9767 = vst.msk [vmem:[%s16447_s11 + $0x148] sm:$0xff] %vm9726_vm5, %v9702_v10  ;;  %v9640_v34 = vadd.f32 %v16426_v27, %v9564_v43  ;;  %v9490_v40 = vmax.f32 %v9426_v46, 0.0  ;;  %v9352_v56 = vmul.f32 %v10816_v38, %v16402_v26  ;;  %v9182_v15 = vpop.f32.mrb[48].mxu0  ;;  %v5132_v60 = vpop.f32.mrb[49].mxu1 }
 0x716   : > { %v9703_v25 = vmax.f32 %v9639_v55, 0.0  ;;  %v9565_v30 = vmul.f32 %v16417_v45, %v9489_v41  ;;  %v9427_v4 = vadd.f32 %v16404_v7, %v9351_v32  ;;  %v10817_v53 = vadd.f32 %v9182_v15, %v5130_v14  ;;  %v9184_v1 = vpop.f32.mrb[49].mxu0 }
 0x717   : > { %v9704_v6 = vmax.f32 %v9640_v34, 0.0  ;;  %v9566_v23 = vmul.f32 %v16421_v48, %v9490_v40  ;;  %v9428_v28 = vadd.f32 %v16409_v39, %v9352_v56  ;;  %v10818_v51 = vadd.f32 %v9184_v1, %v5132_v60 }
 0x718   : > { %9768 = vst [vmem:[%s16447_s11 + $0x150] sm:$0xff] %v9703_v25  ;;  %v9641_v52 = vadd.f32 %v16423_v42, %v9565_v30  ;;  %v9491_v54 = vmax.f32 %v9427_v4, 0.0  ;;  %v9353_v47 = vmul.f32 %v10817_v53, %v16400_v62  ;;  %v5136_v36 = vpop.f32.mrb[50].mxu1 }
 0x719   : > { %9769 = vst.msk [vmem:[%s16447_s11 + $0x158] sm:$0xff] %vm9726_vm5, %v9704_v6  ;;  %v9642_v20 = vadd.f32 %v16426_v27, %v9566_v23  ;;  %v9492_v8 = vmax.f32 %v9428_v28, 0.0  ;;  %v9354_v18 = vmul.f32 %v10818_v51, %v16402_v26  ;;  %v9188_v49 = vpop.f32.mrb[50].mxu0  ;;  %v5138_v24 = vpop.f32.mrb[51].mxu1 }
 0x71a   : > { %v9705_v13 = vmax.f32 %v9641_v52, 0.0  ;;  %v9567_v50 = vmul.f32 %v16417_v45, %v9491_v54  ;;  %v9429_v61 = vadd.f32 %v16404_v7, %v9353_v47  ;;  %v10819_v3 = vadd.f32 %v9188_v49, %v5136_v36  ;;  %v9190_v19 = vpop.f32.mrb[51].mxu0 }
 0x71b   : > { %v9706_v29 = vmax.f32 %v9642_v20, 0.0  ;;  %v9568_v16 = vmul.f32 %v16421_v48, %v9492_v8  ;;  %v9430_v11 = vadd.f32 %v16409_v39, %v9354_v18  ;;  %v10820_v22 = vadd.f32 %v9190_v19, %v5138_v24 }
 0x71c   : > { %9770 = vst [vmem:[%s16447_s11 + $0x160] sm:$0xff] %v9705_v13  ;;  %v9643_v0 = vadd.f32 %v16423_v42, %v9567_v50  ;;  %v9493_v12 = vmax.f32 %v9429_v61, 0.0  ;;  %v9355_v17 = vmul.f32 %v10819_v3, %v16400_v62  ;;  %v5142_v63 = vpop.f32.mrb[52].mxu1 }
 0x71d   : > { %9771 = vst.msk [vmem:[%s16447_s11 + $0x168] sm:$0xff] %vm9726_vm5, %v9706_v29  ;;  %v9644_v57 = vadd.f32 %v16426_v27, %v9568_v16  ;;  %v9494_v5 = vmax.f32 %v9430_v11, 0.0  ;;  %v9356_v37 = vmul.f32 %v10820_v22, %v16402_v26  ;;  %v9194_v59 = vpop.f32.mrb[52].mxu0  ;;  %v5144_v31 = vpop.f32.mrb[53].mxu1 }
 0x71e   : > { %v9707_v33 = vmax.f32 %v9643_v0, 0.0  ;;  %v9569_v21 = vmul.f32 %v16417_v45, %v9493_v12  ;;  %v9431_v35 = vadd.f32 %v16404_v7, %v9355_v17  ;;  %v10821_v2 = vadd.f32 %v9194_v59, %v5142_v63  ;;  %v9196_v44 = vpop.f32.mrb[53].mxu0 }
 0x71f   : > { %v9708_v9 = vmax.f32 %v9644_v57, 0.0  ;;  %v9570_v58 = vmul.f32 %v16421_v48, %v9494_v5  ;;  %v9432_v10 = vadd.f32 %v16409_v39, %v9356_v37  ;;  %v10822_v43 = vadd.f32 %v9196_v44, %v5144_v31 }
 0x720   : > { %9772 = vst [vmem:[%s16447_s11 + $0x170] sm:$0xff] %v9707_v33  ;;  %v9645_v46 = vadd.f32 %v16423_v42, %v9569_v21  ;;  %v9495_v38 = vmax.f32 %v9431_v35, 0.0  ;;  %v9357_v55 = vmul.f32 %v10821_v2, %v16400_v62  ;;  %v5148_v41 = vpop.f32.mrb[54].mxu1 }
 0x721   : > { %9773 = vst.msk [vmem:[%s16447_s11 + $0x178] sm:$0xff] %vm9726_vm5, %v9708_v9  ;;  %v9646_v32 = vadd.f32 %v16426_v27, %v9570_v58  ;;  %v9496_v14 = vmax.f32 %v9432_v10, 0.0  ;;  %v9358_v34 = vmul.f32 %v10822_v43, %v16402_v26  ;;  %v9200_v40 = vpop.f32.mrb[54].mxu0  ;;  %v5150_v56 = vpop.f32.mrb[55].mxu1 }
 0x722   : > { %v9709_v15 = vmax.f32 %v9645_v46, 0.0  ;;  %v9571_v60 = vmul.f32 %v16417_v45, %v9495_v38  ;;  %v9433_v25 = vadd.f32 %v16404_v7, %v9357_v55  ;;  %v10823_v30 = vadd.f32 %v9200_v40, %v5148_v41  ;;  %v9202_v4 = vpop.f32.mrb[55].mxu0 }
 0x723   : > { %v9710_v53 = vmax.f32 %v9646_v32, 0.0  ;;  %v9572_v1 = vmul.f32 %v16421_v48, %v9496_v14  ;;  %v9434_v6 = vadd.f32 %v16409_v39, %v9358_v34  ;;  %v10824_v23 = vadd.f32 %v9202_v4, %v5150_v56 }
 0x724   : > { %9774 = vst [vmem:[%s16447_s11 + $0x180] sm:$0xff] %v9709_v15  ;;  %v9647_v28 = vadd.f32 %v16423_v42, %v9571_v60  ;;  %v9497_v51 = vmax.f32 %v9433_v25, 0.0  ;;  %v9359_v52 = vmul.f32 %v10823_v30, %v16400_v62  ;;  %v5154_v54 = vpop.f32.mrb[56].mxu1 }
 0x725   : > { %9775 = vst.msk [vmem:[%s16447_s11 + $0x188] sm:$0xff] %vm9726_vm5, %v9710_v53  ;;  %v9648_v47 = vadd.f32 %v16426_v27, %v9572_v1  ;;  %v9498_v36 = vmax.f32 %v9434_v6, 0.0  ;;  %v9360_v20 = vmul.f32 %v10824_v23, %v16402_v26  ;;  %v9206_v8 = vpop.f32.mrb[56].mxu0  ;;  %v5156_v18 = vpop.f32.mrb[57].mxu1 }
 0x726   : > { %v9711_v49 = vmax.f32 %v9647_v28, 0.0  ;;  %v9573_v24 = vmul.f32 %v16417_v45, %v9497_v51  ;;  %v9435_v13 = vadd.f32 %v16404_v7, %v9359_v52  ;;  %v10825_v50 = vadd.f32 %v9206_v8, %v5154_v54  ;;  %v9208_v61 = vpop.f32.mrb[57].mxu0 }
 0x727   : > { %v9712_v3 = vmax.f32 %v9648_v47, 0.0  ;;  %v9574_v19 = vmul.f32 %v16421_v48, %v9498_v36  ;;  %v9436_v29 = vadd.f32 %v16409_v39, %v9360_v20  ;;  %v10826_v16 = vadd.f32 %v9208_v61, %v5156_v18 }
 0x728   : > { %9776 = vst [vmem:[%s16447_s11 + $0x190] sm:$0xff] %v9711_v49  ;;  %v9649_v11 = vadd.f32 %v16423_v42, %v9573_v24  ;;  %v9499_v22 = vmax.f32 %v9435_v13, 0.0  ;;  %v9361_v0 = vmul.f32 %v10825_v50, %v16400_v62  ;;  %v5160_v12 = vpop.f32.mrb[58].mxu1 }
 0x729   : > { %9777 = vst.msk [vmem:[%s16447_s11 + $0x198] sm:$0xff] %vm9726_vm5, %v9712_v3  ;;  %v9650_v17 = vadd.f32 %v16426_v27, %v9574_v19  ;;  %v9500_v63 = vmax.f32 %v9436_v29, 0.0  ;;  %v9362_v57 = vmul.f32 %v10826_v16, %v16402_v26  ;;  %v9212_v5 = vpop.f32.mrb[58].mxu0  ;;  %v5162_v37 = vpop.f32.mrb[59].mxu1 }
 0x72a   : > { %v9713_v59 = vmax.f32 %v9649_v11, 0.0  ;;  %v9575_v31 = vmul.f32 %v16417_v45, %v9499_v22  ;;  %v9437_v33 = vadd.f32 %v16404_v7, %v9361_v0  ;;  %v10827_v21 = vadd.f32 %v9212_v5, %v5160_v12  ;;  %v9214_v35 = vpop.f32.mrb[59].mxu0 }
 0x72b   : > { %v9714_v2 = vmax.f32 %v9650_v17, 0.0  ;;  %v9576_v44 = vmul.f32 %v16421_v48, %v9500_v63  ;;  %v9438_v9 = vadd.f32 %v16409_v39, %v9362_v57  ;;  %v10828_v58 = vadd.f32 %v9214_v35, %v5162_v37 }
 0x72c   : > { %9778 = vst [vmem:[%s16447_s11 + $0x1a0] sm:$0xff] %v9713_v59  ;;  %v9651_v10 = vadd.f32 %v16423_v42, %v9575_v31  ;;  %v9501_v43 = vmax.f32 %v9437_v33, 0.0  ;;  %v9363_v46 = vmul.f32 %v10827_v21, %v16400_v62  ;;  %v5166_v38 = vpop.f32.mrb[60].mxu1 }
 0x72d   : > { %9779 = vst.msk [vmem:[%s16447_s11 + $0x1a8] sm:$0xff] %vm9726_vm5, %v9714_v2  ;;  %v9652_v55 = vadd.f32 %v16426_v27, %v9576_v44  ;;  %v9502_v41 = vmax.f32 %v9438_v9, 0.0  ;;  %v9364_v32 = vmul.f32 %v10828_v58, %v16402_v26  ;;  %v9218_v14 = vpop.f32.mrb[60].mxu0  ;;  %v5168_v34 = vpop.f32.mrb[61].mxu1 }
 0x72e   : > { %v9715_v40 = vmax.f32 %v9651_v10, 0.0  ;;  %v9577_v56 = vmul.f32 %v16417_v45, %v9501_v43  ;;  %v9439_v15 = vadd.f32 %v16404_v7, %v9363_v46  ;;  %v10829_v60 = vadd.f32 %v9218_v14, %v5166_v38  ;;  %v9220_v25 = vpop.f32.mrb[61].mxu0 }
 0x72f   : > { %v9716_v30 = vmax.f32 %v9652_v55, 0.0  ;;  %v9578_v4 = vmul.f32 %v16421_v48, %v9502_v41  ;;  %v9440_v53 = vadd.f32 %v16409_v39, %v9364_v32  ;;  %v10830_v1 = vadd.f32 %v9220_v25, %v5168_v34 }
 0x730   : > { %9780 = vst [vmem:[%s16447_s11 + $0x1b0] sm:$0xff] %v9715_v40  ;;  %v9653_v6 = vadd.f32 %v16423_v42, %v9577_v56  ;;  %v9503_v23 = vmax.f32 %v9439_v15, 0.0  ;;  %v9365_v28 = vmul.f32 %v10829_v60, %v16400_v62  ;;  %v5172_v51 = vpop.f32.mrb[62].mxu1 }
 0x731   : > { %9781 = vst.msk [vmem:[%s16447_s11 + $0x1b8] sm:$0xff] %vm9726_vm5, %v9716_v30  ;;  %v9654_v52 = vadd.f32 %v16426_v27, %v9578_v4  ;;  %v9504_v54 = vmax.f32 %v9440_v53, 0.0  ;;  %v9366_v47 = vmul.f32 %v10830_v1, %v16402_v26  ;;  %v9224_v36 = vpop.f32.mrb[62].mxu0  ;;  %v5174_v20 = vpop.f32.mrb[63].mxu1 }
 0x732   : > { %v9717_v8 = vmax.f32 %v9653_v6, 0.0  ;;  %v9579_v18 = vmul.f32 %v16417_v45, %v9503_v23  ;;  %v9441_v49 = vadd.f32 %v16404_v7, %v9365_v28  ;;  %v10831_v24 = vadd.f32 %v9224_v36, %v5172_v51  ;;  %v9226_v13 = vpop.f32.mrb[63].mxu0 }
 0x733   : > { %v9718_v50 = vmax.f32 %v9654_v52, 0.0  ;;  %v9580_v61 = vmul.f32 %v16421_v48, %v9504_v54  ;;  %v9442_v3 = vadd.f32 %v16409_v39, %v9366_v47  ;;  %v10832_v19 = vadd.f32 %v9226_v13, %v5174_v20 }
 0x734   : > { %9782 = vst [vmem:[%s16447_s11 + $0x1c0] sm:$0xff] %v9717_v8  ;;  %v9655_v29 = vadd.f32 %v16423_v42, %v9579_v18  ;;  %v9505_v16 = vmax.f32 %v9441_v49, 0.0  ;;  %v9367_v11 = vmul.f32 %v10831_v24, %v16400_v62 }
 0x735   : > { %9783 = vst.msk [vmem:[%s16447_s11 + $0x1c8] sm:$0xff] %vm9726_vm5, %v9718_v50  ;;  %v9656_v22 = vadd.f32 %v16426_v27, %v9580_v61  ;;  %v9506_v0 = vmax.f32 %v9442_v3, 0.0  ;;  %v9368_v12 = vmul.f32 %v10832_v19, %v16402_v26 }
 0x736   : > { %v9719_v17 = vmax.f32 %v9655_v29, 0.0  ;;  %v9581_v63 = vmul.f32 %v16417_v45, %v9505_v16  ;;  %v9443_v57 = vadd.f32 %v16404_v7, %v9367_v11 }
 0x737   : > { %v9720_v5 = vmax.f32 %v9656_v22, 0.0  ;;  %v9582_v37 = vmul.f32 %v16421_v48, %v9506_v0  ;;  %v9444_v62 = vadd.f32 %v16409_v39, %v9368_v12 }
 0x738   : > { %9784 = vst [vmem:[%s16447_s11 + $0x1d0] sm:$0xff] %v9719_v17  ;;  %v9657_v59 = vadd.f32 %v16423_v42, %v9581_v63  ;;  %v9507_v31 = vmax.f32 %v9443_v57, 0.0 }
 0x739   : > { %9785 = vst.msk [vmem:[%s16447_s11 + $0x1d8] sm:$0xff] %vm9726_vm5, %v9720_v5  ;;  %v9658_v26 = vadd.f32 %v16426_v27, %v9582_v37  ;;  %v9508_v33 = vmax.f32 %v9444_v62, 0.0 }
 0x73a   : > { %v9721_v21 = vmax.f32 %v9657_v59, 0.0  ;;  %v9583_v7 = vmul.f32 %v16417_v45, %v9507_v31 }
 0x73b   : > { %v9722_v35 = vmax.f32 %v9658_v26, 0.0  ;;  %v9584_v2 = vmul.f32 %v16421_v48, %v9508_v33 }
 0x73c   : > { %9786 = vst [vmem:[%s16447_s11 + $0x1e0] sm:$0xff] %v9721_v21  ;;  %v9659_v39 = vadd.f32 %v16423_v42, %v9583_v7 }
 0x73d   : > { %9787 = vst.msk [vmem:[%s16447_s11 + $0x1e8] sm:$0xff] %vm9726_vm5, %v9722_v35  ;;  %v9660_v44 = vadd.f32 %v16426_v27, %v9584_v2 }
 0x73e   : > { %v9723_v9 = vmax.f32 %v9659_v39, 0.0 }
 0x73f   : > { %v9724_v45 = vmax.f32 %v9660_v44, 0.0 }
 0x740   : > { %9788 = vst [vmem:[%s16447_s11 + $0x1f0] sm:$0xff] %v9723_v9 }
 0x741   : > { %9789 = vst.msk [vmem:[%s16447_s11 + $0x1f8] sm:$0xff] %vm9726_vm5, %v9724_v45 }
 0x742   : > { %12481 = shalt.err (!%p12478_p5)
}
 0x743   : > { %s12482_s20 = scalar_lea.hbm %s16809_s15, 8192  ;;  %s12486_s8 = scalar_lea.hbm %s16870_s6, 16384 }
 0x744   : > { %p12483_p6 = scmp.ne.s32.totalorder %s16809_s15, %s12482_s20  ;;  %p12487_p10 = scmp.lt.u32.totalorder %s16809_s15, %s16870_s6 }
 0x745   : > { %p12488_p11 = scmp.lt.u32.totalorder %s12486_s8, %s12482_s20  ;;  %p12490_p13 = scmp.lt.u32.totalorder %s12482_s20, %s16809_s15 }
 0x746   : > { %p12484_p7 = pnand %p12483_p6, %p12627_p4 }
 0x747   : > { %p12489_p12 = por %p12488_p11, %p12487_p10 }
 0x748   : > { %p12485_p9 = pneg %p12484_p7 }
 0x749   : > { %p12491_p0 = por %p12490_p13, %p12489_p12 }
 0x74b   : > { %p12492_p1 = pnand %p12491_p0, %p12485_p9 }
 0x74d   : > { %12495 = shalt.err (!%p12492_p1)
}
 0x74e   : > { %s12550_s14 = smov 256   ;;  %s12551_s30 = smov 16  }
 0x74f   : > { %12306 = dma.vmem_to_hbm [thread:$0]  (%p12627_p4), %s16811_s13, 8192, %s16809_s15, %s16818_s24, %s12550_s14, %s12550_s14, %s12551_s30  }
 0x750 PF: > { %p12312_p2 = scmp.ge.s32.totalorder %s12546_s26, 2  ;;  %s9822_s16 = sand.u32 1, %s12526_s21  }
 0x751   : > { %s9823_s17 = scalar_lea.sflag [#allocation3], %s9822_s16 }
 0x752   : > { %p12309_p3 = pnand %p12312_p2, %p12634_p8 }
 0x754   : > { %12521 = dma.done.wait (!%p12309_p3), %s9823_s17, 8192  }
 0x755   : > { %12523 = vsyncadd (!%p12309_p3), %s9823_s17, 4294959104  ;;  %s19_s26 = sadd.s32 1, %s12546_s26   ;;  %s17724_s21 = smov %s12530_s22 }
 0x756   : > { %p16_p5 = scmp.ge.s32.totalorder %s19_s26, 4   ;;  %s17725_s22 = smov %s12534_s23 }
 0x757   : > { %s17726_s23 = smov %s12640_s10  ;;  %s17727_s24 = smov %s12542_s25 }
 0x758   : > { %s17728_s25 = smov %s17730_s29  ;;  %18 = sbr.rel (!%p16_p5) target bundleno = 4 (0x4), region = 103 }
 0x75f   :  { %9828 = vsyncpa [#allocation3], 1 }
 0x760   :  { %9830 = vsyncpa [#allocation3 + $0x1], 1 }

</bundles_post_ra>
